<compile_context>
chip_gen: v6e
topology: v6e:2x2x1
jax: 0.10.0
libtpu: 0.0.40
codegen_flags: <defaults>
</compile_context>

<pallas_src>
import jax
import jax.numpy as jnp
from jax import lax
from jax.experimental import pallas as pl
from jax.experimental.pallas import tpu as pltpu

_LN_EPS = 1e-5
_L2_EPS_SQ = 1e-24      # F.normalize(eps=1e-12) applied to the squared norm
_NEG_BIG = -1e30        # finite "-inf" for the online-softmax running max


# ---------------------------------------------------------------------------
# small math helpers (traced inside the kernels)
# ---------------------------------------------------------------------------
def _erf_approx(x):
    # Abramowitz & Stegun 7.1.26, |err| <= 1.5e-7; uses only exp (EUP).
    p = 0.3275911
    a1, a2, a3, a4, a5 = (0.254829592, -0.284496736, 1.421413741,
                          -1.453152027, 1.061405429)
    sgn = jnp.where(x < 0.0, -1.0, 1.0)
    z = jnp.abs(x)
    t = 1.0 / (1.0 + p * z)
    poly = ((((a5 * t + a4) * t + a3) * t + a2) * t + a1) * t
    return sgn * (1.0 - poly * jnp.exp(-z * z))


def _gelu(x):
    # PyTorch F.gelu (exact, erf-based) to ~1.5e-7 absolute error.
    return 0.5 * x * (1.0 + _erf_approx(x * 0.7071067811865476))


def _layer_norm(x, w, b, bias_free):
    # x: (HW, C) f32; normalization over the channel (lane) axis, matching
    # to_3d -> LayerNorm(dim) -> to_4d of the PyTorch module.
    mu = jnp.mean(x, axis=-1, keepdims=True)
    var = jnp.mean(jnp.square(x - mu), axis=-1, keepdims=True)   # unbiased=False
    inv = lax.rsqrt(var + _LN_EPS)                               # EUP rsqrt
    if bias_free:
        return x * inv * w
    return (x - mu) * inv * w + b


def _dwconv3x3_flat(x, w, b, row, col, H, W):
    """Depthwise 3x3 conv (zero padding 1) on a row-major flattened image.

    x  : (HW, Cx) f32     flat pixels, p = i*W + j
    w  : (3, 3, Cx) f32   per-channel taps (PyTorch cross-correlation layout)
    b  : (1, Cx)  f32     bias
    row: (HW, 1)  f32     row index i of each p (precomputed on the host)
    col: (HW, 1)  f32     column index j of each p
    Each tap is a sublane roll of the flat array plus an edge mask, so there is
    no (H+2, W+2, Cx) halo scratch and no full-buffer zeroing.
    """
    acc = jnp.zeros_like(x)
    for dh in (-1, 0, 1):
        for dw in (-1, 0, 1):
            if dh == 0 and dw == 0:
                shifted = x
            else:
                # shifted[p] = x[p + dh*W + dw]; wrap-around is masked below.
                shifted = jnp.roll(x, -(dh * W + dw), axis=0)
            tap = shifted * w[dh + 1, dw + 1]
            conds = []
            if dh == -1:
                conds.append(row >= 1.0)
            elif dh == 1:
                conds.append(row < float(H - 1))
            if dw == -1:
                conds.append(col >= 1.0)
            elif dw == 1:
                conds.append(col < float(W - 1))
            if conds:
                valid = conds[0]
                for c in conds[1:]:
                    valid = jnp.logical_and(valid, c)
                tap = jnp.where(valid, tap, 0.0)
            acc = acc + tap
    return acc + b


# ---------------------------------------------------------------------------
# kernel factories
# ---------------------------------------------------------------------------
def _make_qkv_kernel(H, W, C, num_heads, bias_free):
    d = C // num_heads

    def kernel(x_ref, row_ref, col_ref, ln_w_ref, ln_b_ref,
               w_qkv_ref, b_qkv_ref, w_dw_ref, b_dw_ref, temp_ref,
               q_ref, k_ref, v_ref):
        x = x_ref[0]                                            # (HW, C) f32
        y = _layer_norm(x, ln_w_ref[...], ln_b_ref[...], bias_free)
        qkv = jnp.dot(y.astype(jnp.bfloat16), w_qkv_ref[...],
                      preferred_element_type=jnp.float32) + b_qkv_ref[...]
        qkv = _dwconv3x3_flat(qkv, w_dw_ref[...], b_dw_ref[...],
                              row_ref[...], col_ref[...], H, W)  # (HW, 3C)

        for h in range(num_heads):                              # static loop
            lo = h * d
            qh = qkv[:, lo:lo + d]
            kh = qkv[:, C + lo:C + lo + d]
            vh = qkv[:, 2 * C + lo:2 * C + lo + d]
            # F.normalize: x / max(||x||, 1e-12) == x * rsqrt(max(||x||^2, 1e-24))
            q_inv = lax.rsqrt(jnp.maximum(
                jnp.sum(qh * qh, axis=-1, keepdims=True), _L2_EPS_SQ))
            k_inv = lax.rsqrt(jnp.maximum(
                jnp.sum(kh * kh, axis=-1, keepdims=True), _L2_EPS_SQ))
            temp_h = temp_ref[0:1, h:h + 1]                     # (1, 1)
            # temperature folded into q: saves an (HW x HW) multiply later.
            q_ref[0, h] = (qh * (q_inv * temp_h)).astype(jnp.bfloat16)
            k_ref[0, h] = (kh * k_inv).astype(jnp.bfloat16)
            v_ref[0, h] = vh.astype(jnp.bfloat16)

    return kernel


def _make_attention_kernel(num_heads, d):
    def kernel(q_ref, k_ref, v_ref, x_ref, w_po_ref, b_po_ref,
               o_ref, m_s, l_s, acc_s, ob_s):
        ki = pl.program_id(2)

        @pl.when(ki == 0)
        def _():
            m_s[...] = jnp.full_like(m_s, _NEG_BIG)
            l_s[...] = jnp.zeros_like(l_s)
            acc_s[...] = jnp.zeros_like(acc_s)

        def head_step(h, carry):
            qh = q_ref[0, h]                                    # (TQ, d) bf16
            kh = k_ref[0, h]                                    # (TK, d) bf16
            vh = v_ref[0, h]                                    # (TK, d) bf16
            s = lax.dot_general(qh, kh, (((1,), (1,)), ((), ())),
                                preferred_element_type=jnp.float32)   # (TQ, TK)
            m_prev = m_s[h]                                     # (TQ, 1)
            m_new = jnp.maximum(m_prev, jnp.max(s, axis=-1, keepdims=True))
            alpha = jnp.exp(m_prev - m_new)
            p = jnp.exp(s - m_new)
            l_s[h] = alpha * l_s[h] + jnp.sum(p, axis=-1, keepdims=True)
            acc_s[h] = alpha * acc_s[h] + jnp.dot(
                p.astype(jnp.bfloat16), vh, preferred_element_type=jnp.float32)
            m_s[h] = m_new
            return carry

        lax.fori_loop(0, num_heads, head_step, 0)

        @pl.when(ki == pl.num_programs(2) - 1)
        def _():
            # Normalize once after the PV matmuls (EUP reciprocal), merge the
            # heads into (TQ, C), then ONE full-K project_out matmul.
            for h in range(num_heads):                          # static loop
                inv = pl.reciprocal(l_s[h], approx=True)
                ob_s[:, h * d:(h + 1) * d] = acc_s[h] * inv
            proj = jnp.dot(ob_s[...].astype(jnp.bfloat16), w_po_ref[...],
                           preferred_element_type=jnp.float32) + b_po_ref[...]
            o_ref[0] = x_ref[0] + proj

    return kernel


def _make_ffn_kernel(H, W, bias_free):
    def kernel(x_ref, row_ref, col_ref, ln_w_ref, ln_b_ref,
               w_pi1_ref, b_pi1_ref, w_pi2_ref, b_pi2_ref,
               w_dw1_ref, b_dw1_ref, w_dw2_ref, b_dw2_ref,
               w_fo_ref, b_fo_ref, o_ref):
        x = x_ref[0]                                            # (HW, C) f32
        y = _layer_norm(x, ln_w_ref[...], ln_b_ref[...], bias_free)
        yb = y.astype(jnp.bfloat16)
        row = row_ref[...]
        col = col_ref[...]
        # gate / value paths kept separate: no misaligned (HW, 2*hidden) slice.
        g1 = jnp.dot(yb, w_pi1_ref[...],
                     preferred_element_type=jnp.float32) + b_pi1_ref[...]
        g2 = jnp.dot(yb, w_pi2_ref[...],
                     preferred_element_type=jnp.float32) + b_pi2_ref[...]
        g1 = _dwconv3x3_flat(g1, w_dw1_ref[...], b_dw1_ref[...], row, col, H, W)
        g2 = _dwconv3x3_flat(g2, w_dw2_ref[...], b_dw2_ref[...], row, col, H, W)
        g = (_gelu(g1) * g2).astype(jnp.bfloat16)
        out = jnp.dot(g, w_fo_ref[...],
                      preferred_element_type=jnp.float32) + b_fo_ref[...]
        o_ref[0] = x + out

    return kernel


# ---------------------------------------------------------------------------
# wrapper
# ---------------------------------------------------------------------------
def _const_spec(shape):
    """BlockSpec for a grid-invariant parameter (whole array, block index 0).

    Single-buffered (pl.Buffered(1)): its index map never changes, so double
    buffering would only double its VMEM footprint.
    """
    nd = len(shape)
    index_map = lambda *_, _nd=nd: (0,) * _nd
    try:
        return pl.BlockSpec(shape, index_map, pipeline_mode=pl.Buffered(1))
    except (TypeError, AttributeError):
        return pl.BlockSpec(shape, index_map)


def _pick_tile(n, target):
    for t in (target, 512, 256, 128, 64, 32, 16, 8):
        if t <= n and n % t == 0 and t % 8 == 0:
            return t
    return n


def _vmem_limit_bytes():
    """Generation-aware scoped-VMEM limit (~75% of physical, capped at 100 MiB)."""
    cap = 64 * 1024 * 1024                    # safe fallback (v7x per-core VMEM)
    try:
        info = pltpu.get_tpu_info()
        cap = int(getattr(info, "vmem_capacity_bytes", cap))
    except Exception:
        pass
    return int(max(32 * 1024 * 1024, min(cap * 3 // 4, 100 * 1024 * 1024)))


def transformer_block_forward(x_nchw, p, num_heads, bias_free=False,
                              tq=128, tk=128):
    """x_nchw: (B, C, H, W); p: dict of PyTorch-layout parameters."""
    B, C, H, W = map(int, x_nchw.shape)
    assert C % num_heads == 0
    d = C // num_heads
    HW = H * W
    hidden = int(p['ffn_po_w'].shape[1])
    f32, bf16 = jnp.float32, jnp.bfloat16

    x_flat = jnp.transpose(x_nchw, (0, 2, 3, 1)).reshape(B, HW, C).astype(f32)

    # row / column index of every flattened pixel (for the dwconv edge masks).
    rows = jnp.repeat(jnp.arange(H, dtype=f32), W).reshape(HW, 1)
    cols = jnp.tile(jnp.arange(W, dtype=f32), H).reshape(HW, 1)

    # ---- PyTorch layouts -> kernel layouts (channels-last, (in,out) matmuls).
    ln1_w = p['ln1_w'].reshape(1, C).astype(f32)
    ln1_b = p['ln1_b'].reshape(1, C).astype(f32)
    w_qkv = jnp.transpose(p['qkv_w'][:, :, 0, 0]).astype(bf16)         # (C, 3C)
    b_qkv = p['qkv_b'].reshape(1, 3 * C).astype(f32)
    w_qdw = jnp.transpose(p['qkv_dw_w'][:, 0], (1, 2, 0)).astype(f32)  # (3,3,3C)
    b_qdw = p['qkv_dw_b'].reshape(1, 3 * C).astype(f32)
    temp = p['temperature'].reshape(1, num_heads).astype(f32)
    w_po = jnp.transpose(p['po_w'][:, :, 0, 0]).astype(bf16)           # (C, C)
    b_po = p['po_b'].reshape(1, C).astype(f32)
    ln2_w = p['ln2_w'].reshape(1, C).astype(f32)
    ln2_b = p['ln2_b'].reshape(1, C).astype(f32)
    w_pi = jnp.transpose(p['pi_w'][:, :, 0, 0])                        # (C, 2*hidden)
    w_pi1 = w_pi[:, :hidden].astype(bf16)
    w_pi2 = w_pi[:, hidden:].astype(bf16)
    b_pi = p['pi_b'].reshape(2 * hidden)
    b_pi1 = b_pi[:hidden].reshape(1, hidden).astype(f32)
    b_pi2 = b_pi[hidden:].reshape(1, hidden).astype(f32)
    w_fdw = jnp.transpose(p['ffn_dw_w'][:, 0], (1, 2, 0))              # (3,3,2*hidden)
    w_fdw1 = w_fdw[:, :, :hidden].astype(f32)
    w_fdw2 = w_fdw[:, :, hidden:].astype(f32)
    b_fdw = p['ffn_dw_b'].reshape(2 * hidden)
    b_fdw1 = b_fdw[:hidden].reshape(1, hidden).astype(f32)
    b_fdw2 = b_fdw[hidden:].reshape(1, hidden).astype(f32)
    w_fo = jnp.transpose(p['ffn_po_w'][:, :, 0, 0]).astype(bf16)       # (hidden, C)
    b_fo = p['ffn_po_b'].reshape(1, C).astype(f32)

    vmem_limit = _vmem_limit_bytes()

    # ---- Kernel A: LN1 + 1x1 qkv + depthwise 3x3 + per-head L2 norm --------
    a_params = [rows, cols, ln1_w, ln1_b, w_qkv, b_qkv, w_qdw, b_qdw, temp]
    head_shape = jax.ShapeDtypeStruct((B, num_heads, HW, d), bf16)
    head_spec = pl.BlockSpec((1, num_heads, HW, d), lambda b: (b, 0, 0, 0))
    q_t, k_n, v_h = pl.pallas_call(
        _make_qkv_kernel(H, W, C, num_heads, bias_free),
        out_shape=(head_shape, head_shape, head_shape),
        grid_spec=pltpu.PrefetchScalarGridSpec(
            num_scalar_prefetch=0,
            grid=(B,),
            in_specs=[pl.BlockSpec((1, HW, C), lambda b: (b, 0, 0))]
                     + [_const_spec(t.shape) for t in a_params],
            out_specs=[head_spec, head_spec, head_spec]),
        compiler_params=pltpu.CompilerParams(
            dimension_semantics=("parallel",),
            vmem_limit_bytes=vmem_limit),
    )(x_flat, *a_params)

    # ---- Kernel B: flash-style spatial attention + project_out + residual --
    TQ = _pick_tile(HW, tq)
    TK = _pick_tile(HW, tk)
    x_attn = pl.pallas_call(
        _make_attention_kernel(num_heads, d),
        out_shape=jax.ShapeDtypeStruct((B, HW, C), f32),
        grid_spec=pltpu.PrefetchScalarGridSpec(
            num_scalar_prefetch=0,
            grid=(B, HW // TQ, HW // TK),
            in_specs=[
                pl.BlockSpec((1, num_heads, TQ, d),
                             lambda b, qi, ki: (b, 0, qi, 0)),
                pl.BlockSpec((1, num_heads, TK, d),
                             lambda b, qi, ki: (b, 0, ki, 0)),
                pl.BlockSpec((1, num_heads, TK, d),
                             lambda b, qi, ki: (b, 0, ki, 0)),
                pl.BlockSpec((1, TQ, C), lambda b, qi, ki: (b, qi, 0)),
                _const_spec(w_po.shape),
                _const_spec(b_po.shape),
            ],
            out_specs=pl.BlockSpec((1, TQ, C), lambda b, qi, ki: (b, qi, 0)),
            scratch_shapes=[
                pltpu.VMEM((num_heads, TQ, 1), f32),   # running max
                pltpu.VMEM((num_heads, TQ, 1), f32),   # running sum
                pltpu.VMEM((num_heads, TQ, d), f32),   # PV accumulator
                pltpu.VMEM((TQ, C), f32),              # merged-heads staging
            ]),
        compiler_params=pltpu.CompilerParams(
            dimension_semantics=("parallel", "parallel", "arbitrary"),
            vmem_limit_bytes=vmem_limit),
    )(q_t, k_n, v_h, x_flat, w_po, b_po)

    # ---- Kernel C: LN2 + gated FFN (1x1 -> dw 3x3 -> gelu gate -> 1x1) -----
    c_params = [rows, cols, ln2_w, ln2_b, w_pi1, b_pi1, w_pi2, b_pi2,
                w_fdw1, b_fdw1, w_fdw2, b_fdw2, w_fo, b_fo]
    out_flat = pl.pallas_call(
        _make_ffn_kernel(H, W, bias_free),
        out_shape=jax.ShapeDtypeStruct((B, HW, C), f32),
        grid_spec=pltpu.PrefetchScalarGridSpec(
            num_scalar_prefetch=0,
            grid=(B,),
            in_specs=[pl.BlockSpec((1, HW, C), lambda b: (b, 0, 0))]
                     + [_const_spec(t.shape) for t in c_params],
            out_specs=pl.BlockSpec((1, HW, C), lambda b: (b, 0, 0))),
        compiler_params=pltpu.CompilerParams(
            dimension_semantics=("parallel",),
            vmem_limit_bytes=vmem_limit),
    )(x_attn, *c_params)

    return jnp.transpose(out_flat.reshape(B, H, W, C), (0, 3, 1, 2))


# --------------------------- pure-JAX reference ----------------------------
def _reference_forward(x, p, num_heads, bias_free=False):
    B, C, H, W = x.shape
    HW = H * W
    HI = lax.Precision.HIGHEST

    def layer_norm(x4, w, b):
        xr = jnp.transpose(x4, (0, 2, 3, 1)).reshape(B, HW, C)
        mu = xr.mean(-1, keepdims=True)
        var = jnp.mean((xr - mu) ** 2, -1, keepdims=True)
        if bias_free:
            y = xr / jnp.sqrt(var + _LN_EPS) * w
        else:
            y = (xr - mu) / jnp.sqrt(var + _LN_EPS) * w + b
        return jnp.transpose(y.reshape(B, H, W, C), (0, 3, 1, 2))

    def conv1x1(x4, w, b):
        y = jnp.einsum('bihw,oi->bohw', x4, w[:, :, 0, 0], precision=HI)
        return y + b[None, :, None, None]

    def dwconv3x3(x4, w, b):
        y = lax.conv_general_dilated(
            x4, w, window_strides=(1, 1), padding=((1, 1), (1, 1)),
            dimension_numbers=('NCHW', 'OIHW', 'NCHW'),
            feature_group_count=x4.shape[1], precision=HI)
        return y + b[None, :, None, None]

    d = C // num_heads

    # Attention
    xn = layer_norm(x, p['ln1_w'], p['ln1_b'])
    qkv = dwconv3x3(conv1x1(xn, p['qkv_w'], p['qkv_b']),
                    p['qkv_dw_w'], p['qkv_dw_b'])
    q, k, v = jnp.split(qkv, 3, axis=1)

    def heads_split(t):  # 'b (head c) h w -> b head (h w) c'
        return jnp.transpose(t.reshape(B, num_heads, d, HW), (0, 1, 3, 2))

    q, k, v = map(heads_split, (q, k, v))

    def l2n(t):
        return t / jnp.maximum(jnp.sqrt(jnp.sum(t * t, -1, keepdims=True)), 1e-12)

    q, k = l2n(q), l2n(k)
    attn = jnp.einsum('bhqc,bhkc->bhqk', q, k, precision=HI)
    attn = attn * p['temperature'][None, :, :, :]
    attn = jax.nn.softmax(attn, axis=-1)
    out = jnp.einsum('bhqk,bhkc->bhqc', attn, v, precision=HI)
    out = jnp.transpose(out, (0, 1, 3, 2)).reshape(B, C, H, W)
    x = x + conv1x1(out, p['po_w'], p['po_b'])

    # FeedForward
    xn2 = layer_norm(x, p['ln2_w'], p['ln2_b'])
    pin = dwconv3x3(conv1x1(xn2, p['pi_w'], p['pi_b']),
                    p['ffn_dw_w'], p['ffn_dw_b'])
    x1, x2 = jnp.split(pin, 2, axis=1)
    g = jax.nn.gelu(x1, approximate=False) * x2
    return x + conv1x1(g, p['ffn_po_w'], p['ffn_po_b'])


if __name__ == "__main__":
    key = jax.random.PRNGKey(0)
    B, C, H, W = 2, 8, 16, 16
    num_heads = 2
    ffn_expansion_factor = 2.0
    hidden = int(C * ffn_expansion_factor)

    keys = jax.random.split(key, 20)

    def rnd(k, shape, scale=0.1):
        return scale * jax.random.normal(k, shape, dtype=jnp.float32)

    x = jax.random.normal(keys[0], (B, C, H, W), dtype=jnp.float32)

    params = {
        'ln1_w': 1.0 + rnd(keys[1], (C,)),
        'ln1_b': rnd(keys[2], (C,)),
        'qkv_w': rnd(keys[3], (3 * C, C, 1, 1)),
        'qkv_b': rnd(keys[4], (3 * C,)),
        'qkv_dw_w': rnd(keys[5], (3 * C, 1, 3, 3)),
        'qkv_dw_b': rnd(keys[6], (3 * C,)),
        'temperature': 1.0 + rnd(keys[7], (num_heads, 1, 1)),
        'po_w': rnd(keys[8], (C, C, 1, 1)),
        'po_b': rnd(keys[9], (C,)),
        'ln2_w': 1.0 + rnd(keys[10], (C,)),
        'ln2_b': rnd(keys[11], (C,)),
        'pi_w': rnd(keys[12], (2 * hidden, C, 1, 1)),
        'pi_b': rnd(keys[13], (2 * hidden,)),
        'ffn_dw_w': rnd(keys[14], (2 * hidden, 1, 3, 3)),
        'ffn_dw_b': rnd(keys[15], (2 * hidden,)),
        'ffn_po_w': rnd(keys[16], (C, hidden, 1, 1)),
        'ffn_po_b': rnd(keys[17], (C,)),
    }

    out = transformer_block_forward(x, params, num_heads=num_heads,
                                    bias_free=False)
    out = jax.block_until_ready(out)

    ref = _reference_forward(x, params, num_heads=num_heads, bias_free=False)
    assert out.shape == (B, C, H, W), out.shape
    max_err = float(jnp.max(jnp.abs(out - ref)))
    # bf16 MXU operands (f32 accumulation) -> tolerance loosened vs pure f32.
    assert max_err < 2e-2, f"mismatch vs reference, max abs err {max_err}"

    print("KERNEL_OK")
</pallas_src>

<mosaic_0001>
module attributes {stable_mosaic.version = 11 : i64} {
  func.func @kernel(%arg0: i32, %arg1: memref<1x256x8xf32, #tpu.memory_space<vmem>>, %arg2: memref<256x1xf32, #tpu.memory_space<vmem>>, %arg3: memref<256x1xf32, #tpu.memory_space<vmem>>, %arg4: memref<1x8xf32, #tpu.memory_space<vmem>>, %arg5: memref<1x8xf32, #tpu.memory_space<vmem>>, %arg6: memref<8x24xbf16, #tpu.memory_space<vmem>>, %arg7: memref<1x24xf32, #tpu.memory_space<vmem>>, %arg8: memref<3x3x24xf32, #tpu.memory_space<vmem>>, %arg9: memref<1x24xf32, #tpu.memory_space<vmem>>, %arg10: memref<1x2xf32, #tpu.memory_space<vmem>>, %arg11: memref<1x2x256x4xbf16, #tpu.memory_space<vmem>>, %arg12: memref<1x2x256x4xbf16, #tpu.memory_space<vmem>>, %arg13: memref<1x2x256x4xbf16, #tpu.memory_space<vmem>>) attributes {dimension_semantics = [#tpu.dimension_semantics<parallel>], iteration_bounds = array<i64: 2>, scalar_prefetch = 0 : i64, scratch_operands = 0 : i64, tpu.core_type = #tpu.core_type<tc>, window_params = [{transform_indices = @transform_0, window_bounds = array<i64: 1, 256, 8>}, {pipeline_mode = #tpu.pipeline_mode<synchronous>, transform_indices = @transform_1, window_bounds = array<i64: 256, 1>}, {pipeline_mode = #tpu.pipeline_mode<synchronous>, transform_indices = @transform_2, window_bounds = array<i64: 256, 1>}, {pipeline_mode = #tpu.pipeline_mode<synchronous>, transform_indices = @transform_3, window_bounds = array<i64: 1, 8>}, {pipeline_mode = #tpu.pipeline_mode<synchronous>, transform_indices = @transform_4, window_bounds = array<i64: 1, 8>}, {pipeline_mode = #tpu.pipeline_mode<synchronous>, transform_indices = @transform_5, window_bounds = array<i64: 8, 24>}, {pipeline_mode = #tpu.pipeline_mode<synchronous>, transform_indices = @transform_6, window_bounds = array<i64: 1, 24>}, {pipeline_mode = #tpu.pipeline_mode<synchronous>, transform_indices = @transform_7, window_bounds = array<i64: 3, 3, 24>}, {pipeline_mode = #tpu.pipeline_mode<synchronous>, transform_indices = @transform_8, window_bounds = array<i64: 1, 24>}, {pipeline_mode = #tpu.pipeline_mode<synchronous>, transform_indices = @transform_9, window_bounds = array<i64: 1, 2>}, {transform_indices = @transform_10, window_bounds = array<i64: 1, 2, 256, 4>}, {transform_indices = @transform_11, window_bounds = array<i64: 1, 2, 256, 4>}, {transform_indices = @transform_12, window_bounds = array<i64: 1, 2, 256, 4>}]} {
    %c0 = arith.constant 0 : index
    %c0_0 = arith.constant 0 : index
    %c0_1 = arith.constant 0 : index
    %0 = vector.load %arg1[%c0, %c0_0, %c0_1] : memref<1x256x8xf32, #tpu.memory_space<vmem>>, vector<1x256x8xf32>
    %1 = vector.shape_cast %0 : vector<1x256x8xf32> to vector<256x8xf32>
    %c0_2 = arith.constant 0 : index
    %c0_3 = arith.constant 0 : index
    %2 = vector.load %arg4[%c0_2, %c0_3] : memref<1x8xf32, #tpu.memory_space<vmem>>, vector<1x8xf32>
    %c0_4 = arith.constant 0 : index
    %c0_5 = arith.constant 0 : index
    %3 = vector.load %arg5[%c0_4, %c0_5] : memref<1x8xf32, #tpu.memory_space<vmem>>, vector<1x8xf32>
    %cst = arith.constant dense<0.000000e+00> : vector<256xf32>
    %4 = vector.multi_reduction <add>, %1, %cst [1] : vector<256x8xf32> to vector<256xf32>
    %5 = vector.shape_cast %4 : vector<256xf32> to vector<256x1xf32>
    %cst_6 = arith.constant 8.000000e+00 : f32
    %6 = vector.broadcast %cst_6 : f32 to vector<256x1xf32>
    %7 = arith.divf %5, %6 : vector<256x1xf32>
    %8 = vector.broadcast %7 : vector<256x1xf32> to vector<256x8xf32>
    %9 = arith.subf %1, %8 : vector<256x8xf32>
    %10 = arith.mulf %9, %9 : vector<256x8xf32>
    %cst_7 = arith.constant dense<0.000000e+00> : vector<256xf32>
    %11 = vector.multi_reduction <add>, %10, %cst_7 [1] : vector<256x8xf32> to vector<256xf32>
    %12 = vector.shape_cast %11 : vector<256xf32> to vector<256x1xf32>
    %cst_8 = arith.constant 8.000000e+00 : f32
    %13 = vector.broadcast %cst_8 : f32 to vector<256x1xf32>
    %14 = arith.divf %12, %13 : vector<256x1xf32>
    %cst_9 = arith.constant 9.99999974E-6 : f32
    %15 = vector.broadcast %cst_9 : f32 to vector<256x1xf32>
    %16 = arith.addf %14, %15 : vector<256x1xf32>
    %17 = math.rsqrt %16 : vector<256x1xf32>
    %18 = vector.broadcast %7 : vector<256x1xf32> to vector<256x8xf32>
    %19 = arith.subf %1, %18 : vector<256x8xf32>
    %20 = vector.broadcast %17 : vector<256x1xf32> to vector<256x8xf32>
    %21 = arith.mulf %19, %20 : vector<256x8xf32>
    %22 = vector.broadcast %2 : vector<1x8xf32> to vector<256x8xf32>
    %23 = arith.mulf %21, %22 : vector<256x8xf32>
    %24 = vector.broadcast %3 : vector<1x8xf32> to vector<256x8xf32>
    %25 = arith.addf %23, %24 : vector<256x8xf32>
    %26 = arith.truncf %25 : vector<256x8xf32> to vector<256x8xbf16>
    %c0_10 = arith.constant 0 : index
    %c0_11 = arith.constant 0 : index
    %27 = vector.load %arg6[%c0_10, %c0_11] : memref<8x24xbf16, #tpu.memory_space<vmem>>, vector<8x24xbf16>
    %cst_12 = arith.constant dense<0.000000e+00> : vector<256x24xf32>
    %28 = tpu.matmul %26, %27, %cst_12 {dimension_numbers = #tpu.dot_dimension_numbers<[1], [0], [0], [1], [0, 0, 1, 1], [], []>} : vector<256x8xbf16>, vector<8x24xbf16>, vector<256x24xf32> -> vector<256x24xf32>
    %c0_13 = arith.constant 0 : index
    %c0_14 = arith.constant 0 : index
    %29 = vector.load %arg7[%c0_13, %c0_14] : memref<1x24xf32, #tpu.memory_space<vmem>>, vector<1x24xf32>
    %30 = vector.broadcast %29 : vector<1x24xf32> to vector<256x24xf32>
    %31 = arith.addf %28, %30 : vector<256x24xf32>
    %c0_15 = arith.constant 0 : index
    %c0_16 = arith.constant 0 : index
    %c0_17 = arith.constant 0 : index
    %32 = vector.load %arg8[%c0_15, %c0_16, %c0_17] : memref<3x3x24xf32, #tpu.memory_space<vmem>>, vector<3x3x24xf32>
    %c0_18 = arith.constant 0 : index
    %c0_19 = arith.constant 0 : index
    %33 = vector.load %arg9[%c0_18, %c0_19] : memref<1x24xf32, #tpu.memory_space<vmem>>, vector<1x24xf32>
    %c0_20 = arith.constant 0 : index
    %c0_21 = arith.constant 0 : index
    %34 = vector.load %arg2[%c0_20, %c0_21] : memref<256x1xf32, #tpu.memory_space<vmem>>, vector<256x1xf32>
    %c0_22 = arith.constant 0 : index
    %c0_23 = arith.constant 0 : index
    %35 = vector.load %arg3[%c0_22, %c0_23] : memref<256x1xf32, #tpu.memory_space<vmem>>, vector<256x1xf32>
    %cst_24 = arith.constant 0.000000e+00 : f32
    %36 = vector.broadcast %cst_24 : f32 to vector<256x24xf32>
    %37 = vector.extract_strided_slice %31 {offsets = [239, 0], sizes = [17, 24], strides = [1, 1]} : vector<256x24xf32> to vector<17x24xf32>
    %38 = vector.extract_strided_slice %31 {offsets = [0, 0], sizes = [239, 24], strides = [1, 1]} : vector<256x24xf32> to vector<239x24xf32>
    %39 = tpu.concatenate %37, %38 in 0 : vector<17x24xf32>, vector<239x24xf32> -> vector<256x24xf32>
    %40 = vector.extract_strided_slice %32 {offsets = [0, 0, 0], sizes = [1, 1, 24], strides = [1, 1, 1]} : vector<3x3x24xf32> to vector<1x1x24xf32>
    %41 = vector.shape_cast %40 : vector<1x1x24xf32> to vector<24xf32>
    %42 = vector.shape_cast %41 : vector<24xf32> to vector<1x24xf32>
    %43 = vector.broadcast %42 : vector<1x24xf32> to vector<256x24xf32>
    %44 = arith.mulf %39, %43 : vector<256x24xf32>
    %cst_25 = arith.constant 1.000000e+00 : f32
    %45 = vector.broadcast %cst_25 : f32 to vector<256x1xf32>
    %46 = arith.cmpf oge, %34, %45 : vector<256x1xf32>
    %cst_26 = arith.constant 1.000000e+00 : f32
    %47 = vector.broadcast %cst_26 : f32 to vector<256x1xf32>
    %48 = arith.cmpf oge, %35, %47 : vector<256x1xf32>
    %49 = arith.andi %46, %48 : vector<256x1xi1>
    %cst_27 = arith.constant 0.000000e+00 : f32
    %50 = vector.shape_cast %49 : vector<256x1xi1> to vector<256x1xi1>
    %51 = vector.broadcast %50 : vector<256x1xi1> to vector<256x24xi1>
    %52 = vector.broadcast %cst_27 : f32 to vector<256x24xf32>
    %53 = arith.select %51, %44, %52 : vector<256x24xi1>, vector<256x24xf32>
    %54 = arith.addf %36, %53 : vector<256x24xf32>
    %55 = vector.extract_strided_slice %31 {offsets = [240, 0], sizes = [16, 24], strides = [1, 1]} : vector<256x24xf32> to vector<16x24xf32>
    %56 = vector.extract_strided_slice %31 {offsets = [0, 0], sizes = [240, 24], strides = [1, 1]} : vector<256x24xf32> to vector<240x24xf32>
    %57 = tpu.concatenate %55, %56 in 0 : vector<16x24xf32>, vector<240x24xf32> -> vector<256x24xf32>
    %58 = vector.extract_strided_slice %32 {offsets = [0, 1, 0], sizes = [1, 1, 24], strides = [1, 1, 1]} : vector<3x3x24xf32> to vector<1x1x24xf32>
    %59 = vector.shape_cast %58 : vector<1x1x24xf32> to vector<24xf32>
    %60 = vector.shape_cast %59 : vector<24xf32> to vector<1x24xf32>
    %61 = vector.broadcast %60 : vector<1x24xf32> to vector<256x24xf32>
    %62 = arith.mulf %57, %61 : vector<256x24xf32>
    %cst_28 = arith.constant 1.000000e+00 : f32
    %63 = vector.broadcast %cst_28 : f32 to vector<256x1xf32>
    %64 = arith.cmpf oge, %34, %63 : vector<256x1xf32>
    %cst_29 = arith.constant 0.000000e+00 : f32
    %65 = vector.shape_cast %64 : vector<256x1xi1> to vector<256x1xi1>
    %66 = vector.broadcast %65 : vector<256x1xi1> to vector<256x24xi1>
    %67 = vector.broadcast %cst_29 : f32 to vector<256x24xf32>
    %68 = arith.select %66, %62, %67 : vector<256x24xi1>, vector<256x24xf32>
    %69 = arith.addf %54, %68 : vector<256x24xf32>
    %70 = vector.extract_strided_slice %31 {offsets = [241, 0], sizes = [15, 24], strides = [1, 1]} : vector<256x24xf32> to vector<15x24xf32>
    %71 = vector.extract_strided_slice %31 {offsets = [0, 0], sizes = [241, 24], strides = [1, 1]} : vector<256x24xf32> to vector<241x24xf32>
    %72 = tpu.concatenate %70, %71 in 0 : vector<15x24xf32>, vector<241x24xf32> -> vector<256x24xf32>
    %73 = vector.extract_strided_slice %32 {offsets = [0, 2, 0], sizes = [1, 1, 24], strides = [1, 1, 1]} : vector<3x3x24xf32> to vector<1x1x24xf32>
    %74 = vector.shape_cast %73 : vector<1x1x24xf32> to vector<24xf32>
    %75 = vector.shape_cast %74 : vector<24xf32> to vector<1x24xf32>
    %76 = vector.broadcast %75 : vector<1x24xf32> to vector<256x24xf32>
    %77 = arith.mulf %72, %76 : vector<256x24xf32>
    %cst_30 = arith.constant 1.000000e+00 : f32
    %78 = vector.broadcast %cst_30 : f32 to vector<256x1xf32>
    %79 = arith.cmpf oge, %34, %78 : vector<256x1xf32>
    %cst_31 = arith.constant 1.500000e+01 : f32
    %80 = vector.broadcast %cst_31 : f32 to vector<256x1xf32>
    %81 = arith.cmpf olt, %35, %80 : vector<256x1xf32>
    %82 = arith.andi %79, %81 : vector<256x1xi1>
    %cst_32 = arith.constant 0.000000e+00 : f32
    %83 = vector.shape_cast %82 : vector<256x1xi1> to vector<256x1xi1>
    %84 = vector.broadcast %83 : vector<256x1xi1> to vector<256x24xi1>
    %85 = vector.broadcast %cst_32 : f32 to vector<256x24xf32>
    %86 = arith.select %84, %77, %85 : vector<256x24xi1>, vector<256x24xf32>
    %87 = arith.addf %69, %86 : vector<256x24xf32>
    %88 = vector.extract_strided_slice %31 {offsets = [255, 0], sizes = [1, 24], strides = [1, 1]} : vector<256x24xf32> to vector<1x24xf32>
    %89 = vector.extract_strided_slice %31 {offsets = [0, 0], sizes = [255, 24], strides = [1, 1]} : vector<256x24xf32> to vector<255x24xf32>
    %90 = tpu.concatenate %88, %89 in 0 : vector<1x24xf32>, vector<255x24xf32> -> vector<256x24xf32>
    %91 = vector.extract_strided_slice %32 {offsets = [1, 0, 0], sizes = [1, 1, 24], strides = [1, 1, 1]} : vector<3x3x24xf32> to vector<1x1x24xf32>
    %92 = vector.shape_cast %91 : vector<1x1x24xf32> to vector<24xf32>
    %93 = vector.shape_cast %92 : vector<24xf32> to vector<1x24xf32>
    %94 = vector.broadcast %93 : vector<1x24xf32> to vector<256x24xf32>
    %95 = arith.mulf %90, %94 : vector<256x24xf32>
    %cst_33 = arith.constant 1.000000e+00 : f32
    %96 = vector.broadcast %cst_33 : f32 to vector<256x1xf32>
    %97 = arith.cmpf oge, %35, %96 : vector<256x1xf32>
    %cst_34 = arith.constant 0.000000e+00 : f32
    %98 = vector.shape_cast %97 : vector<256x1xi1> to vector<256x1xi1>
    %99 = vector.broadcast %98 : vector<256x1xi1> to vector<256x24xi1>
    %100 = vector.broadcast %cst_34 : f32 to vector<256x24xf32>
    %101 = arith.select %99, %95, %100 : vector<256x24xi1>, vector<256x24xf32>
    %102 = arith.addf %87, %101 : vector<256x24xf32>
    %103 = vector.extract_strided_slice %32 {offsets = [1, 1, 0], sizes = [1, 1, 24], strides = [1, 1, 1]} : vector<3x3x24xf32> to vector<1x1x24xf32>
    %104 = vector.shape_cast %103 : vector<1x1x24xf32> to vector<24xf32>
    %105 = vector.shape_cast %104 : vector<24xf32> to vector<1x24xf32>
    %106 = vector.broadcast %105 : vector<1x24xf32> to vector<256x24xf32>
    %107 = arith.mulf %31, %106 : vector<256x24xf32>
    %108 = arith.addf %102, %107 : vector<256x24xf32>
    %109 = vector.extract_strided_slice %31 {offsets = [1, 0], sizes = [255, 24], strides = [1, 1]} : vector<256x24xf32> to vector<255x24xf32>
    %110 = vector.extract_strided_slice %31 {offsets = [0, 0], sizes = [1, 24], strides = [1, 1]} : vector<256x24xf32> to vector<1x24xf32>
    %111 = tpu.concatenate %109, %110 in 0 : vector<255x24xf32>, vector<1x24xf32> -> vector<256x24xf32>
    %112 = vector.extract_strided_slice %32 {offsets = [1, 2, 0], sizes = [1, 1, 24], strides = [1, 1, 1]} : vector<3x3x24xf32> to vector<1x1x24xf32>
    %113 = vector.shape_cast %112 : vector<1x1x24xf32> to vector<24xf32>
    %114 = vector.shape_cast %113 : vector<24xf32> to vector<1x24xf32>
    %115 = vector.broadcast %114 : vector<1x24xf32> to vector<256x24xf32>
    %116 = arith.mulf %111, %115 : vector<256x24xf32>
    %cst_35 = arith.constant 1.500000e+01 : f32
    %117 = vector.broadcast %cst_35 : f32 to vector<256x1xf32>
    %118 = arith.cmpf olt, %35, %117 : vector<256x1xf32>
    %cst_36 = arith.constant 0.000000e+00 : f32
    %119 = vector.shape_cast %118 : vector<256x1xi1> to vector<256x1xi1>
    %120 = vector.broadcast %119 : vector<256x1xi1> to vector<256x24xi1>
    %121 = vector.broadcast %cst_36 : f32 to vector<256x24xf32>
    %122 = arith.select %120, %116, %121 : vector<256x24xi1>, vector<256x24xf32>
    %123 = arith.addf %108, %122 : vector<256x24xf32>
    %124 = vector.extract_strided_slice %31 {offsets = [15, 0], sizes = [241, 24], strides = [1, 1]} : vector<256x24xf32> to vector<241x24xf32>
    %125 = vector.extract_strided_slice %31 {offsets = [0, 0], sizes = [15, 24], strides = [1, 1]} : vector<256x24xf32> to vector<15x24xf32>
    %126 = tpu.concatenate %124, %125 in 0 : vector<241x24xf32>, vector<15x24xf32> -> vector<256x24xf32>
    %127 = vector.extract_strided_slice %32 {offsets = [2, 0, 0], sizes = [1, 1, 24], strides = [1, 1, 1]} : vector<3x3x24xf32> to vector<1x1x24xf32>
    %128 = vector.shape_cast %127 : vector<1x1x24xf32> to vector<24xf32>
    %129 = vector.shape_cast %128 : vector<24xf32> to vector<1x24xf32>
    %130 = vector.broadcast %129 : vector<1x24xf32> to vector<256x24xf32>
    %131 = arith.mulf %126, %130 : vector<256x24xf32>
    %cst_37 = arith.constant 1.500000e+01 : f32
    %132 = vector.broadcast %cst_37 : f32 to vector<256x1xf32>
    %133 = arith.cmpf olt, %34, %132 : vector<256x1xf32>
    %cst_38 = arith.constant 1.000000e+00 : f32
    %134 = vector.broadcast %cst_38 : f32 to vector<256x1xf32>
    %135 = arith.cmpf oge, %35, %134 : vector<256x1xf32>
    %136 = arith.andi %133, %135 : vector<256x1xi1>
    %cst_39 = arith.constant 0.000000e+00 : f32
    %137 = vector.shape_cast %136 : vector<256x1xi1> to vector<256x1xi1>
    %138 = vector.broadcast %137 : vector<256x1xi1> to vector<256x24xi1>
    %139 = vector.broadcast %cst_39 : f32 to vector<256x24xf32>
    %140 = arith.select %138, %131, %139 : vector<256x24xi1>, vector<256x24xf32>
    %141 = arith.addf %123, %140 : vector<256x24xf32>
    %142 = vector.extract_strided_slice %31 {offsets = [16, 0], sizes = [240, 24], strides = [1, 1]} : vector<256x24xf32> to vector<240x24xf32>
    %143 = vector.extract_strided_slice %31 {offsets = [0, 0], sizes = [16, 24], strides = [1, 1]} : vector<256x24xf32> to vector<16x24xf32>
    %144 = tpu.concatenate %142, %143 in 0 : vector<240x24xf32>, vector<16x24xf32> -> vector<256x24xf32>
    %145 = vector.extract_strided_slice %32 {offsets = [2, 1, 0], sizes = [1, 1, 24], strides = [1, 1, 1]} : vector<3x3x24xf32> to vector<1x1x24xf32>
    %146 = vector.shape_cast %145 : vector<1x1x24xf32> to vector<24xf32>
    %147 = vector.shape_cast %146 : vector<24xf32> to vector<1x24xf32>
    %148 = vector.broadcast %147 : vector<1x24xf32> to vector<256x24xf32>
    %149 = arith.mulf %144, %148 : vector<256x24xf32>
    %cst_40 = arith.constant 1.500000e+01 : f32
    %150 = vector.broadcast %cst_40 : f32 to vector<256x1xf32>
    %151 = arith.cmpf olt, %34, %150 : vector<256x1xf32>
    %cst_41 = arith.constant 0.000000e+00 : f32
    %152 = vector.shape_cast %151 : vector<256x1xi1> to vector<256x1xi1>
    %153 = vector.broadcast %152 : vector<256x1xi1> to vector<256x24xi1>
    %154 = vector.broadcast %cst_41 : f32 to vector<256x24xf32>
    %155 = arith.select %153, %149, %154 : vector<256x24xi1>, vector<256x24xf32>
    %156 = arith.addf %141, %155 : vector<256x24xf32>
    %157 = vector.extract_strided_slice %31 {offsets = [17, 0], sizes = [239, 24], strides = [1, 1]} : vector<256x24xf32> to vector<239x24xf32>
    %158 = vector.extract_strided_slice %31 {offsets = [0, 0], sizes = [17, 24], strides = [1, 1]} : vector<256x24xf32> to vector<17x24xf32>
    %159 = tpu.concatenate %157, %158 in 0 : vector<239x24xf32>, vector<17x24xf32> -> vector<256x24xf32>
    %160 = vector.extract_strided_slice %32 {offsets = [2, 2, 0], sizes = [1, 1, 24], strides = [1, 1, 1]} : vector<3x3x24xf32> to vector<1x1x24xf32>
    %161 = vector.shape_cast %160 : vector<1x1x24xf32> to vector<24xf32>
    %162 = vector.shape_cast %161 : vector<24xf32> to vector<1x24xf32>
    %163 = vector.broadcast %162 : vector<1x24xf32> to vector<256x24xf32>
    %164 = arith.mulf %159, %163 : vector<256x24xf32>
    %cst_42 = arith.constant 1.500000e+01 : f32
    %165 = vector.broadcast %cst_42 : f32 to vector<256x1xf32>
    %166 = arith.cmpf olt, %34, %165 : vector<256x1xf32>
    %cst_43 = arith.constant 1.500000e+01 : f32
    %167 = vector.broadcast %cst_43 : f32 to vector<256x1xf32>
    %168 = arith.cmpf olt, %35, %167 : vector<256x1xf32>
    %169 = arith.andi %166, %168 : vector<256x1xi1>
    %cst_44 = arith.constant 0.000000e+00 : f32
    %170 = vector.shape_cast %169 : vector<256x1xi1> to vector<256x1xi1>
    %171 = vector.broadcast %170 : vector<256x1xi1> to vector<256x24xi1>
    %172 = vector.broadcast %cst_44 : f32 to vector<256x24xf32>
    %173 = arith.select %171, %164, %172 : vector<256x24xi1>, vector<256x24xf32>
    %174 = arith.addf %156, %173 : vector<256x24xf32>
    %175 = vector.broadcast %33 : vector<1x24xf32> to vector<256x24xf32>
    %176 = arith.addf %174, %175 : vector<256x24xf32>
    %177 = vector.extract_strided_slice %176 {offsets = [0, 0], sizes = [256, 4], strides = [1, 1]} : vector<256x24xf32> to vector<256x4xf32>
    %178 = vector.extract_strided_slice %176 {offsets = [0, 8], sizes = [256, 4], strides = [1, 1]} : vector<256x24xf32> to vector<256x4xf32>
    %179 = vector.extract_strided_slice %176 {offsets = [0, 16], sizes = [256, 4], strides = [1, 1]} : vector<256x24xf32> to vector<256x4xf32>
    %180 = arith.mulf %177, %177 : vector<256x4xf32>
    %cst_45 = arith.constant dense<0.000000e+00> : vector<256xf32>
    %181 = vector.multi_reduction <add>, %180, %cst_45 [1] : vector<256x4xf32> to vector<256xf32>
    %182 = vector.shape_cast %181 : vector<256xf32> to vector<256x1xf32>
    %cst_46 = arith.constant 1.000000e-24 : f32
    %183 = vector.broadcast %cst_46 : f32 to vector<256x1xf32>
    %184 = arith.maximumf %182, %183 : vector<256x1xf32>
    %185 = math.rsqrt %184 : vector<256x1xf32>
    %186 = arith.mulf %178, %178 : vector<256x4xf32>
    %cst_47 = arith.constant dense<0.000000e+00> : vector<256xf32>
    %187 = vector.multi_reduction <add>, %186, %cst_47 [1] : vector<256x4xf32> to vector<256xf32>
    %188 = vector.shape_cast %187 : vector<256xf32> to vector<256x1xf32>
    %cst_48 = arith.constant 1.000000e-24 : f32
    %189 = vector.broadcast %cst_48 : f32 to vector<256x1xf32>
    %190 = arith.maximumf %188, %189 : vector<256x1xf32>
    %191 = math.rsqrt %190 : vector<256x1xf32>
    %c0_49 = arith.constant 0 : index
    %c0_50 = arith.constant 0 : index
    %192 = vector.load %arg10[%c0_49, %c0_50] : memref<1x2xf32, #tpu.memory_space<vmem>>, vector<1x1xf32>
    %193 = vector.broadcast %192 : vector<1x1xf32> to vector<256x1xf32>
    %194 = arith.mulf %185, %193 : vector<256x1xf32>
    %195 = vector.broadcast %194 : vector<256x1xf32> to vector<256x4xf32>
    %196 = arith.mulf %177, %195 : vector<256x4xf32>
    %197 = arith.truncf %196 : vector<256x4xf32> to vector<256x4xbf16>
    %c0_51 = arith.constant 0 : index
    %c0_52 = arith.constant 0 : index
    %c0_53 = arith.constant 0 : index
    %c0_54 = arith.constant 0 : index
    %198 = vector.load %arg11[%c0_51, %c0_52, %c0_53, %c0_54] : memref<1x2x256x4xbf16, #tpu.memory_space<vmem>>, vector<1x1x256x4xbf16>
    %199 = vector.shape_cast %198 : vector<1x1x256x4xbf16> to vector<256x4xbf16>
    %200 = vector.shape_cast %197 : vector<256x4xbf16> to vector<1x1x256x4xbf16>
    tpu.vector_store %arg11[%c0_51, %c0_52, %c0_53, %c0_54], %200 {strides = array<i32>} : memref<1x2x256x4xbf16, #tpu.memory_space<vmem>>, vector<1x1x256x4xbf16>,
    %201 = vector.broadcast %191 : vector<256x1xf32> to vector<256x4xf32>
    %202 = arith.mulf %178, %201 : vector<256x4xf32>
    %203 = arith.truncf %202 : vector<256x4xf32> to vector<256x4xbf16>
    %c0_55 = arith.constant 0 : index
    %c0_56 = arith.constant 0 : index
    %c0_57 = arith.constant 0 : index
    %c0_58 = arith.constant 0 : index
    %204 = vector.load %arg12[%c0_55, %c0_56, %c0_57, %c0_58] : memref<1x2x256x4xbf16, #tpu.memory_space<vmem>>, vector<1x1x256x4xbf16>
    %205 = vector.shape_cast %204 : vector<1x1x256x4xbf16> to vector<256x4xbf16>
    %206 = vector.shape_cast %203 : vector<256x4xbf16> to vector<1x1x256x4xbf16>
    tpu.vector_store %arg12[%c0_55, %c0_56, %c0_57, %c0_58], %206 {strides = array<i32>} : memref<1x2x256x4xbf16, #tpu.memory_space<vmem>>, vector<1x1x256x4xbf16>,
    %207 = arith.truncf %179 : vector<256x4xf32> to vector<256x4xbf16>
    %c0_59 = arith.constant 0 : index
    %c0_60 = arith.constant 0 : index
    %c0_61 = arith.constant 0 : index
    %c0_62 = arith.constant 0 : index
    %208 = vector.load %arg13[%c0_59, %c0_60, %c0_61, %c0_62] : memref<1x2x256x4xbf16, #tpu.memory_space<vmem>>, vector<1x1x256x4xbf16>
    %209 = vector.shape_cast %208 : vector<1x1x256x4xbf16> to vector<256x4xbf16>
    %210 = vector.shape_cast %207 : vector<256x4xbf16> to vector<1x1x256x4xbf16>
    tpu.vector_store %arg13[%c0_59, %c0_60, %c0_61, %c0_62], %210 {strides = array<i32>} : memref<1x2x256x4xbf16, #tpu.memory_space<vmem>>, vector<1x1x256x4xbf16>,
    %211 = vector.extract_strided_slice %176 {offsets = [0, 4], sizes = [256, 4], strides = [1, 1]} : vector<256x24xf32> to vector<256x4xf32>
    %212 = vector.extract_strided_slice %176 {offsets = [0, 12], sizes = [256, 4], strides = [1, 1]} : vector<256x24xf32> to vector<256x4xf32>
    %213 = vector.extract_strided_slice %176 {offsets = [0, 20], sizes = [256, 4], strides = [1, 1]} : vector<256x24xf32> to vector<256x4xf32>
    %214 = arith.mulf %211, %211 : vector<256x4xf32>
    %cst_63 = arith.constant dense<0.000000e+00> : vector<256xf32>
    %215 = vector.multi_reduction <add>, %214, %cst_63 [1] : vector<256x4xf32> to vector<256xf32>
    %216 = vector.shape_cast %215 : vector<256xf32> to vector<256x1xf32>
    %cst_64 = arith.constant 1.000000e-24 : f32
    %217 = vector.broadcast %cst_64 : f32 to vector<256x1xf32>
    %218 = arith.maximumf %216, %217 : vector<256x1xf32>
    %219 = math.rsqrt %218 : vector<256x1xf32>
    %220 = arith.mulf %212, %212 : vector<256x4xf32>
    %cst_65 = arith.constant dense<0.000000e+00> : vector<256xf32>
    %221 = vector.multi_reduction <add>, %220, %cst_65 [1] : vector<256x4xf32> to vector<256xf32>
    %222 = vector.shape_cast %221 : vector<256xf32> to vector<256x1xf32>
    %cst_66 = arith.constant 1.000000e-24 : f32
    %223 = vector.broadcast %cst_66 : f32 to vector<256x1xf32>
    %224 = arith.maximumf %222, %223 : vector<256x1xf32>
    %225 = math.rsqrt %224 : vector<256x1xf32>
    %c0_67 = arith.constant 0 : index
    %c1 = arith.constant 1 : index
    %226 = vector.load %arg10[%c0_67, %c1] : memref<1x2xf32, #tpu.memory_space<vmem>>, vector<1x1xf32>
    %227 = vector.broadcast %226 : vector<1x1xf32> to vector<256x1xf32>
    %228 = arith.mulf %219, %227 : vector<256x1xf32>
    %229 = vector.broadcast %228 : vector<256x1xf32> to vector<256x4xf32>
    %230 = arith.mulf %211, %229 : vector<256x4xf32>
    %231 = arith.truncf %230 : vector<256x4xf32> to vector<256x4xbf16>
    %c0_68 = arith.constant 0 : index
    %c1_69 = arith.constant 1 : index
    %c0_70 = arith.constant 0 : index
    %c0_71 = arith.constant 0 : index
    %232 = vector.load %arg11[%c0_68, %c1_69, %c0_70, %c0_71] : memref<1x2x256x4xbf16, #tpu.memory_space<vmem>>, vector<1x1x256x4xbf16>
    %233 = vector.shape_cast %232 : vector<1x1x256x4xbf16> to vector<256x4xbf16>
    %234 = vector.shape_cast %231 : vector<256x4xbf16> to vector<1x1x256x4xbf16>
    tpu.vector_store %arg11[%c0_68, %c1_69, %c0_70, %c0_71], %234 {strides = array<i32>} : memref<1x2x256x4xbf16, #tpu.memory_space<vmem>>, vector<1x1x256x4xbf16>,
    %235 = vector.broadcast %225 : vector<256x1xf32> to vector<256x4xf32>
    %236 = arith.mulf %212, %235 : vector<256x4xf32>
    %237 = arith.truncf %236 : vector<256x4xf32> to vector<256x4xbf16>
    %c0_72 = arith.constant 0 : index
    %c1_73 = arith.constant 1 : index
    %c0_74 = arith.constant 0 : index
    %c0_75 = arith.constant 0 : index
    %238 = vector.load %arg12[%c0_72, %c1_73, %c0_74, %c0_75] : memref<1x2x256x4xbf16, #tpu.memory_space<vmem>>, vector<1x1x256x4xbf16>
    %239 = vector.shape_cast %238 : vector<1x1x256x4xbf16> to vector<256x4xbf16>
    %240 = vector.shape_cast %237 : vector<256x4xbf16> to vector<1x1x256x4xbf16>
    tpu.vector_store %arg12[%c0_72, %c1_73, %c0_74, %c0_75], %240 {strides = array<i32>} : memref<1x2x256x4xbf16, #tpu.memory_space<vmem>>, vector<1x1x256x4xbf16>,
    %241 = arith.truncf %213 : vector<256x4xf32> to vector<256x4xbf16>
    %c0_76 = arith.constant 0 : index
    %c1_77 = arith.constant 1 : index
    %c0_78 = arith.constant 0 : index
    %c0_79 = arith.constant 0 : index
    %242 = vector.load %arg13[%c0_76, %c1_77, %c0_78, %c0_79] : memref<1x2x256x4xbf16, #tpu.memory_space<vmem>>, vector<1x1x256x4xbf16>
    %243 = vector.shape_cast %242 : vector<1x1x256x4xbf16> to vector<256x4xbf16>
    %244 = vector.shape_cast %241 : vector<256x4xbf16> to vector<1x1x256x4xbf16>
    tpu.vector_store %arg13[%c0_76, %c1_77, %c0_78, %c0_79], %244 {strides = array<i32>} : memref<1x2x256x4xbf16, #tpu.memory_space<vmem>>, vector<1x1x256x4xbf16>,
    return
  }
  func.func @transform_0(%arg0: i32) -> (i32, i32, i32) {
    %c0_i32 = arith.constant 0 : i32
    %c0_i32_0 = arith.constant 0 : i32
    %c0_i32_1 = arith.constant 0 : i32
    return %arg0, %c0_i32, %c0_i32_0 : i32, i32, i32
  }
  func.func @transform_1(%arg0: i32) -> (i32, i32) {
    %c0_i32 = arith.constant 0 : i32
    %c0_i32_0 = arith.constant 0 : i32
    %c0_i32_1 = arith.constant 0 : i32
    return %c0_i32, %c0_i32_0 : i32, i32
  }
  func.func @transform_2(%arg0: i32) -> (i32, i32) {
    %c0_i32 = arith.constant 0 : i32
    %c0_i32_0 = arith.constant 0 : i32
    %c0_i32_1 = arith.constant 0 : i32
    return %c0_i32, %c0_i32_0 : i32, i32
  }
  func.func @transform_3(%arg0: i32) -> (i32, i32) {
    %c0_i32 = arith.constant 0 : i32
    %c0_i32_0 = arith.constant 0 : i32
    %c0_i32_1 = arith.constant 0 : i32
    return %c0_i32, %c0_i32_0 : i32, i32
  }
  func.func @transform_4(%arg0: i32) -> (i32, i32) {
    %c0_i32 = arith.constant 0 : i32
    %c0_i32_0 = arith.constant 0 : i32
    %c0_i32_1 = arith.constant 0 : i32
    return %c0_i32, %c0_i32_0 : i32, i32
  }
  func.func @transform_5(%arg0: i32) -> (i32, i32) {
    %c0_i32 = arith.constant 0 : i32
    %c0_i32_0 = arith.constant 0 : i32
    %c0_i32_1 = arith.constant 0 : i32
    return %c0_i32, %c0_i32_0 : i32, i32
  }
  func.func @transform_6(%arg0: i32) -> (i32, i32) {
    %c0_i32 = arith.constant 0 : i32
    %c0_i32_0 = arith.constant 0 : i32
    %c0_i32_1 = arith.constant 0 : i32
    return %c0_i32, %c0_i32_0 : i32, i32
  }
  func.func @transform_7(%arg0: i32) -> (i32, i32, i32) {
    %c0_i32 = arith.constant 0 : i32
    %c0_i32_0 = arith.constant 0 : i32
    %c0_i32_1 = arith.constant 0 : i32
    %c0_i32_2 = arith.constant 0 : i32
    return %c0_i32, %c0_i32_0, %c0_i32_1 : i32, i32, i32
  }
  func.func @transform_8(%arg0: i32) -> (i32, i32) {
    %c0_i32 = arith.constant 0 : i32
    %c0_i32_0 = arith.constant 0 : i32
    %c0_i32_1 = arith.constant 0 : i32
    return %c0_i32, %c0_i32_0 : i32, i32
  }
  func.func @transform_9(%arg0: i32) -> (i32, i32) {
    %c0_i32 = arith.constant 0 : i32
    %c0_i32_0 = arith.constant 0 : i32
    %c0_i32_1 = arith.constant 0 : i32
    return %c0_i32, %c0_i32_0 : i32, i32
  }
  func.func @transform_10(%arg0: i32) -> (i32, i32, i32, i32) {
    %c0_i32 = arith.constant 0 : i32
    %c0_i32_0 = arith.constant 0 : i32
    %c0_i32_1 = arith.constant 0 : i32
    %c0_i32_2 = arith.constant 0 : i32
    return %arg0, %c0_i32, %c0_i32_0, %c0_i32_1 : i32, i32, i32, i32
  }
  func.func @transform_11(%arg0: i32) -> (i32, i32, i32, i32) {
    %c0_i32 = arith.constant 0 : i32
    %c0_i32_0 = arith.constant 0 : i32
    %c0_i32_1 = arith.constant 0 : i32
    %c0_i32_2 = arith.constant 0 : i32
    return %arg0, %c0_i32, %c0_i32_0, %c0_i32_1 : i32, i32, i32, i32
  }
  func.func @transform_12(%arg0: i32) -> (i32, i32, i32, i32) {
    %c0_i32 = arith.constant 0 : i32
    %c0_i32_0 = arith.constant 0 : i32
    %c0_i32_1 = arith.constant 0 : i32
    %c0_i32_2 = arith.constant 0 : i32
    return %arg0, %c0_i32, %c0_i32_0, %c0_i32_1 : i32, i32, i32, i32
  }
}

</mosaic_0001>

<bundles_post_ra>
// kernel: tpu_custom_call.1
= control target key start
LH: loop header
LB: loop body
LE: loop exit
PB: predicated region body
PF: predicated region fallthrough
CT: control target
= control target key end

     0   :  { %s7755_s21 = smov 0   ;;  %s14689_s0 = inlined_call_operand.vmem [shape: f32[2,256,8], index: 0, kind: input, shape index: {}]   ;;  %s14690_s1 = inlined_call_operand.vmem [shape: f32[256,1], index: 1, kind: input, shape index: {}]   ;;  %s14691_s2 = inlined_call_operand.vmem [shape: f32[256,1], index: 2, kind: input, shape index: {}]   ;;  %s14692_s3 = inlined_call_operand.vmem [shape: f32[1,8], index: 3, kind: input, shape index: {}]   ;;  %s14693_s4 = inlined_call_operand.vmem [shape: f32[1,8], index: 4, kind: input, shape index: {}]   ;;  %s14694_s5 = inlined_call_operand.vmem [shape: bf16[8,24], index: 5, kind: input, shape index: {}]   ;;  %s14695_s6 = inlined_call_operand.vmem [shape: f32[1,24], index: 6, kind: input, shape index: {}]   ;;  %s14696_s7 = inlined_call_operand.vmem [shape: f32[3,3,24], index: 7, kind: input, shape index: {}]   ;;  %s14697_s8 = inlined_call_operand.vmem [shape: f32[1,24], index: 8, kind: input, shape index: {}]   ;;  %s14698_s9 = inlined_call_operand.vmem [shape: f32[1,2], index: 9, kind: input, shape index: {}]   ;;  %s14699_s10 = inlined_call_operand.vmem [shape: bf16[2,2,256,4], index: 10, kind: output, shape index: {0}]   ;;  %s14700_s11 = inlined_call_operand.vmem [shape: bf16[2,2,256,4], index: 11, kind: output, shape index: {1}]   ;;  %s14701_s12 = inlined_call_operand.vmem [shape: bf16[2,2,256,4], index: 12, kind: output, shape index: {2}]  }
   0x1 LB: > { %s6771_s22 = sadd.s32 4294967295, %s7681_s21   ;;  %p6775_p0 = scmp.ge.s32.totalorder %s7681_s21, 1  ;;  %s7681_s21 = sphi %s7755_s21, %s23_s21  }
   0x2   : > { %p367_p1 = scmp.lt.s32.totalorder %s7681_s21, 3 }
   0x4   : > { %p368_p2 = pnand %p6775_p0, %p367_p1 }
   0x6   : > { %371 = sbr.rel (%p368_p2) target bundleno = 2434 (0x982), region = 60 }
   0xb   : > { %p419_p3 = scmp.lt.s32.totalorder %s6771_s22, 1  ;;  %vm474_vm0 = vcmask 64512   ;;  %vm1040_vm1 = vcmask 1043456   ;;  %s7684_s19 = smov 120  }
   0xc   : > { %s7685_s27 = smov 112   ;;  %s7686_s13 = smov 124  }
   0xd   : > { %s16892_s22 = smov (!%p419_p3, %s6771_s22), 1 }
   0xe   : > { %s7763_s23 = sshll.u32 %s16892_s22, 8 }
   0xf   : > { %s7769_s26 = scalar_lea.vmem %s14689_s0, %s7763_s23  ;;  %s13590_s30 = scalar_lea.vmem %s14700_s11, %s7763_s23 }
  0x10   : > { %v7772_v0 = vld [vmem:[%s7769_s26] sm:$0xff]  ;;  %v7775_v1 = vld [vmem:[%s7769_s26 + $0x10] sm:$0xff]  ;;  %v7778_v2 = vld [vmem:[%s7769_s26 + $0x8] sm:$0xff]  ;;  %s13867_s16 = scalar_lea.vmem %s14701_s12, %s7763_s23 }
  0x11   : > { %v475_v3 = vsel %vm474_vm0, %v7772_v0, 0.0  ;;  %v481_v4 = vsel %vm474_vm0, %v7775_v1, 0.0  ;;  %v7785_v5 = vld [vmem:[%s7769_s26 + $0x18] sm:$0xff]  ;;  %v478_v6 = vsel %vm474_vm0, %v7778_v2, 0.0  ;;  %v7792_v8 = vld [vmem:[%s7769_s26 + $0x20] sm:$0xff]  ;;  %v7795_v9 = vld [vmem:[%s7769_s26 + $0x28] sm:$0xff] }
  0x12   : > { %476 = vadd.xlane.f32.xlu0 %v475_v3  ;;  %482 = vadd.xlane.f32.xlu1 %v481_v4  ;;  %v484_v7 = vsel %vm474_vm0, %v7785_v5, 0.0  ;;  %v487_v10 = vsel %vm474_vm0, %v7792_v8, 0.0  ;;  %v490_v11 = vsel %vm474_vm0, %v7795_v9, 0.0  ;;  %v7802_v12 = vld [vmem:[%s7769_s26 + $0x30] sm:$0xff]  ;;  %v7805_v13 = vld [vmem:[%s7769_s26 + $0x38] sm:$0xff]  ;;  %v7812_v16 = vld [vmem:[%s7769_s26 + $0x40] sm:$0xff] }
  0x13   : > { %v493_v14 = vsel %vm474_vm0, %v7802_v12, 0.0  ;;  %v496_v15 = vsel %vm474_vm0, %v7805_v13, 0.0  ;;  %v7815_v17 = vld [vmem:[%s7769_s26 + $0x48] sm:$0xff]  ;;  %v499_v18 = vsel %vm474_vm0, %v7812_v16, 0.0  ;;  %v7822_v20 = vld [vmem:[%s7769_s26 + $0x50] sm:$0xff]  ;;  %v7825_v21 = vld [vmem:[%s7769_s26 + $0x58] sm:$0xff] }
  0x14   : > { %v502_v19 = vsel %vm474_vm0, %v7815_v17, 0.0  ;;  %v505_v22 = vsel %vm474_vm0, %v7822_v20, 0.0  ;;  %v508_v23 = vsel %vm474_vm0, %v7825_v21, 0.0  ;;  %v7832_v24 = vld [vmem:[%s7769_s26 + $0x60] sm:$0xff]  ;;  %v7835_v25 = vld [vmem:[%s7769_s26 + $0x68] sm:$0xff]  ;;  %v7842_v28 = vld [vmem:[%s7769_s26 + $0x70] sm:$0xff] }
  0x15   : > { %v511_v26 = vsel %vm474_vm0, %v7832_v24, 0.0  ;;  %v514_v27 = vsel %vm474_vm0, %v7835_v25, 0.0  ;;  %v7845_v29 = vld [vmem:[%s7769_s26 + $0x78] sm:$0xff]  ;;  %v517_v30 = vsel %vm474_vm0, %v7842_v28, 0.0  ;;  %v7852_v32 = vld [vmem:[%s7769_s26 + $0x80] sm:$0xff]  ;;  %v7855_v33 = vld [vmem:[%s7769_s26 + $0x88] sm:$0xff] }
  0x16   : > { %479 = vadd.xlane.f32.xlu0 %v478_v6  ;;  %485 = vadd.xlane.f32.xlu1 %v484_v7  ;;  %v520_v31 = vsel %vm474_vm0, %v7845_v29, 0.0  ;;  %v523_v34 = vsel %vm474_vm0, %v7852_v32, 0.0  ;;  %v526_v35 = vsel %vm474_vm0, %v7855_v33, 0.0  ;;  %v7862_v36 = vld [vmem:[%s7769_s26 + $0x90] sm:$0xff]  ;;  %v7865_v37 = vld [vmem:[%s7769_s26 + $0x98] sm:$0xff]  ;;  %v7872_v40 = vld [vmem:[%s7769_s26 + $0xa0] sm:$0xff] }
  0x17   : > { %v529_v38 = vsel %vm474_vm0, %v7862_v36, 0.0  ;;  %v532_v39 = vsel %vm474_vm0, %v7865_v37, 0.0  ;;  %v7875_v41 = vld [vmem:[%s7769_s26 + $0xa8] sm:$0xff]  ;;  %v535_v42 = vsel %vm474_vm0, %v7872_v40, 0.0  ;;  %v7882_v44 = vld [vmem:[%s7769_s26 + $0xb0] sm:$0xff]  ;;  %v7885_v45 = vld [vmem:[%s7769_s26 + $0xb8] sm:$0xff] }
  0x18   : > { %v538_v43 = vsel %vm474_vm0, %v7875_v41, 0.0  ;;  %v541_v46 = vsel %vm474_vm0, %v7882_v44, 0.0  ;;  %v544_v47 = vsel %vm474_vm0, %v7885_v45, 0.0  ;;  %v7892_v48 = vld [vmem:[%s7769_s26 + $0xc0] sm:$0xff]  ;;  %v7895_v49 = vld [vmem:[%s7769_s26 + $0xc8] sm:$0xff]  ;;  %v7902_v52 = vld [vmem:[%s7769_s26 + $0xd0] sm:$0xff] }
  0x19   : > { %v547_v50 = vsel %vm474_vm0, %v7892_v48, 0.0  ;;  %v550_v51 = vsel %vm474_vm0, %v7895_v49, 0.0  ;;  %v7905_v53 = vld [vmem:[%s7769_s26 + $0xd8] sm:$0xff]  ;;  %v553_v54 = vsel %vm474_vm0, %v7902_v52, 0.0  ;;  %v7912_v56 = vld [vmem:[%s7769_s26 + $0xe0] sm:$0xff]  ;;  %v7915_v57 = vld [vmem:[%s7769_s26 + $0xe8] sm:$0xff] }
  0x1a   : > { %488 = vadd.xlane.f32.xlu0 %v487_v10  ;;  %491 = vadd.xlane.f32.xlu1 %v490_v11  ;;  %v556_v55 = vsel %vm474_vm0, %v7905_v53, 0.0  ;;  %v559_v58 = vsel %vm474_vm0, %v7912_v56, 0.0  ;;  %v562_v59 = vsel %vm474_vm0, %v7915_v57, 0.0  ;;  %v7922_v60 = vld [vmem:[%s7769_s26 + $0xf0] sm:$0xff]  ;;  %v7925_v61 = vld [vmem:[%s7769_s26 + $0xf8] sm:$0xff]  ;;  %v14719_v3 = vmov 0   ;;  %s13402_s26 = scalar_lea.vmem %s14699_s10, %s7763_s23 }
  0x1b   : > { %v565_v62 = vsel %vm474_vm0, %v7922_v60, 0.0  ;;  %v568_v63 = vsel %vm474_vm0, %v7925_v61, 0.0  ;;  %7299 = vset.pattern.permute.xlu1 %v14719_v3  ;;  %7298 = vset.pattern.permute.xlu0 %v14719_v3  ;;  %s7687_s23 = smov 116  }
  0x1e   : > { %494 = vadd.xlane.f32.xlu0 %v493_v14  ;;  %497 = vadd.xlane.f32.xlu1 %v496_v15 }
  0x22   : > { %500 = vadd.xlane.f32.xlu0 %v499_v18  ;;  %503 = vadd.xlane.f32.xlu1 %v502_v19 }
  0x26   : > { %506 = vadd.xlane.f32.xlu0 %v505_v22  ;;  %509 = vadd.xlane.f32.xlu1 %v508_v23 }
  0x2a   : > { %512 = vadd.xlane.f32.xlu0 %v511_v26  ;;  %515 = vadd.xlane.f32.xlu1 %v514_v27 }
  0x2e   : > { %518 = vadd.xlane.f32.xlu0 %v517_v30  ;;  %521 = vadd.xlane.f32.xlu1 %v520_v31 }
  0x32   : > { %524 = vadd.xlane.f32.xlu0 %v523_v34  ;;  %527 = vadd.xlane.f32.xlu1 %v526_v35 }
  0x36   : > { %530 = vadd.xlane.f32.xlu0 %v529_v38  ;;  %533 = vadd.xlane.f32.xlu1 %v532_v39 }
  0x3a   : > { %536 = vadd.xlane.f32.xlu0 %v535_v42  ;;  %539 = vadd.xlane.f32.xlu1 %v538_v43 }
  0x3e   : > { %542 = vadd.xlane.f32.xlu0 %v541_v46  ;;  %545 = vadd.xlane.f32.xlu1 %v544_v47 }
  0x42   : > { %548 = vadd.xlane.f32.xlu0 %v547_v50  ;;  %551 = vadd.xlane.f32.xlu1 %v550_v51 }
  0x46   : > { %554 = vadd.xlane.f32.xlu0 %v553_v54  ;;  %557 = vadd.xlane.f32.xlu1 %v556_v55 }
  0x4a   : > { %560 = vadd.xlane.f32.xlu0 %v559_v58  ;;  %563 = vadd.xlane.f32.xlu1 %v562_v59 }
  0x4e   : > { %566 = vadd.xlane.f32.xlu0 %v565_v62  ;;  %569 = vadd.xlane.f32.xlu1 %v568_v63 }
  0x9b   : > { %v477_v4 = vpop.xlane.xlu0 %476  ;;  %v483_v6 = vpop.xlane.xlu1 %482 }
  0x9c   : > { %v572_v7 = vmul.f32 0.125, %v477_v4  ;;  %v574_v10 = vmul.f32 0.125, %v483_v6 }
  0x9e   : > { %v7934_v11 = vsub.f32 %v7772_v0, %v572_v7  ;;  %v7937_v14 = vsub.f32 %v7775_v1, %v574_v10 }
  0x9f   : > { %v480_v15 = vpop.xlane.xlu0 %479  ;;  %v486_v18 = vpop.xlane.xlu1 %485 }
  0xa0   : > { %v573_v19 = vmul.f32 0.125, %v480_v15  ;;  %v575_v22 = vmul.f32 0.125, %v486_v18  ;;  %v636_v23 = vmul.f32 %v7934_v11, %v7934_v11  ;;  %v638_v26 = vmul.f32 %v7937_v14, %v7937_v14 }
  0xa2   : > { %v7944_v27 = vsub.f32 %v7778_v2, %v573_v19  ;;  %v7947_v30 = vsub.f32 %v7785_v5, %v575_v22  ;;  %v668_v0 = vsel %vm474_vm0, %v636_v23, 0.0  ;;  %v674_v34 = vsel %vm474_vm0, %v638_v26, 0.0 }
  0xa3   : > { %669 = vadd.xlane.f32.xlu0 %v668_v0  ;;  %v489_v1 = vpop.xlane.xlu0 %488  ;;  %v492_v31 = vpop.xlane.xlu1 %491 }
  0xa4   : > { %v576_v35 = vmul.f32 0.125, %v489_v1  ;;  %v577_v38 = vmul.f32 0.125, %v492_v31  ;;  %v637_v39 = vmul.f32 %v7944_v27, %v7944_v27  ;;  %v639_v42 = vmul.f32 %v7947_v30, %v7947_v30 }
  0xa6   : > { %v7956_v2 = vsub.f32 %v7792_v8, %v576_v35  ;;  %v7959_v5 = vsub.f32 %v7795_v9, %v577_v38  ;;  %v671_v43 = vsel %vm474_vm0, %v637_v39, 0.0  ;;  %v677_v50 = vsel %vm474_vm0, %v639_v42, 0.0 }
  0xa7   : > { %675 = vadd.xlane.f32.xlu0 %v674_v34  ;;  %672 = vadd.xlane.f32.xlu1 %v671_v43  ;;  %v495_v46 = vpop.xlane.xlu0 %494  ;;  %v498_v47 = vpop.xlane.xlu1 %497 }
  0xa8   : > { %v578_v51 = vmul.f32 0.125, %v495_v46  ;;  %v579_v54 = vmul.f32 0.125, %v498_v47  ;;  %v640_v55 = vmul.f32 %v7956_v2, %v7956_v2  ;;  %v641_v8 = vmul.f32 %v7959_v5, %v7959_v5 }
  0xaa   : > { %v7968_v58 = vsub.f32 %v7802_v12, %v578_v51  ;;  %v7971_v9 = vsub.f32 %v7805_v13, %v579_v54  ;;  %v680_v59 = vsel %vm474_vm0, %v640_v55, 0.0  ;;  %v683_v4 = vsel %vm474_vm0, %v641_v8, 0.0 }
  0xab   : > { %678 = vadd.xlane.f32.xlu1 %v677_v50  ;;  %681 = vadd.xlane.f32.xlu0 %v680_v59  ;;  %v501_v62 = vpop.xlane.xlu0 %500  ;;  %v504_v63 = vpop.xlane.xlu1 %503 }
  0xac   : > { %v580_v6 = vmul.f32 0.125, %v501_v62  ;;  %v581_v7 = vmul.f32 0.125, %v504_v63  ;;  %v642_v10 = vmul.f32 %v7968_v58, %v7968_v58  ;;  %v643_v12 = vmul.f32 %v7971_v9, %v7971_v9 }
  0xae   : > { %v7980_v15 = vsub.f32 %v7812_v16, %v580_v6  ;;  %v7983_v13 = vsub.f32 %v7815_v17, %v581_v7  ;;  %v686_v18 = vsel %vm474_vm0, %v642_v10, 0.0  ;;  %v689_v23 = vsel %vm474_vm0, %v643_v12, 0.0 }
  0xaf   : > { %684 = vadd.xlane.f32.xlu1 %v683_v4  ;;  %687 = vadd.xlane.f32.xlu0 %v686_v18  ;;  %v507_v19 = vpop.xlane.xlu0 %506  ;;  %v510_v22 = vpop.xlane.xlu1 %509 }
  0xb0   : > { %v582_v26 = vmul.f32 0.125, %v507_v19  ;;  %v583_v0 = vmul.f32 0.125, %v510_v22  ;;  %v644_v1 = vmul.f32 %v7980_v15, %v7980_v15  ;;  %v645_v16 = vmul.f32 %v7983_v13, %v7983_v13 }
  0xb2   : > { %v7992_v31 = vsub.f32 %v7822_v20, %v582_v26  ;;  %v7995_v17 = vsub.f32 %v7825_v21, %v583_v0  ;;  %v692_v34 = vsel %vm474_vm0, %v644_v1, 0.0  ;;  %v695_v39 = vsel %vm474_vm0, %v645_v16, 0.0 }
  0xb3   : > { %690 = vadd.xlane.f32.xlu1 %v689_v23  ;;  %693 = vadd.xlane.f32.xlu0 %v692_v34  ;;  %v513_v35 = vpop.xlane.xlu0 %512  ;;  %v516_v38 = vpop.xlane.xlu1 %515 }
  0xb4   : > { %v584_v42 = vmul.f32 0.125, %v513_v35  ;;  %v585_v43 = vmul.f32 0.125, %v516_v38  ;;  %v646_v46 = vmul.f32 %v7992_v31, %v7992_v31  ;;  %v647_v20 = vmul.f32 %v7995_v17, %v7995_v17 }
  0xb6   : > { %v8004_v47 = vsub.f32 %v7832_v24, %v584_v42  ;;  %v8007_v21 = vsub.f32 %v7835_v25, %v585_v43  ;;  %v698_v50 = vsel %vm474_vm0, %v646_v46, 0.0  ;;  %v701_v55 = vsel %vm474_vm0, %v647_v20, 0.0 }
  0xb7   : > { %696 = vadd.xlane.f32.xlu1 %v695_v39  ;;  %699 = vadd.xlane.f32.xlu0 %v698_v50  ;;  %v519_v51 = vpop.xlane.xlu0 %518  ;;  %v522_v54 = vpop.xlane.xlu1 %521 }
  0xb8   : > { %v586_v8 = vmul.f32 0.125, %v519_v51  ;;  %v587_v59 = vmul.f32 0.125, %v522_v54  ;;  %v648_v62 = vmul.f32 %v8004_v47, %v8004_v47  ;;  %v649_v24 = vmul.f32 %v8007_v21, %v8007_v21 }
  0xba   : > { %v8016_v63 = vsub.f32 %v7842_v28, %v586_v8  ;;  %v8019_v25 = vsub.f32 %v7845_v29, %v587_v59  ;;  %v704_v4 = vsel %vm474_vm0, %v648_v62, 0.0  ;;  %v707_v10 = vsel %vm474_vm0, %v649_v24, 0.0 }
  0xbb   : > { %702 = vadd.xlane.f32.xlu1 %v701_v55  ;;  %705 = vadd.xlane.f32.xlu0 %v704_v4  ;;  %v525_v6 = vpop.xlane.xlu0 %524  ;;  %v528_v7 = vpop.xlane.xlu1 %527 }
  0xbc   : > { %v588_v12 = vmul.f32 0.125, %v525_v6  ;;  %v589_v18 = vmul.f32 0.125, %v528_v7  ;;  %v650_v19 = vmul.f32 %v8016_v63, %v8016_v63  ;;  %v651_v28 = vmul.f32 %v8019_v25, %v8019_v25 }
  0xbe   : > { %v8028_v22 = vsub.f32 %v7852_v32, %v588_v12  ;;  %v8031_v29 = vsub.f32 %v7855_v33, %v589_v18  ;;  %v710_v23 = vsel %vm474_vm0, %v650_v19, 0.0  ;;  %v713_v1 = vsel %vm474_vm0, %v651_v28, 0.0  ;;  %v984_v28 = vld [vmem:[%s14694_s5] sm:$0xf] }
  0xbf   : > { %708 = vadd.xlane.f32.xlu1 %v707_v10  ;;  %711 = vadd.xlane.f32.xlu0 %v710_v23  ;;  %v531_v26 = vpop.xlane.xlu0 %530  ;;  %v534_v0 = vpop.xlane.xlu1 %533 }
  0xc0   : > { %v590_v16 = vmul.f32 0.125, %v531_v26  ;;  %v591_v34 = vmul.f32 0.125, %v534_v0  ;;  %v652_v35 = vmul.f32 %v8028_v22, %v8028_v22  ;;  %v653_v32 = vmul.f32 %v8031_v29, %v8031_v29  ;;  %7281 = vmatprep.subr.msk.bf16.mxu0 %vm1040_vm1, %v984_v28  ;;  %7282 = vmatprep.subr.msk.bf16.mxu1 %vm1040_vm1, %v984_v28 }
  0xc1   : > { %v1042_v0 = vsel %vm1040_vm1, %v984_v28, 0 }
  0xc2   : > { %v8040_v38 = vsub.f32 %v7862_v36, %v590_v16  ;;  %v8043_v33 = vsub.f32 %v7865_v37, %v591_v34  ;;  %v716_v39 = vsel %vm474_vm0, %v652_v35, 0.0  ;;  %v719_v46 = vsel %vm474_vm0, %v653_v32, 0.0  ;;  %7246 = vmatpush3.bf16.msra.mxu0 %v1042_v0  ;;  %7280 = vmatpush3.bf16.msra.mxu1 %v1042_v0  ;;  %v8147_v0 = vld [vmem:[%s14690_s1] sm:$0xff] }
  0xc3   : > { %714 = vadd.xlane.f32.xlu1 %v713_v1  ;;  %717 = vadd.xlane.f32.xlu0 %v716_v39  ;;  %v537_v42 = vpop.xlane.xlu0 %536  ;;  %v540_v43 = vpop.xlane.xlu1 %539  ;;  %vm14716_vm7 = vcmp.ge.f32.partialorder %v8147_v0, 1.0 }
  0xc4   : > { %v592_v20 = vmul.f32 0.125, %v537_v42  ;;  %v593_v50 = vmul.f32 0.125, %v540_v43  ;;  %v654_v51 = vmul.f32 %v8040_v38, %v8040_v38  ;;  %v655_v36 = vmul.f32 %v8043_v33, %v8043_v33 }
  0xc6   : > { %v8052_v54 = vsub.f32 %v7872_v40, %v592_v20  ;;  %v8055_v37 = vsub.f32 %v7875_v41, %v593_v50  ;;  %v722_v55 = vsel %vm474_vm0, %v654_v51, 0.0  ;;  %v725_v62 = vsel %vm474_vm0, %v655_v36, 0.0 }
  0xc7   : > { %720 = vadd.xlane.f32.xlu1 %v719_v46  ;;  %723 = vadd.xlane.f32.xlu0 %v722_v55  ;;  %v543_v8 = vpop.xlane.xlu0 %542  ;;  %v546_v59 = vpop.xlane.xlu1 %545 }
  0xc8   : > { %v594_v24 = vmul.f32 0.125, %v543_v8  ;;  %v595_v4 = vmul.f32 0.125, %v546_v59  ;;  %v656_v6 = vmul.f32 %v8052_v54, %v8052_v54  ;;  %v657_v40 = vmul.f32 %v8055_v37, %v8055_v37 }
  0xca   : > { %v8064_v7 = vsub.f32 %v7882_v44, %v594_v24  ;;  %v8067_v41 = vsub.f32 %v7885_v45, %v595_v4  ;;  %v728_v10 = vsel %vm474_vm0, %v656_v6, 0.0  ;;  %v731_v19 = vsel %vm474_vm0, %v657_v40, 0.0 }
  0xcb   : > { %726 = vadd.xlane.f32.xlu1 %v725_v62  ;;  %729 = vadd.xlane.f32.xlu0 %v728_v10  ;;  %v549_v12 = vpop.xlane.xlu0 %548  ;;  %v552_v18 = vpop.xlane.xlu1 %551 }
  0xcc   : > { %15389 = vst [vmem:[#allocation2_spill] sm:$0xff] %v8067_v41  ;;  %v596_v23 = vmul.f32 0.125, %v549_v12  ;;  %v597_v26 = vmul.f32 0.125, %v552_v18  ;;  %v658_v44 = vmul.f32 %v8064_v7, %v8064_v7  ;;  %v659_v45 = vmul.f32 %v8067_v41, %v8067_v41 }
  0xce   : > { %v8079_v1 = vsub.f32 %v7892_v48, %v596_v23  ;;  %v8082_v16 = vsub.f32 %v7895_v49, %v597_v26  ;;  %v734_v34 = vsel %vm474_vm0, %v658_v44, 0.0  ;;  %v737_v39 = vsel %vm474_vm0, %v659_v45, 0.0  ;;  %v8125_v26 = vld [vmem:[%s14690_s1 + $0x8] sm:$0xff]  ;;  %v8137_v44 = vld [vmem:[%s14690_s1 + $0x10] sm:$0xff] }
  0xcf   : > { %732 = vadd.xlane.f32.xlu1 %v731_v19  ;;  %735 = vadd.xlane.f32.xlu0 %v734_v34  ;;  %v555_v35 = vpop.xlane.xlu0 %554  ;;  %v558_v32 = vpop.xlane.xlu1 %557  ;;  %vm14757_vm2 = vcmp.ge.f32.partialorder %v8125_v26, 1.0  ;;  %v8142_v45 = vld [vmem:[%s14691_s2 + $0x10] sm:$0xff]  ;;  %v8152_v34 = vld [vmem:[%s14691_s2] sm:$0xff]  ;;  %vm14714_vm5 = vcmp.ge.f32.partialorder %v8137_v44, 1.0 }
  0xd0   : > { %15390 = vst [vmem:[#allocation3_spill] sm:$0xff] %v8079_v1  ;;  %15391 = vst [vmem:[#allocation4_spill] sm:$0xff] %v8082_v16  ;;  %v598_v42 = vmul.f32 0.125, %v555_v35  ;;  %v599_v43 = vmul.f32 0.125, %v558_v32  ;;  %v660_v46 = vmul.f32 %v8079_v1, %v8079_v1  ;;  %v661_v48 = vmul.f32 %v8082_v16, %v8082_v16  ;;  %v8165_v35 = vld [vmem:[%s14690_s1 + $0x18] sm:$0xff] }
  0xd1   : > { %15398 = vst [vmem:[#allocation11_spill] sm:$0xff] %v8142_v45  ;;  %15399 = vst [vmem:[#allocation12_spill] sm:$0xff] %v8152_v34  ;;  %vm14702_vm6 = vcmp.ge.f32.partialorder %v8142_v45, 1.0  ;;  %vm14703_vm8 = vcmp.ge.f32.partialorder %v8152_v34, 1.0  ;;  %v8170_v32 = vld [vmem:[%s14691_s2 + $0x18] sm:$0xff]  ;;  %vm14756_vm11 = vcmp.ge.f32.partialorder %v8165_v35, 1.0 }
  0xd2   : > { %v8091_v49 = vsub.f32 %v7902_v52, %v598_v42  ;;  %v8094_v20 = vsub.f32 %v7905_v53, %v599_v43  ;;  %v740_v50 = vsel %vm474_vm0, %v660_v46, 0.0  ;;  %v743_v55 = vsel %vm474_vm0, %v661_v48, 0.0  ;;  %15400 = vst [vmem:[#allocation13_spill] sm:$0xff] %v8170_v32  ;;  %v8176_v42 = vld [vmem:[%s14690_s1 + $0x48] sm:$0xff]  ;;  %vm1505_vm9 = vmand %vm14714_vm5, %vm14702_vm6  ;;  %v8198_v46 = vld [vmem:[%s14690_s1 + $0x20] sm:$0xff] }
  0xd3   : > { %738 = vadd.xlane.f32.xlu1 %v737_v39  ;;  %741 = vadd.xlane.f32.xlu0 %v740_v50  ;;  %v561_v51 = vpop.xlane.xlu0 %560  ;;  %v564_v36 = vpop.xlane.xlu1 %563  ;;  %15401 = vst [vmem:[#allocation14_spill] sm:$0xff] %v8176_v42  ;;  %v8181_v43 = vld [vmem:[%s14691_s2 + $0x48] sm:$0xff]  ;;  %vm1503_vm10 = vmand %vm14716_vm7, %vm14703_vm8  ;;  %vm14705_vm12 = vcmp.ge.f32.partialorder %v8170_v32, 1.0  ;;  %vm1448_vm13 = vcmp.ge.f32.partialorder %v8176_v42, 1.0  ;;  %v8203_v48 = vld [vmem:[%s14691_s2 + $0x20] sm:$0xff]  ;;  %v1537_v50 = vsel %vm1505_vm9, 1, %v14719_v3 }
  0xd4   : > { %15392 = vst [vmem:[#allocation5_spill] sm:$0xff] %v8091_v49  ;;  %15393 = vst [vmem:[#allocation6_spill] sm:$0xff] %v8094_v20  ;;  %v600_v8 = vmul.f32 0.125, %v561_v51  ;;  %v601_v59 = vmul.f32 0.125, %v564_v36  ;;  %v662_v62 = vmul.f32 %v8091_v49, %v8091_v49  ;;  %v663_v52 = vmul.f32 %v8094_v20, %v8094_v20  ;;  %v8209_v51 = vld [vmem:[%s14690_s1 + $0x58] sm:$0xff] }
  0xd5   : > { %15402 = vst [vmem:[#allocation15_spill] sm:$0xff] %v8181_v43  ;;  %vm14704_vm14 = vcmp.ge.f32.partialorder %v8181_v43, 1.0  ;;  %15403 = vst [vmem:[#allocation16_spill] sm:$0xff] %v8198_v46  ;;  %v8214_v36 = vld [vmem:[%s14691_s2 + $0x58] sm:$0xff]  ;;  %vm14706_vm9 = vcmp.ge.f32.partialorder %v8203_v48, 1.0  ;;  %vm14802_vm6 = vcmp.ge.f32.partialorder %v8209_v51, 1.0 }
  0xd6   : > { %v8103_v24 = vsub.f32 %v7912_v56, %v600_v8  ;;  %v8106_v53 = vsub.f32 %v7915_v57, %v601_v59  ;;  %v746_v4 = vsel %vm474_vm0, %v662_v62, 0.0  ;;  %v749_v10 = vsel %vm474_vm0, %v663_v52, 0.0  ;;  %15404 = vst [vmem:[#allocation17_spill] sm:$0xff] %v8203_v48  ;;  %15405 = vst [vmem:[#allocation18_spill] sm:$0xff] %v8209_v51  ;;  %v8233_v59 = vld [vmem:[%s14690_s1 + $0x68] sm:$0xff]  ;;  %v8357_v48 = vld [vmem:[%s14690_s1 + $0xd8] sm:$0xff] }
  0xd7   : > { %744 = vadd.xlane.f32.xlu1 %v743_v55  ;;  %747 = vadd.xlane.f32.xlu0 %v746_v4  ;;  %v567_v6 = vpop.xlane.xlu0 %566  ;;  %15406 = vst [vmem:[#allocation19_spill] sm:$0xff] %v8214_v36  ;;  %v1535_v55 = vsel %vm1503_vm10, 1, %v14719_v3  ;;  %vm1506_vm15 = vmand %vm14756_vm11, %vm14705_vm12  ;;  %vm14708_vm8 = vcmp.ge.f32.partialorder %v8214_v36, 1.0  ;;  %v8238_v62 = vld [vmem:[%s14691_s2 + $0x68] sm:$0xff]  ;;  %v15418_v45 = vmov 0  }
  0xd8   : > { %15394 = vst [vmem:[#allocation7_spill] sm:$0xff] %v8103_v24  ;;  %15395 = vst [vmem:[#allocation8_spill] sm:$0xff] %v8106_v53  ;;  %v602_v40 = vmul.f32 0.125, %v567_v6  ;;  %v664_v12 = vmul.f32 %v8103_v24, %v8103_v24  ;;  %v665_v18 = vmul.f32 %v8106_v53, %v8106_v53  ;;  %v1538_v8 = vsel %vm1506_vm15, 1, %v14719_v3  ;;  %v8255_v6 = vld [vmem:[%s14690_s1 + $0x78] sm:$0xff] }
  0xd9   : > { %vm1512_vm1 = vmand %vm1448_vm13, %vm14704_vm14  ;;  %15407 = vst [vmem:[#allocation20_spill] sm:$0xff] %v8233_v59  ;;  %vm14801_vm14 = vcmp.ge.f32.partialorder %v8233_v59, 1.0  ;;  %vm14707_vm12 = vcmp.ge.f32.partialorder %v8238_v62, 1.0  ;;  %v8591_v59 = vld [vmem:[%s14691_s2 + $0xa0] sm:$0xff] }
  0xda   : > { %v8115_v56 = vsub.f32 %v7922_v60, %v602_v40  ;;  %v752_v57 = vsel %vm474_vm0, %v664_v12, 0.0  ;;  %v755_v19 = vsel %vm474_vm0, %v665_v18, 0.0  ;;  %v8130_v60 = vld [vmem:[%s14691_s2 + $0x8] sm:$0xff]  ;;  %15408 = vst [vmem:[#allocation21_spill] sm:$0xff] %v8238_v62  ;;  %v1544_v52 = vsel %vm1512_vm1, 1, %v14719_v3  ;;  %vm1514_vm15 = vmand %vm14802_vm6, %vm14708_vm8  ;;  %v8260_v40 = vld [vmem:[%s14691_s2 + $0x78] sm:$0xff] }
  0xdb   : > { %750 = vadd.xlane.f32.xlu1 %v749_v10  ;;  %753 = vadd.xlane.f32.xlu0 %v752_v57  ;;  %15397 = vst [vmem:[#allocation10_spill] sm:$0xff] %v8130_v60  ;;  %vm14710_vm3 = vcmp.ge.f32.partialorder %v8130_v60, 1.0  ;;  %15409 = vst [vmem:[#allocation22_spill] sm:$0xff] %v8260_v40  ;;  %v1546_v10 = vsel %vm1514_vm15, 1, %v14719_v3  ;;  %v8272_v12 = vld [vmem:[%s14690_s1 + $0x88] sm:$0xff] }
  0xdc   : > { %15396 = vst [vmem:[#allocation9_spill] sm:$0xff] %v8115_v56  ;;  %v666_v28 = vmul.f32 %v8115_v56, %v8115_v56  ;;  %vm1504_vm4 = vmand %vm14757_vm2, %vm14710_vm3  ;;  %v8277_v18 = vld [vmem:[%s14691_s2 + $0x88] sm:$0xff] }
  0xdd   : > { %v1536_v39 = vsel %vm1504_vm4, 1, %v14719_v3  ;;  %vm14712_vm4 = vcmp.ge.f32.partialorder %v8198_v46, 1.0  ;;  %vm1516_vm1 = vmand %vm14801_vm14, %vm14707_vm12  ;;  %15410 = vst [vmem:[#allocation23_spill] sm:$0xff] %v8277_v18  ;;  %vm1456_vm12 = vcmp.ge.f32.partialorder %v8272_v12, 1.0  ;;  %vm14711_vm8 = vcmp.ge.f32.partialorder %v8277_v18, 1.0  ;;  %v8459_v18 = vld [vmem:[%s14691_s2 + $0x38] sm:$0xff] }
  0xde   : > { %v758_v23 = vsel %vm474_vm0, %v666_v28, 0.0  ;;  %vm1507_vm10 = vmand %vm14712_vm4, %vm14706_vm9  ;;  %vm14709_vm9 = vcmp.ge.f32.partialorder %v8260_v40, 1.0  ;;  %v1548_v57 = vsel %vm1516_vm1, 1, %v14719_v3  ;;  %v8294_v28 = vld [vmem:[%s14691_s2 + $0x98] sm:$0xff]  ;;  %15425 = vst [vmem:[#allocation37_spill] sm:$0xff] %v8459_v18  ;;  %v8565_v46 = vld [vmem:[%s14690_s1 + $0x90] sm:$0xff] }
  0xdf   : > { %756 = vadd.xlane.f32.xlu1 %v755_v19  ;;  %759 = vadd.xlane.f32.xlu0 %v758_v23  ;;  %v1539_v4 = vsel %vm1507_vm10, 1, %v14719_v3  ;;  %vm1454_vm10 = vcmp.ge.f32.partialorder %v8255_v6, 1.0  ;;  %v8289_v19 = vld [vmem:[%s14690_s1 + $0x98] sm:$0xff]  ;;  %15412 = vst [vmem:[#allocation25_spill] sm:$0xff] %v8294_v28  ;;  %vm1520_vm1 = vmand %vm1456_vm12, %vm14711_vm8  ;;  %vm14713_vm3 = vcmp.ge.f32.partialorder %v8294_v28, 1.0  ;;  %v8420_v28 = vld [vmem:[%s14690_s1 + $0x28] sm:$0xff] }
  0xe0   : > { %vm1518_vm15 = vmand %vm1454_vm10, %vm14709_vm9  ;;  %15411 = vst [vmem:[#allocation24_spill] sm:$0xff] %v8289_v19  ;;  %vm1458_vm9 = vcmp.ge.f32.partialorder %v8289_v19, 1.0  ;;  %v8659_v19 = vld [vmem:[%s14690_s1 + $0xb0] sm:$0xff]  ;;  %v9087_v12 = vld [vmem:[%s14691_s2 + $0xe8] sm:$0xff] }
  0xe1   : > { %v1550_v23 = vsel %vm1518_vm15, 1, %v14719_v3  ;;  %vm1522_vm15 = vmand %vm1458_vm9, %vm14713_vm3  ;;  %15438 = vst [vmem:[#allocation48_spill] sm:$0xff] %v8565_v46 }
  0xe2   : > { %15441 = vst [vmem:[#allocation51_spill] sm:$0xff] %v8591_v59  ;;  %15531 = vst [vmem:[#allocation48_spill] sm:$0xff] %v9087_v12 }
  0xf0   : > { %1571 = vperm.xlu1 %7299, %v1536_v39   ;;  %v8306_v39 = vld [vmem:[%s14690_s1 + $0xa8] sm:$0xff] }
  0xf1   : > { %15413 = vst [vmem:[#allocation26_spill] sm:$0xff] %v8306_v39  ;;  %vm14739_vm8 = vcmp.ge.f32.partialorder %v8306_v39, 1.0 }
  0xf4   : > { %1574 = vperm.xlu1 %7299, %v1537_v50   ;;  %v8311_v50 = vld [vmem:[%s14691_s2 + $0xa8] sm:$0xff] }
  0xf5   : > { %1568 = vperm.xlu0 %7298, %v1535_v55   ;;  %15414 = vst [vmem:[#allocation27_spill] sm:$0xff] %v8311_v50  ;;  %v1552_v55 = vsel %vm1520_vm1, 1, %v14719_v3  ;;  %vm14715_vm4 = vcmp.ge.f32.partialorder %v8311_v50, 1.0 }
  0xf6   : > { %vm1524_vm1 = vmand %vm14739_vm8, %vm14715_vm4 }
  0xf8   : > { %1577 = vperm.xlu1 %7299, %v1538_v8   ;;  %v8323_v8 = vld [vmem:[%s14690_s1 + $0xb8] sm:$0xff] }
  0xf9   : > { %1595 = vperm.xlu0 %7298, %v1544_v52   ;;  %v8328_v52 = vld [vmem:[%s14691_s2 + $0xb8] sm:$0xff]  ;;  %vm14726_vm3 = vcmp.ge.f32.partialorder %v8323_v8, 1.0 }
  0xfa   : > { %15415 = vst [vmem:[#allocation28_spill] sm:$0xff] %v8328_v52  ;;  %vm14725_vm5 = vcmp.ge.f32.partialorder %v8328_v52, 1.0 }
  0xfc   : > { %1580 = vperm.xlu1 %7299, %v1539_v4   ;;  %v1554_v4 = vsel %vm1522_vm15, 1, %v14719_v3  ;;  %vm1526_vm15 = vmand %vm14726_vm3, %vm14725_vm5  ;;  %vm14736_vm5 = vcmp.ge.f32.partialorder %v8357_v48, 1.0 }
  0xfd   : > { %1601 = vperm.xlu0 %7298, %v1546_v10   ;;  %v8340_v10 = vld [vmem:[%s14690_s1 + $0xc8] sm:$0xff]  ;;  %v1558_v34 = vsel %vm1526_vm15, 1, %v15418_v45 }
  0xfe   : > { %vm14732_vm4 = vcmp.ge.f32.partialorder %v8340_v10, 1.0 }
 0x101   : > { %1607 = vperm.xlu0 %7298, %v1548_v57   ;;  %v8345_v57 = vld [vmem:[%s14691_s2 + $0xc8] sm:$0xff] }
 0x102   : > { %15416 = vst [vmem:[#allocation29_spill] sm:$0xff] %v8345_v57  ;;  %vm14731_vm7 = vcmp.ge.f32.partialorder %v8345_v57, 1.0  ;;  %v8382_v57 = vld [vmem:[%s14691_s2 + $0xe8] sm:$0xff] }
 0x103   : > { %15420 = vst [vmem:[#allocation32_spill] sm:$0xff] %v8382_v57 }
 0x105   : > { %1613 = vperm.xlu0 %7298, %v1550_v23   ;;  %v1556_v23 = vsel %vm1524_vm1, 1, %v14719_v3  ;;  %v8362_v3 = vld [vmem:[%s14691_s2 + $0xd8] sm:$0xff]  ;;  %vm1528_vm1 = vmand %vm14732_vm4, %vm14731_vm7  ;;  %vm14745_vm4 = vcmp.ge.f32.partialorder %v8382_v57, 1.0 }
 0x106   : > { %15417 = vst [vmem:[#allocation30_spill] sm:$0xff] %v8362_v3  ;;  %vm14735_vm3 = vcmp.ge.f32.partialorder %v8362_v3, 1.0  ;;  %v1560_v52 = vsel %vm1528_vm1, 1, %v15418_v45 }
 0x107   : > { %vm1530_vm15 = vmand %vm14736_vm5, %vm14735_vm3 }
 0x108   : > { %v1562_v3 = vsel %vm1530_vm15, 1, %v15418_v45  ;;  %vm1444_vm15 = vcmp.ge.f32.partialorder %v8420_v28, 1.0 }
 0x109   : > { %1619 = vperm.xlu0 %7298, %v1552_v55   ;;  %v570_v55 = vpop.xlane.xlu1 %569  ;;  %v1800_v56 = vsel %vm1444_vm15, 1, %v15418_v45 }
 0x10d   : > { %1625 = vperm.xlu0 %7298, %v1554_v4   ;;  %v603_v4 = vmul.f32 0.125, %v570_v55  ;;  %v8377_v55 = vld [vmem:[%s14690_s1 + $0xe8] sm:$0xff] }
 0x10e   : > { %vm1468_vm7 = vcmp.ge.f32.partialorder %v8377_v55, 1.0 }
 0x10f   : > { %vm1532_vm1 = vmand %vm1468_vm7, %vm14745_vm4 }
 0x110   : > { %v1564_v50 = vsel %vm1532_vm1, 1, %v15418_v45 }
 0x111   : > { %1631 = vperm.xlu0 %7298, %v1556_v23   ;;  %v8372_v23 = vsub.f32 %v7925_v61, %v603_v4  ;;  %v8401_v4 = vld [vmem:[%s14691_s2 + $0xf8] sm:$0xff] }
 0x112   : > { %15421 = vst [vmem:[#allocation33_spill] sm:$0xff] %v8401_v4  ;;  %vm14744_vm5 = vcmp.ge.f32.partialorder %v8401_v4, 1.0  ;;  %v8454_v4 = vld [vmem:[%s14690_s1 + $0x38] sm:$0xff] }
 0x113   : > { %15419 = vst [vmem:[#allocation31_spill] sm:$0xff] %v8372_v23  ;;  %v667_v61 = vmul.f32 %v8372_v23, %v8372_v23 }
 0x115   : > { %1637 = vperm.xlu0 %7298, %v1558_v34   ;;  %v8396_v34 = vld [vmem:[%s14690_s1 + $0xf8] sm:$0xff] }
 0x116   : > { %vm1470_vm3 = vcmp.ge.f32.partialorder %v8396_v34, 1.0  ;;  %v9130_v34 = vld [vmem:[%s14691_s2] sm:$0xff] }
 0x117   : > { %vm1534_vm8 = vmand %vm1470_vm3, %vm14744_vm5  ;;  %15539 = vst [vmem:[#allocation61_spill] sm:$0xff] %v9130_v34 }
 0x118   : > { %v1566_v57 = vsel %vm1534_vm8, 1, %v15418_v45 }
 0x119   : > { %1643 = vperm.xlu0 %7298, %v1560_v52   ;;  %v761_v52 = vsel %vm474_vm0, %v667_v61, 0.0  ;;  %v1796_v61 = vsel %vm14757_vm2, 1, %v15418_v45  ;;  %vm14772_vm2 = vcmp.ge.f32.partialorder %v8459_v18, 1.0 }
 0x11d   : > { %1649 = vperm.xlu0 %7298, %v1562_v3   ;;  %v8425_v3 = vld [vmem:[%s14691_s2 + $0x28] sm:$0xff] }
 0x11e   : > { %15422 = vst [vmem:[#allocation34_spill] sm:$0xff] %v8425_v3  ;;  %vm14755_vm1 = vcmp.ge.f32.partialorder %v8425_v3, 1.0 }
 0x11f   : > { %vm1508_vm8 = vmand %vm1444_vm15, %vm14755_vm1 }
 0x120   : > { %762 = vadd.xlane.f32.xlu1 %v761_v52  ;;  %v1798_v52 = vsel %vm14756_vm11, 1, %v15418_v45  ;;  %v1540_v23 = vsel %vm1508_vm8, 1, %v15418_v45  ;;  %vm14773_vm11 = vcmp.ge.f32.partialorder %v8454_v4, 1.0 }
 0x121   : > { %1655 = vperm.xlu0 %7298, %v1564_v50   ;;  %v8435_v50 = vld [vmem:[%s14690_s1 + $0x30] sm:$0xff]  ;;  %vm1510_vm8 = vmand %vm14773_vm11, %vm14772_vm2 }
 0x122   : > { %15423 = vst [vmem:[#allocation35_spill] sm:$0xff] %v8435_v50  ;;  %vm14767_vm5 = vcmp.ge.f32.partialorder %v8435_v50, 1.0  ;;  %v1802_v50 = vsel %vm14773_vm11, 1, %v15418_v45 }
 0x125   : > { %1661 = vperm.xlu0 %7298, %v1566_v57   ;;  %v8440_v57 = vld [vmem:[%s14691_s2 + $0x30] sm:$0xff] }
 0x126   : > { %15424 = vst [vmem:[#allocation36_spill] sm:$0xff] %v8440_v57  ;;  %vm14766_vm4 = vcmp.ge.f32.partialorder %v8440_v57, 1.0 }
 0x127   : > { %vm1509_vm1 = vmand %vm14767_vm5, %vm14766_vm4 }
 0x128   : > { %v1541_v20 = vsel %vm1509_vm1, 1, %v15418_v45 }
 0x129   : > { %1831 = vperm.xlu0 %7298, %v1796_v61  }
 0x12c   : > { %v670_v61 = vpop.xlane.xlu0 %669 }
 0x12d   : > { %v764_v40 = vmul.f32 0.125, %v670_v61  ;;  %1837 = vperm.xlu0 %7298, %v1798_v52   ;;  %v8474_v52 = vld [vmem:[%s14690_s1 + $0x40] sm:$0xff] }
 0x12e   : > { %15426 = vst [vmem:[#allocation38_spill] sm:$0xff] %v8474_v52  ;;  %v8479_v61 = vld [vmem:[%s14691_s2 + $0x40] sm:$0xff]  ;;  %vm14779_vm4 = vcmp.ge.f32.partialorder %v8474_v52, 1.0 }
 0x12f   : > { %v796_v53 = vadd.f32 1e-05, %v764_v40  ;;  %15427 = vst [vmem:[#allocation39_spill] sm:$0xff] %v8479_v61  ;;  %vm14778_vm5 = vcmp.ge.f32.partialorder %v8479_v61, 1.0 }
 0x130   : > { %v673_v40 = vpop.xlane.xlu1 %672  ;;  %v676_v24 = vpop.xlane.xlu0 %675  ;;  %vm1511_vm1 = vmand %vm14779_vm4, %vm14778_vm5 }
 0x131   : > { %7302 = vrsqrt.f32 %v796_v53  ;;  %v765_v57 = vmul.f32 0.125, %v673_v40  ;;  %v766_v62 = vmul.f32 0.125, %v676_v24  ;;  %1583 = vperm.xlu1 %7299, %v1540_v23   ;;  %1843 = vperm.xlu0 %7298, %v1800_v56   ;;  %v8494_v24 = vld [vmem:[%s14690_s1 + $0x50] sm:$0xff] }
 0x132   : > { %15428 = vst [vmem:[#allocation40_spill] sm:$0xff] %v8494_v24  ;;  %v8499_v56 = vld [vmem:[%s14691_s2 + $0x50] sm:$0xff]  ;;  %vm14787_vm2 = vcmp.ge.f32.partialorder %v8494_v24, 1.0 }
 0x133   : > { %v797_v53 = vadd.f32 1e-05, %v765_v57  ;;  %v798_v40 = vadd.f32 1e-05, %v766_v62  ;;  %15429 = vst [vmem:[#allocation41_spill] sm:$0xff] %v8499_v56  ;;  %v1542_v57 = vsel %vm1510_vm8, 1, %v15418_v45 }
 0x134   : > { %v679_v23 = vpop.xlane.xlu1 %678  ;;  %v682_v49 = vpop.xlane.xlu0 %681  ;;  %v1804_v62 = vsel %vm1448_vm13, 1, %v15418_v45  ;;  %vm14786_vm11 = vcmp.ge.f32.partialorder %v8499_v56, 1.0 }
 0x135   : > { %7304 = vrsqrt.f32 %v797_v53  ;;  %v767_v36 = vmul.f32 0.125, %v679_v23  ;;  %v768_v16 = vmul.f32 0.125, %v682_v49  ;;  %1586 = vperm.xlu1 %7299, %v1541_v20   ;;  %1849 = vperm.xlu0 %7298, %v1802_v50   ;;  %v8514_v20 = vld [vmem:[%s14690_s1 + $0x60] sm:$0xff]  ;;  %vm1513_vm8 = vmand %vm14787_vm2, %vm14786_vm11 }
 0x136   : > { %7306 = vrsqrt.f32 %v798_v40  ;;  %15430 = vst [vmem:[#allocation42_spill] sm:$0xff] %v8514_v20  ;;  %v8519_v50 = vld [vmem:[%s14691_s2 + $0x60] sm:$0xff]  ;;  %vm14800_vm5 = vcmp.ge.f32.partialorder %v8514_v20, 1.0  ;;  %v1545_v51 = vsel %vm1513_vm8, 1, %v15418_v45 }
 0x137   : > { %v799_v53 = vadd.f32 1e-05, %v767_v36  ;;  %v800_v49 = vadd.f32 1e-05, %v768_v16  ;;  %15431 = vst [vmem:[#allocation43_spill] sm:$0xff] %v8519_v50  ;;  %v1543_v36 = vsel %vm1511_vm1, 1, %v15418_v45 }
 0x138   : > { %v685_v40 = vpop.xlane.xlu1 %684  ;;  %v688_v23 = vpop.xlane.xlu0 %687  ;;  %v8529_v16 = vld [vmem:[%s14690_s1 + $0x70] sm:$0xff]  ;;  %vm14790_vm4 = vcmp.ge.f32.partialorder %v8519_v50, 1.0 }
 0x139   : > { %7308 = vrsqrt.f32 %v799_v53  ;;  %v769_v61 = vmul.f32 0.125, %v685_v40  ;;  %v770_v52 = vmul.f32 0.125, %v688_v23  ;;  %1589 = vperm.xlu1 %7299, %v1542_v57   ;;  %1855 = vperm.xlu0 %7298, %v1804_v62   ;;  %15432 = vst [vmem:[#allocation44_spill] sm:$0xff] %v8529_v16  ;;  %v1806_v53 = vsel %vm14802_vm6, 1, %v15418_v45  ;;  %v8539_v57 = vld [vmem:[%s14691_s2 + $0x70] sm:$0xff]  ;;  %v8544_v23 = vld [vmem:[%s14690_s1 + $0x80] sm:$0xff]  ;;  %vm8557_vm11 = vmand %vm14800_vm5, %vm14790_vm4 }
 0x13a   : > { %7310 = vrsqrt.f32 %v800_v49  ;;  %15433 = vst [vmem:[#allocation45_spill] sm:$0xff] %v8539_v57  ;;  %15434 = vst [vmem:[#allocation46_spill] sm:$0xff] %v8544_v23  ;;  %v8549_v49 = vld [vmem:[%s14691_s2 + $0x80] sm:$0xff]  ;;  %vm14806_vm1 = vcmp.ge.f32.partialorder %v8529_v16, 1.0  ;;  %vm14805_vm2 = vcmp.ge.f32.partialorder %v8539_v57, 1.0  ;;  %vm1455_vm8 = vcmp.ge.f32.partialorder %v8544_v23, 1.0 }
 0x13b   : > { %v801_v62 = vadd.f32 1e-05, %v769_v61  ;;  %v802_v40 = vadd.f32 1e-05, %v770_v52  ;;  %15435 = vst [vmem:[#allocation47_spill] sm:$0xff] %v8549_v49  ;;  %vm14809_vm4 = vcmp.ge.f32.partialorder %v8549_v49, 1.0  ;;  %vm8600_vm5 = vmand %vm14806_vm1, %vm14805_vm2 }
 0x13c   : > { %v691_v56 = vpop.xlane.xlu1 %690  ;;  %v694_v24 = vpop.xlane.xlu0 %693  ;;  %v1547_v41 = vsel %vm8557_vm11, 1, %v15418_v45  ;;  %v1810_v52 = vsel %vm1454_vm10, 1, %v15418_v45  ;;  %vm8613_vm11 = vmand %vm1455_vm8, %vm14809_vm4  ;;  %vm14824_vm1 = vcmp.ge.f32.partialorder %v8591_v59, 1.0  ;;  %v1549_v49 = vsel %vm8600_vm5, 1, %v15418_v45 }
 0x13d   : > { %7312 = vrsqrt.f32 %v801_v62  ;;  %v771_v42 = vmul.f32 0.125, %v691_v56  ;;  %v772_v61 = vmul.f32 0.125, %v694_v24  ;;  %1592 = vperm.xlu1 %7299, %v1543_v36   ;;  %1861 = vperm.xlu0 %7298, %v1806_v53   ;;  %v8570_v24 = vld [vmem:[%s14691_s2 + $0x90] sm:$0xff]  ;;  %v1808_v36 = vsel %vm14801_vm14, 1, %v15418_v45  ;;  %v8578_v53 = vld [vmem:[%s14692_s3] ss:$0 sm:$0xff] }
 0x13e   : > { %15439 = vst [vmem:[#allocation49_spill] sm:$0xff] %v8570_v24  ;;  %v7303_v56 = vpop.eup %7302  ;;  %7314 = vrsqrt.f32 %v802_v40  ;;  %v8586_v40 = vld [vmem:[%s14690_s1 + $0xa0] sm:$0xff]  ;;  %vm1457_vm14 = vcmp.ge.f32.partialorder %v8565_v46, 1.0  ;;  %vm14825_vm6 = vcmp.ge.f32.partialorder %v8570_v24, 1.0 }
 0x13f   : > { %v803_v62 = vadd.f32 1e-05, %v771_v42  ;;  %v804_v50 = vadd.f32 1e-05, %v772_v61  ;;  %v860_v20 = vmul.f32 %v7303_v56, %v7934_v11  ;;  %15440 = vst [vmem:[#allocation50_spill] sm:$0xff] %v8586_v40  ;;  %vm14828_vm2 = vcmp.ge.f32.partialorder %v8586_v40, 1.0  ;;  %vm8633_vm4 = vmand %vm1457_vm14, %vm14825_vm6 }
 0x140   : > { %v697_v1 = vpop.xlane.xlu1 %696  ;;  %v700_v43 = vpop.xlane.xlu0 %699  ;;  %v1551_v11 = vsel %vm8613_vm11, 1, %v15418_v45  ;;  %vm8652_vm5 = vmand %vm14828_vm2, %vm14824_vm1  ;;  %vm15450_vm11 = vcmp.ge.f32.partialorder %v8306_v39, 1.0  ;;  %vm15459_vm2 = vcmp.ge.f32.partialorder %v8340_v10, 1.0 }
 0x141   : > { %7316 = vrsqrt.f32 %v803_v62  ;;  %v773_v42 = vmul.f32 0.125, %v697_v1  ;;  %v774_v61 = vmul.f32 0.125, %v700_v43  ;;  %1598 = vperm.xlu1 %7299, %v1545_v51   ;;  %1867 = vperm.xlu0 %7298, %v1808_v36   ;;  %v8620_v1 = vld [vmem:[%s14693_s4] ss:$0 sm:$0xff]  ;;  %v898_v43 = vmul.f32 %v8578_v53, %v860_v20 }
 0x142   : > { %v7305_v57 = vpop.eup %7304  ;;  %7318 = vrsqrt.f32 %v804_v50 }
 0x143   : > { %v7307_v51 = vpop.eup %7306  ;;  %v805_v36 = vadd.f32 1e-05, %v773_v42  ;;  %v806_v62 = vadd.f32 1e-05, %v774_v61  ;;  %v861_v50 = vmul.f32 %v7305_v57, %v7944_v27  ;;  %v1812_v42 = vsel %vm1456_vm12, 1, %v15418_v45 }
 0x144   : > { %v703_v20 = vpop.xlane.xlu1 %702  ;;  %v706_v16 = vpop.xlane.xlu0 %705  ;;  %v1814_v27 = vsel %vm1458_vm9, 1, %v15418_v45  ;;  %v862_v57 = vmul.f32 %v7307_v51, %v7937_v14 }
 0x145   : > { %7320 = vrsqrt.f32 %v805_v36  ;;  %v775_v61 = vmul.f32 0.125, %v703_v20  ;;  %v776_v24 = vmul.f32 0.125, %v706_v16  ;;  %1604 = vperm.xlu1 %7299, %v1547_v41   ;;  %1873 = vperm.xlu0 %7298, %v1810_v52   ;;  %v899_v46 = vmul.f32 %v8578_v53, %v861_v50 }
 0x146   : > { %v7309_v14 = vpop.eup %7308  ;;  %7322 = vrsqrt.f32 %v806_v62  ;;  %v936_v41 = vadd.f32 %v8620_v1, %v898_v43  ;;  %v8665_v16 = vsel %vm8633_vm4, 1, %v15418_v45  ;;  %v8670_v52 = vsel %vm15450_vm11, 1, %v15418_v45  ;;  %v8677_v43 = vld [vmem:[%s14691_s2 + $0xb0] sm:$0xff] }
 0x147   : > { %v7311_v51 = vpop.eup %7310  ;;  %v807_v36 = vadd.f32 1e-05, %v775_v61  ;;  %v808_v50 = vadd.f32 1e-05, %v776_v24  ;;  %v937_v20 = vadd.f32 %v8620_v1, %v899_v46  ;;  %v863_v59 = vmul.f32 %v7309_v14, %v7947_v30  ;;  %15451 = vst [vmem:[#allocation52_spill] sm:$0xff] %v8677_v43  ;;  %v8690_v14 = vld [vmem:[%s14690_s1 + $0xc0] sm:$0xff] }
 0x148   : > { %v709_v23 = vpop.xlane.xlu1 %708  ;;  %v712_v62 = vpop.xlane.xlu0 %711  ;;  %v900_v40 = vmul.f32 %v8578_v53, %v862_v57  ;;  %v864_v39 = vmul.f32 %v7311_v51, %v7956_v2  ;;  %v8684_v61 = vsel %vm8652_vm5, 1, %v15418_v45  ;;  %vm14827_vm4 = vcmp.ge.f32.partialorder %v8659_v19, 1.0 }
 0x149   : > { %7324 = vrsqrt.f32 %v807_v36  ;;  %v777_v30 = vmul.f32 0.125, %v709_v23  ;;  %v778_v46 = vmul.f32 0.125, %v712_v62  ;;  %1610 = vperm.xlu1 %7299, %v1549_v49   ;;  %1879 = vperm.xlu0 %7298, %v1812_v42   ;;  %v968_v24 = vpack.c.bf16 %v937_v20, %v936_v41  ;;  %v8703_v41 = vld [vmem:[%s14691_s2 + $0xc0] sm:$0xff] }
 0x14a   : > { %v7313_v57 = vpop.eup %7312  ;;  %7326 = vrsqrt.f32 %v808_v50  ;;  %v901_v2 = vmul.f32 %v8578_v53, %v863_v59  ;;  %v902_v56 = vmul.f32 %v8578_v53, %v864_v39  ;;  %vm14826_vm5 = vcmp.ge.f32.partialorder %v8677_v43, 1.0  ;;  %15453 = vst [vmem:[#allocation53_spill] sm:$0xff] %v8703_v41 }
 0x14b   : > { %v7315_v51 = vpop.eup %7314  ;;  %v809_v36 = vadd.f32 1e-05, %v777_v30  ;;  %v810_v23 = vadd.f32 1e-05, %v778_v46  ;;  %7247 = vmatprep.mubr.msk.bf16.mxu0 %vm474_vm0, %v968_v24  ;;  %v865_v49 = vmul.f32 %v7313_v57, %v7959_v5  ;;  %vm15452_vm11 = vcmp.ge.f32.partialorder %v8323_v8, 1.0 }
 0x14c   : > { %v1818_v42 = vsel %vm15452_vm11, 1, %v15418_v45  ;;  %v715_v59 = vpop.xlane.xlu1 %714  ;;  %v718_v39 = vpop.xlane.xlu0 %717  ;;  %v938_v50 = vadd.f32 %v8620_v1, %v900_v40  ;;  %v939_v20 = vadd.f32 %v8620_v1, %v901_v2  ;;  %v866_v62 = vmul.f32 %v7315_v51, %v7968_v58  ;;  %vm8714_vm11 = vmand %vm14827_vm4, %vm14826_vm5  ;;  %v8721_v58 = vld [vmem:[%s14690_s1 + $0xd0] sm:$0xff] }
 0x14d   : > { %vm1463_vm1 = vcmp.ge.f32.partialorder %v8690_v14, 1.0  ;;  %7328 = vrsqrt.f32 %v809_v36  ;;  %v779_v5 = vmul.f32 0.125, %v715_v59  ;;  %v780_v30 = vmul.f32 0.125, %v718_v39  ;;  %1616 = vperm.xlu1 %7299, %v1551_v11   ;;  %1885 = vperm.xlu0 %7298, %v1814_v27   ;;  %v8730_v59 = vld [vmem:[%s14691_s2 + $0xd0] sm:$0xff] }
 0x14e   : > { %v903_v46 = vmul.f32 %v8578_v53, %v865_v49  ;;  %v7317_v40 = vpop.eup %7316  ;;  %7330 = vrsqrt.f32 %v810_v23  ;;  %v969_v57 = vpack.c.bf16 %v939_v20, %v938_v50  ;;  %v940_v11 = vadd.f32 %v8620_v1, %v902_v56  ;;  %15456 = vst [vmem:[#allocation54_spill] sm:$0xff] %v8730_v59 }
 0x14f   : > { %vm14830_vm6 = vcmp.ge.f32.partialorder %v8703_v41, 1.0  ;;  %v7319_v27 = vpop.eup %7318  ;;  %v811_v2 = vadd.f32 1e-05, %v779_v5  ;;  %v812_v51 = vadd.f32 1e-05, %v780_v30  ;;  %v867_v49 = vmul.f32 %v7317_v40, %v7971_v9 }
 0x150   : > { %v941_v36 = vadd.f32 %v8620_v1, %v903_v46  ;;  %7248 = vmatmul.mubr.msk.bf16.vlgmr.msra.gmra.mxu0 %vm474_vm0, %v969_v57  ;;  %v721_v23 = vpop.xlane.xlu1 %720  ;;  %v724_v39 = vpop.xlane.xlu0 %723  ;;  %v904_v56 = vmul.f32 %v8578_v53, %v866_v62  ;;  %v1557_v50 = vsel %vm8714_vm11, 1, %v15418_v45  ;;  %v868_v20 = vmul.f32 %v7319_v27, %v7980_v15  ;;  %vm8745_vm4 = vmand %vm1463_vm1, %vm14830_vm6 }
 0x151   : > { %vm14831_vm5 = vcmp.ge.f32.partialorder %v8721_v58, 1.0  ;;  %7332 = vrsqrt.f32 %v811_v2  ;;  %v781_v9 = vmul.f32 0.125, %v721_v23  ;;  %v782_v5 = vmul.f32 0.125, %v724_v39  ;;  %1622 = vperm.xlu1 %7299, %v8665_v16   ;;  %1891 = vperm.xlu0 %7298, %v8670_v52  }
 0x152   : > { %v970_v30 = vpack.c.bf16 %v941_v36, %v940_v11  ;;  %v7321_v46 = vpop.eup %7320  ;;  %7334 = vrsqrt.f32 %v812_v51  ;;  %v905_v15 = vmul.f32 %v8578_v53, %v867_v49  ;;  %v906_v24 = vmul.f32 %v8578_v53, %v868_v20 }
 0x153   : > { %vm14829_vm11 = vcmp.ge.f32.partialorder %v8730_v59, 1.0  ;;  %v7323_v16 = vpop.eup %7322  ;;  %v813_v40 = vadd.f32 1e-05, %v781_v9  ;;  %v814_v52 = vadd.f32 1e-05, %v782_v5  ;;  %v1820_v57 = vsel %vm15459_vm2, 1, %v15418_v45 }
 0x154   : > { %7251 = vmatprep.mubr.msk.bf16.mxu0 %vm474_vm0, %v970_v30  ;;  %v869_v11 = vmul.f32 %v7321_v46, %v7983_v13  ;;  %v727_v27 = vpop.xlane.xlu1 %726  ;;  %v730_v2 = vpop.xlane.xlu0 %729  ;;  %v942_v51 = vadd.f32 %v8620_v1, %v904_v56  ;;  %v943_v36 = vadd.f32 %v8620_v1, %v905_v15  ;;  %v1559_v49 = vsel %vm8745_vm4, 1, %v15418_v45  ;;  %vm8769_vm2 = vmand %vm14831_vm5, %vm14829_vm11 }
 0x155   : > { %v870_v23 = vmul.f32 %v7323_v16, %v7992_v31  ;;  %7336 = vrsqrt.f32 %v813_v40  ;;  %v783_v39 = vmul.f32 0.125, %v727_v27  ;;  %v784_v20 = vmul.f32 0.125, %v730_v2  ;;  %1628 = vperm.xlu1 %7299, %v8684_v61   ;;  %1897 = vperm.xlu0 %7298, %v1818_v42   ;;  %v8776_v31 = vld [vmem:[%s14690_s1 + $0xe0] sm:$0xff] }
 0x156   : > { %v907_v13 = vmul.f32 %v8578_v53, %v869_v11  ;;  %v7325_v9 = vpop.eup %7324  ;;  %7338 = vrsqrt.f32 %v814_v52  ;;  %v971_v5 = vpack.c.bf16 %v943_v36, %v942_v51  ;;  %v944_v61 = vadd.f32 %v8620_v1, %v906_v24  ;;  %v8787_v40 = vld [vmem:[%s14691_s2 + $0xe0] sm:$0xff] }
 0x157   : > { %vm15462_vm4 = vcmp.ge.f32.partialorder %v8357_v48, 1.0  ;;  %v7327_v30 = vpop.eup %7326  ;;  %v815_v62 = vadd.f32 1e-05, %v783_v39  ;;  %v816_v46 = vadd.f32 1e-05, %v784_v20  ;;  %v871_v16 = vmul.f32 %v7325_v9, %v7995_v17  ;;  %15463 = vst [vmem:[#allocation55_spill] sm:$0xff] %v8787_v40 }
 0x158   : > { %v1822_v42 = vsel %vm15462_vm4, 1, %v15418_v45  ;;  %v945_v15 = vadd.f32 %v8620_v1, %v907_v13  ;;  %7252 = vmatmul.mubr.msk.bf16.gmra.mxu0 %vm474_vm0, %v971_v5  ;;  %v733_v52 = vpop.xlane.xlu1 %732  ;;  %v736_v24 = vpop.xlane.xlu0 %735  ;;  %v908_v11 = vmul.f32 %v8578_v53, %v870_v23  ;;  %v1561_v27 = vsel %vm8769_vm2, 1, %v15418_v45  ;;  %v8799_v17 = vld [vmem:[%s14690_s1 + $0xf0] sm:$0xff] }
 0x159   : > { %v872_v2 = vmul.f32 %v7327_v30, %v8004_v47  ;;  %vm14833_vm4 = vcmp.ge.f32.partialorder %v8776_v31, 1.0  ;;  %7340 = vrsqrt.f32 %v815_v62  ;;  %v785_v51 = vmul.f32 0.125, %v733_v52  ;;  %1634 = vperm.xlu1 %7299, %v1557_v50   ;;  %1903 = vperm.xlu0 %7298, %v1820_v57   ;;  %v8804_v23 = vld [vmem:[%s14691_s2 + $0xf0] sm:$0xff] }
 0x15a   : > { %v786_v36 = vmul.f32 0.125, %v736_v24  ;;  %v972_v39 = vpack.c.bf16 %v945_v15, %v944_v61  ;;  %15464 = vst [vmem:[#allocation56_spill] sm:$0xff] %v8804_v23  ;;  %v7329_v20 = vpop.eup %7328  ;;  %7342 = vrsqrt.f32 %v816_v46  ;;  %v909_v47 = vmul.f32 %v8578_v53, %v871_v16 }
 0x15b   : > { %v910_v13 = vmul.f32 %v8578_v53, %v872_v2  ;;  %vm14832_vm2 = vcmp.ge.f32.partialorder %v8787_v40, 1.0  ;;  %v7331_v56 = vpop.eup %7330  ;;  %v817_v9 = vadd.f32 1e-05, %v785_v51  ;;  %v873_v50 = vmul.f32 %v7329_v20, %v8007_v21 }
 0x15c   : > { %v818_v5 = vadd.f32 1e-05, %v786_v36  ;;  %7255 = vmatprep.mubr.msk.bf16.mxu0 %vm474_vm0, %v972_v39  ;;  %vm14835_vm11 = vcmp.ge.f32.partialorder %v8799_v17, 1.0  ;;  %v739_v57 = vpop.xlane.xlu1 %738  ;;  %v742_v61 = vpop.xlane.xlu0 %741  ;;  %v946_v30 = vadd.f32 %v8620_v1, %v908_v11  ;;  %v947_v62 = vadd.f32 %v8620_v1, %v909_v47  ;;  %vm1531_vm5 = vmand %vm14833_vm4, %vm14832_vm2 }
 0x15d   : > { %v874_v46 = vmul.f32 %v7331_v56, %v8016_v63  ;;  %vm14834_vm6 = vcmp.ge.f32.partialorder %v8804_v23, 1.0  ;;  %7344 = vrsqrt.f32 %v817_v9  ;;  %v787_v15 = vmul.f32 0.125, %v739_v57  ;;  %1640 = vperm.xlu1 %7299, %v1559_v49   ;;  %1909 = vperm.xlu0 %7298, %v1822_v42  }
 0x15e   : > { %v788_v16 = vmul.f32 0.125, %v742_v61  ;;  %v911_v52 = vmul.f32 %v8578_v53, %v873_v50  ;;  %v7333_v21 = vpop.eup %7332  ;;  %7346 = vrsqrt.f32 %v818_v5  ;;  %v973_v24 = vpack.c.bf16 %v947_v62, %v946_v30  ;;  %vm8834_vm2 = vmand %vm14835_vm11, %vm14834_vm6 }
 0x15f   : > { %v1824_v63 = vsel %vm1468_vm7, 1, %v15418_v45  ;;  %v948_v11 = vadd.f32 %v8620_v1, %v910_v13  ;;  %v7335_v2 = vpop.eup %7334  ;;  %v819_v51 = vadd.f32 1e-05, %v787_v15  ;;  %v875_v36 = vmul.f32 %v7333_v21, %v8019_v25 }
 0x160   : > { %v820_v49 = vadd.f32 1e-05, %v788_v16  ;;  %v949_v42 = vadd.f32 %v8620_v1, %v911_v52  ;;  %7256 = vmatmul.mubr.msk.bf16.gmra.mxu0 %vm474_vm0, %v973_v24  ;;  %v745_v39 = vpop.xlane.xlu1 %744  ;;  %v748_v20 = vpop.xlane.xlu0 %747  ;;  %v1563_v47 = vsel %vm1531_vm5, 1, %v15418_v45  ;;  %v912_v56 = vmul.f32 %v8578_v53, %v874_v46 }
 0x161   : > { %vm14957_vm4 = vcmp.lt.f32.partialorder %v8130_v60, 15.0  ;;  %v876_v25 = vmul.f32 %v7335_v2, %v8028_v22  ;;  %7348 = vrsqrt.f32 %v819_v51  ;;  %v789_v9 = vmul.f32 0.125, %v745_v39  ;;  %1646 = vperm.xlu1 %7299, %v1561_v27   ;;  %1915 = vperm.xlu0 %7298, %v1824_v63  }
 0x162   : > { %v790_v5 = vmul.f32 0.125, %v748_v20  ;;  %v974_v50 = vpack.c.bf16 %v949_v42, %v948_v11  ;;  %v7337_v57 = vpop.eup %7336  ;;  %7350 = vrsqrt.f32 %v820_v49  ;;  %v1826_v61 = vsel %vm1470_vm3, 1, %v15418_v45 }
 0x163   : > { %v913_v30 = vmul.f32 %v8578_v53, %v875_v36  ;;  %v914_v62 = vmul.f32 %v8578_v53, %v876_v25  ;;  %v7339_v46 = vpop.eup %7338  ;;  %v821_v15 = vadd.f32 1e-05, %v789_v9  ;;  %v1565_v22 = vsel %vm8834_vm2, 1, %v15418_v45 }
 0x164   : > { %v822_v16 = vadd.f32 1e-05, %v790_v5  ;;  %7259 = vmatprep.mubr.msk.bf16.mxu0 %vm474_vm0, %v974_v50  ;;  %vm15467_vm5 = vcmp.ge.f32.partialorder %v8125_v26, 1.0  ;;  %v877_v52 = vmul.f32 %v7337_v57, %v8031_v29  ;;  %v751_v21 = vpop.xlane.xlu1 %750  ;;  %v754_v24 = vpop.xlane.xlu0 %753  ;;  %v950_v63 = vadd.f32 %v8620_v1, %v912_v56 }
 0x165   : > { %vm8853_vm6 = vmand %vm15467_vm5, %vm14957_vm4  ;;  %v951_v11 = vadd.f32 %v8620_v1, %v913_v30  ;;  %vm14836_vm11 = vcmp.lt.f32.partialorder %v8170_v32, 15.0  ;;  %v878_v2 = vmul.f32 %v7339_v46, %v8040_v38  ;;  %7352 = vrsqrt.f32 %v821_v15  ;;  %1652 = vperm.xlu1 %7299, %v1563_v47   ;;  %1921 = vperm.xlu0 %7298, %v1826_v61  }
 0x166   : > { %v791_v51 = vmul.f32 0.125, %v751_v21  ;;  %v792_v49 = vmul.f32 0.125, %v754_v24  ;;  %v915_v26 = vmul.f32 %v8578_v53, %v877_v52  ;;  %v7341_v42 = vpop.eup %7340  ;;  %7354 = vrsqrt.f32 %v822_v16 }
 0x167   : > { %v975_v29 = vpack.c.bf16 %v951_v11, %v950_v63  ;;  %v2218_v36 = vsel %vm8853_vm6, 1, %v15418_v45  ;;  %v952_v39 = vadd.f32 %v8620_v1, %v914_v62  ;;  %v7343_v20 = vpop.eup %7342  ;;  %vm15470_vm2 = vcmp.ge.f32.partialorder %v8165_v35, 1.0 }
 0x168   : > { %v823_v56 = vadd.f32 1e-05, %v791_v51  ;;  %v824_v13 = vadd.f32 1e-05, %v792_v49  ;;  %v953_v38 = vadd.f32 %v8620_v1, %v915_v26  ;;  %vm2188_vm5 = vmand %vm15470_vm2, %vm14836_vm11  ;;  %v879_v47 = vmul.f32 %v7341_v42, %v8043_v33  ;;  %v757_v25 = vpop.xlane.xlu1 %756  ;;  %v8889_v16 = vpop.xlane.xlu0 %759 }
 0x169   : > { %7260 = vmatmul.mubr.msk.bf16.gmra.mxu0 %vm474_vm0, %v975_v29  ;;  %v916_v9 = vmul.f32 %v8578_v53, %v878_v2  ;;  %vm14837_vm6 = vcmp.lt.f32.partialorder %v8425_v3, 15.0  ;;  %v880_v5 = vmul.f32 %v7343_v20, %v8052_v54  ;;  %v793_v50 = vmul.f32 0.125, %v757_v25  ;;  %1658 = vperm.xlu1 %7299, %v1565_v22   ;;  %v15476_v29 = vld [vmem:[#allocation15_spill] sm:$0xff] }
 0x16a   : > { %7356 = vrsqrt.f32 %v823_v56  ;;  %2253 = vperm.xlu0 %7298, %v2218_v36   ;;  %v976_v57 = vpack.c.bf16 %v953_v38, %v952_v39  ;;  %v7345_v61 = vpop.eup %7344  ;;  %vm15471_vm2 = vcmp.ge.f32.partialorder %v8147_v0, 1.0  ;;  %v2220_v35 = vsel %vm2188_vm5, 1, %v15418_v45  ;;  %vm2190_vm11 = vmand %vm1444_vm15, %vm14837_vm6  ;;  %v15477_v36 = vld [vmem:[#allocation3_spill] sm:$0xff] }
 0x16b   : > { %7358 = vrsqrt.f32 %v824_v13  ;;  %v1795_v33 = vsel %vm15471_vm2, 1, %v15418_v45  ;;  %v917_v30 = vmul.f32 %v8578_v53, %v879_v47  ;;  %v7347_v62 = vpop.eup %7346  ;;  %v825_v46 = vadd.f32 1e-05, %v793_v50  ;;  %v15497_v50 = vld [vmem:[#allocation8_spill] sm:$0xff] }
 0x16c   : > { %7263 = vmatprep.mubr.msk.bf16.mxu1 %vm474_vm0, %v976_v57  ;;  %v881_v54 = vmul.f32 %v7345_v61, %v8055_v37  ;;  %v918_v15 = vmul.f32 %v8578_v53, %v880_v5  ;;  %v954_v22 = vadd.f32 %v8620_v1, %v916_v9  ;;  %vm14955_vm5 = vcmp.lt.f32.partialorder %v8459_v18, 15.0  ;;  %v15481_v57 = vld [vmem:[#allocation4_spill] sm:$0xff] }
 0x16d   : > { %v955_v27 = vadd.f32 %v8620_v1, %v917_v30  ;;  %v882_v52 = vmul.f32 %v7347_v62, %v8064_v7  ;;  %7360 = vrsqrt.f32 %v825_v46  ;;  %1828 = vperm.xlu1 %7299, %v1795_v33   ;;  %vm15472_vm15 = vcmp.ge.f32.partialorder %v8137_v44, 1.0  ;;  %v15474_v7 = vld [vmem:[#allocation2_spill] sm:$0xff]  ;;  %v15483_v30 = vld [vmem:[#allocation19_spill] sm:$0xff]  ;;  %v15484_v62 = vld [vmem:[#allocation5_spill] sm:$0xff] }
 0x16e   : > { %2259 = vperm.xlu0 %7298, %v2220_v35   ;;  %v919_v28 = vmul.f32 %v8578_v53, %v881_v54  ;;  %v7349_v21 = vpop.eup %7348  ;;  %v1797_v37 = vsel %vm15472_vm15, 1, %v15418_v45  ;;  %v2222_v63 = vsel %vm2190_vm11, 1, %v15418_v45  ;;  %v956_v2 = vadd.f32 %v8620_v1, %v918_v15 }
 0x16f   : > { %v977_v24 = vpack.c.bf16 %v955_v27, %v954_v22  ;;  %v7351_v11 = vpop.eup %7350  ;;  %vm15473_vm2 = vcmp.ge.f32.partialorder %v8454_v4, 1.0  ;;  %v883_v49 = vmul.f32 %v7349_v21, %v15474_v7  ;;  %v920_v26 = vmul.f32 %v8578_v53, %v882_v52  ;;  %v15478_v4 = vld [vmem:[#allocation16_spill] sm:$0xff]  ;;  %v15485_v27 = vld [vmem:[#allocation35_spill] sm:$0xff] }
 0x170   : > { %v957_v51 = vadd.f32 %v8620_v1, %v919_v28  ;;  %vm2192_vm6 = vmand %vm15473_vm2, %vm14955_vm5  ;;  %v8909_v42 = vpop.permute.xlu0 %1568  ;;  %vm14838_vm11 = vcmp.lt.f32.partialorder %v15476_v29, 15.0  ;;  %v884_v39 = vmul.f32 %v7351_v11, %v15477_v36  ;;  %vm15479_vm15 = vcmp.ge.f32.partialorder %v15478_v4, 1.0  ;;  %v15489_v11 = vld [vmem:[#allocation6_spill] sm:$0xff] }
 0x171   : > { %7264 = vmatmul.mubr.msk.bf16.vlgmr.msra.gmra.mxu1 %vm474_vm0, %v977_v24  ;;  %15475 = vst [vmem:[#allocation2_spill] sm:$0xff] %v8909_v42  ;;  %1834 = vperm.xlu1 %7299, %v1797_v37   ;;  %v921_v56 = vmul.f32 %v8578_v53, %v883_v49  ;;  %v1799_v38 = vsel %vm15479_vm15, 1, %v15418_v45  ;;  %v2224_v47 = vsel %vm2192_vm6, 1, %v15418_v45  ;;  %v958_v9 = vadd.f32 %v8620_v1, %v920_v26  ;;  %vm2194_vm2 = vmand %vm1448_vm13, %vm14838_vm11  ;;  %v15491_v49 = vld [vmem:[#allocation21_spill] sm:$0xff]  ;;  %v15492_v26 = vld [vmem:[#allocation7_spill] sm:$0xff] }
 0x172   : > { %2265 = vperm.xlu0 %7298, %v2222_v63   ;;  %v978_v20 = vpack.c.bf16 %v957_v51, %v956_v2  ;;  %v7353_v13 = vpop.eup %7352  ;;  %v922_v33 = vmul.f32 %v8578_v53, %v884_v39  ;;  %vm14839_vm6 = vcmp.lt.f32.partialorder %v15483_v30, 15.0  ;;  %vm15486_vm15 = vcmp.ge.f32.partialorder %v15485_v27, 1.0  ;;  %v15487_v63 = vld [vmem:[#allocation18_spill] sm:$0xff] }
 0x173   : > { %v7355_v25 = vpop.eup %7354  ;;  %v959_v5 = vadd.f32 %v8620_v1, %v921_v56  ;;  %v885_v61 = vmul.f32 %v7353_v13, %v15481_v57  ;;  %v1801_v52 = vsel %vm15486_vm15, 1, %v15418_v45  ;;  %v2226_v28 = vsel %vm2194_vm2, 1, %v15418_v45  ;;  %v15493_v13 = vld [vmem:[#allocation38_spill] sm:$0xff] }
 0x174   : > { %7267 = vmatprep.mubr.msk.bf16.mxu1 %vm474_vm0, %v978_v20  ;;  %v8927_v35 = vpop.permute.xlu0 %1595  ;;  %v886_v46 = vmul.f32 %v7355_v25, %v15484_v62  ;;  %v960_v24 = vadd.f32 %v8620_v1, %v922_v33  ;;  %vm15488_vm13 = vcmp.ge.f32.partialorder %v15487_v63, 1.0  ;;  %vm14948_vm2 = vcmp.lt.f32.partialorder %v15491_v49, 15.0  ;;  %v8968_v62 = vld [vmem:[%s14691_s2 + $0x78] sm:$0xff] }
 0x175   : > { %15482 = vst [vmem:[#allocation3_spill] sm:$0xff] %v8927_v35  ;;  %1840 = vperm.xlu1 %7299, %v1799_v38   ;;  %v979_v54 = vpack.c.bf16 %v959_v5, %v958_v9  ;;  %v923_v15 = vmul.f32 %v8578_v53, %v885_v61  ;;  %vm2196_vm11 = vmand %vm15488_vm13, %vm14839_vm6  ;;  %vm15494_vm15 = vcmp.ge.f32.partialorder %v15493_v13, 1.0  ;;  %v15495_v5 = vld [vmem:[#allocation20_spill] sm:$0xff]  ;;  %v794_v55 = vmul.f32 0.125, %v8889_v16 }
 0x176   : > { %2271 = vperm.xlu0 %7298, %v2224_v47   ;;  %v924_v51 = vmul.f32 %v8578_v53, %v886_v46  ;;  %v1803_v38 = vsel %vm15494_vm15, 1, %v15418_v45  ;;  %v2228_v47 = vsel %vm2196_vm11, 1, %v15418_v45  ;;  %vm15496_vm13 = vcmp.ge.f32.partialorder %v15495_v5, 1.0  ;;  %15499 = vst [vmem:[#allocation4_spill] sm:$0xff] %v8968_v62  ;;  %v15514_v5 = vld [vmem:[#allocation26_spill] sm:$0xff] }
 0x177   : > { %v7357_v22 = vpop.eup %7356  ;;  %v961_v37 = vadd.f32 %v8620_v1, %v923_v15  ;;  %vm2198_vm6 = vmand %vm15496_vm13, %vm14948_vm2  ;;  %vm14840_vm11 = vcmp.lt.f32.partialorder %v8968_v62, 15.0  ;;  %v15500_v15 = vld [vmem:[#allocation40_spill] sm:$0xff] }
 0x178   : > { %v7359_v21 = vpop.eup %7358  ;;  %v887_v2 = vmul.f32 %v7357_v22, %v15489_v11  ;;  %v8945_v7 = vpop.permute.xlu0 %1601  ;;  %v962_v25 = vadd.f32 %v8620_v1, %v924_v51  ;;  %vm15501_vm15 = vcmp.ge.f32.partialorder %v15500_v15, 1.0  ;;  %vm2200_vm13 = vmand %vm1454_vm10, %vm14840_vm11  ;;  %v15504_v11 = vld [vmem:[#allocation42_spill] sm:$0xff] }
 0x179   : > { %7268 = vmatmul.mubr.msk.bf16.gmra.mxu1 %vm474_vm0, %v979_v54  ;;  %15490 = vst [vmem:[#allocation16_spill] sm:$0xff] %v8945_v7  ;;  %v888_v36 = vmul.f32 %v7359_v21, %v15492_v26  ;;  %1846 = vperm.xlu1 %7299, %v1801_v52   ;;  %v980_v39 = vpack.c.bf16 %v961_v37, %v960_v24  ;;  %v1805_v22 = vsel %vm15501_vm15, 1, %v15418_v45  ;;  %v2230_v52 = vsel %vm2198_vm6, 1, %v15418_v45  ;;  %v8988_v37 = vld [vmem:[%s14691_s2 + $0x88] sm:$0xff]  ;;  %v9005_v26 = vld [vmem:[%s14691_s2 + $0x98] sm:$0xff] }
 0x17a   : > { %2277 = vperm.xlu0 %7298, %v2226_v28   ;;  %v925_v20 = vmul.f32 %v8578_v53, %v887_v2  ;;  %v7361_v56 = vpop.eup %7360  ;;  %15503 = vst [vmem:[#allocation35_spill] sm:$0xff] %v8988_v37  ;;  %vm14947_vm6 = vcmp.lt.f32.partialorder %v8988_v37, 15.0  ;;  %vm15505_vm15 = vcmp.ge.f32.partialorder %v15504_v11, 1.0  ;;  %v2232_v6 = vsel %vm2200_vm13, 1, %v15418_v45  ;;  %15507 = vst [vmem:[#allocation6_spill] sm:$0xff] %v9005_v26  ;;  %v15661_v37 = vld [vmem:[#allocation49_spill] sm:$0xff] }
 0x17b   : > { %7271 = vmatprep.mubr.msk.bf16.mxu1 %vm474_vm0, %v980_v39  ;;  %v889_v57 = vmul.f32 %v7361_v56, %v15497_v50  ;;  %v926_v61 = vmul.f32 %v8578_v53, %v888_v36  ;;  %v1807_v2 = vsel %vm15505_vm15, 1, %v15418_v45  ;;  %vm2202_vm10 = vmand %vm1456_vm12, %vm14947_vm6  ;;  %vm14842_vm11 = vcmp.lt.f32.partialorder %v9005_v26, 15.0  ;;  %v15508_v36 = vld [vmem:[#allocation44_spill] sm:$0xff] }
 0x17c   : > { %v963_v9 = vadd.f32 %v8620_v1, %v925_v20  ;;  %v8963_v33 = vpop.permute.xlu0 %1607  ;;  %vm15509_vm13 = vcmp.ge.f32.partialorder %v15508_v36, 1.0  ;;  %v2234_v20 = vsel %vm2202_vm10, 1, %v15418_v45  ;;  %vm2204_vm12 = vmand %vm1458_vm9, %vm14842_vm11  ;;  %vm15515_vm9 = vcmp.ge.f32.partialorder %v15514_v5, 1.0 }
 0x17d   : > { %15498 = vst [vmem:[#allocation14_spill] sm:$0xff] %v8963_v33  ;;  %1852 = vperm.xlu1 %7299, %v1803_v38   ;;  %v927_v54 = vmul.f32 %v8578_v53, %v889_v57  ;;  %v964_v28 = vadd.f32 %v8620_v1, %v926_v61  ;;  %v1809_v39 = vsel %vm15509_vm13, 1, %v15418_v45  ;;  %v9021_v38 = vld [vmem:[%s14691_s2 + $0xa8] sm:$0xff]  ;;  %v9037_v57 = vld [vmem:[%s14691_s2 + $0xb8] sm:$0xff] }
 0x17e   : > { %2283 = vperm.xlu0 %7298, %v2228_v47   ;;  %v981_v46 = vpack.c.bf16 %v963_v9, %v962_v25  ;;  %15512 = vst [vmem:[#allocation38_spill] sm:$0xff] %v9021_v38  ;;  %vm14841_vm15 = vcmp.lt.f32.partialorder %v9021_v38, 15.0  ;;  %v1811_v25 = vsel %vm1455_vm8, 1, %v15418_v45  ;;  %v2236_v9 = vsel %vm2204_vm12, 1, %v15418_v45  ;;  %15517 = vst [vmem:[#allocation8_spill] sm:$0xff] %v9037_v57 }
 0x17f   : > { %v965_v21 = vadd.f32 %v8620_v1, %v927_v54  ;;  %vm2206_vm10 = vmand %vm15515_vm9, %vm14841_vm15  ;;  %vm14843_vm13 = vcmp.lt.f32.partialorder %v9037_v57, 15.0  ;;  %vm15519_vm12 = vcmp.ge.f32.partialorder %v8323_v8, 1.0 }
 0x180   : > { %v8983_v24 = vpop.permute.xlu0 %1613  ;;  %v2238_v54 = vsel %vm2206_vm10, 1, %v15418_v45  ;;  %vm2208_vm9 = vmand %vm15519_vm12, %vm14843_vm13  ;;  %vm15525_vm10 = vcmp.ge.f32.partialorder %v8340_v10, 1.0 }
 0x181   : > { %7272 = vmatmul.mubr.msk.bf16.gmra.mxu1 %vm474_vm0, %v981_v46  ;;  %15502 = vst [vmem:[#allocation5_spill] sm:$0xff] %v8983_v24  ;;  %1858 = vperm.xlu1 %7299, %v1805_v22   ;;  %v982_v63 = vpack.c.bf16 %v965_v21, %v964_v28  ;;  %v1813_v46 = vsel %vm1457_vm14, 1, %v15418_v45  ;;  %v15522_v28 = vld [vmem:[#allocation50_spill] sm:$0xff] }
 0x182   : > { %2289 = vperm.xlu0 %7298, %v2230_v52   ;;  %v9053_v52 = vld [vmem:[%s14691_s2 + $0xc8] sm:$0xff]  ;;  %vm15523_vm11 = vcmp.ge.f32.partialorder %v15522_v28, 1.0 }
 0x183   : > { %7275 = vmatprep.mubr.msk.bf16.mxu1 %vm474_vm0, %v982_v63  ;;  %15521 = vst [vmem:[#allocation42_spill] sm:$0xff] %v9053_v52  ;;  %vm14844_vm15 = vcmp.lt.f32.partialorder %v9053_v52, 15.0  ;;  %v1815_v21 = vsel %vm15523_vm11, 1, %v15418_v45  ;;  %v2240_v63 = vsel %vm2208_vm9, 1, %v15418_v45  ;;  %vm15528_vm11 = vcmp.ge.f32.partialorder %v8659_v19, 1.0 }
 0x184   : > { %v9000_v51 = vpop.permute.xlu0 %1619  ;;  %vm2210_vm12 = vmand %vm15525_vm10, %vm14844_vm15  ;;  %vm15529_vm9 = vcmp.ge.f32.partialorder %v8357_v48, 1.0  ;;  %vm14936_vm15 = vcmp.lt.f32.partialorder %v9087_v12, 15.0 }
 0x185   : > { %15506 = vst [vmem:[#allocation18_spill] sm:$0xff] %v9000_v51  ;;  %1864 = vperm.xlu1 %7299, %v1807_v2   ;;  %v9060_v2 = vpop.permute.xlu1 %1571 }
 0x186   : > { %2295 = vperm.xlu0 %7298, %v2232_v6   ;;  %15524 = vst [vmem:[#allocation44_spill] sm:$0xff] %v9060_v2  ;;  %v9071_v6 = vld [vmem:[%s14691_s2 + $0xd8] sm:$0xff] }
 0x187   : > { %15527 = vst [vmem:[#allocation46_spill] sm:$0xff] %v9071_v6  ;;  %vm14937_vm13 = vcmp.lt.f32.partialorder %v9071_v6, 15.0  ;;  %v9552_v6 = vld [vmem:[%s14690_s1 + $0x8] sm:$0xff] }
 0x188   : > { %v9016_v56 = vpop.permute.xlu0 %1625  ;;  %vm2212_vm10 = vmand %vm15529_vm9, %vm14937_vm13  ;;  %vm15535_vm9 = vcmp.ge.f32.partialorder %v8721_v58, 1.0  ;;  %15681 = vst [vmem:[#allocation115_spill] sm:$0xff] %v9552_v6 }
 0x189   : > { %15511 = vst [vmem:[#allocation7_spill] sm:$0xff] %v9016_v56  ;;  %1870 = vperm.xlu1 %7299, %v1809_v39   ;;  %v1817_v39 = vsel %vm15528_vm11, 1, %v15418_v45  ;;  %v2244_v48 = vsel %vm2212_vm10, 1, %v15418_v45  ;;  %vm15537_vm10 = vcmp.ge.f32.partialorder %v8776_v31, 1.0 }
 0x18a   : > { %2301 = vperm.xlu0 %7298, %v2234_v20   ;;  %v2242_v20 = vsel %vm2210_vm12, 1, %v15418_v45  ;;  %vm2214_vm12 = vmand %vm1468_vm7, %vm14936_vm15 }
 0x18c   : > { %v9032_v50 = vpop.permute.xlu0 %1631 }
 0x18d   : > { %15516 = vst [vmem:[#allocation20_spill] sm:$0xff] %v9032_v50  ;;  %1876 = vperm.xlu1 %7299, %v1811_v25   ;;  %v9090_v25 = vpop.permute.xlu1 %1574  ;;  %v15630_v50 = vld [vmem:[#allocation17_spill] sm:$0xff] }
 0x18e   : > { %2307 = vperm.xlu0 %7298, %v2236_v9   ;;  %15532 = vst [vmem:[#allocation50_spill] sm:$0xff] %v9090_v25  ;;  %v1819_v9 = vsel %vm1463_vm1, 1, %v15418_v45 }
 0x190   : > { %v9048_v22 = vpop.permute.xlu0 %1637 }
 0x191   : > { %15520 = vst [vmem:[#allocation40_spill] sm:$0xff] %v9048_v22  ;;  %1882 = vperm.xlu1 %7299, %v1813_v46   ;;  %v9105_v46 = vld [vmem:[%s14691_s2 + $0xf8] sm:$0xff] }
 0x192   : > { %2313 = vperm.xlu0 %7298, %v2238_v54   ;;  %15534 = vst [vmem:[#allocation58_spill] sm:$0xff] %v9105_v46  ;;  %vm14846_vm11 = vcmp.lt.f32.partialorder %v9105_v46, 15.0  ;;  %v1821_v54 = vsel %vm15535_vm9, 1, %v15418_v45  ;;  %vm15541_vm9 = vcmp.ge.f32.partialorder %v8130_v60, 1.0 }
 0x193   : > { %vm2216_vm7 = vmand %vm1470_vm3, %vm14846_vm11  ;;  %vm14850_vm3 = vcmp.lt.f32.partialorder %v9130_v34, 15.0 }
 0x194   : > { %v9066_v8 = vpop.permute.xlu0 %1643 }
 0x195   : > { %15526 = vst [vmem:[#allocation24_spill] sm:$0xff] %v9066_v8  ;;  %1888 = vperm.xlu1 %7299, %v1815_v21   ;;  %v2246_v21 = vsel %vm2214_vm12, 1, %v15418_v45  ;;  %vm15540_vm12 = vcmp.ge.f32.partialorder %v8799_v17, 1.0 }
 0x196   : > { %2319 = vperm.xlu0 %7298, %v2240_v63   ;;  %v9112_v63 = vpop.permute.xlu1 %1577 }
 0x198   : > { %v9082_v10 = vpop.permute.xlu0 %1649 }
 0x199   : > { %15530 = vst [vmem:[#allocation26_spill] sm:$0xff] %v9082_v10  ;;  %1894 = vperm.xlu1 %7299, %v1817_v39   ;;  %v15595_v10 = vld [vmem:[#allocation28_spill] sm:$0xff] }
 0x19a   : > { %2325 = vperm.xlu0 %7298, %v2242_v20   ;;  %v1823_v20 = vsel %vm15537_vm10, 1, %v15418_v45  ;;  %v9133_v16 = vpop.permute.xlu1 %1580 }
 0x19c   : > { %v9100_v5 = vpop.permute.xlu0 %1655 }
 0x19d   : > { %15533 = vst [vmem:[#allocation57_spill] sm:$0xff] %v9100_v5  ;;  %1900 = vperm.xlu1 %7299, %v1819_v9   ;;  %v2248_v9 = vsel %vm2216_vm7, 1, %v15418_v45  ;;  %vm15542_vm7 = vcmp.ge.f32.partialorder %v8147_v0, 1.0  ;;  %v15566_v5 = vld [vmem:[#allocation31_spill] sm:$0xff] }
 0x19e   : > { %2331 = vperm.xlu0 %7298, %v2244_v48   ;;  %v826_v48 = vadd.f32 1e-05, %v794_v55  ;;  %vm2185_vm10 = vmand %vm15542_vm7, %vm14850_vm3 }
 0x19f   : > { %v2217_v2 = vsel %vm2185_vm10, 1, %v15418_v45  ;;  %vm15548_vm10 = vcmp.ge.f32.partialorder %v8425_v3, 1.0 }
 0x1a0   : > { %v9119_v39 = vpop.permute.xlu0 %1661  ;;  %7362 = vrsqrt.f32 %v826_v48 }
 0x1a1   : > { %15536 = vst [vmem:[#allocation59_spill] sm:$0xff] %v9119_v39  ;;  %1906 = vperm.xlu1 %7299, %v1821_v54   ;;  %v1825_v54 = vsel %vm15540_vm12, 1, %v15418_v45  ;;  %vm15544_vm12 = vcmp.ge.f32.partialorder %v8170_v32, 1.0 }
 0x1a2   : > { %2337 = vperm.xlu0 %7298, %v2246_v21   ;;  %v2478_v21 = vsel %vm15541_vm9, 1, %v15418_v45  ;;  %v2480_v0 = vsel %vm15544_vm12, 1, %v15418_v45  ;;  %vm15545_vm9 = vcmp.ge.f32.partialorder %v8137_v44, 1.0  ;;  %v2482_v44 = vsel %vm15548_vm10, 1, %v15418_v45 }
 0x1a3   : > { %vm15549_vm12 = vcmp.ge.f32.partialorder %v15478_v4, 1.0  ;;  %vm15553_vm10 = vcmp.ge.f32.partialorder %v15485_v27, 1.0 }
 0x1a4   : > { %v9125_v42 = vpop.permute.xlu0 %1831 }
 0x1a5   : > { %15538 = vst [vmem:[#allocation60_spill] sm:$0xff] %v9125_v42  ;;  %1912 = vperm.xlu1 %7299, %v1823_v20   ;;  %v9150_v20 = vld [vmem:[%s14691_s2 + $0x10] sm:$0xff] }
 0x1a6   : > { %2343 = vperm.xlu0 %7298, %v2248_v9   ;;  %15543 = vst [vmem:[#allocation62_spill] sm:$0xff] %v9150_v20  ;;  %vm14851_vm11 = vcmp.lt.f32.partialorder %v9150_v20, 15.0 }
 0x1a7   : > { %vm2187_vm7 = vmand %vm15545_vm9, %vm14851_vm11 }
 0x1a8   : > { %v9145_v55 = vpop.permute.xlu0 %1837 }
 0x1a9   : > { %1918 = vperm.xlu1 %7299, %v1825_v54   ;;  %v763_v9 = vpop.xlane.xlu1 %762  ;;  %v9166_v54 = vld [vmem:[%s14691_s2 + $0x20] sm:$0xff] }
 0x1aa   : > { %2513 = vperm.xlu0 %7298, %v2478_v21   ;;  %v795_v42 = vmul.f32 0.125, %v763_v9  ;;  %15546 = vst [vmem:[#allocation63_spill] sm:$0xff] %v9166_v54  ;;  %vm14853_vm3 = vcmp.lt.f32.partialorder %v9166_v54, 15.0  ;;  %v2219_v9 = vsel %vm2187_vm7, 1, %v15418_v45  ;;  %vm15552_vm7 = vcmp.ge.f32.partialorder %v8459_v18, 1.0 }
 0x1ab   : > { %vm2189_vm9 = vmand %vm15549_vm12, %vm14853_vm3  ;;  %v2484_v4 = vsel %vm15552_vm7, 1, %v15418_v45  ;;  %vm15558_vm7 = vcmp.ge.f32.partialorder %v15493_v13, 1.0 }
 0x1ac   : > { %v827_v48 = vadd.f32 1e-05, %v795_v42  ;;  %v9161_v33 = vpop.permute.xlu0 %1843 }
 0x1ad   : > { %2250 = vperm.xlu1 %7299, %v2217_v2   ;;  %v9169_v21 = vpop.permute.xlu1 %1583  ;;  %v9184_v2 = vld [vmem:[%s14691_s2 + $0x30] sm:$0xff] }
 0x1ae   : > { %15547 = vst [vmem:[#allocation64_spill] sm:$0xff] %v9169_v21  ;;  %2519 = vperm.xlu0 %7298, %v2480_v0   ;;  %7364 = vrsqrt.f32 %v827_v48  ;;  %15551 = vst [vmem:[#allocation66_spill] sm:$0xff] %v9184_v2  ;;  %vm14857_vm11 = vcmp.lt.f32.partialorder %v9184_v2, 15.0  ;;  %v2221_v48 = vsel %vm2189_vm9, 1, %v15418_v45  ;;  %vm15557_vm9 = vcmp.ge.f32.partialorder %v15476_v29, 1.0 }
 0x1af   : > { %vm2191_vm12 = vmand %vm15553_vm10, %vm14857_vm11  ;;  %v2486_v27 = vsel %vm15557_vm9, 1, %v15418_v45  ;;  %vm15564_vm9 = vcmp.ge.f32.partialorder %v15500_v15, 1.0 }
 0x1b0   : > { %v9179_v42 = vpop.permute.xlu0 %1849  ;;  %v2223_v24 = vsel %vm2191_vm12, 1, %v15418_v45  ;;  %vm15563_vm12 = vcmp.ge.f32.partialorder %v15483_v30, 1.0 }
 0x1b1   : > { %15550 = vst [vmem:[#allocation65_spill] sm:$0xff] %v9179_v42  ;;  %2256 = vperm.xlu1 %7299, %v2219_v9   ;;  %v9187_v0 = vpop.permute.xlu1 %1586  ;;  %v9202_v9 = vld [vmem:[%s14691_s2 + $0x40] sm:$0xff]  ;;  %v2488_v13 = vsel %vm15563_vm12, 1, %v15418_v45  ;;  %vm15569_vm12 = vcmp.ge.f32.partialorder %v15491_v49, 1.0 }
 0x1b2   : > { %2525 = vperm.xlu0 %7298, %v2482_v44   ;;  %15555 = vst [vmem:[#allocation68_spill] sm:$0xff] %v9202_v9  ;;  %vm14976_vm3 = vcmp.lt.f32.partialorder %v9202_v9, 15.0  ;;  %v7363_v44 = vpop.eup %7362 }
 0x1b3   : > { %vm2193_vm10 = vmand %vm15558_vm7, %vm14976_vm3 }
 0x1b4   : > { %v9197_v7 = vpop.permute.xlu0 %1855 }
 0x1b5   : > { %15554 = vst [vmem:[#allocation67_spill] sm:$0xff] %v9197_v7  ;;  %2262 = vperm.xlu1 %7299, %v2221_v48   ;;  %v9205_v25 = vpop.permute.xlu1 %1589  ;;  %v9220_v48 = vld [vmem:[%s14691_s2 + $0x50] sm:$0xff] }
 0x1b6   : > { %15556 = vst [vmem:[#allocation69_spill] sm:$0xff] %v9205_v25  ;;  %2531 = vperm.xlu0 %7298, %v2484_v4   ;;  %15560 = vst [vmem:[#allocation71_spill] sm:$0xff] %v9220_v48  ;;  %vm14865_vm11 = vcmp.lt.f32.partialorder %v9220_v48, 15.0  ;;  %v15561_v4 = vld [vmem:[#allocation9_spill] sm:$0xff]  ;;  %v2225_v25 = vsel %vm2193_vm10, 1, %v15418_v45 }
 0x1b7   : > { %v890_v35 = vmul.f32 %v7363_v44, %v15561_v4  ;;  %vm2195_vm7 = vmand %vm15564_vm9, %vm14865_vm11  ;;  %vm15570_vm9 = vcmp.ge.f32.partialorder %v15504_v11, 1.0 }
 0x1b8   : > { %v9215_v7 = vpop.permute.xlu0 %1861  ;;  %v2227_v15 = vsel %vm2195_vm7, 1, %v15418_v45 }
 0x1b9   : > { %15559 = vst [vmem:[#allocation70_spill] sm:$0xff] %v9215_v7  ;;  %2268 = vperm.xlu1 %7299, %v2223_v24   ;;  %v9224_v42 = vpop.permute.xlu1 %1592  ;;  %v928_v24 = vmul.f32 %v8578_v53, %v890_v35 }
 0x1ba   : > { %15562 = vst [vmem:[#allocation9_spill] sm:$0xff] %v9224_v42  ;;  %2537 = vperm.xlu0 %7298, %v2486_v27   ;;  %v9241_v27 = vld [vmem:[%s14691_s2 + $0x60] sm:$0xff] }
 0x1bb   : > { %v7365_v7 = vpop.eup %7364  ;;  %15567 = vst [vmem:[#allocation31_spill] sm:$0xff] %v9241_v27  ;;  %vm14867_vm10 = vcmp.lt.f32.partialorder %v9241_v27, 15.0 }
 0x1bc   : > { %v9234_v39 = vpop.permute.xlu0 %1867  ;;  %v891_v44 = vmul.f32 %v7365_v7, %v15566_v5  ;;  %vm2197_vm11 = vmand %vm15570_vm9, %vm14867_vm10  ;;  %vm15576_vm9 = vcmp.ge.f32.partialorder %v15508_v36, 1.0  ;;  %v15580_v36 = vld [vmem:[#allocation23_spill] sm:$0xff] }
 0x1bd   : > { %15565 = vst [vmem:[#allocation72_spill] sm:$0xff] %v9234_v39  ;;  %2274 = vperm.xlu1 %7299, %v2225_v25   ;;  %v9244_v4 = vpop.permute.xlu1 %1598  ;;  %v2490_v39 = vsel %vm15569_vm12, 1, %v15418_v45  ;;  %v966_v25 = vadd.f32 %v8620_v1, %v928_v24  ;;  %v2229_v11 = vsel %vm2197_vm11, 1, %v15418_v45 }
 0x1be   : > { %15568 = vst [vmem:[#allocation73_spill] sm:$0xff] %v9244_v4  ;;  %2543 = vperm.xlu0 %7298, %v2488_v13   ;;  %v929_v7 = vmul.f32 %v8578_v53, %v891_v44  ;;  %v9262_v13 = vld [vmem:[%s14691_s2 + $0x70] sm:$0xff]  ;;  %v15574_v4 = vld [vmem:[#allocation22_spill] sm:$0xff] }
 0x1bf   : > { %15572 = vst [vmem:[#allocation75_spill] sm:$0xff] %v9262_v13  ;;  %vm15003_vm7 = vcmp.lt.f32.partialorder %v9262_v13, 15.0  ;;  %vm15575_vm12 = vcmp.ge.f32.partialorder %v15574_v4, 1.0  ;;  %v9965_v13 = vld [vmem:[%s14690_s1 + $0xf8] sm:$0xff] }
 0x1c0   : > { %v9255_v35 = vpop.permute.xlu0 %1873  ;;  %v967_v5 = vadd.f32 %v8620_v1, %v929_v7  ;;  %v2492_v24 = vsel %vm15575_vm12, 1, %v15418_v45  ;;  %vm2199_vm10 = vmand %vm15576_vm9, %vm15003_vm7  ;;  %vm15581_vm12 = vcmp.ge.f32.partialorder %v15580_v36, 1.0  ;;  %15787 = vst [vmem:[#allocation169_spill] sm:$0xff] %v9965_v13 }
 0x1c1   : > { %15571 = vst [vmem:[#allocation74_spill] sm:$0xff] %v9255_v35  ;;  %2280 = vperm.xlu1 %7299, %v2227_v15   ;;  %v9265_v53 = vpop.permute.xlu1 %1604  ;;  %v2231_v7 = vsel %vm2199_vm10, 1, %v15418_v45 }
 0x1c2   : > { %15573 = vst [vmem:[#allocation76_spill] sm:$0xff] %v9265_v53  ;;  %2549 = vperm.xlu0 %7298, %v2490_v39   ;;  %v983_v44 = vpack.c.bf16 %v967_v5, %v966_v25  ;;  %v9281_v39 = vld [vmem:[%s14691_s2 + $0x80] sm:$0xff]  ;;  %v2494_v25 = vsel %vm15581_vm12, 1, %v15418_v45  ;;  %v15585_v53 = vld [vmem:[#allocation25_spill] sm:$0xff] }
 0x1c3   : > { %15578 = vst [vmem:[#allocation77_spill] sm:$0xff] %v9281_v39  ;;  %vm14876_vm11 = vcmp.lt.f32.partialorder %v9281_v39, 15.0  ;;  %vm15586_vm10 = vcmp.ge.f32.partialorder %v15585_v53, 1.0 }
 0x1c4   : > { %7276 = vmatmul.mubr.msk.bf16.gmra.mxu1 %vm474_vm0, %v983_v44  ;;  %v9276_v1 = vpop.permute.xlu0 %1879  ;;  %vm2201_vm0 = vmand %vm1455_vm8, %vm14876_vm11  ;;  %v9299_v44 = vld [vmem:[%s14691_s2 + $0x90] sm:$0xff]  ;;  %v2496_v47 = vsel %vm15586_vm10, 1, %v15418_v45 }
 0x1c5   : > { %15577 = vst [vmem:[#allocation22_spill] sm:$0xff] %v9276_v1  ;;  %2286 = vperm.xlu1 %7299, %v2229_v11   ;;  %v9284_v15 = vpop.permute.xlu1 %1610  ;;  %15583 = vst [vmem:[#allocation79_spill] sm:$0xff] %v9299_v44  ;;  %vm14873_vm9 = vcmp.lt.f32.partialorder %v9299_v44, 15.0 }
 0x1c6   : > { %15579 = vst [vmem:[#allocation78_spill] sm:$0xff] %v9284_v15  ;;  %2555 = vperm.xlu0 %7298, %v2492_v24   ;;  %v2233_v24 = vsel %vm2201_vm0, 1, %v15418_v45  ;;  %vm2203_vm8 = vmand %vm1457_vm14, %vm14873_vm9  ;;  %vm15592_vm14 = vcmp.ge.f32.partialorder %v15522_v28, 1.0  ;;  %vm14881_vm9 = vcmp.lt.f32.partialorder %v8677_v43, 15.0 }
 0x1c7   : > { %v2235_v42 = vsel %vm2203_vm8, 1, %v15418_v45  ;;  %vm15596_vm8 = vcmp.ge.f32.partialorder %v15595_v10, 1.0 }
 0x1c8   : > { %v9294_v5 = vpop.permute.xlu0 %1885  ;;  %v2500_v8 = vsel %vm15596_vm8, 1, %v15418_v45 }
 0x1c9   : > { %15582 = vst [vmem:[#allocation23_spill] sm:$0xff] %v9294_v5  ;;  %2292 = vperm.xlu1 %7299, %v2231_v7   ;;  %v9302_v11 = vpop.permute.xlu1 %1616  ;;  %v9317_v7 = vld [vmem:[%s14691_s2 + $0xa0] sm:$0xff] }
 0x1ca   : > { %15584 = vst [vmem:[#allocation80_spill] sm:$0xff] %v9302_v11  ;;  %2561 = vperm.xlu0 %7298, %v2494_v25   ;;  %15588 = vst [vmem:[#allocation81_spill] sm:$0xff] %v9317_v7  ;;  %vm15006_vm12 = vcmp.lt.f32.partialorder %v9317_v7, 15.0  ;;  %v15590_v11 = vld [vmem:[#allocation27_spill] sm:$0xff]  ;;  %v10025_v7 = vld [vmem:[%s14690_s1 + $0x10] sm:$0xff] }
 0x1cb   : > { %vm15591_vm0 = vcmp.ge.f32.partialorder %v15590_v11, 1.0  ;;  %vm2205_vm10 = vmand %vm15592_vm14, %vm15006_vm12  ;;  %vm14884_vm14 = vcmp.lt.f32.partialorder %v8703_v41, 15.0  ;;  %15798 = vst [vmem:[#allocation173_spill] sm:$0xff] %v10025_v7 }
 0x1cc   : > { %v9312_v15 = vpop.permute.xlu0 %1891  ;;  %v2498_v61 = vsel %vm15591_vm0, 1, %v15418_v45  ;;  %vm15597_vm0 = vcmp.ge.f32.partialorder %v8659_v19, 1.0  ;;  %vm2209_vm8 = vmand %vm1463_vm1, %vm14884_vm14  ;;  %vm15028_vm1 = vcmp.lt.f32.partialorder %v8787_v40, 15.0 }
 0x1cd   : > { %15587 = vst [vmem:[#allocation25_spill] sm:$0xff] %v9312_v15  ;;  %2298 = vperm.xlu1 %7299, %v2233_v24   ;;  %v9320_v25 = vpop.permute.xlu1 %1622  ;;  %vm2207_vm11 = vmand %vm15597_vm0, %vm14881_vm9  ;;  %vm14887_vm0 = vcmp.lt.f32.partialorder %v8730_v59, 15.0 }
 0x1ce   : > { %15589 = vst [vmem:[#allocation82_spill] sm:$0xff] %v9320_v25  ;;  %2567 = vperm.xlu0 %7298, %v2496_v47   ;;  %v2237_v47 = vsel %vm2205_vm10, 1, %v15418_v45  ;;  %v15626_v25 = vld [vmem:[#allocation11_spill] sm:$0xff] }
 0x1d0   : > { %v9330_v35 = vpop.permute.xlu0 %1897 }
 0x1d1   : > { %15593 = vst [vmem:[#allocation27_spill] sm:$0xff] %v9330_v35  ;;  %2304 = vperm.xlu1 %7299, %v2235_v42   ;;  %v9333_v24 = vpop.permute.xlu1 %1628 }
 0x1d2   : > { %15594 = vst [vmem:[#allocation83_spill] sm:$0xff] %v9333_v24  ;;  %2573 = vperm.xlu0 %7298, %v2498_v61   ;;  %v2239_v61 = vsel %vm2207_vm11, 1, %v15418_v45  ;;  %v15600_v24 = vld [vmem:[#allocation29_spill] sm:$0xff] }
 0x1d3   : > { %vm15601_vm10 = vcmp.ge.f32.partialorder %v15600_v24, 1.0 }
 0x1d4   : > { %v9343_v28 = vpop.permute.xlu0 %1903  ;;  %v2502_v35 = vsel %vm15601_vm10, 1, %v15418_v45  ;;  %vm15606_vm10 = vcmp.ge.f32.partialorder %v8721_v58, 1.0 }
 0x1d5   : > { %15598 = vst [vmem:[#allocation28_spill] sm:$0xff] %v9343_v28  ;;  %2310 = vperm.xlu1 %7299, %v2237_v47   ;;  %v9346_v42 = vpop.permute.xlu1 %1634  ;;  %vm2211_vm9 = vmand %vm15606_vm10, %vm14887_vm0  ;;  %vm15036_vm10 = vcmp.lt.f32.partialorder %v8804_v23, 15.0 }
 0x1d6   : > { %15599 = vst [vmem:[#allocation84_spill] sm:$0xff] %v9346_v42  ;;  %2579 = vperm.xlu0 %7298, %v2500_v8   ;;  %v2241_v8 = vsel %vm2209_vm8, 1, %v15418_v45  ;;  %v15604_v42 = vld [vmem:[#allocation30_spill] sm:$0xff] }
 0x1d7   : > { %vm15605_vm11 = vcmp.ge.f32.partialorder %v15604_v42, 1.0 }
 0x1d8   : > { %v9356_v19 = vpop.permute.xlu0 %1909  ;;  %v2504_v28 = vsel %vm15605_vm11, 1, %v15418_v45  ;;  %vm15611_vm11 = vcmp.ge.f32.partialorder %v8776_v31, 1.0 }
 0x1d9   : > { %15602 = vst [vmem:[#allocation29_spill] sm:$0xff] %v9356_v19  ;;  %2316 = vperm.xlu1 %7299, %v2239_v61   ;;  %v9359_v47 = vpop.permute.xlu1 %1640  ;;  %vm2213_vm14 = vmand %vm15611_vm11, %vm15028_vm1  ;;  %vm15623_vm11 = vcmp.lt.f32.partialorder %v8170_v32, 15.0 }
 0x1da   : > { %15603 = vst [vmem:[#allocation85_spill] sm:$0xff] %v9359_v47  ;;  %2585 = vperm.xlu0 %7298, %v2502_v35   ;;  %v2243_v35 = vsel %vm2211_vm9, 1, %v15418_v45  ;;  %v15609_v47 = vld [vmem:[#allocation32_spill] sm:$0xff] }
 0x1db   : > { %vm15610_vm8 = vcmp.ge.f32.partialorder %v15609_v47, 1.0 }
 0x1dc   : > { %v9369_v14 = vpop.permute.xlu0 %1915  ;;  %v2506_v19 = vsel %vm15610_vm8, 1, %v15418_v45  ;;  %vm15616_vm8 = vcmp.ge.f32.partialorder %v8799_v17, 1.0  ;;  %v15621_v17 = vld [vmem:[#allocation12_spill] sm:$0xff] }
 0x1dd   : > { %15607 = vst [vmem:[#allocation30_spill] sm:$0xff] %v9369_v14  ;;  %2322 = vperm.xlu1 %7299, %v2241_v8   ;;  %v9372_v61 = vpop.permute.xlu1 %1646  ;;  %v15614_v14 = vld [vmem:[#allocation33_spill] sm:$0xff]  ;;  %vm2215_vm0 = vmand %vm15616_vm8, %vm15036_vm10  ;;  %vm15631_vm8 = vcmp.ge.f32.partialorder %v15630_v50, 1.0 }
 0x1de   : > { %15608 = vst [vmem:[#allocation86_spill] sm:$0xff] %v9372_v61  ;;  %2591 = vperm.xlu0 %7298, %v2504_v28   ;;  %v2245_v28 = vsel %vm2213_vm14, 1, %v15418_v45  ;;  %vm15615_vm9 = vcmp.ge.f32.partialorder %v15614_v14, 1.0  ;;  %vm15622_vm14 = vcmp.ge.f32.partialorder %v15621_v17, 1.0 }
 0x1df   : > { %v2508_v61 = vsel %vm15615_vm9, 1, %v15418_v45  ;;  %vm15628_vm9 = vcmp.lt.f32.partialorder %v8425_v3, 15.0 }
 0x1e0   : > { %v9382_v58 = vpop.permute.xlu0 %1921 }
 0x1e1   : > { %15612 = vst [vmem:[#allocation32_spill] sm:$0xff] %v9382_v58  ;;  %2328 = vperm.xlu1 %7299, %v2243_v35   ;;  %v9385_v8 = vpop.permute.xlu1 %1652  ;;  %v2247_v35 = vsel %vm2215_vm0, 1, %v15418_v45  ;;  %vm15627_vm0 = vcmp.ge.f32.partialorder %v15626_v25, 1.0 }
 0x1e2   : > { %15613 = vst [vmem:[#allocation87_spill] sm:$0xff] %v9385_v8  ;;  %2597 = vperm.xlu0 %7298, %v2506_v19   ;;  %v2806_v19 = vsel %vm14957_vm4, 1, %v15418_v45 }
 0x1e5   : > { %v9395_v31 = vpop.permute.xlu0 %2253  ;;  %2334 = vperm.xlu1 %7299, %v2245_v28   ;;  %v9397_v58 = vpop.permute.xlu1 %1658 }
 0x1e6   : > { %15617 = vst [vmem:[#allocation33_spill] sm:$0xff] %v9395_v31  ;;  %15618 = vst [vmem:[#allocation88_spill] sm:$0xff] %v9397_v58  ;;  %2603 = vperm.xlu0 %7298, %v2508_v61   ;;  %v2477_v31 = vsel %vm15622_vm14, 1, %v15418_v45  ;;  %v2808_v61 = vsel %vm15623_vm11, 1, %v15418_v45  ;;  %vm15635_vm11 = vcmp.lt.f32.partialorder %v15476_v29, 15.0 }
 0x1e9   : > { %v9403_v8 = vpop.permute.xlu0 %2259  ;;  %2340 = vperm.xlu1 %7299, %v2247_v35   ;;  %v9405_v22 = vpop.permute.xlu1 %1828  ;;  %v2479_v35 = vsel %vm15627_vm0, 1, %v15418_v45 }
 0x1ea   : > { %15619 = vst [vmem:[#allocation89_spill] sm:$0xff] %v9403_v8  ;;  %15620 = vst [vmem:[#allocation90_spill] sm:$0xff] %v9405_v22  ;;  %2841 = vperm.xlu0 %7298, %v2806_v19   ;;  %v2810_v19 = vsel %vm15628_vm9, 1, %v15418_v45  ;;  %vm15640_vm9 = vcmp.lt.f32.partialorder %v15483_v30, 15.0 }
 0x1ed   : > { %v9413_v28 = vpop.permute.xlu0 %2265  ;;  %2510 = vperm.xlu1 %7299, %v2477_v31   ;;  %v9415_v58 = vpop.permute.xlu1 %1834  ;;  %v2481_v31 = vsel %vm15631_vm8, 1, %v15418_v45 }
 0x1ee   : > { %15624 = vst [vmem:[#allocation12_spill] sm:$0xff] %v9413_v28  ;;  %15625 = vst [vmem:[#allocation91_spill] sm:$0xff] %v9415_v58  ;;  %2847 = vperm.xlu0 %7298, %v2808_v61   ;;  %v2812_v61 = vsel %vm14955_vm5, 1, %v15418_v45  ;;  %vm15721_vm5 = vcmp.ge.f32.partialorder %v8459_v18, 1.0 }
 0x1f1   : > { %v9423_v22 = vpop.permute.xlu0 %2271  ;;  %2516 = vperm.xlu1 %7299, %v2479_v35   ;;  %v9425_v15 = vpop.permute.xlu1 %1840 }
 0x1f2   : > { %15629 = vst [vmem:[#allocation11_spill] sm:$0xff] %v9423_v22  ;;  %2853 = vperm.xlu0 %7298, %v2810_v19   ;;  %v15633_v22 = vld [vmem:[#allocation36_spill] sm:$0xff]  ;;  %v2814_v19 = vsel %vm15635_vm11, 1, %v15418_v45  ;;  %vm15649_vm11 = vcmp.lt.f32.partialorder %v8968_v62, 15.0  ;;  %v15656_v62 = vld [vmem:[#allocation47_spill] sm:$0xff]  ;;  %vm1927_vm4 = vcmp.eq.s32.totalorder %v9425_v15, 1 }
 0x1f3   : > { %vm15634_vm14 = vcmp.ge.f32.partialorder %v15633_v22, 1.0 }
 0x1f4   : > { %v2483_v35 = vsel %vm15634_vm14, 1, %v15418_v45 }
 0x1f5   : > { %v9433_v58 = vpop.permute.xlu0 %2277  ;;  %2522 = vperm.xlu1 %7299, %v2481_v31   ;;  %v9435_v5 = vpop.permute.xlu1 %1846 }
 0x1f6   : > { %15632 = vst [vmem:[#allocation92_spill] sm:$0xff] %v9433_v58  ;;  %2859 = vperm.xlu0 %7298, %v2812_v61   ;;  %v15638_v58 = vld [vmem:[#allocation39_spill] sm:$0xff]  ;;  %v2816_v61 = vsel %vm15640_vm9, 1, %v15418_v45  ;;  %vm15657_vm9 = vcmp.ge.f32.partialorder %v15656_v62, 1.0 }
 0x1f7   : > { %vm15639_vm0 = vcmp.ge.f32.partialorder %v15638_v58, 1.0 }
 0x1f8   : > { %v2485_v31 = vsel %vm15639_vm0, 1, %v15418_v45 }
 0x1f9   : > { %v9443_v56 = vpop.permute.xlu0 %2283  ;;  %2528 = vperm.xlu1 %7299, %v2483_v35   ;;  %v9445_v28 = vpop.permute.xlu1 %1852 }
 0x1fa   : > { %15636 = vst [vmem:[#allocation93_spill] sm:$0xff] %v9443_v56  ;;  %15637 = vst [vmem:[#allocation94_spill] sm:$0xff] %v9445_v28  ;;  %2865 = vperm.xlu0 %7298, %v2814_v19   ;;  %v15643_v56 = vld [vmem:[#allocation41_spill] sm:$0xff]  ;;  %v2818_v19 = vsel %vm14948_vm2, 1, %v15418_v45 }
 0x1fb   : > { %vm15644_vm8 = vcmp.ge.f32.partialorder %v15643_v56, 1.0 }
 0x1fc   : > { %v2487_v35 = vsel %vm15644_vm8, 1, %v15418_v45  ;;  %vm15658_vm8 = vcmp.lt.f32.partialorder %v9005_v26, 15.0 }
 0x1fd   : > { %v9453_v1 = vpop.permute.xlu0 %2289  ;;  %2534 = vperm.xlu1 %7299, %v2485_v31   ;;  %v9455_v22 = vpop.permute.xlu1 %1858 }
 0x1fe   : > { %15641 = vst [vmem:[#allocation95_spill] sm:$0xff] %v9453_v1  ;;  %15642 = vst [vmem:[#allocation96_spill] sm:$0xff] %v9455_v22  ;;  %2871 = vperm.xlu0 %7298, %v2816_v61   ;;  %v15647_v1 = vld [vmem:[#allocation43_spill] sm:$0xff]  ;;  %v2820_v61 = vsel %vm15649_vm11, 1, %v15418_v45  ;;  %vm15663_vm11 = vcmp.lt.f32.partialorder %v9021_v38, 15.0 }
 0x1ff   : > { %vm15648_vm14 = vcmp.ge.f32.partialorder %v15647_v1, 1.0 }
 0x200   : > { %v2489_v31 = vsel %vm15648_vm14, 1, %v15418_v45  ;;  %vm15662_vm14 = vcmp.ge.f32.partialorder %v15661_v37, 1.0 }
 0x201   : > { %v9463_v28 = vpop.permute.xlu0 %2295  ;;  %2540 = vperm.xlu1 %7299, %v2487_v35   ;;  %v9465_v58 = vpop.permute.xlu1 %1864 }
 0x202   : > { %15645 = vst [vmem:[#allocation97_spill] sm:$0xff] %v9463_v28  ;;  %15646 = vst [vmem:[#allocation98_spill] sm:$0xff] %v9465_v58  ;;  %2877 = vperm.xlu0 %7298, %v2818_v19   ;;  %v15652_v28 = vld [vmem:[#allocation45_spill] sm:$0xff]  ;;  %v2822_v19 = vsel %vm14947_vm6, 1, %v15418_v45  ;;  %vm15707_vm6 = vcmp.ge.f32.partialorder %v8425_v3, 1.0 }
 0x203   : > { %vm15653_vm0 = vcmp.ge.f32.partialorder %v15652_v28, 1.0 }
 0x204   : > { %v2491_v35 = vsel %vm15653_vm0, 1, %v15418_v45 }
 0x205   : > { %v9473_v22 = vpop.permute.xlu0 %2301  ;;  %2546 = vperm.xlu1 %7299, %v2489_v31   ;;  %v9475_v56 = vpop.permute.xlu1 %1870  ;;  %v2493_v31 = vsel %vm15657_vm9, 1, %v15418_v45  ;;  %vm15668_vm9 = vcmp.lt.f32.partialorder %v9037_v57, 15.0 }
 0x206   : > { %15650 = vst [vmem:[#allocation99_spill] sm:$0xff] %v9473_v22  ;;  %15651 = vst [vmem:[#allocation100_spill] sm:$0xff] %v9475_v56  ;;  %2883 = vperm.xlu0 %7298, %v2820_v61   ;;  %v2824_v61 = vsel %vm15658_vm8, 1, %v15418_v45  ;;  %v2828_v37 = vsel %vm15668_vm9, 1, %v15418_v45  ;;  %vm15671_vm8 = vcmp.ge.f32.partialorder %v8677_v43, 1.0  ;;  %vm14989_vm9 = vcmp.lt.f32.partialorder %v9552_v6, 15.0 }
 0x209   : > { %v9483_v58 = vpop.permute.xlu0 %2307  ;;  %2552 = vperm.xlu1 %7299, %v2491_v35   ;;  %v9485_v1 = vpop.permute.xlu1 %1876  ;;  %v2495_v35 = vsel %vm15662_vm14, 1, %v15418_v45  ;;  %vm15672_vm14 = vcmp.lt.f32.partialorder %v9053_v52, 15.0  ;;  %v1403_v52 = vlaneseq }
 0x20a   : > { %15654 = vst [vmem:[#allocation101_spill] sm:$0xff] %v9483_v58  ;;  %15655 = vst [vmem:[#allocation102_spill] sm:$0xff] %v9485_v1  ;;  %2889 = vperm.xlu0 %7298, %v2822_v19   ;;  %v2826_v19 = vsel %vm15663_vm11, 1, %v15418_v45  ;;  %vm15676_vm11 = vcmp.ge.f32.partialorder %v8703_v41, 1.0 }
 0x20d   : > { %v9493_v56 = vpop.permute.xlu0 %2313  ;;  %2558 = vperm.xlu1 %7299, %v2493_v31   ;;  %v9495_v28 = vpop.permute.xlu1 %1882  ;;  %v15666_v31 = vld [vmem:[#allocation51_spill] sm:$0xff] }
 0x20e   : > { %15659 = vst [vmem:[#allocation103_spill] sm:$0xff] %v9493_v56  ;;  %15660 = vst [vmem:[#allocation104_spill] sm:$0xff] %v9495_v28  ;;  %2895 = vperm.xlu0 %7298, %v2824_v61   ;;  %vm15667_vm0 = vcmp.ge.f32.partialorder %v15666_v31, 1.0  ;;  %v2830_v31 = vsel %vm15672_vm14, 1, %v15418_v45  ;;  %vm15686_vm14 = vcmp.lt.f32.partialorder %v9105_v46, 15.0 }
 0x20f   : > { %v2497_v61 = vsel %vm15667_vm0, 1, %v15418_v45  ;;  %vm15679_vm0 = vcmp.ge.f32.partialorder %v8730_v59, 1.0  ;;  %v2836_v22 = vsel %vm15686_vm14, 1, %v15418_v45  ;;  %vm15695_vm14 = vcmp.ge.f32.partialorder %v8804_v23, 1.0 }
 0x210   : > { %v7249_v1 = vpop.f32.mrf.mxu0 }
 0x211   : > { %v9503_v62 = vpop.permute.xlu0 %2319  ;;  %2564 = vperm.xlu1 %7299, %v2495_v35   ;;  %v9505_v26 = vpop.permute.xlu1 %1888 }
 0x212   : > { %15664 = vst [vmem:[#allocation105_spill] sm:$0xff] %v9503_v62  ;;  %15665 = vst [vmem:[#allocation106_spill] sm:$0xff] %v9505_v26  ;;  %2901 = vperm.xlu0 %7298, %v2826_v19   ;;  %v9507_v56 = vpop.f32.mrf.mxu0  ;;  %v2499_v19 = vsel %vm15671_vm8, 1, %v15418_v45  ;;  %vm15685_vm8 = vcmp.ge.f32.partialorder %v8787_v40, 1.0 }
 0x214   : > { %v7250_v28 = vpop.f32.mrf.mxu0 }
 0x215   : > { %v9515_v38 = vpop.permute.xlu0 %2325  ;;  %2570 = vperm.xlu1 %7299, %v2497_v61   ;;  %v9517_v58 = vpop.permute.xlu1 %1894  ;;  %v2832_v61 = vsel %vm14937_vm13, 1, %v15418_v45 }
 0x216   : > { %15669 = vst [vmem:[#allocation107_spill] sm:$0xff] %v9515_v38  ;;  %15670 = vst [vmem:[#allocation108_spill] sm:$0xff] %v9517_v58  ;;  %2907 = vperm.xlu0 %7298, %v2828_v37   ;;  %v1081_v35 = vpop.f32.mrf.mxu0  ;;  %v2501_v37 = vsel %vm15676_vm11, 1, %v15418_v45  ;;  %vm15687_vm11 = vcmp.ge.f32.partialorder %v8130_v60, 1.0 }
 0x218   : > { %v9529_v38 = vpop.f32.mrf.mxu0 }
 0x219   : > { %v9525_v26 = vpop.permute.xlu0 %2331  ;;  %2576 = vperm.xlu1 %7299, %v2499_v19   ;;  %v9527_v57 = vpop.permute.xlu1 %1900  ;;  %15675 = vst [vmem:[#allocation111_spill] sm:$0xff] %v9529_v38  ;;  %v2507_v38 = vsel %vm15695_vm14, 1, %v15418_v45  ;;  %vm15703_vm14 = vcmp.lt.f32.partialorder %v9130_v34, 15.0 }
 0x21a   : > { %15673 = vst [vmem:[#allocation109_spill] sm:$0xff] %v9525_v26  ;;  %15674 = vst [vmem:[#allocation110_spill] sm:$0xff] %v9527_v57  ;;  %2913 = vperm.xlu0 %7298, %v2830_v31   ;;  %v1094_v19 = vpop.f32.mrf.mxu0  ;;  %v2503_v31 = vsel %vm15679_vm0, 1, %v15418_v45  ;;  %v2834_v57 = vsel %vm14936_vm15, 1, %v15418_v45 }
 0x21b   : > { %vm3098_vm0 = vmand %vm14989_vm9, %vm15687_vm11  ;;  %vm15696_vm11 = vcmp.ge.f32.partialorder %v8170_v32, 1.0 }
 0x21c   : > { %v3130_v51 = vsel %vm3098_vm0, 1, %v15418_v45  ;;  %vm1276_vm0 = vcmask 1040384  }
 0x21d   : > { %v9537_v58 = vpop.permute.xlu0 %2337  ;;  %2582 = vperm.xlu1 %7299, %v2501_v37   ;;  %v9539_v62 = vpop.permute.xlu1 %1906  ;;  %v9558_v37 = vld [vmem:[%s14695_s6] ss:$0 sm:$0xff] }
 0x21e   : > { %15677 = vst [vmem:[#allocation112_spill] sm:$0xff] %v9537_v58  ;;  %15678 = vst [vmem:[#allocation113_spill] sm:$0xff] %v9539_v62  ;;  %2919 = vperm.xlu0 %7298, %v2832_v61   ;;  %v1404_v61 = vshrl.u32 %v1403_v52, 7  ;;  %v9563_v12 = vadd.f32 %v9558_v37, %v1081_v35  ;;  %v2505_v62 = vsel %vm15685_vm8, 1, %v15418_v45  ;;  %v9585_v35 = vld [vmem:[%s14690_s1 + $0x18] sm:$0xff] }
 0x21f   : > { %15690 = vst [vmem:[#allocation121_spill] sm:$0xff] %v9585_v35  ;;  %vm14986_vm8 = vcmp.lt.f32.partialorder %v9585_v35, 15.0  ;;  %v2805_v35 = vsel %vm15703_vm14, 1, %v15418_v45  ;;  %vm15716_vm14 = vcmp.lt.f32.partialorder %v9150_v20, 15.0 }
 0x220   : > { %15683 = vst [vmem:[#allocation117_spill] sm:$0xff] %v9563_v12  ;;  %v9590_v46 = vsub.s32 0, %v1404_v61  ;;  %vm3100_vm15 = vmand %vm14986_vm8, %vm15696_vm11  ;;  %v15705_v6 = vrot.slane %v9563_v12, 7  ;;  %vm14969_vm11 = vcmask 1046528   ;;  %vm15770_vm8 = vcmp.lt.f32.partialorder %v9220_v48, 15.0 }
 0x221   : > { %v9547_v26 = vpop.permute.xlu0 %2343  ;;  %2588 = vperm.xlu1 %7299, %v2503_v31   ;;  %v9560_v58 = vpop.permute.xlu1 %1912  ;;  %v9588_v31 = vsub.s32 1, %v1404_v61  ;;  %v3132_v8 = vsel %vm3100_vm15, 1, %v15418_v45 }
 0x222   : > { %15680 = vst [vmem:[#allocation114_spill] sm:$0xff] %v9547_v26  ;;  %15682 = vst [vmem:[#allocation116_spill] sm:$0xff] %v9560_v58  ;;  %2925 = vperm.xlu0 %7298, %v2834_v57   ;;  %v9565_v26 = vpop.f32.mrf.mxu0  ;;  %v9578_v57 = vadd.f32 %v7249_v1, %v9558_v37  ;;  %v1205_v1 = vld [vmem:[%s14696_s7] sm:$0x7] }
 0x223   : > { %15684 = vst [vmem:[#allocation118_spill] sm:$0xff] %v9565_v26  ;;  %15691 = vst [vmem:[#allocation122_spill] sm:$0xff] %v9588_v31  ;;  %v9619_v58 = vrot.slane %v1205_v1, %v9588_v31  ;;  %v9622_v32 = vrot.slane %v1205_v1, %v9590_v46 }
 0x224   : > { %15688 = vst [vmem:[#allocation119_spill] sm:$0xff] %v9578_v57  ;;  %15692 = vst [vmem:[#allocation123_spill] sm:$0xff] %v9590_v46  ;;  %v1097_v26 = vpop.f32.mrf.mxu0  ;;  %v15704_v21 = vrot.slane %v9578_v57, 7  ;;  %v15839_v40 = vrot.slane %v9578_v57, 7 }
 0x225   : > { %v9580_v52 = vpop.permute.xlu0 %2513  ;;  %2594 = vperm.xlu1 %7299, %v2505_v62   ;;  %v9592_v60 = vpop.permute.xlu1 %1918  ;;  %15699 = vst [vmem:[#allocation128_spill] sm:$0xff] %v9622_v32 }
 0x226   : > { %15689 = vst [vmem:[#allocation120_spill] sm:$0xff] %v9580_v52  ;;  %15693 = vst [vmem:[#allocation124_spill] sm:$0xff] %v9592_v60  ;;  %2931 = vperm.xlu0 %7298, %v2836_v22   ;;  %v9598_v52 = vadd.f32 %v7250_v28, %v9558_v37  ;;  %v9615_v28 = vld [vmem:[%s14690_s1 + $0x28] sm:$0xff]  ;;  %v9624_v60 = vsub.s32 2, %v1404_v61  ;;  %v9629_v50 = vpop.f32.mrf.mxu0  ;;  %v9640_v61 = vsel %vm1276_vm0, %v15705_v6, %v15704_v21 }
 0x227   : > { %15698 = vst [vmem:[#allocation127_spill] sm:$0xff] %v9615_v28  ;;  %vm14975_vm13 = vcmp.lt.f32.partialorder %v9615_v28, 15.0  ;;  %15702 = vst [vmem:[#allocation131_spill] sm:$0xff] %v9629_v50  ;;  %v1411_v21 = vmul.f32 %v9622_v32, %v9640_v61  ;;  %v1767_v50 = vmul.f32 %v9619_v58, %v9578_v57 }
 0x228   : > { %15694 = vst [vmem:[#allocation125_spill] sm:$0xff] %v9598_v52  ;;  %15700 = vst [vmem:[#allocation129_spill] sm:$0xff] %v9624_v60  ;;  %v9665_v34 = vrot.slane %v1205_v1, %v9624_v60  ;;  %v15718_v1 = vrot.slane %v9578_v57, 1 }
 0x229   : > { %v9610_v22 = vpop.permute.xlu0 %2519  ;;  %2600 = vperm.xlu1 %7299, %v2507_v38   ;;  %v9626_v62 = vpop.permute.xlu1 %2250  ;;  %15706 = vst [vmem:[#allocation132_spill] sm:$0xff] %v9640_v61  ;;  %vm9646_vm2 = vmand %vm14975_vm13, %vm15707_vm6  ;;  %v9653_v38 = vld [vmem:[%s14690_s1 + $0x38] sm:$0xff]  ;;  %vm1667_vm6 = vcmp.eq.s32.totalorder %v9133_v16, 1  ;;  %v2807_v61 = vsel %vm15716_vm14, 1, %v15418_v45  ;;  %v1959_v18 = vsel %vm1927_vm4, %v1767_v50, 0.0  ;;  %vm15729_vm4 = vcmp.ge.f32.partialorder %v15476_v29, 1.0 }
 0x22a   : > { %15697 = vst [vmem:[#allocation126_spill] sm:$0xff] %v9610_v22  ;;  %15701 = vst [vmem:[#allocation130_spill] sm:$0xff] %v9626_v62  ;;  %3165 = vperm.xlu0 %7298, %v3130_v51   ;;  %vm14962_vm15 = vcmp.lt.f32.partialorder %v9653_v38, 15.0  ;;  %v9662_v62 = vadd.f32 %v9558_v37, %v1094_v19  ;;  %v9672_v22 = vpop.f32.mrf.mxu0  ;;  %v15717_v19 = vrot.slane %v9598_v52, 1  ;;  %v1699_v16 = vsel %vm1667_vm6, %v1411_v21, 0.0 }
 0x22b   : > { %15710 = vst [vmem:[#allocation133_spill] sm:$0xff] %v9653_v38  ;;  %15713 = vst [vmem:[#allocation136_spill] sm:$0xff] %v9665_v34  ;;  %vm15728_vm6 = vcmp.lt.f32.partialorder %v9166_v54, 15.0  ;;  %v14964_v51 = vrot.slane %v9598_v52, 7 }
 0x22c   : > { %15712 = vst [vmem:[#allocation135_spill] sm:$0xff] %v9662_v62  ;;  %15715 = vst [vmem:[#allocation138_spill] sm:$0xff] %v9672_v22  ;;  %v9712_v15 = vpop.f32.mrf.mxu0  ;;  %v15734_v50 = vrot.slane %v9662_v62, 7  ;;  %v1769_v20 = vmul.f32 %v9619_v58, %v9662_v62  ;;  %v15740_v29 = vrot.slane %v9662_v62, 1 }
 0x22d   : > { %v9657_v6 = vpop.permute.xlu0 %2525  ;;  %2838 = vperm.xlu1 %7299, %v2805_v35   ;;  %v9667_v3 = vpop.permute.xlu1 %2256  ;;  %v9682_v35 = vsel %vm14969_vm11, %v15718_v1, %v15717_v19  ;;  %vm9694_vm14 = vmand %vm14962_vm15, %vm15721_vm5  ;;  %15727 = vst [vmem:[#allocation144_spill] sm:$0xff] %v9712_v15 }
 0x22e   : > { %15711 = vst [vmem:[#allocation134_spill] sm:$0xff] %v9657_v6  ;;  %15714 = vst [vmem:[#allocation137_spill] sm:$0xff] %v9667_v3  ;;  %3171 = vperm.xlu0 %7298, %v3132_v8   ;;  %v3134_v8 = vsel %vm9646_vm2, 1, %v15418_v45  ;;  %v9688_v3 = vadd.f32 %v9558_v37, %v1097_v26  ;;  %v9706_v26 = vld [vmem:[%s14690_s1 + $0x48] sm:$0xff]  ;;  %v2125_v22 = vmul.f32 %v9665_v34, %v9682_v35 }
 0x22f   : > { %15719 = vst [vmem:[#allocation139_spill] sm:$0xff] %v9682_v35  ;;  %15726 = vst [vmem:[#allocation143_spill] sm:$0xff] %v9706_v26  ;;  %vm14967_vm2 = vcmp.lt.f32.partialorder %v9706_v26, 15.0  ;;  %v1991_v6 = vadd.f32 %v1959_v18, %v1699_v16  ;;  %v9745_v54 = vsel %vm1276_vm0, %v14964_v51, %v15734_v50 }
 0x230   : > { %15720 = vst [vmem:[#allocation140_spill] sm:$0xff] %v9688_v3  ;;  %vm9728_vm15 = vmand %vm14967_vm2, %vm15729_vm4  ;;  %vm1929_vm4 = vcmp.eq.s32.totalorder %v9435_v5, 1  ;;  %v15739_v51 = vrot.slane %v9688_v3, 1 }
 0x231   : > { %v9699_v19 = vpop.f32.mrf.mxu1  ;;  %v9701_v1 = vpop.permute.xlu0 %2531  ;;  %2844 = vperm.xlu1 %7299, %v2807_v61   ;;  %v3136_v61 = vsel %vm9694_vm14, 1, %v15418_v45  ;;  %15735 = vst [vmem:[#allocation147_spill] sm:$0xff] %v9745_v54 }
 0x232   : > { %15724 = vst [vmem:[#allocation141_spill] sm:$0xff] %v9699_v19  ;;  %15725 = vst [vmem:[#allocation142_spill] sm:$0xff] %v9701_v1  ;;  %v2263_v21 = vpop.permute.xlu1 %2262  ;;  %3177 = vperm.xlu0 %7298, %v3134_v8   ;;  %v2809_v19 = vsel %vm15728_vm6, 1, %v15418_v45  ;;  %vm1669_vm6 = vcmp.eq.s32.totalorder %v9187_v0, 1 }
 0x233   : > { %vm2349_vm5 = vcmp.eq.s32.totalorder %v2263_v21, 1  ;;  %v9714_v1 = vpop.f32.mrf.mxu1 }
 0x234   : > { %v2381_v35 = vsel %vm2349_vm5, %v2125_v22, 0.0  ;;  %vm15738_vm5 = vcmp.lt.f32.partialorder %v9184_v2, 15.0  ;;  %v1961_v2 = vsel %vm1929_vm4, %v1769_v20, 0.0 }
 0x235   : > { %v9732_v8 = vadd.f32 %v2381_v35, %v1991_v6  ;;  %v9734_v16 = vpop.permute.xlu0 %2537  ;;  %v9738_v21 = vpop.f32.mrf.mxu1  ;;  %2850 = vperm.xlu1 %7299, %v2809_v19   ;;  %v9750_v6 = vld [vmem:[%s14690_s1 + $0x58] sm:$0xff]  ;;  %v1413_v19 = vmul.f32 %v9622_v32, %v9745_v54  ;;  %v2811_v50 = vsel %vm15738_vm5, 1, %v15418_v45  ;;  %v15838_v54 = vrot.slane %v9598_v52, 7 }
 0x236   : > { %15733 = vst [vmem:[#allocation146_spill] sm:$0xff] %v9734_v16  ;;  %v2269_v22 = vpop.permute.xlu1 %2268  ;;  %3183 = vperm.xlu0 %7298, %v3136_v61   ;;  %15736 = vst [vmem:[#allocation148_spill] sm:$0xff] %v9750_v6  ;;  %vm14974_vm14 = vcmp.lt.f32.partialorder %v9750_v6, 15.0  ;;  %v9753_v35 = vpop.f32.mrf.mxu0  ;;  %v3138_v61 = vsel %vm9728_vm15, 1, %v15418_v45  ;;  %v9771_v16 = vsel %vm14969_vm11, %v15740_v29, %v15739_v51  ;;  %vm15744_vm15 = vcmp.ge.f32.partialorder %v15483_v30, 1.0  ;;  %v9796_v51 = vld [vmem:[%s14690_s1 + $0x78] sm:$0xff] }
 0x237   : > { %15732 = vst [vmem:[#allocation145_spill] sm:$0xff] %v9732_v8  ;;  %15737 = vst [vmem:[#allocation149_spill] sm:$0xff] %v9753_v35  ;;  %vm2351_vm2 = vcmp.eq.s32.totalorder %v2269_v22, 1  ;;  %v9776_v35 = vld [vmem:[%s14690_s1 + $0x68] sm:$0xff]  ;;  %v1701_v18 = vsel %vm1669_vm6, %v1413_v19, 0.0  ;;  %v2127_v5 = vmul.f32 %v9665_v34, %v9771_v16  ;;  %vm14977_vm6 = vcmp.lt.f32.partialorder %v9796_v51, 15.0  ;;  %v9799_v20 = vpop.f32.mrf.mxu1 }
 0x238   : > { %15741 = vst [vmem:[#allocation150_spill] sm:$0xff] %v9771_v16  ;;  %15742 = vst [vmem:[#allocation151_spill] sm:$0xff] %v9776_v35  ;;  %vm14984_vm5 = vcmp.lt.f32.partialorder %v9776_v35, 15.0  ;;  %v1993_v0 = vadd.f32 %v1961_v2, %v1701_v18  ;;  %v9809_v30 = vpop.f32.mrf.mxu0  ;;  %v2813_v2 = vsel %vm14976_vm3, 1, %v15418_v45  ;;  %v10182_v8 = vld [vmem:[%s14690_s1 + $0x50] sm:$0xff] }
 0x239   : > { %v9783_v15 = vpop.permute.xlu0 %2543  ;;  %vm9789_vm11 = vmand %vm14974_vm14, %vm15744_vm15  ;;  %15747 = vst [vmem:[#allocation153_spill] sm:$0xff] %v9796_v51  ;;  %2856 = vperm.xlu1 %7299, %v2811_v50   ;;  %v2383_v16 = vsel %vm2351_vm2, %v2127_v5, 0.0  ;;  %vm15750_vm15 = vcmp.ge.f32.partialorder %v15491_v49, 1.0  ;;  %vm15755_vm2 = vcmp.ge.f32.partialorder %v15574_v4, 1.0  ;;  %v9870_v49 = vpop.f32.mrf.mxu1  ;;  %v9915_v50 = vadd.f32 %v9558_v37, %v9507_v56  ;;  %v9934_v56 = vld [vmem:[%s14690_s1 + $0xe8] sm:$0xff] }
 0x23a   : > { %15743 = vst [vmem:[#allocation152_spill] sm:$0xff] %v9783_v15  ;;  %v9801_v19 = vpop.permute.xlu1 %2274  ;;  %3189 = vperm.xlu0 %7298, %v3138_v61   ;;  %v9806_v15 = vld [vmem:[%s14690_s1 + $0x88] sm:$0xff]  ;;  %vm9819_vm14 = vmand %vm14984_vm5, %vm15750_vm15  ;;  %v9826_v61 = vld [vmem:[%s14690_s1 + $0x98] sm:$0xff]  ;;  %v9829_v22 = vadd.f32 %v2383_v16, %v1993_v0  ;;  %v3140_v18 = vsel %vm9789_vm11, 1, %v15418_v45  ;;  %vm15760_vm11 = vcmp.ge.f32.partialorder %v15580_v36, 1.0  ;;  %v9942_v5 = vsel %vm15003_vm7, 1, %v15418_v45 }
 0x23b   : > { %15748 = vst [vmem:[#allocation154_spill] sm:$0xff] %v9801_v19  ;;  %15749 = vst [vmem:[#allocation155_spill] sm:$0xff] %v9806_v15  ;;  %vm14980_vm4 = vcmp.lt.f32.partialorder %v9806_v15, 15.0  ;;  %vm14987_vm13 = vcmp.lt.f32.partialorder %v9826_v61, 15.0  ;;  %v9845_v19 = vld [vmem:[%s14690_s1 + $0xa8] sm:$0xff]  ;;  %v9864_v0 = vld [vmem:[%s14690_s1 + $0xb8] sm:$0xff]  ;;  %v9968_v4 = vpop.f32.mrf.mxu1  ;;  %v10191_v51 = vsel %vm1276_vm0, %v15839_v40, %v15838_v54 }
 0x23c   : > { %15753 = vst [vmem:[#allocation156_spill] sm:$0xff] %v9826_v61  ;;  %15754 = vst [vmem:[#allocation157_spill] sm:$0xff] %v9829_v22  ;;  %vm14993_vm3 = vcmp.lt.f32.partialorder %v9845_v19, 15.0  ;;  %v1206_v16 = vld [vmem:[%s14696_s7 + $0x4] sm:$0x7]  ;;  %v9885_v15 = vld [vmem:[%s14690_s1 + $0xc8] sm:$0xff] }
 0x23d   : > { %vm9838_vm15 = vmand %vm14977_vm6, %vm15755_vm2  ;;  %15758 = vst [vmem:[#allocation158_spill] sm:$0xff] %v9845_v19  ;;  %v9851_v29 = vpop.permute.xlu0 %2549  ;;  %vm15160_vm6 = vcmp.lt.f32.partialorder %v9864_v0, 15.0  ;;  %v9868_v9 = vrot.slane %v1206_v16, %v9590_v46  ;;  %2862 = vperm.xlu1 %7299, %v2813_v2   ;;  %vm15053_vm5 = vcmp.lt.f32.partialorder %v9885_v15, 15.0  ;;  %v9888_v46 = vpop.f32.mrf.mxu0  ;;  %v3142_v2 = vsel %vm9819_vm14, 1, %v15418_v45  ;;  %v15852_v40 = vld [vmem:[#allocation39_spill] sm:$0xff] }
 0x23e   : > { %15759 = vst [vmem:[#allocation159_spill] sm:$0xff] %v9851_v29  ;;  %vm9857_vm2 = vmand %vm14980_vm4, %vm15760_vm11  ;;  %v9872_v36 = vpop.permute.xlu1 %2280  ;;  %vm15765_vm11 = vcmp.ge.f32.partialorder %v15585_v53, 1.0  ;;  %3195 = vperm.xlu0 %7298, %v3140_v18   ;;  %v2815_v53 = vsel %vm15770_vm8, 1, %v15418_v45  ;;  %v9907_v18 = vld [vmem:[%s14690_s1 + $0xd8] sm:$0xff]  ;;  %v9911_v48 = vrot.slane %v1206_v16, %v9624_v60  ;;  %vm15777_vm8 = vcmp.lt.f32.partialorder %v9241_v27, 15.0  ;;  %v9998_v29 = vld [vmem:[%s14690_s1] sm:$0xff]  ;;  %v10100_v61 = vpop.f32.mrf.mxu1 }
 0x23f   : > { %15763 = vst [vmem:[#allocation160_spill] sm:$0xff] %v9864_v0  ;;  %15764 = vst [vmem:[#allocation161_spill] sm:$0xff] %v9872_v36  ;;  %vm15009_vm9 = vcmp.lt.f32.partialorder %v9907_v18, 15.0  ;;  %vm15778_vm14 = vcmp.ge.f32.partialorder %v15595_v10, 1.0  ;;  %v9947_v10 = vsel %vm9857_vm2, 1, %v15418_v45  ;;  %vm15037_vm2 = vcmp.lt.f32.partialorder %v9965_v13, 15.0 }
 0x240   : > { %vm9878_vm4 = vmand %vm14987_vm13, %vm15765_vm11  ;;  %15768 = vst [vmem:[#allocation162_spill] sm:$0xff] %v9885_v15  ;;  %vm15771_vm11 = vcmp.ge.f32.partialorder %v15590_v11, 1.0  ;;  %v2817_v11 = vsel %vm15777_vm8, 1, %v15418_v45  ;;  %vm15784_vm8 = vcmp.ge.f32.partialorder %v15600_v24, 1.0  ;;  %v10004_v36 = vsel %vm15006_vm12, 1, %v15418_v45 }
 0x241   : > { %15769 = vst [vmem:[#allocation163_spill] sm:$0xff] %v9888_v46  ;;  %vm9900_vm13 = vmand %vm14993_vm3, %vm15771_vm11  ;;  %v3144_v46 = vsel %vm9838_vm15, 1, %v15418_v45  ;;  %vm15008_vm3 = vcmp.lt.f32.partialorder %v9934_v56, 15.0  ;;  %v9937_v27 = vpop.permute.xlu0 %2555  ;;  %vm15783_vm15 = vcmp.lt.f32.partialorder %v9281_v39, 15.0  ;;  %2868 = vperm.xlu1 %7299, %v2815_v53   ;;  %v9975_v24 = vsel %vm9878_vm4, 1, %v15418_v45  ;;  %v10081_v53 = vld [vmem:[%s14690_s1 + $0x20] sm:$0xff] }
 0x242   : > { %15774 = vst [vmem:[#allocation164_spill] sm:$0xff] %v9907_v18  ;;  %15775 = vst [vmem:[#allocation165_spill] sm:$0xff] %v9911_v48  ;;  %v9952_v60 = vsel %vm15783_vm15, 1, %v15418_v45  ;;  %v9970_v39 = vpop.permute.xlu1 %2286  ;;  %vm15789_vm15 = vcmp.lt.f32.partialorder %v9299_v44, 15.0  ;;  %v9985_v0 = vsel %vm9900_vm13, 1, %v15418_v45  ;;  %vm15029_vm4 = vcmp.lt.f32.partialorder %v9998_v29, 15.0  ;;  %3201 = vperm.xlu0 %7298, %v3142_v2  }
 0x243   : > { %15776 = vst [vmem:[#allocation166_spill] sm:$0xff] %v9915_v50  ;;  %vm9927_vm11 = vmand %vm15160_vm6, %vm15778_vm14  ;;  %v9980_v15 = vsel %vm15789_vm15, 1, %v15418_v45  ;;  %vm15794_vm13 = vcmp.ge.f32.partialorder %v15609_v47, 1.0  ;;  %v10020_v2 = vrot.slane %v1206_v16, %v9588_v31  ;;  %vm15800_vm12 = vcmp.lt.f32.partialorder %v8703_v41, 15.0  ;;  %v15823_v44 = vld [vmem:[#allocation89_spill] sm:$0xff]  ;;  %v10162_v47 = vld [vmem:[%s14690_s1 + $0x40] sm:$0xff] }
 0x244   : > { %15781 = vst [vmem:[#allocation167_spill] sm:$0xff] %v9934_v56  ;;  %15782 = vst [vmem:[#allocation168_spill] sm:$0xff] %v9937_v27  ;;  %v10043_v31 = vsel %vm15800_vm12, 1, %v15418_v45  ;;  %v10095_v41 = vadd.f32 %v9809_v30, %v9558_v37  ;;  %v10121_v30 = vsel %vm15036_vm10, 1, %v15418_v45  ;;  %v15842_v48 = vrot.slane %v9563_v12, 1 }
 0x245   : > { %vm9958_vm14 = vmand %vm15053_vm5, %vm15784_vm8  ;;  %15788 = vst [vmem:[#allocation170_spill] sm:$0xff] %v9970_v39  ;;  %vm15790_vm8 = vcmp.ge.f32.partialorder %v15604_v42, 1.0  ;;  %v7262_v39 = vpop.f32.mrf.mxu0  ;;  %v10009_v42 = vsel %vm9927_vm11, 1, %v15418_v45  ;;  %vm1666_vm11 = vcmp.eq.s32.totalorder %v9112_v63, 1  ;;  %v10053_v56 = vpop.permute.xlu0 %2561  ;;  %2874 = vperm.xlu1 %7299, %v2817_v11   ;;  %v10131_v11 = vld [vmem:[%s14690_s1 + $0x30] sm:$0xff] }
 0x246   : > { %vm9991_vm7 = vmand %vm15009_vm9, %vm15790_vm8  ;;  %15793 = vst [vmem:[#allocation171_spill] sm:$0xff] %v9998_v29  ;;  %vm15030_vm8 = vcmp.lt.f32.partialorder %v10025_v7, 15.0  ;;  %v10038_v16 = vsel %vm9958_vm14, 1, %v15418_v45  ;;  %vm15804_vm14 = vcmp.lt.f32.partialorder %v8730_v59, 15.0  ;;  %v15809_v59 = vrot.slane %v9563_v12, 7  ;;  %v10102_v22 = vpop.permute.xlu1 %2292  ;;  %3207 = vperm.xlu0 %7298, %v3144_v46   ;;  %v15822_v46 = vld [vmem:[#allocation64_spill] sm:$0xff] }
 0x247   : > { %vm10015_vm15 = vmand %vm15008_vm3, %vm15794_vm13  ;;  %15797 = vst [vmem:[#allocation172_spill] sm:$0xff] %v10020_v2  ;;  %vm15799_vm13 = vcmp.lt.f32.partialorder %v8677_v43, 15.0  ;;  %vm15801_vm3 = vcmp.ge.f32.partialorder %v15614_v14, 1.0  ;;  %v10058_v27 = vsel %vm9991_vm7, 1, %v15418_v45  ;;  %v10063_v18 = vsel %vm15804_vm14, 1, %v15418_v45  ;;  %v15825_v7 = vld [vmem:[#allocation121_spill] sm:$0xff] }
 0x248   : > { %v10033_v19 = vsel %vm15799_vm13, 1, %v15418_v45  ;;  %vm10049_vm9 = vmand %vm15037_vm2, %vm15801_vm3  ;;  %v10068_v14 = vsel %vm15028_vm1, 1, %v15418_v45  ;;  %vm15805_vm3 = vcmp.ge.f32.partialorder %v15621_v17, 1.0  ;;  %15808 = vst [vmem:[#allocation174_spill] sm:$0xff] %v10081_v53  ;;  %vm15051_vm7 = vcmp.lt.f32.partialorder %v10081_v53, 15.0  ;;  %v15870_v63 = vld [vmem:[#allocation12_spill] sm:$0xff] }
 0x249   : > { %vm10074_vm12 = vmand %vm15029_vm4, %vm15805_vm3  ;;  %vm1926_vm13 = vcmp.eq.s32.totalorder %v9145_v55, 1  ;;  %v15810_v17 = vrot.slane %v9915_v50, 7  ;;  %15812 = vst [vmem:[#allocation176_spill] sm:$0xff] %v10095_v41  ;;  %v10098_v43 = vadd.f32 %v7262_v39, %v9558_v37  ;;  %vm15815_vm14 = vcmp.ge.f32.partialorder %v15626_v25, 1.0  ;;  %v15818_v39 = vld [vmem:[#allocation115_spill] sm:$0xff]  ;;  %2880 = vperm.xlu1 %7299, %v9942_v5  }
 0x24a   : > { %15814 = vst [vmem:[#allocation178_spill] sm:$0xff] %v10102_v22  ;;  %vm10108_vm3 = vmand %vm15030_vm8, %vm15815_vm14  ;;  %vm1928_vm1 = vcmp.eq.s32.totalorder %v9161_v33, 1  ;;  %vm15819_vm4 = vcmp.lt.f32.partialorder %v15818_v39, 15.0  ;;  %vm15052_vm14 = vcmp.lt.f32.partialorder %v10131_v11, 15.0  ;;  %vm2348_vm8 = vcmp.eq.s32.totalorder %v15823_v44, 1  ;;  %v15828_v39 = vld [vmem:[#allocation17_spill] sm:$0xff]  ;;  %3213 = vperm.xlu0 %7298, %v9947_v10  }
 0x24b   : > { %v10091_v29 = vsel %vm1276_vm0, %v15810_v17, %v15809_v59  ;;  %15813 = vst [vmem:[#allocation177_spill] sm:$0xff] %v10098_v43  ;;  %v10116_v59 = vsel %vm10015_vm15, 1, %v15418_v45  ;;  %v10126_v25 = vsel %vm15819_vm4, 1, %v15418_v45  ;;  %15821 = vst [vmem:[#allocation180_spill] sm:$0xff] %v10131_v11  ;;  %vm1668_vm15 = vcmp.eq.s32.totalorder %v15822_v46, 1  ;;  %v15857_v10 = vld [vmem:[#allocation111_spill] sm:$0xff] }
 0x24c   : > { %15811 = vst [vmem:[#allocation175_spill] sm:$0xff] %v10091_v29  ;;  %15820 = vst [vmem:[#allocation179_spill] sm:$0xff] %v10126_v25  ;;  %v10139_v17 = vsel %vm10049_vm9, 1, %v15418_v45  ;;  %v10144_v22 = vsel %vm10074_vm12, 1, %v15418_v45  ;;  %vm15826_vm4 = vcmp.lt.f32.partialorder %v15825_v7, 15.0  ;;  %vm15829_vm10 = vcmp.ge.f32.partialorder %v15828_v39, 1.0  ;;  %v10167_v7 = vpop.permute.xlu0 %2567 }
 0x24d   : > { %15824 = vst [vmem:[#allocation64_spill] sm:$0xff] %v10144_v22  ;;  %v10149_v23 = vsel %vm15826_vm4, 1, %v15418_v45  ;;  %vm10155_vm2 = vmand %vm15051_vm7, %vm15829_vm10  ;;  %vm3073_vm9 = vcmp.lt.f32.partialorder %v10162_v47, 15.0  ;;  %v1410_v13 = vmul.f32 %v9622_v32, %v10091_v29  ;;  %v10172_v39 = vsel %vm10108_vm3, 1, %v15418_v45  ;;  %v15837_v29 = vld [vmem:[#allocation18_spill] sm:$0xff]  ;;  %v10205_v22 = vpop.permute.xlu1 %2298  ;;  %v15846_v25 = vld [vmem:[#allocation36_spill] sm:$0xff]  ;;  %2886 = vperm.xlu1 %7299, %v9952_v60  }
 0x24e   : > { %15827 = vst [vmem:[#allocation89_spill] sm:$0xff] %v10149_v23  ;;  %15832 = vst [vmem:[#allocation17_spill] sm:$0xff] %v10162_v47  ;;  %vm15834_vm10 = vcmp.lt.f32.partialorder %v9615_v28, 15.0  ;;  %vm15071_vm12 = vcmp.lt.f32.partialorder %v10182_v8, 15.0  ;;  %vm1680_vm4 = vcmp.eq.s32.totalorder %v15837_v29, 1  ;;  %v15841_v28 = vrot.slane %v9578_v57, 1  ;;  %3219 = vperm.xlu0 %7298, %v9975_v24  }
 0x24f   : > { %15833 = vst [vmem:[#allocation181_spill] sm:$0xff] %v10172_v39  ;;  %v10177_v53 = vsel %vm15834_vm10, 1, %v15418_v45  ;;  %15836 = vst [vmem:[#allocation183_spill] sm:$0xff] %v10182_v8  ;;  %vm15843_vm3 = vcmask 1046528   ;;  %vm15847_vm10 = vcmp.ge.f32.partialorder %v15846_v25, 1.0  ;;  %v10225_v5 = vsel %vm10155_vm2, 1, %v15418_v45 }
 0x250   : > { %15835 = vst [vmem:[#allocation182_spill] sm:$0xff] %v10177_v53  ;;  %15840 = vst [vmem:[#allocation18_spill] sm:$0xff] %v10191_v51  ;;  %v10198_v2 = vsel %vm15843_vm3, %v15842_v48, %v15841_v28  ;;  %v10200_v53 = vpop.f32.mrf.mxu1  ;;  %v1766_v48 = vmul.f32 %v9619_v58, %v9563_v12  ;;  %v10219_v28 = vadd.f32 %v9558_v37, %v9714_v1  ;;  %vm15851_vm3 = vcmp.lt.f32.partialorder %v9653_v38, 15.0  ;;  %v15856_v1 = vld [vmem:[#allocation22_spill] sm:$0xff]  ;;  %v15864_v57 = vld [vmem:[#allocation99_spill] sm:$0xff] }
 0x251   : > { %15844 = vst [vmem:[#allocation184_spill] sm:$0xff] %v10198_v2  ;;  %15845 = vst [vmem:[#allocation185_spill] sm:$0xff] %v10205_v22  ;;  %v10230_v25 = vsel %vm15851_vm3, 1, %v15418_v45  ;;  %vm1940_vm5 = vcmp.eq.s32.totalorder %v15856_v1, 1  ;;  %v10243_v50 = vadd.f32 %v15857_v10, %v9558_v37  ;;  %v1768_v23 = vmul.f32 %v9619_v58, %v9598_v52  ;;  %v10289_v54 = vpop.permute.xlu1 %2304  ;;  %2892 = vperm.xlu1 %7299, %v9980_v15   ;;  %v15882_v24 = vld [vmem:[#allocation23_spill] sm:$0xff]  ;;  %v15883_v46 = vld [vmem:[#allocation141_spill] sm:$0xff] }
 0x252   : > { %vm10211_vm7 = vmand %vm15052_vm14, %vm15847_vm10  ;;  %15850 = vst [vmem:[#allocation36_spill] sm:$0xff] %v10219_v28  ;;  %vm15853_vm10 = vcmp.ge.f32.partialorder %v15852_v40, 1.0  ;;  %v15859_v22 = vrot.slane %v10098_v43, 7  ;;  %v15860_v11 = vrot.slane %v10095_v41, 7  ;;  %vm15862_vm2 = vcmp.lt.f32.partialorder %v9706_v26, 15.0  ;;  %v10266_v41 = vpop.permute.xlu0 %2573  ;;  %3225 = vperm.xlu0 %7298, %v9985_v0  }
 0x253   : > { %vm10236_vm14 = vmand %vm3073_vm9, %vm15853_vm10  ;;  %15858 = vst [vmem:[#allocation39_spill] sm:$0xff] %v10243_v50  ;;  %v10257_v47 = vsel %vm15862_vm2, 1, %v15418_v45  ;;  %vm2362_vm3 = vcmp.eq.s32.totalorder %v15864_v57, 1  ;;  %v1412_v10 = vmul.f32 %v9622_v32, %v10191_v51  ;;  %v1698_v38 = vsel %vm1666_vm11, %v1410_v13, 0.0 }
 0x254   : > { %v10252_v40 = vsel %vm1276_vm0, %v15860_v11, %v15859_v22  ;;  %15863 = vst [vmem:[#allocation111_spill] sm:$0xff] %v10257_v47  ;;  %v2124_v12 = vmul.f32 %v9665_v34, %v10198_v2  ;;  %v10271_v22 = vsel %vm10211_vm7, 1, %v15418_v45  ;;  %v15866_v11 = vld [vmem:[#allocation41_spill] sm:$0xff]  ;;  %vm2350_vm11 = vcmp.eq.s32.totalorder %v15870_v63, 1  ;;  %v10286_v2 = vpop.f32.mrf.mxu1 }
 0x255   : > { %15861 = vst [vmem:[#allocation22_spill] sm:$0xff] %v10252_v40  ;;  %15865 = vst [vmem:[#allocation99_spill] sm:$0xff] %v10271_v22  ;;  %vm15867_vm10 = vcmp.ge.f32.partialorder %v15866_v11, 1.0  ;;  %v10284_v13 = vadd.f32 %v9558_v37, %v9799_v20  ;;  %v10294_v11 = vsel %vm10236_vm14, 1, %v15418_v45  ;;  %vm15873_vm7 = vcmp.lt.f32.partialorder %v9750_v6, 15.0  ;;  %2898 = vperm.xlu1 %7299, %v10004_v36  }
 0x256   : > { %vm10277_vm2 = vmand %vm15071_vm12, %vm15867_vm10  ;;  %15872 = vst [vmem:[#allocation12_spill] sm:$0xff] %v10294_v11  ;;  %v10299_v8 = vsel %vm15873_vm7, 1, %v15418_v45  ;;  %vm15874_vm10 = vcmp.lt.f32.partialorder %v9776_v35, 15.0  ;;  %v1958_v60 = vsel %vm1926_vm13, %v1766_v48, 0.0  ;;  %v15876_v47 = vrot.slane %v9662_v62, 1  ;;  %v10345_v35 = vpop.permute.xlu1 %2310  ;;  %3231 = vperm.xlu0 %7298, %v10009_v42  }
 0x257   : > { %15871 = vst [vmem:[#allocation41_spill] sm:$0xff] %v10284_v13  ;;  %v10304_v20 = vsel %vm15874_vm10, 1, %v15418_v45  ;;  %v15877_v22 = vrot.slane %v9598_v52, 1  ;;  %vm15878_vm12 = vcmask 1046528   ;;  %v1424_v6 = vmul.f32 %v9622_v32, %v10252_v40 }
 0x258   : > { %15875 = vst [vmem:[#allocation186_spill] sm:$0xff] %v10304_v20  ;;  %v1990_v20 = vadd.f32 %v1958_v60, %v1698_v38  ;;  %v1960_v55 = vsel %vm1928_vm1, %v1768_v23, 0.0  ;;  %v10325_v48 = vsel %vm10277_vm2, 1, %v15418_v45  ;;  %v10332_v11 = vmul.f32 %v9868_v9, %v10191_v51  ;;  %v10337_v23 = vpop.permute.xlu0 %2579  ;;  %v1174_v60 = vpop.f32.mrf.mxu1 }
 0x259   : > { %v10313_v39 = vsel %vm15878_vm12, %v15877_v22, %v15876_v47  ;;  %15880 = vst [vmem:[#allocation188_spill] sm:$0xff] %v10325_v48  ;;  %v15881_v47 = vld [vmem:[#allocation7_spill] sm:$0xff]  ;;  %v2380_v22 = vsel %vm2348_vm8, %v2124_v12, 0.0  ;;  %v1700_v33 = vsel %vm1668_vm15, %v1412_v10, 0.0  ;;  %vm1942_vm1 = vcmp.eq.s32.totalorder %v15882_v24, 1  ;;  %vm15887_vm8 = vmmov %vm15878_vm12  ;;  %2904 = vperm.xlu1 %7299, %v10033_v19  }
 0x25a   : > { %15879 = vst [vmem:[#allocation187_spill] sm:$0xff] %v10313_v39  ;;  %vm1682_vm13 = vcmp.eq.s32.totalorder %v15881_v47, 1  ;;  %v2126_v26 = vmul.f32 %v9665_v34, %v10313_v39  ;;  %v10350_v10 = vadd.f32 %v15883_v46, %v9558_v37  ;;  %v1712_v38 = vsel %vm1680_vm4, %v1424_v6, 0.0  ;;  %v15892_v39 = vld [vmem:[#allocation101_spill] sm:$0xff]  ;;  %v10395_v1 = vpop.permute.xlu1 %2316  ;;  %vm15906_vm4 = vmmov %vm15887_vm8  ;;  %3237 = vperm.xlu0 %7298, %v10038_v16  }
 0x25b   : > { %v1780_v51 = vmul.f32 %v9619_v58, %v10098_v43  ;;  %v15885_v44 = vrot.slane %v10219_v28, 1  ;;  %v15886_v12 = vrot.slane %v10098_v43, 1  ;;  %v10364_v40 = vadd.f32 %v2380_v22, %v1990_v20 }
 0x25c   : > { %15884 = vst [vmem:[#allocation7_spill] sm:$0xff] %v10350_v10  ;;  %v15889_v46 = vrot.slane %v10284_v13, 7  ;;  %v15890_v45 = vrot.slane %v10219_v28, 7  ;;  %vm2622_vm14 = vcmp.eq.s32.totalorder %v10053_v56, 1  ;;  %vm2364_vm15 = vcmp.eq.s32.totalorder %v15892_v39, 1 }
 0x25d   : > { %v10361_v15 = vsel %vm15887_vm8, %v15886_v12, %v15885_v44  ;;  %v1992_v44 = vadd.f32 %v1960_v55, %v1700_v33  ;;  %v10379_v0 = vadd.f32 %v9738_v21, %v9558_v37  ;;  %v1972_v20 = vsel %vm1940_vm5, %v1780_v51, 0.0  ;;  %v15894_v51 = vld [vmem:[#allocation20_spill] sm:$0xff]  ;;  %2910 = vperm.xlu1 %7299, %v10043_v31  }
 0x25e   : > { %15888 = vst [vmem:[#allocation23_spill] sm:$0xff] %v10361_v15  ;;  %v10371_v6 = vsel %vm1276_vm0, %v15890_v45, %v15889_v46  ;;  %v2138_v29 = vmul.f32 %v9665_v34, %v10361_v15  ;;  %v10385_v45 = vpop.permute.xlu0 %2585  ;;  %v10388_v46 = vpop.f32.mrf.mxu1  ;;  %v2004_v55 = vadd.f32 %v1972_v20, %v1712_v38  ;;  %vm1684_vm5 = vcmp.eq.s32.totalorder %v15894_v51, 1  ;;  %3243 = vperm.xlu0 %7298, %v10058_v27  }
 0x25f   : > { %15891 = vst [vmem:[#allocation141_spill] sm:$0xff] %v10371_v6  ;;  %15893 = vst [vmem:[#allocation101_spill] sm:$0xff] %v10379_v0  ;;  %v2462_v22 = vmul.f32 %v9868_v9, %v10371_v6  ;;  %v1426_v15 = vmul.f32 %v9622_v32, %v10371_v6  ;;  %v15895_v33 = vrot.slane %v9688_v3, 7  ;;  %v15896_v48 = vrot.slane %v9662_v62, 7 }
 0x260   : > { %v2394_v21 = vsel %vm2362_vm3, %v2138_v29, 0.0  ;;  %v2382_v6 = vsel %vm2350_vm11, %v2126_v26, 0.0  ;;  %v15083_v38 = vrot.slane %v10350_v10, 1  ;;  %v10413_v36 = vadd.f32 %v9870_v49, %v9558_v37  ;;  %v15901_v26 = vld [vmem:[#allocation25_spill] sm:$0xff] }
 0x261   : > { %v10403_v12 = vsel %vm1276_vm0, %v15896_v48, %v15895_v33  ;;  %v2654_v57 = vsel %vm2622_vm14, %v2462_v22, 0.0  ;;  %v10417_v29 = vadd.f32 %v9558_v37, %v9968_v4  ;;  %v10421_v48 = vadd.f32 %v10100_v61, %v9558_v37  ;;  %v1177_v61 = vpop.f32.mrf.mxu1  ;;  %v10450_v33 = vpop.permute.xlu1 %2322  ;;  %2916 = vperm.xlu1 %7299, %v10063_v18   ;;  %v15929_v18 = vld [vmem:[#allocation24_spill] sm:$0xff] }
 0x262   : > { %15897 = vst [vmem:[#allocation20_spill] sm:$0xff] %v10403_v12  ;;  %15898 = vst [vmem:[#allocation189_spill] sm:$0xff] %v10413_v36  ;;  %v2426_v63 = vadd.f32 %v2394_v21, %v2004_v55  ;;  %vm1944_vm12 = vcmp.eq.s32.totalorder %v15901_v26, 1  ;;  %v10426_v56 = vadd.f32 %v9558_v37, %v10200_v53  ;;  %v10430_v42 = vadd.f32 %v10286_v2, %v9558_v37  ;;  %v10434_v20 = vpop.permute.xlu0 %2591 }
 0x263   : > { %15899 = vst [vmem:[#allocation190_spill] sm:$0xff] %v10417_v29  ;;  %15900 = vst [vmem:[#allocation191_spill] sm:$0xff] %v10421_v48  ;;  %v15085_v49 = vrot.slane %v10350_v10, 7  ;;  %v15084_v4 = vrot.slane %v10379_v0, 7  ;;  %v1714_v55 = vsel %vm1682_vm13, %v1426_v15, 0.0  ;;  %v1782_v53 = vmul.f32 %v9619_v58, %v10284_v13  ;;  %3249 = vperm.xlu0 %7298, %v10116_v59  }
 0x264   : > { %15902 = vst [vmem:[#allocation25_spill] sm:$0xff] %v10426_v56  ;;  %15903 = vst [vmem:[#allocation192_spill] sm:$0xff] %v10430_v42  ;;  %v10436_v22 = vadd.f32 %v2654_v57, %v2426_v63  ;;  %v15905_v2 = vrot.slane %v10284_v13, 1  ;;  %v15908_v57 = vld [vmem:[#allocation103_spill] sm:$0xff]  ;;  %v10454_v63 = vadd.f32 %v9558_v37, %v1174_v60  ;;  %vm2624_vm2 = vcmp.eq.s32.totalorder %v10167_v7, 1 }
 0x265   : > { %vm2366_vm3 = vcmp.eq.s32.totalorder %v15908_v57, 1  ;;  %v10461_v47 = vsel %vm1276_vm0, %v15085_v49, %v15084_v4  ;;  %v10467_v19 = vadd.f32 %v2382_v6, %v1992_v44  ;;  %v15911_v4 = vld [vmem:[#allocation82_spill] sm:$0xff]  ;;  %v15912_v49 = vld [vmem:[#allocation104_spill] sm:$0xff]  ;;  %v10480_v16 = vadd.f32 %v9558_v37, %v1177_v61  ;;  %v15930_v61 = vld [vmem:[#allocation83_spill] sm:$0xff]  ;;  %2922 = vperm.xlu1 %7299, %v10068_v14  }
 0x266   : > { %15904 = vst [vmem:[#allocation193_spill] sm:$0xff] %v10436_v22  ;;  %v10447_v21 = vsel %vm15906_vm4, %v15905_v2, %v15083_v38  ;;  %15909 = vst [vmem:[#allocation103_spill] sm:$0xff] %v10454_v63  ;;  %v1428_v60 = vmul.f32 %v9622_v32, %v10461_v47  ;;  %v1974_v2 = vsel %vm1942_vm1, %v1782_v53, 0.0  ;;  %v2464_v38 = vmul.f32 %v9868_v9, %v10461_v47  ;;  %v10482_v44 = vpop.permute.xlu0 %2597  ;;  %v10492_v22 = vpop.permute.xlu1 %2328 }
 0x267   : > { %15907 = vst [vmem:[#allocation194_spill] sm:$0xff] %v10447_v21  ;;  %15910 = vst [vmem:[#allocation195_spill] sm:$0xff] %v10461_v47  ;;  %v2140_v15 = vmul.f32 %v9665_v34, %v10447_v21  ;;  %vm1681_vm11 = vcmp.eq.s32.totalorder %v15911_v4, 1  ;;  %vm1941_vm7 = vcmp.eq.s32.totalorder %v15912_v49, 1  ;;  %v2006_v6 = vadd.f32 %v1974_v2, %v1714_v55  ;;  %v15915_v21 = vld [vmem:[#allocation40_spill] sm:$0xff]  ;;  %v15923_v2 = vld [vmem:[#allocation105_spill] sm:$0xff]  ;;  %3255 = vperm.xlu0 %7298, %v10139_v17  }
 0x268   : > { %15913 = vst [vmem:[#allocation82_spill] sm:$0xff] %v10480_v16  ;;  %15914 = vst [vmem:[#allocation104_spill] sm:$0xff] %v10482_v44  ;;  %vm1686_vm10 = vcmp.eq.s32.totalorder %v15915_v21, 1  ;;  %v2656_v62 = vsel %vm2624_vm2, %v2464_v38, 0.0  ;;  %v15092_v53 = vrot.slane %v10417_v29, 7  ;;  %v15091_v39 = vrot.slane %v10426_v56, 7 }
 0x269   : > { %v2396_v47 = vsel %vm2364_vm15, %v2140_v15, 0.0  ;;  %v1716_v7 = vsel %vm1684_vm5, %v1428_v60, 0.0  ;;  %v1784_v31 = vmul.f32 %v9619_v58, %v10379_v0  ;;  %v15916_v38 = vld [vmem:[#allocation27_spill] sm:$0xff]  ;;  %v10507_v15 = vadd.f32 %v10388_v46, %v9558_v37  ;;  %vm15920_vm1 = vmmov %vm15906_vm4  ;;  %2928 = vperm.xlu1 %7299, %v10121_v30  }
 0x26a   : > { %v2428_v44 = vadd.f32 %v2396_v47, %v2006_v6  ;;  %vm1946_vm13 = vcmp.eq.s32.totalorder %v15916_v38, 1  ;;  %v15918_v27 = vrot.slane %v10417_v29, 1  ;;  %v15919_v55 = vrot.slane %v10379_v0, 1  ;;  %v10519_v60 = vpop.permute.xlu0 %2603  ;;  %vm15933_vm4 = vmmov %vm15920_vm1  ;;  %v15938_v49 = vld [vmem:[#allocation107_spill] sm:$0xff] }
 0x26b   : > { %15917 = vst [vmem:[#allocation40_spill] sm:$0xff] %v10507_v15  ;;  %15922 = vst [vmem:[#allocation196_spill] sm:$0xff] %v10519_v60  ;;  %vm2368_vm8 = vcmp.eq.s32.totalorder %v15923_v2, 1  ;;  %v10527_v37 = vsel %vm1276_vm0, %v15092_v53, %v15091_v39  ;;  %vm2626_vm14 = vcmp.eq.s32.totalorder %v10266_v41, 1  ;;  %v15926_v26 = vrot.slane %v10219_v28, 7  ;;  %v15956_v2 = vld [vmem:[#allocation29_spill] sm:$0xff] }
 0x26c   : > { %v10510_v6 = vadd.f32 %v2656_v62, %v2428_v44  ;;  %v10517_v51 = vsel %vm15920_vm1, %v15919_v55, %v15918_v27  ;;  %15924 = vst [vmem:[#allocation105_spill] sm:$0xff] %v10527_v37  ;;  %v1976_v62 = vsel %vm1944_vm12, %v1784_v31, 0.0  ;;  %v10535_v44 = vpop.permute.xlu1 %2334  ;;  %v15925_v55 = vld [vmem:[#allocation106_spill] sm:$0xff]  ;;  %v1430_v27 = vmul.f32 %v9622_v32, %v10527_v37 }
 0x26d   : > { %15921 = vst [vmem:[#allocation27_spill] sm:$0xff] %v10517_v51  ;;  %v2142_v46 = vmul.f32 %v9665_v34, %v10517_v51  ;;  %vm1943_vm15 = vcmp.eq.s32.totalorder %v15925_v55, 1  ;;  %v2008_v47 = vadd.f32 %v1976_v62, %v1716_v7  ;;  %v2466_v39 = vmul.f32 %v9868_v9, %v10527_v37 }
 0x26e   : > { %v15927_v31 = vrot.slane %v10098_v43, 7  ;;  %vm1688_vm5 = vcmp.eq.s32.totalorder %v15929_v18, 1  ;;  %vm1683_vm12 = vcmp.eq.s32.totalorder %v15930_v61, 1  ;;  %v1781_v62 = vmul.f32 %v9619_v58, %v10219_v28  ;;  %v15961_v61 = vld [vmem:[#allocation64_spill] sm:$0xff] }
 0x26f   : > { %v2398_v24 = vsel %vm2366_vm3, %v2142_v46, 0.0  ;;  %v15931_v37 = vrot.slane %v10284_v13, 1  ;;  %v2658_v43 = vsel %vm2626_vm14, %v2466_v39, 0.0  ;;  %vm2363_vm3 = vcmp.eq.s32.totalorder %v10289_v54, 1  ;;  %v10570_v46 = vpop.permute.xlu0 %2841  ;;  %v15937_v39 = vld [vmem:[#allocation28_spill] sm:$0xff]  ;;  %vm15950_vm14 = vmmov %vm15933_vm4  ;;  %3162 = vperm.xlu1 %7299, %v15961_v61  }
 0x270   : > { %v10547_v53 = vsel %vm1276_vm0, %v15927_v31, %v15926_v26  ;;  %v15932_v26 = vrot.slane %v10219_v28, 1  ;;  %v2430_v59 = vadd.f32 %v2398_v24, %v2008_v47  ;;  %15935 = vst [vmem:[#allocation83_spill] sm:$0xff] %v10570_v46  ;;  %v1973_v28 = vsel %vm1941_vm7, %v1781_v62, 0.0  ;;  %v10579_v41 = vpop.permute.xlu1 %2340  ;;  %vm15942_vm7 = vmmov %vm15920_vm1 }
 0x271   : > { %15928 = vst [vmem:[#allocation106_spill] sm:$0xff] %v10547_v53  ;;  %v1425_v7 = vmul.f32 %v9622_v32, %v10547_v53  ;;  %v15100_v24 = vrot.slane %v10421_v48, 7  ;;  %15936 = vst [vmem:[#allocation197_spill] sm:$0xff] %v10579_v41  ;;  %vm1948_vm2 = vcmp.eq.s32.totalorder %v15937_v39, 1  ;;  %v1718_v4 = vsel %vm1686_vm10, %v1430_v27, 0.0 }
 0x272   : > { %v10563_v31 = vsel %vm15933_vm4, %v15932_v26, %v15931_v37  ;;  %v15101_v37 = vrot.slane %v10413_v36, 7  ;;  %v10582_v47 = vadd.f32 %v2658_v43, %v2430_v59  ;;  %v1786_v43 = vmul.f32 %v9619_v58, %v10426_v56 }
 0x273   : > { %15934 = vst [vmem:[#allocation24_spill] sm:$0xff] %v10563_v31  ;;  %v2139_v57 = vmul.f32 %v9665_v34, %v10563_v31  ;;  %v1713_v53 = vsel %vm1681_vm11, %v1425_v7, 0.0  ;;  %vm2370_vm11 = vcmp.eq.s32.totalorder %v15938_v49, 1  ;;  %vm2628_vm10 = vcmp.eq.s32.totalorder %v10337_v23, 1  ;;  %v10613_v59 = vpop.permute.xlu0 %2847  ;;  %v15954_v31 = vld [vmem:[#allocation84_spill] sm:$0xff] }
 0x274   : > { %v2005_v54 = vadd.f32 %v1973_v28, %v1713_v53  ;;  %v10593_v14 = vsel %vm1276_vm0, %v15101_v37, %v15100_v24  ;;  %v15940_v28 = vrot.slane %v10413_v36, 1  ;;  %v15941_v53 = vrot.slane %v10426_v56, 1  ;;  %v10635_v38 = vpop.permute.xlu1 %2510 }
 0x275   : > { %v2395_v26 = vsel %vm2363_vm3, %v2139_v57, 0.0  ;;  %15939 = vst [vmem:[#allocation28_spill] sm:$0xff] %v10593_v14  ;;  %v1432_v27 = vmul.f32 %v9622_v32, %v10593_v14  ;;  %v2468_v62 = vmul.f32 %v9868_v9, %v10593_v14  ;;  %v15944_v57 = vld [vmem:[#allocation108_spill] sm:$0xff]  ;;  %v1783_v24 = vmul.f32 %v9619_v58, %v10350_v10  ;;  %15952 = vst [vmem:[#allocation199_spill] sm:$0xff] %v10635_v38 }
 0x276   : > { %v10602_v21 = vsel %vm15942_vm7, %v15941_v53, %v15940_v28  ;;  %v10605_v17 = vadd.f32 %v2395_v26, %v2005_v54  ;;  %vm1945_vm1 = vcmp.eq.s32.totalorder %v15944_v57, 1  ;;  %v1978_v28 = vsel %vm1946_vm13, %v1786_v43, 0.0  ;;  %v15953_v43 = vld [vmem:[#allocation26_spill] sm:$0xff] }
 0x277   : > { %15943 = vst [vmem:[#allocation107_spill] sm:$0xff] %v10602_v21  ;;  %v2144_v7 = vmul.f32 %v9665_v34, %v10602_v21  ;;  %v15945_v53 = vrot.slane %v10350_v10, 7  ;;  %v15946_v54 = vrot.slane %v10284_v13, 7  ;;  %v15948_v37 = vrot.slane %v10379_v0, 1  ;;  %v10658_v55 = vpop.permute.xlu0 %2853 }
 0x278   : > { %v15949_v46 = vrot.slane %v10350_v10, 1  ;;  %vm1690_vm13 = vcmp.eq.s32.totalorder %v15953_v43, 1  ;;  %vm1685_vm4 = vcmp.eq.s32.totalorder %v15954_v31, 1  ;;  %v2660_v41 = vsel %vm2628_vm10, %v2468_v62, 0.0  ;;  %v10671_v18 = vpop.permute.xlu1 %2516 }
 0x279   : > { %v10623_v26 = vsel %vm1276_vm0, %v15946_v54, %v15945_v53  ;;  %v2010_v53 = vadd.f32 %v1978_v28, %v1718_v4  ;;  %v2400_v54 = vsel %vm2368_vm8, %v2144_v7, 0.0  ;;  %v1975_v30 = vsel %vm1943_vm15, %v1783_v24, 0.0  ;;  %v15957_v24 = vld [vmem:[#allocation126_spill] sm:$0xff]  ;;  %15962 = vst [vmem:[#allocation84_spill] sm:$0xff] %v10671_v18 }
 0x27a   : > { %15947 = vst [vmem:[#allocation108_spill] sm:$0xff] %v10623_v26  ;;  %v10632_v14 = vsel %vm15950_vm14, %v15949_v46, %v15948_v37  ;;  %v1427_v10 = vmul.f32 %v9622_v32, %v10623_v26  ;;  %v15955_v46 = vld [vmem:[#allocation179_spill] sm:$0xff]  ;;  %vm2365_vm3 = vcmp.eq.s32.totalorder %v10345_v35, 1  ;;  %vm1950_vm8 = vcmp.eq.s32.totalorder %v15956_v2, 1 }
 0x27b   : > { %15951 = vst [vmem:[#allocation198_spill] sm:$0xff] %v10632_v14  ;;  %3425 = vperm.xlu0 %7298, %v15955_v46   ;;  %v2141_v37 = vmul.f32 %v9665_v34, %v10632_v14  ;;  %v2432_v7 = vadd.f32 %v2400_v54, %v2010_v53  ;;  %v15108_v62 = vrot.slane %v10480_v16, 7  ;;  %v1720_v28 = vsel %vm1688_vm5, %v1432_v27, 0.0  ;;  %v15963_v27 = vld [vmem:[#allocation109_spill] sm:$0xff] }
 0x27c   : > { %v1715_v23 = vsel %vm1683_vm12, %v1427_v10, 0.0  ;;  %vm2608_vm15 = vcmp.eq.s32.totalorder %v15957_v24, 1  ;;  %v1788_v35 = vmul.f32 %v9619_v58, %v10421_v48  ;;  %v15958_v4 = vrot.slane %v10454_v63, 1 }
 0x27d   : > { %v2007_v46 = vadd.f32 %v1975_v30, %v1715_v23  ;;  %v2397_v38 = vsel %vm2365_vm3, %v2141_v37, 0.0  ;;  %v15959_v53 = vrot.slane %v10421_v48, 1  ;;  %vm2372_vm5 = vcmp.eq.s32.totalorder %v15963_v27, 1 }
 0x27e   : > { %v10674_v54 = vadd.f32 %v2660_v41, %v2432_v7  ;;  %v15964_v30 = vrot.slane %v10454_v63, 7  ;;  %vm2630_vm12 = vcmp.eq.s32.totalorder %v10385_v45, 1  ;;  %v1980_v7 = vsel %vm1948_vm2, %v1788_v35, 0.0  ;;  %v10707_v35 = vpop.permute.xlu0 %2859 }
 0x27f   : > { %v10668_v10 = vsel %vm15942_vm7, %v15959_v53, %v15958_v4  ;;  %v15966_v4 = vld [vmem:[#allocation89_spill] sm:$0xff]  ;;  %v10687_v53 = vadd.f32 %v2397_v38, %v2007_v46  ;;  %v15969_v45 = vrot.slane %v10417_v29, 7  ;;  %v15970_v38 = vrot.slane %v10379_v0, 7  ;;  %15972 = vst [vmem:[#allocation64_spill] sm:$0xff] %v10707_v35 }
 0x280   : > { %15960 = vst [vmem:[#allocation26_spill] sm:$0xff] %v10668_v10  ;;  %v10681_v37 = vsel %vm1276_vm0, %v15964_v30, %v15108_v62  ;;  %v2146_v23 = vmul.f32 %v9665_v34, %v10668_v10  ;;  %3431 = vperm.xlu0 %7298, %v15966_v4   ;;  %v15968_v30 = vld [vmem:[#allocation110_spill] sm:$0xff]  ;;  %v2012_v62 = vadd.f32 %v1980_v7, %v1720_v28  ;;  %v15973_v4 = vld [vmem:[#allocation85_spill] sm:$0xff]  ;;  %v15974_v49 = vrot.slane %v10426_v56, 1 }
 0x281   : > { %15965 = vst [vmem:[#allocation179_spill] sm:$0xff] %v10681_v37  ;;  %15967 = vst [vmem:[#allocation29_spill] sm:$0xff] %v10687_v53  ;;  %v1434_v41 = vmul.f32 %v9622_v32, %v10681_v37  ;;  %v2470_v61 = vmul.f32 %v9868_v9, %v10681_v37  ;;  %vm1947_vm10 = vcmp.eq.s32.totalorder %v15968_v30, 1  ;;  %v10703_v46 = vsel %vm1276_vm0, %v15970_v38, %v15969_v45  ;;  %v15978_v45 = vld [vmem:[#allocation181_spill] sm:$0xff]  ;;  %v10721_v38 = vpop.permute.xlu1 %2522  ;;  %v15979_v53 = vld [vmem:[#allocation182_spill] sm:$0xff] }
 0x282   : > { %v2402_v14 = vsel %vm2370_vm11, %v2146_v23, 0.0  ;;  %15971 = vst [vmem:[#allocation126_spill] sm:$0xff] %v10703_v46  ;;  %v1785_v39 = vmul.f32 %v9619_v58, %v10417_v29  ;;  %vm1687_vm2 = vcmp.eq.s32.totalorder %v15973_v4, 1  ;;  %v1429_v28 = vmul.f32 %v9622_v32, %v10703_v46  ;;  %vm15976_vm11 = vmmov %vm15942_vm7  ;;  %3168 = vperm.xlu1 %7299, %v15978_v45   ;;  %v10749_v43 = vpop.permute.xlu0 %2865 }
 0x283   : > { %v2662_v37 = vsel %vm2630_vm12, %v2470_v61, 0.0  ;;  %v15975_v23 = vrot.slane %v10417_v29, 1  ;;  %vm2367_vm14 = vcmp.eq.s32.totalorder %v10395_v1, 1  ;;  %v2434_v35 = vadd.f32 %v2402_v14, %v2012_v62  ;;  %v15980_v29 = vld [vmem:[#allocation113_spill] sm:$0xff]  ;;  %v15981_v62 = vld [vmem:[#allocation86_spill] sm:$0xff]  ;;  %15986 = vst [vmem:[#allocation110_spill] sm:$0xff] %v10749_v43 }
 0x284   : > { %v1977_v61 = vsel %vm1945_vm1, %v1785_v39, 0.0  ;;  %v1365_v60 = vrot.slane %v10430_v42, 7  ;;  %3437 = vperm.xlu0 %7298, %v15979_v53   ;;  %vm1949_vm3 = vcmp.eq.s32.totalorder %v15980_v29, 1  ;;  %v1722_v14 = vsel %vm1690_vm13, %v1434_v41, 0.0 }
 0x285   : > { %v10717_v7 = vsel %vm15976_vm11, %v15975_v23, %v15974_v49  ;;  %v1717_v49 = vsel %vm1685_vm4, %v1429_v28, 0.0  ;;  %v15117_v23 = vrot.slane %v10507_v15, 7  ;;  %v1790_v57 = vmul.f32 %v9619_v58, %v10480_v16  ;;  %vm15984_vm4 = vmmov %vm15942_vm7 }
 0x286   : > { %15977 = vst [vmem:[#allocation109_spill] sm:$0xff] %v10717_v7  ;;  %v2143_v18 = vmul.f32 %v9665_v34, %v10717_v7  ;;  %vm1689_vm1 = vcmp.eq.s32.totalorder %v15981_v62, 1  ;;  %v10738_v39 = vadd.f32 %v2662_v37, %v2434_v35  ;;  %v2009_v45 = vadd.f32 %v1977_v61, %v1717_v49  ;;  %3174 = vperm.xlu1 %7299, %v10225_v5   ;;  %v15988_v35 = vld [vmem:[#allocation116_spill] sm:$0xff]  ;;  %vm15996_vm12 = vmmov %vm15984_vm4 }
 0x287   : > { %v15982_v7 = vrot.slane %v10430_v42, 1  ;;  %v15983_v31 = vrot.slane %v10480_v16, 1  ;;  %v10754_v41 = vsel %vm1276_vm0, %v1365_v60, %v15117_v23  ;;  %v1982_v37 = vsel %vm1950_vm8, %v1790_v57, 0.0  ;;  %v15990_v57 = vld [vmem:[#allocation87_spill] sm:$0xff] }
 0x288   : > { %v2399_v53 = vsel %vm2367_vm14, %v2143_v18, 0.0  ;;  %15987 = vst [vmem:[#allocation85_spill] sm:$0xff] %v10754_v41  ;;  %vm2632_vm13 = vcmp.eq.s32.totalorder %v10434_v20, 1  ;;  %v10762_v18 = vpop.permute.xlu1 %2528  ;;  %vm1951_vm7 = vcmp.eq.s32.totalorder %v15988_v35, 1  ;;  %v2014_v49 = vadd.f32 %v1982_v37, %v1722_v14  ;;  %3443 = vperm.xlu0 %7298, %v10230_v25  }
 0x289   : > { %v10747_v28 = vsel %vm15984_vm4, %v15983_v31, %v15982_v7  ;;  %v2450_v7 = vmul.f32 %v9868_v9, %v10403_v12  ;;  %v10767_v61 = vadd.f32 %v2399_v53, %v2009_v45  ;;  %v2472_v2 = vmul.f32 %v9868_v9, %v10754_v41 }
 0x28a   : > { %15985 = vst [vmem:[#allocation89_spill] sm:$0xff] %v10747_v28  ;;  %v2148_v1 = vmul.f32 %v9665_v34, %v10747_v28  ;;  %vm1691_vm8 = vcmp.eq.s32.totalorder %v15990_v57, 1  ;;  %v15991_v31 = vrot.slane %v10413_v36, 7  ;;  %v15992_v23 = vrot.slane %v10426_v56, 7  ;;  %v16024_v57 = vld [vmem:[#allocation188_spill] sm:$0xff] }
 0x28b   : > { %15989 = vst [vmem:[#allocation181_spill] sm:$0xff] %v10767_v61  ;;  %v1787_v14 = vmul.f32 %v9619_v58, %v10413_v36  ;;  %v15994_v45 = vrot.slane %v10421_v48, 1  ;;  %v15995_v53 = vrot.slane %v10413_v36, 1  ;;  %v2640_v27 = vsel %vm2608_vm15, %v10332_v11, 0.0  ;;  %v15999_v61 = vld [vmem:[#allocation134_spill] sm:$0xff]  ;;  %v16000_v11 = vld [vmem:[#allocation99_spill] sm:$0xff]  ;;  %vm16008_vm15 = vmmov %vm15984_vm4 }
 0x28c   : > { %v2404_v5 = vsel %vm2372_vm5, %v2148_v1, 0.0  ;;  %v10780_v43 = vsel %vm1276_vm0, %v15992_v23, %v15991_v31  ;;  %v2664_v1 = vsel %vm2632_vm13, %v2472_v2, 0.0  ;;  %v10798_v31 = vpop.permute.xlu0 %2871  ;;  %vm2610_vm5 = vcmp.eq.s32.totalorder %v15999_v61, 1  ;;  %3180 = vperm.xlu1 %7299, %v16000_v11   ;;  %v10807_v24 = vpop.permute.xlu1 %2534 }
 0x28d   : > { %15993 = vst [vmem:[#allocation182_spill] sm:$0xff] %v10780_v43  ;;  %v10789_v25 = vsel %vm15996_vm12, %v15995_v53, %v15994_v45  ;;  %v2436_v37 = vadd.f32 %v2404_v5, %v2014_v49  ;;  %v1431_v23 = vmul.f32 %v9622_v32, %v10780_v43  ;;  %15998 = vst [vmem:[#allocation86_spill] sm:$0xff] %v10798_v31  ;;  %v1979_v36 = vsel %vm1947_vm10, %v1787_v14, 0.0 }
 0x28e   : > { %15997 = vst [vmem:[#allocation113_spill] sm:$0xff] %v10789_v25  ;;  %v2145_v45 = vmul.f32 %v9665_v34, %v10789_v25  ;;  %vm2369_vm11 = vcmp.eq.s32.totalorder %v10450_v33, 1  ;;  %16001 = vst [vmem:[#allocation116_spill] sm:$0xff] %v10807_v24  ;;  %v16002_v2 = vrot.slane %v10454_v63, 7  ;;  %v16003_v61 = vrot.slane %v10421_v48, 7  ;;  %v16005_v33 = vld [vmem:[#allocation111_spill] sm:$0xff] }
 0x28f   : > { %v10809_v20 = vadd.f32 %v2664_v1, %v2436_v37  ;;  %v1719_v49 = vsel %vm1687_vm2, %v1431_v23, 0.0  ;;  %v1789_v5 = vmul.f32 %v9619_v58, %v10454_v63  ;;  %3449 = vperm.xlu0 %7298, %v16005_v33   ;;  %v16006_v4 = vrot.slane %v10480_v16, 1  ;;  %vm16017_vm2 = vmmov %vm15984_vm4 }
 0x290   : > { %v10818_v30 = vsel %vm1276_vm0, %v16003_v61, %v16002_v2  ;;  %v2011_v14 = vadd.f32 %v1979_v36, %v1719_v49  ;;  %v2401_v53 = vsel %vm2369_vm11, %v2145_v45, 0.0  ;;  %v16007_v1 = vrot.slane %v10454_v63, 1  ;;  %v10837_v36 = vpop.permute.xlu0 %2877  ;;  %vm16020_vm14 = vmmov %vm16017_vm2  ;;  %v16050_v63 = vld [vmem:[#allocation57_spill] sm:$0xff] }
 0x291   : > { %16004 = vst [vmem:[#allocation87_spill] sm:$0xff] %v10818_v30  ;;  %v1433_v37 = vmul.f32 %v9622_v32, %v10818_v30  ;;  %v2642_v11 = vsel %vm2610_vm5, %v2450_v7, 0.0  ;;  %v1981_v2 = vsel %vm1949_vm3, %v1789_v5, 0.0  ;;  %vm2371_vm10 = vcmp.eq.s32.totalorder %v10492_v22, 1  ;;  %16010 = vst [vmem:[#allocation99_spill] sm:$0xff] %v10837_v36  ;;  %v16013_v7 = vld [vmem:[#allocation12_spill] sm:$0xff]  ;;  %v10851_v5 = vpop.permute.xlu1 %2540 }
 0x292   : > { %v10830_v23 = vsel %vm16008_vm15, %v16007_v1, %v16006_v4  ;;  %v10839_v45 = vadd.f32 %v2401_v53, %v2011_v14  ;;  %v16011_v33 = vrot.slane %v10480_v16, 7  ;;  %v1791_v29 = vmul.f32 %v9619_v58, %v10430_v42  ;;  %3186 = vperm.xlu1 %7299, %v16013_v7   ;;  %16014 = vst [vmem:[#allocation12_spill] sm:$0xff] %v10851_v5 }
 0x293   : > { %16009 = vst [vmem:[#allocation134_spill] sm:$0xff] %v10830_v23  ;;  %v2147_v61 = vmul.f32 %v9665_v34, %v10830_v23  ;;  %v1721_v49 = vsel %vm1689_vm1, %v1433_v37, 0.0  ;;  %v15121_v62 = vrot.slane %v10507_v15, 1  ;;  %3455 = vperm.xlu0 %7298, %v10299_v8   ;;  %v2672_v53 = vadd.f32 %v2640_v27, %v10364_v40 }
 0x294   : > { %v10846_v4 = vsel %vm1276_vm0, %v16011_v33, %v1365_v60  ;;  %v2013_v22 = vadd.f32 %v1981_v2, %v1721_v49  ;;  %v2674_v60 = vadd.f32 %v2642_v11, %v10467_v19  ;;  %v16015_v37 = vrot.slane %v10243_v50, 1  ;;  %v10880_v19 = vpop.permute.xlu0 %2883  ;;  %v16023_v11 = vld [vmem:[#allocation172_spill] sm:$0xff] }
 0x295   : > { %16012 = vst [vmem:[#allocation111_spill] sm:$0xff] %v10846_v4  ;;  %v2403_v1 = vsel %vm2371_vm10, %v2147_v61, 0.0  ;;  %v1435_v14 = vmul.f32 %v9622_v32, %v10846_v4  ;;  %v16016_v33 = vrot.slane %v9688_v3, 1  ;;  %v1983_v2 = vsel %vm1951_vm7, %v1791_v29, 0.0  ;;  %16022 = vst [vmem:[#allocation202_spill] sm:$0xff] %v10880_v19 }
 0x296   : > { %v10868_v61 = vadd.f32 %v2403_v1, %v2013_v22  ;;  %v16019_v8 = vrot.slane %v10430_v42, 1  ;;  %vm2373_vm3 = vcmp.eq.s32.totalorder %v10535_v44, 1  ;;  %v2708_v29 = vmul.f32 %v16023_v11, %v9598_v52  ;;  %3192 = vperm.xlu1 %7299, %v16024_v57   ;;  %v10887_v22 = vpop.permute.xlu1 %2546  ;;  %v16026_v1 = vld [vmem:[#allocation187_spill] sm:$0xff]  ;;  %v16049_v42 = vld [vmem:[#allocation194_spill] sm:$0xff] }
 0x297   : > { %v10864_v7 = vsel %vm16017_vm2, %v16016_v33, %v16015_v37  ;;  %v1723_v49 = vsel %vm1691_vm8, %v1435_v14, 0.0  ;;  %16025 = vst [vmem:[#allocation188_spill] sm:$0xff] %v10887_v22  ;;  %v16027_v14 = vld [vmem:[#allocation165_spill] sm:$0xff]  ;;  %vm2936_vm1 = vcmp.eq.s32.totalorder %v10613_v59, 1  ;;  %v2710_v44 = vmul.f32 %v16023_v11, %v9688_v3  ;;  %v16028_v33 = vld [vmem:[#allocation186_spill] sm:$0xff] }
 0x298   : > { %16018 = vst [vmem:[#allocation200_spill] sm:$0xff] %v10864_v7  ;;  %v10877_v40 = vsel %vm16020_vm14, %v16019_v8, %v15121_v62  ;;  %v2015_v27 = vadd.f32 %v1983_v2, %v1723_v49  ;;  %v2776_v37 = vmul.f32 %v16027_v14, %v16026_v1  ;;  %3461 = vperm.xlu0 %7298, %v16028_v33   ;;  %v16029_v2 = vmov 0   ;;  %v16030_v49 = vld [vmem:[#allocation153_spill] sm:$0xff]  ;;  %v2890_v24 = vpop.permute.xlu0 %2889 }
 0x299   : > { %16021 = vst [vmem:[#allocation201_spill] sm:$0xff] %v10877_v40  ;;  %v2149_v35 = vmul.f32 %v9665_v34, %v10877_v40  ;;  %vm16031_vm4 = vcmp.lt.f32.partialorder %v16030_v49, 15.0  ;;  %v2740_v5 = vadd.f32 %v2708_v29, %v2672_v53  ;;  %v2778_v57 = vmul.f32 %v16027_v14, %v10864_v7  ;;  %v16036_v29 = vld [vmem:[#allocation147_spill] sm:$0xff]  ;;  %v16055_v49 = vld [vmem:[#allocation193_spill] sm:$0xff] }
 0x29a   : > { %v3404_v8 = vsel %vm16031_vm4, 1, %v16029_v2  ;;  %vm2938_vm13 = vcmp.eq.s32.totalorder %v10658_v55, 1  ;;  %v15125_v22 = vrot.slane %v10243_v50, 7  ;;  %v2968_v59 = vsel %vm2936_vm1, %v2776_v37, 0.0  ;;  %v10906_v31 = vpop.permute.xlu1 %2552 }
 0x29b   : > { %v2405_v62 = vsel %vm2373_vm3, %v2149_v35, 0.0  ;;  %v2742_v1 = vadd.f32 %v2710_v44, %v2674_v60  ;;  %v10904_v52 = vadd.f32 %v2968_v59, %v2740_v5  ;;  %v2970_v33 = vsel %vm2938_vm13, %v2778_v57, 0.0  ;;  %16033 = vst [vmem:[#allocation203_spill] sm:$0xff] %v10906_v31  ;;  %v16046_v31 = vld [vmem:[#allocation43_spill] sm:$0xff] }
 0x29c   : > { %v10902_v36 = vadd.f32 %v2405_v62, %v2015_v27  ;;  %v16034_v53 = vrot.slane %v9688_v3, 7  ;;  %v2449_v62 = vmul.f32 %v9868_v9, %v16036_v29  ;;  %3467 = vperm.xlu0 %7298, %v3404_v8   ;;  %vm2609_vm7 = vcmp.eq.s32.totalorder %v10721_v38, 1  ;;  %v2896_v60 = vpop.permute.xlu0 %2895  ;;  %v16037_v27 = vld [vmem:[#allocation145_spill] sm:$0xff]  ;;  %v16048_v29 = vld [vmem:[#allocation166_spill] sm:$0xff] }
 0x29d   : > { %16032 = vst [vmem:[#allocation186_spill] sm:$0xff] %v10904_v52  ;;  %v10915_v55 = vadd.f32 %v2970_v33, %v2742_v1  ;;  %vm2611_vm8 = vcmp.eq.s32.totalorder %v10762_v18, 1  ;;  %v7277_v1 = vpop.f32.mrf.mxu1  ;;  %v16040_v33 = vld [vmem:[#allocation157_spill] sm:$0xff]  ;;  %v10946_v18 = vld [vmem:[%s14695_s6] ss:$0 sm:$0xff]  ;;  %vm16047_vm5 = vcmp.ge.f32.partialorder %v16046_v31, 1.0  ;;  %v2722_v40 = vmul.f32 %v16023_v11, %v10284_v13 }
 0x29e   : > { %v10913_v35 = vsel %vm1276_vm0, %v16034_v53, %v15125_v22  ;;  %v2641_v5 = vsel %vm2609_vm7, %v2449_v62, 0.0  ;;  %v10925_v57 = vpop.permute.xlu1 %2558  ;;  %v10938_v62 = vld [vmem:[%s14690_s1 + $0x60] sm:$0xff]  ;;  %v15142_v52 = vrot.slane %v16048_v29, 1  ;;  %vm2950_vm15 = vcmp.eq.s32.totalorder %v2890_v24, 1 }
 0x29f   : > { %16035 = vst [vmem:[#allocation204_spill] sm:$0xff] %v10913_v35  ;;  %v10921_v37 = vadd.f32 %v2641_v5, %v16037_v27  ;;  %v2451_v44 = vmul.f32 %v9868_v9, %v10913_v35  ;;  %16039 = vst [vmem:[#allocation205_spill] sm:$0xff] %v10925_v57  ;;  %vm3077_vm12 = vcmp.lt.f32.partialorder %v10938_v62, 15.0  ;;  %v1190_v5 = vpop.f32.mrf.mxu1  ;;  %vm1692_vm10 = vcmp.eq.s32.totalorder %v16050_v63, 1 }
 0x2a0   : > { %v10931_v8 = vpop.permute.xlu0 %2901  ;;  %16042 = vst [vmem:[#allocation206_spill] sm:$0xff] %v10938_v62  ;;  %vm3109_vm11 = vmand %vm3077_vm12, %vm16047_vm5  ;;  %v10970_v31 = vmul.f32 %v9619_v58, %v16048_v29  ;;  %v2754_v13 = vadd.f32 %v2722_v40, %v16055_v49  ;;  %v2724_v49 = vmul.f32 %v16023_v11, %v10379_v0  ;;  %vm2952_vm14 = vcmp.eq.s32.totalorder %v2896_v60, 1 }
 0x2a1   : > { %16038 = vst [vmem:[#allocation145_spill] sm:$0xff] %v10921_v37  ;;  %v2643_v59 = vsel %vm2611_vm8, %v2451_v44, 0.0  ;;  %v16043_v44 = vld [vmem:[#allocation118_spill] sm:$0xff]  ;;  %v7278_v23 = vpop.f32.mrf.mxu1  ;;  %v2726_v0 = vmul.f32 %v16023_v11, %v10426_v56  ;;  %v11043_v63 = vadd.f32 %v10946_v18, %v7277_v1  ;;  %vm2954_vm7 = vcmp.eq.s32.totalorder %v10931_v8, 1  ;;  %v16070_v1 = vld [vmem:[#allocation156_spill] sm:$0xff] }
 0x2a2   : > { %v10929_v53 = vadd.f32 %v2643_v59, %v16040_v33  ;;  %v10933_v38 = vpop.permute.xlu1 %2564  ;;  %v10950_v59 = vadd.f32 %v10946_v18, %v16043_v44  ;;  %v16044_v33 = vld [vmem:[#allocation131_spill] sm:$0xff]  ;;  %v2790_v44 = vmul.f32 %v16027_v14, %v16049_v42  ;;  %v3141_v42 = vsel %vm3109_vm11, 1, %v16029_v2  ;;  %v16056_v37 = vld [vmem:[#allocation138_spill] sm:$0xff] }
 0x2a3   : > { %v10954_v22 = vadd.f32 %v10946_v18, %v16044_v33  ;;  %16051 = vst [vmem:[#allocation131_spill] sm:$0xff] %v10970_v31  ;;  %v16052_v33 = vld [vmem:[#allocation117_spill] sm:$0xff]  ;;  %v10987_v31 = vadd.f32 %v10946_v18, %v16056_v37  ;;  %3198 = vperm.xlu1 %7299, %v3141_v42   ;;  %v11001_v37 = vmul.f32 %v9622_v32, %v10403_v12  ;;  %16065 = vst [vmem:[#allocation207_spill] sm:$0xff] %v11043_v63 }
 0x2a4   : > { %16041 = vst [vmem:[#allocation157_spill] sm:$0xff] %v10929_v53  ;;  %v10941_v27 = vpop.permute.xlu0 %2907  ;;  %v16053_v25 = vrot.slane %v16052_v33, 1  ;;  %v2982_v57 = vsel %vm2950_vm15, %v2790_v44, 0.0  ;;  %v1436_v33 = vmul.f32 %v9622_v32, %v10754_v41  ;;  %v2792_v44 = vmul.f32 %v16027_v14, %v10517_v51  ;;  %v11019_v51 = vld [vmem:[%s14690_s1 + $0x70] sm:$0xff]  ;;  %v16060_v42 = vld [vmem:[#allocation45_spill] sm:$0xff] }
 0x2a5   : > { %16045 = vst [vmem:[#allocation118_spill] sm:$0xff] %v10954_v22  ;;  %16057 = vst [vmem:[#allocation57_spill] sm:$0xff] %v10987_v31  ;;  %v10993_v40 = vadd.f32 %v2982_v57, %v2754_v13  ;;  %v11009_v13 = vadd.f32 %v10946_v18, %v1190_v5  ;;  %v11013_v57 = vmul.f32 %v9619_v58, %v10507_v15  ;;  %vm15208_vm3 = vcmp.lt.f32.partialorder %v11019_v51, 15.0 }
 0x2a6   : > { %v10960_v35 = vpop.permute.xlu1 %2570  ;;  %v10977_v62 = vsel %vm16017_vm2, %v15142_v52, %v16053_v25  ;;  %v1193_v52 = vpop.f32.mrf.mxu1  ;;  %v2756_v60 = vadd.f32 %v2724_v49, %v10510_v6  ;;  %v2984_v19 = vsel %vm2952_vm14, %v2792_v44, 0.0  ;;  %16059 = vst [vmem:[#allocation138_spill] sm:$0xff] %v11019_v51  ;;  %v11026_v5 = vsel %vm1692_vm10, %v1436_v33, 0.0  ;;  %v16062_v6 = vld [vmem:[#allocation155_spill] sm:$0xff] }
 0x2a7   : > { %16054 = vst [vmem:[#allocation43_spill] sm:$0xff] %v10977_v62  ;;  %v11005_v53 = vmul.f32 %v9665_v34, %v10977_v62  ;;  %16058 = vst [vmem:[#allocation193_spill] sm:$0xff] %v11009_v13  ;;  %vm16061_vm1 = vcmp.ge.f32.partialorder %v16060_v42, 1.0  ;;  %vm16063_vm13 = vcmp.lt.f32.partialorder %v16062_v6, 15.0  ;;  %v11036_v44 = vadd.f32 %v10946_v18, %v1193_v52  ;;  %v16072_v52 = vld [vmem:[#allocation30_spill] sm:$0xff] }
 0x2a8   : > { %v10981_v24 = vpop.permute.xlu0 %2913  ;;  %vm3111_vm4 = vmand %vm15208_vm3, %vm16061_vm1  ;;  %v3406_v49 = vsel %vm16063_vm13, 1, %v16029_v2  ;;  %v11046_v33 = vadd.f32 %v10946_v18, %v7278_v23  ;;  %v11048_v42 = vadd.f32 %v2984_v19, %v2756_v60  ;;  %v2758_v56 = vadd.f32 %v2726_v0, %v10582_v47  ;;  %v11060_v23 = vld [vmem:[%s14690_s1 + $0x80] sm:$0xff]  ;;  %v16068_v47 = vld [vmem:[#allocation47_spill] sm:$0xff] }
 0x2a9   : > { %16064 = vst [vmem:[#allocation45_spill] sm:$0xff] %v11036_v44  ;;  %v3143_v41 = vsel %vm3111_vm4, 1, %v16029_v2  ;;  %3473 = vperm.xlu0 %7298, %v3406_v49   ;;  %v2794_v6 = vmul.f32 %v16027_v14, %v10602_v21  ;;  %16067 = vst [vmem:[#allocation209_spill] sm:$0xff] %v11060_v23  ;;  %vm15201_vm8 = vcmp.lt.f32.partialorder %v11060_v23, 15.0  ;;  %v2463_v19 = vmul.f32 %v9868_v9, %v10623_v26 }
 0x2aa   : > { %v10991_v25 = vpop.permute.xlu1 %2576  ;;  %16066 = vst [vmem:[#allocation208_spill] sm:$0xff] %v11046_v33  ;;  %3204 = vperm.xlu1 %7299, %v3143_v41   ;;  %vm2623_vm5 = vcmp.eq.s32.totalorder %v10933_v38, 1  ;;  %vm16069_vm11 = vcmp.ge.f32.partialorder %v16068_v47, 1.0  ;;  %vm16071_vm10 = vcmp.lt.f32.partialorder %v16070_v1, 15.0  ;;  %v2728_v60 = vmul.f32 %v16023_v11, %v10421_v48 }
 0x2ab   : > { %v2986_v0 = vsel %vm2954_vm7, %v2794_v6, 0.0  ;;  %vm3113_vm15 = vmand %vm15201_vm8, %vm16069_vm11  ;;  %v3408_v8 = vsel %vm16071_vm10, 1, %v16029_v2  ;;  %v2796_v49 = vmul.f32 %v16027_v14, %v10668_v10  ;;  %v2655_v47 = vsel %vm2623_vm5, %v2463_v19, 0.0  ;;  %v16074_v19 = vld [vmem:[#allocation49_spill] sm:$0xff]  ;;  %v16083_v10 = vld [vmem:[#allocation51_spill] sm:$0xff] }
 0x2ac   : > { %v11022_v62 = vpop.permute.xlu0 %2919  ;;  %v11081_v38 = vadd.f32 %v2986_v0, %v2758_v56  ;;  %v3145_v6 = vsel %vm3113_vm15, 1, %v16029_v2  ;;  %vm2956_vm2 = vcmp.eq.s32.totalorder %v10941_v27, 1  ;;  %vm1952_vm14 = vcmp.eq.s32.totalorder %v16072_v52, 1  ;;  %v11093_v56 = vld [vmem:[%s14690_s1 + $0x90] sm:$0xff] }
 0x2ad   : > { %3479 = vperm.xlu0 %7298, %v3408_v8   ;;  %v11087_v26 = vadd.f32 %v2655_v47, %v10605_v17  ;;  %v2760_v21 = vadd.f32 %v2728_v60, %v10674_v54  ;;  %v2988_v48 = vsel %vm2956_vm2, %v2796_v49, 0.0  ;;  %16073 = vst [vmem:[#allocation47_spill] sm:$0xff] %v11093_v56  ;;  %vm15162_vm1 = vcmp.lt.f32.partialorder %v11093_v56, 15.0  ;;  %v16076_v17 = vld [vmem:[#allocation158_spill] sm:$0xff]  ;;  %v16079_v60 = vld [vmem:[#allocation112_spill] sm:$0xff] }
 0x2ae   : > { %v11040_v12 = vpop.permute.xlu1 %2582  ;;  %3210 = vperm.xlu1 %7299, %v3145_v6   ;;  %vm16075_vm4 = vcmp.ge.f32.partialorder %v16074_v19, 1.0  ;;  %v2465_v27 = vmul.f32 %v9868_v9, %v10703_v46  ;;  %vm2625_vm7 = vcmp.eq.s32.totalorder %v10960_v35, 1  ;;  %vm16077_vm5 = vcmp.lt.f32.partialorder %v16076_v17, 15.0  ;;  %v16174_v56 = vld [vmem:[#allocation50_spill] sm:$0xff] }
 0x2af   : > { %vm3115_vm13 = vmand %vm15162_vm1, %vm16075_vm4  ;;  %v3410_v54 = vsel %vm16077_vm5, 1, %v16029_v2  ;;  %v2730_v0 = vmul.f32 %v16023_v11, %v10480_v16  ;;  %vm2374_vm11 = vcmp.eq.s32.totalorder %v16079_v60, 1  ;;  %v11111_v49 = vadd.f32 %v2988_v48, %v2760_v21  ;;  %v16081_v21 = vld [vmem:[#allocation29_spill] sm:$0xff]  ;;  %v16100_v16 = vld [vmem:[#allocation32_spill] sm:$0xff] }
 0x2b0   : > { %v11066_v41 = vpop.permute.xlu0 %2925  ;;  %v3147_v6 = vsel %vm3115_vm13, 1, %v16029_v2  ;;  %v2798_v47 = vmul.f32 %v16027_v14, %v10747_v28  ;;  %vm2958_vm15 = vcmp.eq.s32.totalorder %v10981_v24, 1  ;;  %v2657_v19 = vsel %vm2625_vm7, %v2465_v27, 0.0  ;;  %v16120_v60 = vld [vmem:[#allocation11_spill] sm:$0xff] }
 0x2b1   : > { %3485 = vperm.xlu0 %7298, %v3410_v54   ;;  %v2762_v46 = vadd.f32 %v2730_v0, %v10738_v39  ;;  %v2467_v48 = vmul.f32 %v9868_v9, %v10780_v43  ;;  %v11129_v28 = vadd.f32 %v2657_v19, %v16081_v21  ;;  %vm16084_vm2 = vcmp.ge.f32.partialorder %v16083_v10, 1.0 }
 0x2b2   : > { %v11079_v51 = vpop.permute.xlu1 %2588  ;;  %3216 = vperm.xlu1 %7299, %v3147_v6   ;;  %v2990_v24 = vsel %vm2958_vm15, %v2798_v47, 0.0  ;;  %vm2627_vm13 = vcmp.eq.s32.totalorder %v10991_v25, 1  ;;  %v3412_v27 = vsel %vm15160_vm6, 1, %v16029_v2  ;;  %v15163_v19 = vrot.slane %v11009_v13, 1  ;;  %v16088_v47 = vld [vmem:[#allocation181_spill] sm:$0xff] }
 0x2b3   : > { %16082 = vst [vmem:[#allocation49_spill] sm:$0xff] %v11129_v28  ;;  %v11139_v54 = vadd.f32 %v2990_v24, %v2762_v46  ;;  %v2659_v6 = vsel %vm2627_vm13, %v2467_v48, 0.0  ;;  %v2732_v43 = vmul.f32 %v16023_v11, %v10507_v15  ;;  %vm2960_vm7 = vcmp.eq.s32.totalorder %v11022_v62, 1  ;;  %v11154_v46 = vld [vmem:[%s14690_s1 + $0xb0] sm:$0xff] }
 0x2b4   : > { %v11108_v8 = vpop.permute.xlu0 %2931  ;;  %v11146_v10 = vadd.f32 %v2659_v6, %v16088_v47  ;;  %16090 = vst [vmem:[#allocation181_spill] sm:$0xff] %v11154_v46  ;;  %vm15182_vm5 = vcmp.lt.f32.partialorder %v11154_v46, 15.0  ;;  %v16092_v48 = vrot.slane %v10507_v15, 1  ;;  %vm16093_vm15 = vcmask 1046528   ;;  %v16095_v6 = vld [vmem:[#allocation52_spill] sm:$0xff] }
 0x2b5   : > { %16078 = vst [vmem:[#allocation156_spill] sm:$0xff] %v11108_v8  ;;  %v11123_v8 = vld [vmem:[%s14690_s1 + $0xa0] sm:$0xff]  ;;  %16086 = vst [vmem:[#allocation112_spill] sm:$0xff] %v11139_v54  ;;  %3491 = vperm.xlu0 %7298, %v3412_v27   ;;  %v2469_v47 = vmul.f32 %v9868_v9, %v10818_v30  ;;  %vm2629_vm13 = vcmp.eq.s32.totalorder %v11040_v12, 1  ;;  %vm1954_vm1 = vcmp.eq.s32.totalorder %v16100_v16, 1  ;;  %v16101_v12 = vld [vmem:[#allocation69_spill] sm:$0xff] }
 0x2b6   : > { %v11117_v35 = vpop.permute.xlu1 %2594  ;;  %16080 = vst [vmem:[#allocation30_spill] sm:$0xff] %v11123_v8  ;;  %vm15159_vm10 = vcmp.lt.f32.partialorder %v11123_v8, 15.0  ;;  %16089 = vst [vmem:[#allocation51_spill] sm:$0xff] %v11146_v10  ;;  %v11164_v24 = vsel %vm16093_vm15, %v16092_v48, %v15163_v19  ;;  %v2764_v19 = vadd.f32 %v2732_v43, %v10809_v20  ;;  %vm1670_vm15 = vcmp.eq.s32.totalorder %v16101_v12, 1 }
 0x2b7   : > { %vm3117_vm4 = vmand %vm15159_vm10, %vm16084_vm2  ;;  %16094 = vst [vmem:[#allocation211_spill] sm:$0xff] %v11164_v24  ;;  %vm16096_vm2 = vcmp.ge.f32.partialorder %v16095_v6, 1.0  ;;  %v2150_v48 = vmul.f32 %v9665_v34, %v11164_v24  ;;  %v2800_v6 = vmul.f32 %v16027_v14, %v11164_v24  ;;  %v2661_v46 = vsel %vm2629_vm13, %v2469_v47, 0.0  ;;  %v16106_v24 = vld [vmem:[#allocation114_spill] sm:$0xff] }
 0x2b8   : > { %v3149_v0 = vsel %vm3117_vm4, 1, %v16029_v2  ;;  %v11143_v21 = vpop.permute.xlu0 %3165  ;;  %vm3119_vm4 = vmand %vm15182_vm5, %vm16096_vm2  ;;  %v16103_v8 = vrot.slane %v11009_v13, 7  ;;  %v11202_v10 = vadd.f32 %v2661_v46, %v10839_v45  ;;  %v16111_v45 = vrot.slane %v11043_v63, 1 }
 0x2b9   : > { %16087 = vst [vmem:[#allocation29_spill] sm:$0xff] %v11143_v21  ;;  %v16099_v21 = vld [vmem:[#allocation59_spill] sm:$0xff]  ;;  %3222 = vperm.xlu1 %7299, %v3149_v0   ;;  %v3151_v30 = vsel %vm3119_vm4, 1, %v16029_v2  ;;  %v1984_v0 = vsel %vm1952_vm14, %v11013_v57, 0.0  ;;  %v2992_v47 = vsel %vm2960_vm7, %v2800_v6, 0.0  ;;  %v2406_v43 = vsel %vm2374_vm11, %v2150_v48, 0.0  ;;  %v1129_v57 = vpop.f32.mrf.mxu0 }
 0x2ba   : > { %v11157_v25 = vpop.permute.xlu1 %2600  ;;  %vm1694_vm6 = vcmp.eq.s32.totalorder %v16099_v21, 1  ;;  %16107 = vst [vmem:[#allocation69_spill] sm:$0xff] %v11202_v10  ;;  %v2016_v54 = vadd.f32 %v1984_v0, %v11026_v5  ;;  %v11209_v52 = vadd.f32 %v2992_v47, %v2764_v19  ;;  %v16110_v6 = vld [vmem:[#allocation104_spill] sm:$0xff]  ;;  %vm16112_vm7 = vcmask 1046528   ;;  %v11226_v19 = vld [vmem:[%s14690_s1 + $0xc0] sm:$0xff]  ;;  %v16115_v48 = vld [vmem:[#allocation53_spill] sm:$0xff] }
 0x2bb   : > { %16091 = vst [vmem:[#allocation210_spill] sm:$0xff] %v11157_v25  ;;  %v16097_v25 = vld [vmem:[#allocation162_spill] sm:$0xff]  ;;  %vm2634_vm14 = vcmp.eq.s32.totalorder %v16110_v6, 1  ;;  %16114 = vst [vmem:[#allocation213_spill] sm:$0xff] %v11226_v19  ;;  %vm15181_vm11 = vcmp.lt.f32.partialorder %v11226_v19, 15.0  ;;  %vm16116_vm2 = vcmp.ge.f32.partialorder %v16115_v48, 1.0 }
 0x2bc   : > { %vm16098_vm10 = vcmp.lt.f32.partialorder %v16097_v25, 15.0  ;;  %v16102_v25 = vrot.slane %v11036_v44, 7  ;;  %v11196_v20 = vpop.permute.xlu0 %3171  ;;  %16109 = vst [vmem:[#allocation212_spill] sm:$0xff] %v11209_v52  ;;  %v2438_v46 = vadd.f32 %v2406_v43, %v2016_v54  ;;  %vm3121_vm4 = vmand %vm15181_vm11, %vm16116_vm2  ;;  %v2471_v54 = vmul.f32 %v9868_v9, %v10846_v4  ;;  %v16117_v43 = vld [vmem:[#allocation65_spill] sm:$0xff]  ;;  %v16143_v52 = vld [vmem:[#allocation3_spill] sm:$0xff] }
 0x2bd   : > { %v3414_v27 = vsel %vm16098_vm10, 1, %v16029_v2  ;;  %16105 = vst [vmem:[#allocation32_spill] sm:$0xff] %v11196_v20  ;;  %vm2376_vm10 = vcmp.eq.s32.totalorder %v16106_v24, 1  ;;  %3228 = vperm.xlu1 %7299, %v3151_v30   ;;  %v1794_v30 = vmul.f32 %v9619_v58, %v11036_v44  ;;  %vm1930_vm13 = vcmp.eq.s32.totalorder %v16117_v43, 1 }
 0x2be   : > { %v11190_v39 = vsel %vm1276_vm0, %v16103_v8, %v16102_v25  ;;  %v15170_v8 = vrot.slane %v11036_v44, 1  ;;  %v11206_v25 = vpop.permute.xlu1 %2838  ;;  %3497 = vperm.xlu0 %7298, %v3414_v27   ;;  %v3153_v6 = vsel %vm3121_vm4, 1, %v16029_v2  ;;  %vm2352_vm2 = vcmp.eq.s32.totalorder %v16120_v60, 1  ;;  %v11374_v60 = vld [vmem:[%s14690_s1 + $0xe0] sm:$0xff] }
 0x2bf   : > { %16104 = vst [vmem:[#allocation59_spill] sm:$0xff] %v11190_v39  ;;  %16108 = vst [vmem:[#allocation114_spill] sm:$0xff] %v11206_v25  ;;  %v2474_v62 = vmul.f32 %v9868_v9, %v11190_v39  ;;  %v1438_v4 = vmul.f32 %v9622_v32, %v11190_v39  ;;  %v1702_v16 = vsel %vm1670_vm15, %v11001_v37, 0.0  ;;  %v16136_v12 = vrot.slane %v11009_v13, 7 }
 0x2c0   : > { %v11221_v5 = vsel %vm16112_vm7, %v15170_v8, %v16111_v45  ;;  %v11238_v0 = vpop.permute.xlu0 %3177  ;;  %vm2631_vm7 = vcmp.eq.s32.totalorder %v11079_v51, 1  ;;  %v16137_v37 = vrot.slane %v10507_v15, 7  ;;  %v2128_v24 = vmul.f32 %v9665_v34, %v10864_v7 }
 0x2c1   : > { %16113 = vst [vmem:[#allocation104_spill] sm:$0xff] %v11221_v5  ;;  %v2666_v27 = vsel %vm2634_vm14, %v2474_v62, 0.0  ;;  %v16118_v62 = vld [vmem:[#allocation164_spill] sm:$0xff]  ;;  %v2152_v25 = vmul.f32 %v9665_v34, %v11221_v5  ;;  %v2663_v48 = vsel %vm2631_vm7, %v2471_v54, 0.0  ;;  %v1770_v54 = vmul.f32 %v9619_v58, %v9688_v3  ;;  %3234 = vperm.xlu1 %7299, %v3153_v6  }
 0x2c2   : > { %v11241_v47 = vadd.f32 %v2666_v27, %v2438_v46  ;;  %vm16119_vm14 = vcmp.lt.f32.partialorder %v16118_v62, 15.0  ;;  %v11248_v8 = vpop.permute.xlu1 %2844  ;;  %v16121_v46 = vrot.slane %v11046_v33, 7  ;;  %v16122_v27 = vrot.slane %v11043_v63, 7  ;;  %v16124_v62 = vld [vmem:[#allocation144_spill] sm:$0xff] }
 0x2c3   : > { %v3416_v45 = vsel %vm16119_vm14, 1, %v16029_v2  ;;  %v11265_v20 = vadd.f32 %v10946_v18, %v16124_v62  ;;  %v16127_v63 = vld [vmem:[#allocation88_spill] sm:$0xff]  ;;  %v1726_v19 = vsel %vm1694_vm6, %v1438_v4, 0.0  ;;  %v1986_v62 = vsel %vm1954_vm1, %v1794_v30, 0.0 }
 0x2c4   : > { %3503 = vperm.xlu0 %7298, %v3416_v45   ;;  %v11258_v51 = vsel %vm1276_vm0, %v16122_v27, %v16121_v46  ;;  %v11270_v45 = vadd.f32 %v2663_v48, %v10868_v61  ;;  %vm1693_vm4 = vcmp.eq.s32.totalorder %v16127_v63, 1  ;;  %v16128_v46 = vld [vmem:[#allocation149_spill] sm:$0xff]  ;;  %v11283_v3 = vpop.permute.xlu0 %3183  ;;  %v11286_v61 = vadd.f32 %v10946_v18, %v1129_v57  ;;  %v16133_v30 = vld [vmem:[#allocation124_spill] sm:$0xff] }
 0x2c5   : > { %16123 = vst [vmem:[#allocation65_spill] sm:$0xff] %v11258_v51  ;;  %16125 = vst [vmem:[#allocation11_spill] sm:$0xff] %v11265_v20  ;;  %v11275_v27 = vadd.f32 %v10946_v18, %v16128_v46  ;;  %v2476_v10 = vmul.f32 %v9868_v9, %v11258_v51  ;;  %v16131_v48 = vrot.slane %v10950_v59, 7  ;;  %v16132_v6 = vrot.slane %v10243_v50, 7 }
 0x2c6   : > { %16126 = vst [vmem:[#allocation144_spill] sm:$0xff] %v11270_v45  ;;  %16129 = vst [vmem:[#allocation88_spill] sm:$0xff] %v11283_v3  ;;  %v2018_v4 = vadd.f32 %v1986_v62, %v1726_v19  ;;  %v11298_v21 = vpop.permute.xlu1 %2850  ;;  %vm1953_vm6 = vcmp.eq.s32.totalorder %v16133_v30, 1  ;;  %v16134_v3 = vld [vmem:[#allocation196_spill] sm:$0xff]  ;;  %v2408_v57 = vsel %vm2376_vm10, %v2152_v25, 0.0  ;;  %v11315_v19 = vsel %vm1276_vm0, %v16137_v37, %v16136_v12  ;;  %v16139_v62 = vld [vmem:[#allocation163_spill] sm:$0xff] }
 0x2c7   : > { %16130 = vst [vmem:[#allocation149_spill] sm:$0xff] %v11286_v61  ;;  %v11293_v46 = vsel %vm1276_vm0, %v16132_v6, %v16131_v48  ;;  %vm2636_vm1 = vcmp.eq.s32.totalorder %v16134_v3, 1  ;;  %v11307_v45 = vld [vmem:[%s14690_s1 + $0xd0] sm:$0xff]  ;;  %16138 = vst [vmem:[#allocation196_spill] sm:$0xff] %v11315_v19  ;;  %v11319_v3 = vadd.f32 %v10946_v18, %v16139_v62  ;;  %v16141_v6 = vld [vmem:[#allocation54_spill] sm:$0xff]  ;;  %vm1672_vm14 = vcmp.eq.s32.totalorder %v16143_v52, 1 }
 0x2c8   : > { %16135 = vst [vmem:[#allocation124_spill] sm:$0xff] %v11307_v45  ;;  %vm15190_vm7 = vcmp.lt.f32.partialorder %v11307_v45, 15.0  ;;  %v2440_v25 = vadd.f32 %v2408_v57, %v2018_v4  ;;  %v2668_v48 = vsel %vm2636_vm1, %v2476_v10, 0.0  ;;  %vm16142_vm15 = vcmp.ge.f32.partialorder %v16141_v6, 1.0  ;;  %v16144_v18 = vld [vmem:[#allocation167_spill] sm:$0xff]  ;;  %v11335_v4 = vpop.permute.xlu0 %3189  ;;  %v16149_v45 = vld [vmem:[#allocation92_spill] sm:$0xff] }
 0x2c9   : > { %16140 = vst [vmem:[#allocation163_spill] sm:$0xff] %v11319_v3  ;;  %vm3123_vm10 = vmand %vm15190_vm7, %vm16142_vm15  ;;  %v2473_v12 = vmul.f32 %v9868_v9, %v11315_v19  ;;  %vm2633_vm11 = vcmp.eq.s32.totalorder %v11117_v35, 1  ;;  %vm16145_vm5 = vcmp.lt.f32.partialorder %v16144_v18, 15.0  ;;  %v1416_v10 = vmul.f32 %v9622_v32, %v11293_v46  ;;  %v16148_v35 = vld [vmem:[#allocation67_spill] sm:$0xff]  ;;  %v16152_v18 = vld [vmem:[#allocation176_spill] sm:$0xff] }
 0x2ca   : > { %v3155_v15 = vsel %vm3123_vm10, 1, %v16029_v2  ;;  %v3418_v37 = vsel %vm16145_vm5, 1, %v16029_v2  ;;  %16146 = vst [vmem:[#allocation3_spill] sm:$0xff] %v11335_v4  ;;  %v11340_v62 = vadd.f32 %v2668_v48, %v2440_v25  ;;  %v1437_v6 = vmul.f32 %v9622_v32, %v11315_v19  ;;  %v11344_v7 = vpop.permute.xlu1 %2856  ;;  %v16150_v48 = vld [vmem:[#allocation5_spill] sm:$0xff]  ;;  %v16185_v52 = vld [vmem:[#allocation10_spill] sm:$0xff] }
 0x2cb   : > { %3240 = vperm.xlu1 %7299, %v3155_v15   ;;  %3509 = vperm.xlu0 %7298, %v3418_v37   ;;  %vm1932_vm1 = vcmp.eq.s32.totalorder %v16148_v35, 1  ;;  %vm2354_vm5 = vcmp.eq.s32.totalorder %v16149_v45, 1  ;;  %v1962_v4 = vsel %vm1930_vm13, %v1770_v54, 0.0  ;;  %v11353_v25 = vmul.f32 %v9868_v9, %v11293_v46  ;;  %16157 = vst [vmem:[#allocation5_spill] sm:$0xff] %v11374_v60  ;;  %v16195_v35 = vld [vmem:[#allocation123_spill] sm:$0xff] }
 0x2cc   : > { %16147 = vst [vmem:[#allocation214_spill] sm:$0xff] %v11340_v62  ;;  %v2665_v15 = vsel %vm2633_vm11, %v2473_v12, 0.0  ;;  %vm1678_vm15 = vcmp.eq.s32.totalorder %v16150_v48, 1  ;;  %v1994_v57 = vadd.f32 %v1962_v4, %v1702_v16  ;;  %v2384_v37 = vsel %vm2352_vm2, %v2128_v24, 0.0  ;;  %v11394_v51 = vpop.permute.xlu0 %3195  ;;  %v16165_v16 = vld [vmem:[#allocation137_spill] sm:$0xff] }
 0x2cd   : > { %v15191_v62 = vrot.slane %v11319_v3, 7  ;;  %v11360_v19 = vadd.f32 %v2665_v15, %v10902_v36  ;;  %v16153_v54 = vrot.slane %v10987_v31, 1  ;;  %v16154_v39 = vrot.slane %v10950_v59, 1  ;;  %v16158_v36 = vld [vmem:[#allocation74_spill] sm:$0xff]  ;;  %16163 = vst [vmem:[#allocation215_spill] sm:$0xff] %v11394_v51 }
 0x2ce   : > { %vm16155_vm11 = vcmask 1046528   ;;  %vm15200_vm13 = vcmp.lt.f32.partialorder %v11374_v60, 15.0  ;;  %vm1938_vm2 = vcmp.eq.s32.totalorder %v16158_v36, 1  ;;  %v16159_v24 = vrot.slane %v11286_v61, 7  ;;  %v11396_v43 = vpop.permute.xlu1 %2862  ;;  %v16170_v60 = vld [vmem:[#allocation97_spill] sm:$0xff] }
 0x2cf   : > { %16151 = vst [vmem:[#allocation67_spill] sm:$0xff] %v11360_v19  ;;  %v11369_v12 = vsel %vm16155_vm11, %v16154_v39, %v16153_v54  ;;  %v16161_v39 = vld [vmem:[#allocation55_spill] sm:$0xff]  ;;  %v1725_v15 = vsel %vm1693_vm4, %v1437_v6, 0.0  ;;  %v1793_v54 = vmul.f32 %v9619_v58, %v11009_v13  ;;  %16164 = vst [vmem:[#allocation216_spill] sm:$0xff] %v11396_v43  ;;  %vm2347_vm7 = vcmp.eq.s32.totalorder %v16165_v16, 1  ;;  %v16194_v16 = vld [vmem:[#allocation146_spill] sm:$0xff] }
 0x2d0   : > { %16156 = vst [vmem:[#allocation92_spill] sm:$0xff] %v11369_v12  ;;  %v11384_v4 = vsel %vm1276_vm0, %v15191_v62, %v16159_v24  ;;  %vm16162_vm10 = vcmp.ge.f32.partialorder %v16161_v39, 1.0  ;;  %v16166_v39 = vrot.slane %v11036_v44, 1  ;;  %v16167_v3 = vrot.slane %v11009_v13, 1  ;;  %v16172_v13 = vld [vmem:[#allocation169_spill] sm:$0xff] }
 0x2d1   : > { %16160 = vst [vmem:[#allocation74_spill] sm:$0xff] %v11384_v4  ;;  %vm3125_vm11 = vmand %vm15200_vm13, %vm16162_vm10  ;;  %vm16168_vm10 = vcmask 1046528   ;;  %v1772_v6 = vmul.f32 %v9619_v58, %v10950_v59  ;;  %v2130_v51 = vmul.f32 %v9665_v34, %v11369_v12  ;;  %v1985_v43 = vsel %vm1953_vm6, %v1793_v54, 0.0  ;;  %v16202_v36 = vld [vmem:[#allocation121_spill] sm:$0xff] }
 0x2d2   : > { %v3157_v62 = vsel %vm3125_vm11, 1, %v16029_v2  ;;  %v11406_v63 = vsel %vm16168_vm10, %v16167_v3, %v16166_v39  ;;  %vm2360_vm4 = vcmp.eq.s32.totalorder %v16170_v60, 1  ;;  %v1422_v19 = vmul.f32 %v9622_v32, %v11384_v4  ;;  %v16171_v3 = vld [vmem:[#allocation197_spill] sm:$0xff] }
 0x2d3   : > { %16169 = vst [vmem:[#allocation137_spill] sm:$0xff] %v11406_v63  ;;  %3246 = vperm.xlu1 %7299, %v3157_v62   ;;  %v2151_v24 = vmul.f32 %v9665_v34, %v11406_v63  ;;  %vm2375_vm11 = vcmp.eq.s32.totalorder %v16171_v3, 1  ;;  %v2017_v39 = vadd.f32 %v1985_v43, %v1725_v15  ;;  %vm16173_vm10 = vcmp.lt.f32.partialorder %v16172_v13, 15.0  ;;  %v16175_v62 = vld [vmem:[#allocation91_spill] sm:$0xff]  ;;  %v11436_v3 = vpop.permute.xlu0 %3201  ;;  %v11438_v13 = vpop.permute.xlu1 %2868 }
 0x2d4   : > { %v3420_v17 = vsel %vm16173_vm10, 1, %v16029_v2  ;;  %vm1665_vm13 = vcmp.eq.s32.totalorder %v16174_v56, 1  ;;  %vm1925_vm8 = vcmp.eq.s32.totalorder %v16175_v62, 1  ;;  %v11425_v30 = vadd.f32 %v2384_v37, %v1994_v57  ;;  %16178 = vst [vmem:[#allocation97_spill] sm:$0xff] %v11436_v3  ;;  %16179 = vst [vmem:[#allocation197_spill] sm:$0xff] %v11438_v13 }
 0x2d5   : > { %v16176_v54 = vrot.slane %v11275_v27, 7  ;;  %v16177_v63 = vrot.slane %v10987_v31, 7  ;;  %v1704_v43 = vsel %vm1672_vm14, %v1416_v10, 0.0  ;;  %v2407_v15 = vsel %vm2375_vm11, %v2151_v24, 0.0  ;;  %3515 = vperm.xlu0 %7298, %v3420_v17   ;;  %v11454_v17 = vld [vmem:[%s14690_s1 + $0xf0] sm:$0xff]  ;;  %v16187_v10 = vld [vmem:[#allocation115_spill] sm:$0xff] }
 0x2d6   : > { %v1778_v57 = vmul.f32 %v9619_v58, %v11286_v61  ;;  %v16180_v37 = vrot.slane %v16152_v18, 1  ;;  %v16181_v4 = vrot.slane %v11286_v61, 1  ;;  %vm16182_vm6 = vcmask 1046528  }
 0x2d7   : > { %v11432_v28 = vsel %vm1276_vm0, %v16177_v63, %v16176_v54  ;;  %v11449_v63 = vadd.f32 %v2407_v15, %v2017_v39  ;;  %vm3095_vm14 = vcmp.lt.f32.partialorder %v11454_v17, 15.0  ;;  %vm16186_vm11 = vcmp.lt.f32.partialorder %v16185_v52, 15.0  ;;  %v16191_v39 = vld [vmem:[#allocation142_spill] sm:$0xff]  ;;  %v16192_v52 = vld [vmem:[#allocation56_spill] sm:$0xff]  ;;  %v11501_v48 = vpop.permute.xlu0 %3207 }
 0x2d8   : > { %v11447_v31 = vsel %vm16182_vm6, %v16181_v4, %v16180_v37  ;;  %vm16188_vm10 = vcmp.lt.f32.partialorder %v16187_v10, 15.0  ;;  %v2379_v4 = vsel %vm2347_vm7, %v11005_v53, 0.0  ;;  %vm2612_vm6 = vcmp.eq.s32.totalorder %v16191_v39, 1  ;;  %v11476_v37 = vld [vmem:[%s14696_s7 + $0x8] sm:$0x7] }
 0x2d9   : > { %16183 = vst [vmem:[#allocation50_spill] sm:$0xff] %v11447_v31  ;;  %16184 = vst [vmem:[#allocation91_spill] sm:$0xff] %v11449_v63  ;;  %v1964_v54 = vsel %vm1932_vm1, %v1772_v6, 0.0  ;;  %v2386_v15 = vsel %vm2354_vm5, %v2130_v51, 0.0  ;;  %vm2614_vm7 = vcmp.eq.s32.totalorder %v16194_v16, 1  ;;  %v1710_v53 = vsel %vm1678_vm15, %v1422_v19, 0.0 }
 0x2da   : > { %vm11461_vm3 = vmand %vm16188_vm10, %vm16186_vm11  ;;  %vm16193_vm11 = vcmp.ge.f32.partialorder %v16192_v52, 1.0  ;;  %v11487_v6 = vrot.slane %v11476_v37, %v16195_v35  ;;  %v1996_v45 = vadd.f32 %v1964_v54, %v1704_v43  ;;  %v2454_v10 = vmul.f32 %v9868_v9, %v11432_v28  ;;  %v11503_v35 = vpop.permute.xlu1 %2874 }
 0x2db   : > { %vm3127_vm10 = vmand %vm3095_vm14, %vm16193_vm11  ;;  %v2136_v13 = vmul.f32 %v9665_v34, %v11447_v31  ;;  %v16196_v63 = vrot.slane %v16048_v29, 7  ;;  %v16197_v3 = vrot.slane %v11046_v33, 7  ;;  %16199 = vst [vmem:[#allocation115_spill] sm:$0xff] %v11503_v35  ;;  %v11508_v43 = vsel %vm2612_vm6, %v11353_v25, 0.0  ;;  %v16200_v25 = vld [vmem:[#allocation13_spill] sm:$0xff] }
 0x2dc   : > { %v3159_v51 = vsel %vm3127_vm10, 1, %v16029_v2  ;;  %v1970_v54 = vsel %vm1938_vm2, %v1778_v57, 0.0  ;;  %v11521_v35 = vsel %vm2614_vm7, %v2454_v10, 0.0  ;;  %vm3262_vm1 = vcmp.eq.s32.totalorder %v11238_v0, 1  ;;  %v16204_v57 = vld [vmem:[#allocation168_spill] sm:$0xff]  ;;  %v16211_v10 = vld [vmem:[#allocation22_spill] sm:$0xff] }
 0x2dd   : > { %3252 = vperm.xlu1 %7299, %v3159_v51   ;;  %v11499_v19 = vsel %vm1276_vm0, %v16197_v3, %v16196_v63  ;;  %v3682_v51 = vsel %vm11461_vm3, 1, %v16029_v2  ;;  %v3038_v3 = vmul.f32 %v11487_v6, %v11293_v46  ;;  %v11517_v63 = vadd.f32 %v2386_v15, %v1996_v45  ;;  %v16205_v46 = vld [vmem:[#allocation171_spill] sm:$0xff]  ;;  %v16232_v29 = vld [vmem:[#allocation145_spill] sm:$0xff] }
 0x2de   : > { %16198 = vst [vmem:[#allocation10_spill] sm:$0xff] %v11499_v19  ;;  %v2002_v31 = vadd.f32 %v1970_v54, %v1710_v53  ;;  %3717 = vperm.xlu0 %7298, %v3682_v51   ;;  %vm16201_vm5 = vcmp.lt.f32.partialorder %v16200_v25, 15.0  ;;  %vm16203_vm15 = vcmp.lt.f32.partialorder %v16202_v36, 15.0  ;;  %vm2620_vm3 = vcmp.eq.s32.totalorder %v16204_v57, 1  ;;  %v11550_v25 = vpop.permute.xlu1 %2880  ;;  %v16213_v36 = vld [vmem:[#allocation84_spill] sm:$0xff] }
 0x2df   : > { %vm3652_vm2 = vmand %vm16203_vm15, %vm16201_vm5  ;;  %v3294_v24 = vsel %vm3262_vm1, %v3038_v3, 0.0  ;;  %vm16206_vm6 = vcmp.lt.f32.partialorder %v16205_v46, 15.0  ;;  %v1409_v15 = vmul.f32 %v9622_v32, %v11499_v19  ;;  %v16207_v16 = vrot.slane %v10950_v59, 1  ;;  %v11548_v3 = vpop.permute.xlu0 %3213  ;;  %16212 = vst [vmem:[#allocation146_spill] sm:$0xff] %v11550_v25  ;;  %v16216_v25 = vld [vmem:[#allocation34_spill] sm:$0xff]  ;;  %v16231_v19 = vld [vmem:[#allocation139_spill] sm:$0xff] }
 0x2e0   : > { %v3389_v39 = vsel %vm16206_vm6, 1, %v16029_v2  ;;  %v16208_v53 = vrot.slane %v10243_v50, 1  ;;  %vm16209_vm11 = vcmask 1046528   ;;  %v2392_v45 = vsel %vm2360_vm4, %v2136_v13, 0.0 }
 0x2e1   : > { %v2460_v54 = vmul.f32 %v9868_v9, %v16211_v10  ;;  %v11546_v51 = vadd.f32 %v3294_v24, %v10915_v55  ;;  %3422 = vperm.xlu1 %7299, %v3389_v39   ;;  %vm2607_vm10 = vcmp.eq.s32.totalorder %v16213_v36, 1  ;;  %v3684_v60 = vsel %vm3652_vm2, 1, %v16029_v2  ;;  %v16215_v24 = vld [vmem:[#allocation132_spill] sm:$0xff]  ;;  %v16218_v36 = vld [vmem:[#allocation127_spill] sm:$0xff] }
 0x2e2   : > { %v11539_v0 = vsel %vm16209_vm11, %v16208_v53, %v16207_v16  ;;  %v1697_v16 = vsel %vm1665_vm13, %v1409_v15, 0.0  ;;  %v16214_v53 = vld [vmem:[#allocation131_spill] sm:$0xff]  ;;  %v2424_v10 = vadd.f32 %v2392_v45, %v2002_v31  ;;  %v2447_v39 = vmul.f32 %v9868_v9, %v16215_v24  ;;  %3723 = vperm.xlu0 %7298, %v3684_v60   ;;  %v16225_v15 = vld [vmem:[#allocation173_spill] sm:$0xff]  ;;  %v16230_v24 = vld [vmem:[#allocation102_spill] sm:$0xff] }
 0x2e3   : > { %16210 = vst [vmem:[#allocation142_spill] sm:$0xff] %v11539_v0  ;;  %v1957_v13 = vsel %vm1925_vm8, %v16214_v53, 0.0  ;;  %v2652_v55 = vsel %vm2620_vm3, %v2460_v54, 0.0  ;;  %vm16217_vm4 = vcmp.lt.f32.partialorder %v16216_v25, 15.0  ;;  %vm16219_vm7 = vcmp.lt.f32.partialorder %v16218_v36, 15.0  ;;  %v16227_v54 = vld [vmem:[#allocation135_spill] sm:$0xff] }
 0x2e4   : > { %v1989_v52 = vadd.f32 %v1957_v13, %v1697_v16  ;;  %vm11567_vm13 = vmand %vm16219_vm7, %vm16217_vm4  ;;  %v16222_v62 = vrot.slane %v16152_v18, 7  ;;  %v16223_v31 = vrot.slane %v11286_v61, 7  ;;  %vm16226_vm8 = vcmp.lt.f32.partialorder %v16225_v15, 15.0  ;;  %v16228_v16 = vld [vmem:[#allocation150_spill] sm:$0xff]  ;;  %v16229_v13 = vld [vmem:[#allocation80_spill] sm:$0xff] }
 0x2e5   : > { %v3391_v45 = vsel %vm16226_vm8, 1, %v16029_v2  ;;  %v2709_v25 = vmul.f32 %v16023_v11, %v16227_v54  ;;  %v2777_v53 = vmul.f32 %v16027_v14, %v16228_v16  ;;  %vm1679_vm1 = vcmp.eq.s32.totalorder %v16229_v13, 1  ;;  %v16238_v15 = vld [vmem:[#allocation174_spill] sm:$0xff] }
 0x2e6   : > { %v11576_v57 = vsel %vm1276_vm0, %v16223_v31, %v16222_v62  ;;  %v2639_v60 = vsel %vm2607_vm10, %v2447_v39, 0.0  ;;  %v2411_v36 = vadd.f32 %v2379_v4, %v1989_v52  ;;  %vm2935_vm5 = vcmp.eq.s32.totalorder %v11248_v8, 1  ;;  %3428 = vperm.xlu1 %7299, %v3391_v45   ;;  %v11588_v62 = vpop.permute.xlu0 %3219  ;;  %v11590_v31 = vpop.permute.xlu1 %2886  ;;  %v16233_v52 = vld [vmem:[#allocation37_spill] sm:$0xff]  ;;  %v16237_v45 = vld [vmem:[#allocation119_spill] sm:$0xff] }
 0x2e7   : > { %16224 = vst [vmem:[#allocation123_spill] sm:$0xff] %v11576_v57  ;;  %vm2937_vm15 = vcmp.eq.s32.totalorder %v11298_v21, 1  ;;  %vm1939_vm2 = vcmp.eq.s32.totalorder %v16230_v24, 1  ;;  %v2775_v54 = vmul.f32 %v16027_v14, %v16231_v19  ;;  %v2741_v33 = vadd.f32 %v2709_v25, %v16232_v29  ;;  %v16235_v39 = vld [vmem:[#allocation133_spill] sm:$0xff] }
 0x2e8   : > { %v2969_v61 = vsel %vm2937_vm15, %v2777_v53, 0.0  ;;  %v3686_v4 = vsel %vm11567_vm13, 1, %v16029_v2  ;;  %vm16234_vm3 = vcmp.lt.f32.partialorder %v16233_v52, 15.0  ;;  %vm16236_vm6 = vcmp.lt.f32.partialorder %v16235_v39, 15.0 }
 0x2e9   : > { %vm3656_vm11 = vmand %vm16236_vm6, %vm16234_vm3  ;;  %v2671_v21 = vadd.f32 %v2639_v60, %v2411_v36  ;;  %v2707_v16 = vmul.f32 %v16023_v11, %v16237_v45  ;;  %3729 = vperm.xlu0 %7298, %v3686_v4   ;;  %vm16239_vm10 = vcmp.lt.f32.partialorder %v16238_v15, 15.0  ;;  %v2711_v29 = vmul.f32 %v16023_v11, %v10243_v50  ;;  %v16240_v4 = vld [vmem:[#allocation157_spill] sm:$0xff]  ;;  %v16241_v45 = vld [vmem:[#allocation15_spill] sm:$0xff] }
 0x2ea   : > { %v3393_v19 = vsel %vm16239_vm10, 1, %v16029_v2  ;;  %v2967_v56 = vsel %vm2935_vm5, %v2775_v54, 0.0  ;;  %v11612_v25 = vadd.f32 %v2969_v61, %v2741_v33  ;;  %v2779_v53 = vmul.f32 %v16027_v14, %v11539_v0  ;;  %v16243_v50 = vld [vmem:[#allocation143_spill] sm:$0xff]  ;;  %v11623_v8 = vpop.permute.xlu0 %3225  ;;  %v11625_v33 = vpop.permute.xlu1 %2892 }
 0x2eb   : > { %vm2939_vm4 = vcmp.eq.s32.totalorder %v11344_v7, 1  ;;  %v2684_v60 = vadd.f32 %v2652_v55, %v2424_v10  ;;  %v2739_v36 = vadd.f32 %v2707_v16, %v2671_v21  ;;  %3434 = vperm.xlu1 %7299, %v3393_v19   ;;  %v2743_v52 = vadd.f32 %v2711_v29, %v16240_v4  ;;  %v16245_v7 = vld [vmem:[#allocation177_spill] sm:$0xff]  ;;  %v16250_v16 = vld [vmem:[#allocation180_spill] sm:$0xff] }
 0x2ec   : > { %v3688_v39 = vsel %vm3656_vm11, 1, %v16029_v2  ;;  %vm16242_vm7 = vcmp.lt.f32.partialorder %v16241_v45, 15.0  ;;  %vm16244_vm13 = vcmp.lt.f32.partialorder %v16243_v50, 15.0  ;;  %v1423_v61 = vmul.f32 %v9622_v32, %v11576_v57  ;;  %v16252_v45 = vld [vmem:[#allocation202_spill] sm:$0xff] }
 0x2ed   : > { %vm3658_vm8 = vmand %vm16244_vm13, %vm16242_vm7  ;;  %v16246_v10 = vrot.slane %v16245_v7, 1  ;;  %v16247_v19 = vrot.slane %v16152_v18, 1  ;;  %vm16248_vm5 = vcmask 1046528   ;;  %v2971_v54 = vsel %vm2939_vm4, %v2779_v53, 0.0  ;;  %3735 = vperm.xlu0 %7298, %v3688_v39   ;;  %v16255_v53 = vld [vmem:[#allocation23_spill] sm:$0xff] }
 0x2ee   : > { %vm16251_vm15 = vcmp.lt.f32.partialorder %v16250_v16, 15.0  ;;  %v1779_v21 = vmul.f32 %v9619_v58, %v16152_v18  ;;  %vm2948_vm3 = vcmp.eq.s32.totalorder %v16252_v45, 1  ;;  %v11642_v29 = vadd.f32 %v2967_v56, %v2739_v36  ;;  %v11665_v39 = vpop.permute.xlu0 %3231  ;;  %v16263_v45 = vld [vmem:[#allocation141_spill] sm:$0xff] }
 0x2ef   : > { %v11634_v55 = vsel %vm16248_vm5, %v16247_v19, %v16246_v10  ;;  %v3395_v50 = vsel %vm16251_vm15, 1, %v16029_v2  ;;  %v11644_v4 = vadd.f32 %v2971_v54, %v2743_v52  ;;  %v2676_v57 = vadd.f32 %v11508_v43, %v11425_v30  ;;  %v16254_v10 = vld [vmem:[#allocation185_spill] sm:$0xff]  ;;  %v16256_v30 = vld [vmem:[#allocation19_spill] sm:$0xff]  ;;  %v16258_v43 = vld [vmem:[#allocation148_spill] sm:$0xff]  ;;  %v11667_v54 = vpop.permute.xlu1 %2898 }
 0x2f0   : > { %16249 = vst [vmem:[#allocation13_spill] sm:$0xff] %v11634_v55  ;;  %vm2361_vm6 = vcmp.eq.s32.totalorder %v16254_v10, 1  ;;  %v2788_v19 = vmul.f32 %v16027_v14, %v16255_v53  ;;  %v3690_v0 = vsel %vm3658_vm8, 1, %v16029_v2  ;;  %v11654_v18 = vadd.f32 %v11521_v35, %v11517_v63  ;;  %3440 = vperm.xlu1 %7299, %v3395_v50   ;;  %v16262_v35 = vld [vmem:[#allocation106_spill] sm:$0xff] }
 0x2f1   : > { %16253 = vst [vmem:[#allocation121_spill] sm:$0xff] %v11644_v4  ;;  %v2137_v36 = vmul.f32 %v9665_v34, %v11634_v55  ;;  %v2720_v52 = vmul.f32 %v16023_v11, %v16245_v7  ;;  %vm16257_vm11 = vcmp.lt.f32.partialorder %v16256_v30, 15.0  ;;  %vm16259_vm10 = vcmp.lt.f32.partialorder %v16258_v43, 15.0  ;;  %v16261_v4 = vld [vmem:[#allocation205_spill] sm:$0xff]  ;;  %3741 = vperm.xlu0 %7298, %v3690_v0  }
 0x2f2   : > { %vm3660_vm4 = vmand %vm16259_vm10, %vm16257_vm11  ;;  %v1711_v63 = vsel %vm1679_vm1, %v1423_v61, 0.0  ;;  %v2980_v56 = vsel %vm2948_vm3, %v2788_v19, 0.0  ;;  %v3397_v50 = vsel %vm3073_vm9, 1, %v16029_v2  ;;  %v1971_v30 = vsel %vm1939_vm2, %v1779_v21, 0.0 }
 0x2f3   : > { %v2393_v43 = vsel %vm2361_vm6, %v2137_v36, 0.0  ;;  %v2752_v7 = vadd.f32 %v2720_v52, %v2684_v60  ;;  %vm2621_vm7 = vcmp.eq.s32.totalorder %v16261_v4, 1  ;;  %v2461_v13 = vmul.f32 %v9868_v9, %v16262_v35  ;;  %vm16266_vm2 = vmmov %vm16248_vm5  ;;  %v16267_v36 = vld [vmem:[#allocation21_spill] sm:$0xff]  ;;  %v16269_v52 = vld [vmem:[#allocation151_spill] sm:$0xff] }
 0x2f4   : > { %v3692_v61 = vsel %vm3660_vm4, 1, %v16029_v2  ;;  %v3048_v19 = vmul.f32 %v11487_v6, %v16263_v45  ;;  %vm3272_vm1 = vcmp.eq.s32.totalorder %v11501_v48, 1  ;;  %v16264_v24 = vrot.slane %v10954_v22, 1  ;;  %3446 = vperm.xlu1 %7299, %v3397_v50   ;;  %v11701_v45 = vpop.permute.xlu0 %3237  ;;  %v11703_v48 = vpop.permute.xlu1 %2904 }
 0x2f5   : > { %v16265_v21 = vrot.slane %v11275_v27, 1  ;;  %v2003_v60 = vadd.f32 %v1971_v30, %v1711_v63  ;;  %v2712_v0 = vmul.f32 %v16023_v11, %v10950_v59  ;;  %v3012_v4 = vadd.f32 %v2980_v56, %v2752_v7  ;;  %v16273_v30 = vld [vmem:[#allocation195_spill] sm:$0xff]  ;;  %3747 = vperm.xlu0 %7298, %v3692_v61  }
 0x2f6   : > { %vm16268_vm13 = vcmp.lt.f32.partialorder %v16267_v36, 15.0  ;;  %vm16270_vm8 = vcmp.lt.f32.partialorder %v16269_v52, 15.0  ;;  %v2653_v35 = vsel %vm2621_vm7, %v2461_v13, 0.0  ;;  %v3304_v34 = vsel %vm3272_vm1, %v3048_v19, 0.0 }
 0x2f7   : > { %v11693_v10 = vsel %vm16266_vm2, %v16265_v21, %v16264_v24  ;;  %vm3662_vm5 = vmand %vm16270_vm8, %vm16268_vm13  ;;  %v16271_v24 = vld [vmem:[#allocation183_spill] sm:$0xff]  ;;  %v3050_v21 = vmul.f32 %v11487_v6, %v16273_v30  ;;  %v16274_v7 = vrot.slane %v11265_v20, 7  ;;  %v16275_v56 = vrot.slane %v10954_v22, 7 }
 0x2f8   : > { %vm16272_vm15 = vcmp.lt.f32.partialorder %v16271_v24, 15.0  ;;  %v2425_v36 = vadd.f32 %v2393_v43, %v2003_v60  ;;  %v11717_v52 = vadd.f32 %v3304_v34, %v3012_v4  ;;  %vm3274_vm3 = vcmp.eq.s32.totalorder %v11548_v3, 1  ;;  %v16277_v3 = vld [vmem:[#allocation4_spill] sm:$0xff]  ;;  %v11739_v43 = vpop.permute.xlu0 %3243  ;;  %v11741_v61 = vpop.permute.xlu1 %2910 }
 0x2f9   : > { %v3399_v63 = vsel %vm16272_vm15, 1, %v16029_v2  ;;  %v11715_v50 = vsel %vm1276_vm0, %v16275_v56, %v16274_v7  ;;  %v11720_v13 = vadd.f32 %v2712_v0, %v2676_v57  ;;  %v11724_v19 = vmul.f32 %v16027_v14, %v11369_v12  ;;  %v16279_v57 = vld [vmem:[#allocation153_spill] sm:$0xff] }
 0x2fa   : > { %v3694_v30 = vsel %vm3662_vm5, 1, %v16029_v2  ;;  %v3306_v24 = vsel %vm3274_vm3, %v3050_v21, 0.0  ;;  %v11729_v22 = vmul.f32 %v16023_v11, %v11275_v27  ;;  %v2685_v7 = vadd.f32 %v2653_v35, %v2425_v36  ;;  %3452 = vperm.xlu1 %7299, %v3399_v63   ;;  %v16282_v0 = vld [vmem:[#allocation105_spill] sm:$0xff]  ;;  %v16284_v21 = vld [vmem:[#allocation24_spill] sm:$0xff]  ;;  %v16293_v35 = vld [vmem:[#allocation7_spill] sm:$0xff] }
 0x2fb   : > { %vm2962_vm6 = vcmp.eq.s32.totalorder %v11066_v41, 1  ;;  %v11733_v34 = vadd.f32 %v3306_v24, %v10993_v40  ;;  %vm16278_vm11 = vcmp.lt.f32.partialorder %v16277_v3, 15.0  ;;  %vm16280_vm10 = vcmp.lt.f32.partialorder %v16279_v57, 15.0  ;;  %3753 = vperm.xlu0 %7298, %v3694_v30   ;;  %v16283_v24 = vld [vmem:[#allocation36_spill] sm:$0xff] }
 0x2fc   : > { %vm3664_vm4 = vmand %vm16280_vm10, %vm16278_vm11  ;;  %v2802_v60 = vmul.f32 %v16027_v14, %v11221_v5  ;;  %v3401_v41 = vsel %vm3077_vm12, 1, %v16029_v2  ;;  %v3052_v40 = vmul.f32 %v11487_v6, %v16282_v0  ;;  %vm3276_vm7 = vcmp.eq.s32.totalorder %v11588_v62, 1  ;;  %v16285_v5 = vld [vmem:[#allocation35_spill] sm:$0xff]  ;;  %v16289_v62 = vld [vmem:[#allocation28_spill] sm:$0xff] }
 0x2fd   : > { %16276 = vst [vmem:[#allocation168_spill] sm:$0xff] %v11733_v34  ;;  %v2734_v4 = vmul.f32 %v16023_v11, %v11036_v44  ;;  %v2721_v63 = vmul.f32 %v16023_v11, %v16283_v24  ;;  %v2789_v56 = vmul.f32 %v16027_v14, %v16284_v21  ;;  %vm2949_vm1 = vcmp.eq.s32.totalorder %v11590_v31, 1  ;;  %v16287_v0 = vld [vmem:[#allocation155_spill] sm:$0xff]  ;;  %v11769_v31 = vpop.permute.xlu0 %3249 }
 0x2fe   : > { %v2994_v36 = vsel %vm2962_vm6, %v2802_v60, 0.0  ;;  %v3696_v3 = vsel %vm3664_vm4, 1, %v16029_v2  ;;  %v3308_v57 = vsel %vm3276_vm7, %v3052_v40, 0.0  ;;  %vm16286_vm2 = vcmp.lt.f32.partialorder %v16285_v5, 15.0  ;;  %3458 = vperm.xlu1 %7299, %v3401_v41   ;;  %v11771_v60 = vpop.permute.xlu1 %2916  ;;  %v16291_v5 = vld [vmem:[#allocation138_spill] sm:$0xff] }
 0x2ff   : > { %vm16288_vm13 = vcmp.lt.f32.partialorder %v16287_v0, 15.0  ;;  %v3054_v30 = vmul.f32 %v11487_v6, %v16289_v62  ;;  %v11766_v12 = vadd.f32 %v3308_v57, %v11048_v42  ;;  %v2753_v44 = vadd.f32 %v2721_v63, %v2685_v7  ;;  %v16294_v41 = vld [vmem:[#allocation198_spill] sm:$0xff]  ;;  %3759 = vperm.xlu0 %7298, %v3696_v3  }
 0x300   : > { %vm3666_vm8 = vmand %vm16288_vm13, %vm16286_vm2  ;;  %v2981_v34 = vsel %vm2949_vm1, %v2789_v56, 0.0  ;;  %vm3278_vm5 = vcmp.eq.s32.totalorder %v11623_v8, 1  ;;  %vm16292_vm15 = vcmp.lt.f32.partialorder %v16291_v5, 15.0  ;;  %v2723_v62 = vmul.f32 %v16023_v11, %v16293_v35 }
 0x301   : > { %16290 = vst [vmem:[#allocation171_spill] sm:$0xff] %v11766_v12  ;;  %v3403_v40 = vsel %vm16292_vm15, 1, %v16029_v2  ;;  %v3310_v0 = vsel %vm3278_vm5, %v3054_v30, 0.0  ;;  %v2791_v42 = vmul.f32 %v16027_v14, %v16294_v41  ;;  %v11780_v7 = vadd.f32 %v2981_v34, %v2753_v44  ;;  %v16297_v30 = vld [vmem:[#allocation179_spill] sm:$0xff]  ;;  %v16298_v44 = vld [vmem:[#allocation6_spill] sm:$0xff]  ;;  %v11801_v3 = vpop.permute.xlu0 %3255 }
 0x302   : > { %v3698_v8 = vsel %vm3666_vm8, 1, %v16029_v2  ;;  %v11784_v63 = vadd.f32 %v3310_v0, %v11081_v38  ;;  %vm2951_vm3 = vcmp.eq.s32.totalorder %v11625_v33, 1  ;;  %v2755_v56 = vadd.f32 %v2723_v62, %v11087_v26  ;;  %3464 = vperm.xlu1 %7299, %v3403_v40   ;;  %v16301_v38 = vld [vmem:[#allocation190_spill] sm:$0xff]  ;;  %v16302_v33 = vld [vmem:[#allocation109_spill] sm:$0xff]  ;;  %16303 = vst [vmem:[#allocation34_spill] sm:$0xff] %v11801_v3  ;;  %v11803_v0 = vpop.permute.xlu1 %2922 }
 0x303   : > { %16295 = vst [vmem:[#allocation84_spill] sm:$0xff] %v11780_v7  ;;  %v2983_v57 = vsel %vm2951_vm3, %v2791_v42, 0.0  ;;  %v3056_v12 = vmul.f32 %v11487_v6, %v16297_v30  ;;  %vm3280_vm6 = vcmp.eq.s32.totalorder %v11665_v39, 1  ;;  %v2766_v5 = vadd.f32 %v2734_v4, %v11241_v47  ;;  %v16306_v4 = vld [vmem:[#allocation85_spill] sm:$0xff]  ;;  %3765 = vperm.xlu0 %7298, %v3698_v8  }
 0x304   : > { %16296 = vst [vmem:[#allocation131_spill] sm:$0xff] %v11784_v63  ;;  %vm16299_vm11 = vcmp.lt.f32.partialorder %v16298_v44, 15.0  ;;  %vm16300_vm10 = vcmp.lt.f32.partialorder %v16070_v1, 15.0  ;;  %v2725_v34 = vmul.f32 %v16023_v11, %v16301_v38  ;;  %v2793_v26 = vmul.f32 %v16027_v14, %v16302_v33  ;;  %v16308_v42 = vld [vmem:[#allocation49_spill] sm:$0xff] }
 0x305   : > { %vm3668_vm4 = vmand %vm16300_vm10, %vm16299_vm11  ;;  %vm2953_vm7 = vcmp.eq.s32.totalorder %v11667_v54, 1  ;;  %vm16304_vm1 = vcmp.lt.f32.partialorder %v11060_v23, 15.0  ;;  %v11808_v39 = vadd.f32 %v2983_v57, %v2755_v56  ;;  %v3312_v1 = vsel %vm3280_vm6, %v3056_v12, 0.0  ;;  %v16309_v63 = vld [vmem:[#allocation189_spill] sm:$0xff]  ;;  %v16324_v23 = vld [vmem:[#allocation59_spill] sm:$0xff] }
 0x306   : > { %v3405_v47 = vsel %vm16304_vm1, 1, %v16029_v2  ;;  %v3058_v40 = vmul.f32 %v11487_v6, %v16306_v4  ;;  %v11813_v62 = vadd.f32 %v3312_v1, %v11111_v49  ;;  %v2757_v54 = vadd.f32 %v2725_v34, %v16308_v42  ;;  %v16310_v57 = vld [vmem:[#allocation113_spill] sm:$0xff]  ;;  %v16312_v49 = vld [vmem:[#allocation47_spill] sm:$0xff]  ;;  %v16319_v1 = vld [vmem:[#allocation112_spill] sm:$0xff]  ;;  %v11838_v42 = vpop.permute.xlu1 %2928 }
 0x307   : > { %16305 = vst [vmem:[#allocation127_spill] sm:$0xff] %v11808_v39  ;;  %v2985_v30 = vsel %vm2953_vm7, %v2793_v26, 0.0  ;;  %vm3282_vm2 = vcmp.eq.s32.totalorder %v11701_v45, 1  ;;  %v3700_v44 = vsel %vm3668_vm4, 1, %v16029_v2  ;;  %v2727_v56 = vmul.f32 %v16023_v11, %v16309_v63  ;;  %v16311_v39 = vld [vmem:[#allocation64_spill] sm:$0xff]  ;;  %3470 = vperm.xlu1 %7299, %v3405_v47   ;;  %v16315_v26 = vld [vmem:[#allocation38_spill] sm:$0xff] }
 0x308   : > { %16307 = vst [vmem:[#allocation80_spill] sm:$0xff] %v11813_v62  ;;  %v3314_v3 = vsel %vm3282_vm2, %v3058_v40, 0.0  ;;  %v2795_v12 = vmul.f32 %v16027_v14, %v16310_v57  ;;  %vm2940_vm13 = vcmp.eq.s32.totalorder %v16311_v39, 1  ;;  %vm16313_vm8 = vcmp.lt.f32.partialorder %v16312_v49, 15.0  ;;  %v16317_v45 = vld [vmem:[#allocation158_spill] sm:$0xff]  ;;  %v11836_v40 = vpop.permute.xlu0 %3425  ;;  %16322 = vst [vmem:[#allocation133_spill] sm:$0xff] %v11838_v42  ;;  %3771 = vperm.xlu0 %7298, %v3700_v44  }
 0x309   : > { %v3407_v8 = vsel %vm16313_vm8, 1, %v16029_v2  ;;  %v11826_v34 = vadd.f32 %v2985_v30, %v2757_v54  ;;  %vm16316_vm5 = vcmp.lt.f32.partialorder %v16315_v26, 15.0  ;;  %vm16318_vm15 = vcmp.lt.f32.partialorder %v16317_v45, 15.0  ;;  %16321 = vst [vmem:[#allocation37_spill] sm:$0xff] %v11836_v40  ;;  %v16323_v47 = vld [vmem:[#allocation51_spill] sm:$0xff]  ;;  %v16326_v45 = vld [vmem:[#allocation134_spill] sm:$0xff] }
 0x30a   : > { %vm3670_vm3 = vmand %vm16318_vm15, %vm16316_vm5  ;;  %v11833_v4 = vadd.f32 %v3314_v3, %v16319_v1  ;;  %vm2955_vm6 = vcmp.eq.s32.totalorder %v11703_v48, 1  ;;  %v2759_v62 = vadd.f32 %v2727_v56, %v16323_v47  ;;  %v3060_v54 = vmul.f32 %v11487_v6, %v16324_v23  ;;  %v16325_v26 = vld [vmem:[#allocation103_spill] sm:$0xff]  ;;  %v16335_v44 = vld [vmem:[#allocation212_spill] sm:$0xff] }
 0x30b   : > { %16314 = vst [vmem:[#allocation102_spill] sm:$0xff] %v11826_v34  ;;  %v2987_v49 = vsel %vm2955_vm6, %v2795_v12, 0.0  ;;  %vm3284_vm11 = vcmp.eq.s32.totalorder %v11739_v43, 1  ;;  %v3026_v30 = vadd.f32 %v2994_v36, %v2766_v5  ;;  %v2729_v3 = vmul.f32 %v16023_v11, %v16325_v26  ;;  %v16328_v12 = vld [vmem:[#allocation65_spill] sm:$0xff]  ;;  %3476 = vperm.xlu1 %7299, %v3407_v8   ;;  %v16329_v43 = vld [vmem:[#allocation8_spill] sm:$0xff]  ;;  %v16339_v8 = vld [vmem:[#allocation30_spill] sm:$0xff] }
 0x30c   : > { %16320 = vst [vmem:[#allocation145_spill] sm:$0xff] %v11833_v4  ;;  %v2797_v48 = vmul.f32 %v16027_v14, %v16326_v45  ;;  %vm2957_vm10 = vcmp.eq.s32.totalorder %v11741_v61, 1  ;;  %v3702_v1 = vsel %vm3670_vm3, 1, %v16029_v2  ;;  %v11850_v42 = vadd.f32 %v2987_v49, %v2759_v62  ;;  %v16331_v36 = vld [vmem:[#allocation160_spill] sm:$0xff]  ;;  %v16337_v61 = vld [vmem:[#allocation69_spill] sm:$0xff]  ;;  %v3432_v49 = vpop.permute.xlu0 %3431 }
 0x30d   : > { %v3316_v56 = vsel %vm3284_vm11, %v3060_v54, 0.0  ;;  %v3062_v23 = vmul.f32 %v11487_v6, %v16328_v12  ;;  %vm16330_vm4 = vcmp.lt.f32.partialorder %v16329_v43, 15.0  ;;  %vm16332_vm7 = vcmp.lt.f32.partialorder %v16331_v36, 15.0  ;;  %v11867_v54 = vpop.permute.xlu1 %3162  ;;  %v16342_v34 = vld [vmem:[#allocation201_spill] sm:$0xff]  ;;  %3777 = vperm.xlu0 %7298, %v3702_v1   ;;  %v16348_v12 = vld [vmem:[#allocation110_spill] sm:$0xff]  ;;  %v16368_v39 = vld [vmem:[#allocation140_spill] sm:$0xff] }
 0x30e   : > { %16327 = vst [vmem:[#allocation174_spill] sm:$0xff] %v11850_v42  ;;  %vm11858_vm1 = vmand %vm16332_vm7, %vm16330_vm4  ;;  %v11863_v47 = vadd.f32 %v3316_v56, %v16335_v44  ;;  %v2761_v40 = vadd.f32 %v2729_v3, %v16337_v61  ;;  %v2989_v62 = vsel %vm2957_vm10, %v2797_v48, 0.0  ;;  %vm3286_vm2 = vcmp.eq.s32.totalorder %v11769_v31, 1  ;;  %v16341_v42 = vld [vmem:[#allocation192_spill] sm:$0xff]  ;;  %v16349_v1 = vld [vmem:[#allocation42_spill] sm:$0xff] }
 0x30f   : > { %16338 = vst [vmem:[#allocation15_spill] sm:$0xff] %v11867_v54  ;;  %vm16340_vm8 = vcmp.lt.f32.partialorder %v16339_v8, 15.0  ;;  %v3318_v36 = vsel %vm3286_vm2, %v3062_v23, 0.0  ;;  %v2731_v4 = vmul.f32 %v16023_v11, %v16341_v42  ;;  %v2799_v56 = vmul.f32 %v16027_v14, %v16342_v34  ;;  %v16343_v44 = vld [vmem:[#allocation32_spill] sm:$0xff] }
 0x310   : > { %16336 = vst [vmem:[#allocation157_spill] sm:$0xff] %v11863_v47  ;;  %v3409_v43 = vsel %vm16340_vm8, 1, %v16029_v2  ;;  %vm3260_vm5 = vcmp.eq.s32.totalorder %v16343_v44, 1  ;;  %v11877_v3 = vadd.f32 %v2989_v62, %v2761_v40  ;;  %v11879_v31 = vadd.f32 %v3318_v36, %v3026_v30  ;;  %v16346_v48 = vld [vmem:[#allocation20_spill] sm:$0xff]  ;;  %v16351_v40 = vld [vmem:[#allocation162_spill] sm:$0xff]  ;;  %v16356_v36 = vld [vmem:[#allocation137_spill] sm:$0xff] }
 0x311   : > { %vm2959_vm15 = vcmp.eq.s32.totalorder %v11771_v60, 1  ;;  %v3036_v61 = vmul.f32 %v11487_v6, %v16346_v48  ;;  %v3704_v23 = vsel %vm11858_vm1, 1, %v16029_v2  ;;  %v16347_v54 = vld [vmem:[#allocation144_spill] sm:$0xff]  ;;  %vm2942_vm3 = vcmp.eq.s32.totalorder %v16348_v12, 1  ;;  %3482 = vperm.xlu1 %7299, %v3409_v43   ;;  %v16355_v60 = vld [vmem:[#allocation193_spill] sm:$0xff] }
 0x312   : > { %16344 = vst [vmem:[#allocation143_spill] sm:$0xff] %v11877_v3  ;;  %16345 = vst [vmem:[#allocation180_spill] sm:$0xff] %v11879_v31  ;;  %v2763_v47 = vadd.f32 %v2731_v4, %v16347_v54  ;;  %v2991_v8 = vsel %vm2959_vm15, %v2799_v56, 0.0  ;;  %vm16350_vm6 = vcmp.lt.f32.partialorder %v16349_v1, 15.0  ;;  %vm16352_vm11 = vcmp.lt.f32.partialorder %v16351_v40, 15.0  ;;  %v3438_v4 = vpop.permute.xlu0 %3437  ;;  %v16357_v56 = vld [vmem:[#allocation181_spill] sm:$0xff]  ;;  %3783 = vperm.xlu0 %7298, %v3704_v23  }
 0x313   : > { %vm11893_vm10 = vmand %vm16352_vm11, %vm16350_vm6  ;;  %v2733_v62 = vmul.f32 %v16023_v11, %v16355_v60  ;;  %v2801_v5 = vmul.f32 %v16027_v14, %v16356_v36  ;;  %vm2961_vm4 = vcmp.eq.s32.totalorder %v11803_v0, 1  ;;  %v2782_v54 = vmul.f32 %v16027_v14, %v11693_v10  ;;  %v16360_v40 = vld [vmem:[#allocation88_spill] sm:$0xff]  ;;  %v16361_v31 = vld [vmem:[#allocation67_spill] sm:$0xff]  ;;  %v3169_v14 = vpop.permute.xlu1 %3168 }
 0x314   : > { %v3292_v43 = vsel %vm3260_vm5, %v3036_v61, 0.0  ;;  %vm16358_vm7 = vcmp.lt.f32.partialorder %v16357_v56, 15.0  ;;  %v11909_v1 = vadd.f32 %v2991_v8, %v2763_v47  ;;  %vm3264_vm1 = vcmp.eq.s32.totalorder %v16360_v40, 1  ;;  %v16362_v0 = vld [vmem:[#allocation122_spill] sm:$0xff]  ;;  %v16375_v40 = vld [vmem:[#allocation167_spill] sm:$0xff] }
 0x315   : > { %v3411_v48 = vsel %vm16358_vm7, 1, %v16029_v2  ;;  %v2765_v11 = vadd.f32 %v2733_v62, %v16361_v31  ;;  %v2993_v3 = vsel %vm2961_vm4, %v2801_v5, 0.0  ;;  %v11915_v7 = vrot.slane %v11476_v37, %v16362_v0  ;;  %v16363_v23 = vld [vmem:[#allocation46_spill] sm:$0xff]  ;;  %v16365_v62 = vld [vmem:[#allocation164_spill] sm:$0xff] }
 0x316   : > { %16359 = vst [vmem:[#allocation202_spill] sm:$0xff] %v11909_v1  ;;  %v2972_v44 = vsel %vm2940_vm13, %v11724_v19, 0.0  ;;  %v2974_v61 = vsel %vm2942_vm3, %v2782_v54, 0.0  ;;  %v3040_v47 = vmul.f32 %v11487_v6, %v11432_v28  ;;  %v3706_v8 = vsel %vm11893_vm10, 1, %v16029_v2  ;;  %3488 = vperm.xlu1 %7299, %v3411_v48   ;;  %v3444_v5 = vpop.permute.xlu0 %3443  ;;  %v16369_v54 = vld [vmem:[#allocation186_spill] sm:$0xff]  ;;  %v16370_v1 = vld [vmem:[#allocation3_spill] sm:$0xff] }
 0x317   : > { %v2746_v31 = vadd.f32 %v11729_v22, %v11654_v18  ;;  %vm16364_vm2 = vcmp.lt.f32.partialorder %v16363_v23, 15.0  ;;  %vm16366_vm8 = vcmp.lt.f32.partialorder %v16365_v62, 15.0  ;;  %v11933_v19 = vadd.f32 %v2993_v3, %v2765_v11  ;;  %v16371_v22 = vld [vmem:[#allocation213_spill] sm:$0xff]  ;;  %3789 = vperm.xlu0 %7298, %v3706_v8   ;;  %v16379_v8 = vld [vmem:[#allocation147_spill] sm:$0xff]  ;;  %v3175_v62 = vpop.permute.xlu1 %3174 }
 0x318   : > { %vm3676_vm5 = vmand %vm16366_vm8, %vm16364_vm2  ;;  %v3360_v12 = vmul.f32 %v11915_v7, %v16368_v39  ;;  %vm3520_vm13 = vcmp.eq.s32.totalorder %v3432_v49, 1  ;;  %v3324_v0 = vadd.f32 %v3292_v43, %v16369_v54  ;;  %v3296_v30 = vsel %vm3264_vm1, %v3040_v47, 0.0  ;;  %v16373_v43 = vld [vmem:[#allocation48_spill] sm:$0xff] }
 0x319   : > { %16367 = vst [vmem:[#allocation185_spill] sm:$0xff] %v11933_v19  ;;  %vm3266_vm15 = vcmp.eq.s32.totalorder %v16370_v1, 1  ;;  %vm16372_vm3 = vcmp.lt.f32.partialorder %v16371_v22, 15.0  ;;  %v3004_v48 = vadd.f32 %v2972_v44, %v11720_v13  ;;  %v3006_v11 = vadd.f32 %v2974_v61, %v2746_v31  ;;  %v16420_v19 = vld [vmem:[#allocation27_spill] sm:$0xff] }
 0x31a   : > { %v3413_v18 = vsel %vm16372_vm3, 1, %v16029_v2  ;;  %v3042_v3 = vmul.f32 %v11487_v6, %v11715_v50  ;;  %v3552_v49 = vsel %vm3520_vm13, %v3360_v12, 0.0  ;;  %v3708_v23 = vsel %vm3676_vm5, 1, %v16029_v2  ;;  %v3450_v39 = vpop.permute.xlu0 %3449  ;;  %v16380_v12 = vld [vmem:[#allocation124_spill] sm:$0xff] }
 0x31b   : > { %vm16374_vm6 = vcmp.lt.f32.partialorder %v16373_v43, 15.0  ;;  %vm16376_vm11 = vcmp.lt.f32.partialorder %v16375_v40, 15.0  ;;  %v11956_v47 = vadd.f32 %v3552_v49, %v3324_v0  ;;  %v3362_v13 = vmul.f32 %v11915_v7, %v10950_v59  ;;  %3494 = vperm.xlu1 %7299, %v3413_v18   ;;  %3795 = vperm.xlu0 %7298, %v3708_v23   ;;  %v16382_v18 = vld [vmem:[#allocation204_spill] sm:$0xff] }
 0x31c   : > { %vm11952_vm10 = vmand %vm16376_vm11, %vm16374_vm6  ;;  %vm3522_vm4 = vcmp.eq.s32.totalorder %v3438_v4, 1  ;;  %v3328_v44 = vadd.f32 %v3296_v30, %v3004_v48  ;;  %v3298_v61 = vsel %vm3266_vm15, %v3042_v3, 0.0  ;;  %v3035_v31 = vmul.f32 %v11487_v6, %v16379_v8 }
 0x31d   : > { %vm3259_vm7 = vcmp.eq.s32.totalorder %v3169_v14, 1  ;;  %vm16381_vm1 = vcmp.lt.f32.partialorder %v16380_v12, 15.0  ;;  %v3554_v43 = vsel %vm3522_vm4, %v3362_v13, 0.0  ;;  %v3364_v0 = vmul.f32 %v11915_v7, %v11275_v27  ;;  %v16385_v13 = vld [vmem:[#allocation5_spill] sm:$0xff] }
 0x31e   : > { %v3415_v54 = vsel %vm16381_vm1, 1, %v16029_v2  ;;  %vm3524_vm2 = vcmp.eq.s32.totalorder %v3444_v5, 1  ;;  %v3710_v4 = vsel %vm11952_vm10, 1, %v16029_v2  ;;  %v11971_v30 = vadd.f32 %v3554_v43, %v11546_v51  ;;  %v11982_v51 = vpop.permute.xlu0 %3455 }
 0x31f   : > { %v3291_v14 = vsel %vm3259_vm7, %v3035_v31, 0.0  ;;  %v3037_v48 = vmul.f32 %v11487_v6, %v16382_v18  ;;  %v3556_v49 = vsel %vm3524_vm2, %v3364_v0, 0.0  ;;  %vm3261_vm8 = vcmp.eq.s32.totalorder %v3175_v62, 1  ;;  %3500 = vperm.xlu1 %7299, %v3415_v54   ;;  %16384 = vst [vmem:[#allocation19_spill] sm:$0xff] %v11982_v51  ;;  %3801 = vperm.xlu0 %7298, %v3710_v4   ;;  %v16394_v0 = vld [vmem:[#allocation101_spill] sm:$0xff] }
 0x320   : > { %v11976_v3 = vadd.f32 %v3291_v14, %v11642_v29  ;;  %v3366_v5 = vmul.f32 %v11915_v7, %v11265_v20  ;;  %v3330_v23 = vadd.f32 %v3298_v61, %v3006_v11  ;;  %v11980_v40 = vadd.f32 %v3556_v49, %v3328_v44  ;;  %v11997_v61 = vpop.permute.xlu1 %3180  ;;  %v16395_v14 = vld [vmem:[#allocation25_spill] sm:$0xff] }
 0x321   : > { %v3293_v1 = vsel %vm3261_vm8, %v3037_v48, 0.0  ;;  %vm3526_vm5 = vcmp.eq.s32.totalorder %v3450_v39, 1  ;;  %vm16386_vm13 = vcmp.lt.f32.partialorder %v16385_v13, 15.0  ;;  %v3419_v44 = vsel %vm3095_vm14, 1, %v16029_v2  ;;  %v16390_v39 = vld [vmem:[#allocation61_spill] sm:$0xff] }
 0x322   : > { %16383 = vst [vmem:[#allocation23_spill] sm:$0xff] %v11980_v40  ;;  %v3417_v8 = vsel %vm16386_vm13, 1, %v16029_v2  ;;  %v11988_v29 = vadd.f32 %v3293_v1, %v11612_v25  ;;  %v3558_v31 = vsel %vm3526_vm5, %v3366_v5, 0.0  ;;  %v11992_v11 = vpop.permute.xlu0 %3461  ;;  %vm16391_vm15 = vcmp.lt.f32.partialorder %v16390_v39, 15.0  ;;  %v16393_v25 = vld [vmem:[#allocation41_spill] sm:$0xff]  ;;  %v16396_v5 = vld [vmem:[#allocation191_spill] sm:$0xff] }
 0x323   : > { %v11990_v62 = vadd.f32 %v3558_v31, %v3330_v23  ;;  %3506 = vperm.xlu1 %7299, %v3417_v8   ;;  %16389 = vst [vmem:[#allocation205_spill] sm:$0xff] %v11992_v11  ;;  %vm16392_vm3 = vcmp.lt.f32.partialorder %v16205_v46, 15.0  ;;  %v3372_v54 = vmul.f32 %v11915_v7, %v16393_v25  ;;  %v12007_v4 = vmul.f32 %v11915_v7, %v16394_v0  ;;  %v16397_v23 = vld [vmem:[#allocation62_spill] sm:$0xff]  ;;  %v16399_v1 = vld [vmem:[#allocation173_spill] sm:$0xff]  ;;  %v16449_v40 = vld [vmem:[#allocation139_spill] sm:$0xff] }
 0x324   : > { %16387 = vst [vmem:[#allocation148_spill] sm:$0xff] %v11988_v29  ;;  %vm3649_vm6 = vmand %vm16392_vm3, %vm16391_vm15  ;;  %v12011_v48 = vmul.f32 %v11915_v7, %v16395_v14  ;;  %v12016_v46 = vmul.f32 %v11915_v7, %v16396_v5  ;;  %vm16398_vm10 = vcmp.lt.f32.partialorder %v16397_v23, 15.0  ;;  %vm16400_vm4 = vcmp.lt.f32.partialorder %v16399_v1, 15.0  ;;  %v16401_v31 = vld [vmem:[#allocation82_spill] sm:$0xff]  ;;  %v12026_v39 = vpop.permute.xlu1 %3186  ;;  %v16405_v5 = vld [vmem:[#allocation63_spill] sm:$0xff] }
 0x325   : > { %16388 = vst [vmem:[#allocation17_spill] sm:$0xff] %v11990_v62  ;;  %v3681_v49 = vsel %vm3649_vm6, 1, %v16029_v2  ;;  %vm3651_vm7 = vmand %vm16400_vm4, %vm16398_vm10  ;;  %vm16406_vm1 = vcmp.lt.f32.partialorder %v16405_v5, 15.0  ;;  %vm16407_vm2 = vcmp.lt.f32.partialorder %v16238_v15, 15.0  ;;  %v16409_v1 = vld [vmem:[#allocation66_spill] sm:$0xff]  ;;  %vm16411_vm13 = vcmp.lt.f32.partialorder %v16250_v16, 15.0 }
 0x326   : > { %v3468_v43 = vpop.permute.xlu0 %3467  ;;  %16402 = vst [vmem:[#allocation141_spill] sm:$0xff] %v12026_v39  ;;  %v3683_v14 = vsel %vm3651_vm7, 1, %v16029_v2  ;;  %vm3653_vm8 = vmand %vm16407_vm2, %vm16406_vm1  ;;  %vm16410_vm5 = vcmp.lt.f32.partialorder %v16409_v1, 15.0  ;;  %v16414_v15 = vld [vmem:[#allocation39_spill] sm:$0xff]  ;;  %v1418_v16 = vmul.f32 %v9622_v32, %v11432_v28  ;;  %v16422_v62 = vld [vmem:[#allocation9_spill] sm:$0xff]  ;;  %v12081_v28 = vmul.f32 %v11915_v7, %v16283_v24 }
 0x327   : > { %3512 = vperm.xlu1 %7299, %v3419_v44   ;;  %vm3532_vm11 = vcmp.eq.s32.totalorder %v3468_v43, 1  ;;  %v12024_v44 = vmul.f32 %v11915_v7, %v16401_v31  ;;  %v16404_v43 = vld [vmem:[#allocation40_spill] sm:$0xff]  ;;  %vm3655_vm15 = vmand %vm16411_vm13, %vm16410_vm5  ;;  %v12089_v11 = vmul.f32 %v11915_v7, %v16293_v35  ;;  %v16431_v24 = vld [vmem:[#allocation89_spill] sm:$0xff]  ;;  %v12139_v55 = vmul.f32 %v11915_v7, %v16355_v60 }
 0x328   : > { %v3564_v8 = vsel %vm3532_vm11, %v3372_v54, 0.0  ;;  %v12033_v0 = vmul.f32 %v11915_v7, %v16404_v43  ;;  %v16408_v54 = vld [vmem:[#allocation129_spill] sm:$0xff]  ;;  %v12053_v31 = vpop.permute.xlu1 %3192  ;;  %v12057_v43 = vmul.f32 %v11915_v7, %v16414_v15  ;;  %v3687_v1 = vsel %vm3655_vm15, 1, %v16029_v2  ;;  %16423 = vst [vmem:[#allocation105_spill] sm:$0xff] %v12081_v28  ;;  %v16434_v35 = vld [vmem:[#allocation211_spill] sm:$0xff]  ;;  %v16438_v28 = vld [vmem:[#allocation120_spill] sm:$0xff] }
 0x329   : > { %v12029_v25 = vadd.f32 %v3564_v8, %v11717_v52  ;;  %v12042_v23 = vrot.slane %v11476_v37, %v16408_v54  ;;  %v16412_v52 = vld [vmem:[#allocation200_spill] sm:$0xff]  ;;  %v3685_v8 = vsel %vm3653_vm8, 1, %v16029_v2  ;;  %16413 = vst [vmem:[#allocation151_spill] sm:$0xff] %v12053_v31  ;;  %v1774_v54 = vmul.f32 %v9619_v58, %v11275_v27  ;;  %16426 = vst [vmem:[#allocation24_spill] sm:$0xff] %v12089_v11  ;;  %v16544_v51 = vld [vmem:[#allocation81_spill] sm:$0xff] }
 0x32a   : > { %v16415_v37 = vld [vmem:[#allocation16_spill] sm:$0xff]  ;;  %vm1671_vm11 = vcmp.eq.s32.totalorder %v16422_v62, 1  ;;  %vm2606_vm7 = vcmp.eq.s32.totalorder %v16438_v28, 1  ;;  %16448 = vst [vmem:[#allocation109_spill] sm:$0xff] %v12139_v55  ;;  %v16475_v62 = vrot.slane %v11265_v20, 1  ;;  %v16518_v55 = vld [vmem:[#allocation127_spill] sm:$0xff] }
 0x32b   : > { %16403 = vst [vmem:[#allocation21_spill] sm:$0xff] %v12029_v25  ;;  %3714 = vperm.xlu1 %7299, %v3681_v49   ;;  %v12050_v49 = vmul.f32 %v12042_v23, %v16412_v52  ;;  %vm1674_vm3 = vcmp.eq.s32.totalorder %v16415_v37, 1  ;;  %v12065_v5 = vmul.f32 %v12042_v23, %v16255_v53  ;;  %v16418_v52 = vld [vmem:[#allocation194_spill] sm:$0xff]  ;;  %v12076_v25 = vmul.f32 %v12042_v23, %v16420_v19  ;;  %v16424_v53 = vld [vmem:[#allocation107_spill] sm:$0xff]  ;;  %v16429_v19 = vld [vmem:[#allocation93_spill] sm:$0xff] }
 0x32c   : > { %v12072_v31 = vmul.f32 %v12042_v23, %v16418_v52  ;;  %v16427_v52 = vld [vmem:[#allocation26_spill] sm:$0xff]  ;;  %vm2356_vm10 = vcmp.eq.s32.totalorder %v16429_v19, 1  ;;  %v1415_v37 = vmul.f32 %v9622_v32, %v16382_v18  ;;  %v12178_v18 = vmul.f32 %v12042_v23, %v16284_v21 }
 0x32d   : > { %16417 = vst [vmem:[#allocation195_spill] sm:$0xff] %v12065_v5  ;;  %16421 = vst [vmem:[#allocation153_spill] sm:$0xff] %v12076_v25  ;;  %v12085_v5 = vmul.f32 %v12042_v23, %v16424_v53  ;;  %v12102_v25 = vmul.f32 %v12042_v23, %v16431_v24  ;;  %v12106_v53 = vmul.f32 %v11915_v7, %v16309_v63  ;;  %v16546_v29 = vld [vmem:[#allocation30_spill] sm:$0xff] }
 0x32e   : > { %16419 = vst [vmem:[#allocation4_spill] sm:$0xff] %v12072_v31  ;;  %v12093_v31 = vmul.f32 %v12042_v23, %v16427_v52  ;;  %v16436_v52 = vld [vmem:[#allocation94_spill] sm:$0xff]  ;;  %v12126_v63 = vmul.f32 %v11915_v7, %v16325_v26  ;;  %v12143_v26 = vmul.f32 %v12042_v23, %v16449_v40  ;;  %v16456_v40 = vld [vmem:[#allocation136_spill] sm:$0xff]  ;;  %16464 = vst [vmem:[#allocation113_spill] sm:$0xff] %v12178_v18 }
 0x32f   : > { %3720 = vperm.xlu1 %7299, %v3683_v14   ;;  %v16416_v14 = vld [vmem:[#allocation70_spill] sm:$0xff]  ;;  %16425 = vst [vmem:[#allocation36_spill] sm:$0xff] %v12085_v5  ;;  %16432 = vst [vmem:[#allocation28_spill] sm:$0xff] %v12102_v25  ;;  %v12110_v5 = vmul.f32 %v12042_v23, %v16434_v35  ;;  %vm1931_vm4 = vcmp.eq.s32.totalorder %v16436_v52, 1  ;;  %v12130_v35 = vmul.f32 %v11915_v7, %v16341_v42  ;;  %v1706_v42 = vsel %vm1674_vm3, %v1418_v16, 0.0 }
 0x330   : > { %vm1934_vm6 = vcmp.eq.s32.totalorder %v16416_v14, 1  ;;  %16428 = vst [vmem:[#allocation35_spill] sm:$0xff] %v12093_v31  ;;  %16433 = vst [vmem:[#allocation7_spill] sm:$0xff] %v12106_v53  ;;  %v16437_v31 = vld [vmem:[#allocation175_spill] sm:$0xff]  ;;  %v12186_v24 = vmul.f32 %v12042_v23, %v16302_v33  ;;  %v12198_v21 = vmul.f32 %v12042_v23, %v16342_v34  ;;  %v1420_v33 = vmul.f32 %v9622_v32, %v11715_v50  ;;  %v16482_v52 = vld [vmem:[#allocation78_spill] sm:$0xff] }
 0x331   : > { %16435 = vst [vmem:[#allocation198_spill] sm:$0xff] %v12110_v5  ;;  %v2446_v11 = vmul.f32 %v9868_v9, %v16437_v31  ;;  %16443 = vst [vmem:[#allocation179_spill] sm:$0xff] %v12126_v63  ;;  %v16445_v5 = vld [vmem:[#allocation14_spill] sm:$0xff]  ;;  %v16446_v53 = vld [vmem:[#allocation163_spill] sm:$0xff]  ;;  %v1966_v60 = vsel %vm1934_vm6, %v1774_v54, 0.0  ;;  %v12182_v54 = vmul.f32 %v12042_v23, %v16294_v41  ;;  %v12202_v41 = vmul.f32 %v12042_v23, %v16356_v36 }
 0x332   : > { %16444 = vst [vmem:[#allocation6_spill] sm:$0xff] %v12130_v35  ;;  %vm1676_vm8 = vcmp.eq.s32.totalorder %v16445_v5, 1  ;;  %16450 = vst [vmem:[#allocation85_spill] sm:$0xff] %v12143_v26  ;;  %v16451_v35 = vld [vmem:[#allocation152_spill] sm:$0xff]  ;;  %v16452_v63 = vld [vmem:[#allocation150_spill] sm:$0xff]  ;;  %v2132_v26 = vmul.f32 %v16456_v40, %v11693_v10  ;;  %v1703_v34 = vsel %vm1671_vm11, %v1415_v37, 0.0 }
 0x333   : > { %3726 = vperm.xlu1 %7299, %v3685_v8   ;;  %v12098_v8 = vmul.f32 %v11915_v7, %v16301_v38  ;;  %v16439_v38 = vld [vmem:[#allocation68_spill] sm:$0xff]  ;;  %v12150_v25 = vmul.f32 %v12042_v23, %v16452_v63  ;;  %v1771_v63 = vmul.f32 %v9619_v58, %v16414_v15  ;;  %16465 = vst [vmem:[#allocation64_spill] sm:$0xff] %v12182_v54  ;;  %16466 = vst [vmem:[#allocation38_spill] sm:$0xff] %v12186_v24  ;;  %vm16476_vm11 = vcmask 1046528   ;;  %v16511_v54 = vld [vmem:[#allocation131_spill] sm:$0xff] }
 0x334   : > { %vm16440_vm1 = vcmp.lt.f32.partialorder %v16439_v38, 15.0  ;;  %v16454_v38 = vld [vmem:[#allocation142_spill] sm:$0xff]  ;;  %v12194_v15 = vmul.f32 %v12042_v23, %v16326_v45  ;;  %16469 = vst [vmem:[#allocation51_spill] sm:$0xff] %v12198_v21  ;;  %16470 = vst [vmem:[#allocation59_spill] sm:$0xff] %v12202_v41  ;;  %v1998_v24 = vadd.f32 %v1966_v60, %v1706_v42  ;;  %v3474_v45 = vpop.permute.xlu0 %3473  ;;  %v16474_v60 = vrot.slane %v16446_v53, 1  ;;  %v16483_v14 = vld [vmem:[#allocation108_spill] sm:$0xff] }
 0x335   : > { %16430 = vst [vmem:[#allocation155_spill] sm:$0xff] %v12098_v8  ;;  %vm12120_vm2 = vmand %vm3073_vm9, %vm16440_vm1  ;;  %v12135_v8 = vpop.permute.xlu1 %3198  ;;  %vm2616_vm9 = vcmp.eq.s32.totalorder %v16451_v35, 1  ;;  %v2129_v36 = vmul.f32 %v16456_v40, %v16454_v38  ;;  %v1963_v19 = vsel %vm1931_vm4, %v1771_v63, 0.0  ;;  %v1776_v35 = vmul.f32 %v9619_v58, %v11265_v20 }
 0x336   : > { %16447 = vst [vmem:[#allocation190_spill] sm:$0xff] %v12135_v8  ;;  %16453 = vst [vmem:[#allocation49_spill] sm:$0xff] %v12150_v25  ;;  %v12154_v8 = vmul.f32 %v12042_v23, %v16454_v38  ;;  %v3689_v16 = vsel %vm12120_vm2, 1, %v16029_v2  ;;  %v16458_v25 = vld [vmem:[#allocation71_spill] sm:$0xff]  ;;  %vm3534_vm2 = vcmp.eq.s32.totalorder %v3474_v45, 1  ;;  %v12228_v37 = vsel %vm16476_vm11, %v16475_v62, %v16474_v60 }
 0x337   : > { %3732 = vperm.xlu1 %7299, %v3687_v1   ;;  %v16457_v1 = vld [vmem:[#allocation72_spill] sm:$0xff]  ;;  %vm16459_vm13 = vcmp.lt.f32.partialorder %v16458_v25, 15.0  ;;  %v12190_v25 = vmul.f32 %v12042_v23, %v16310_v57  ;;  %16468 = vst [vmem:[#allocation112_spill] sm:$0xff] %v12194_v15  ;;  %v2456_v57 = vmul.f32 %v9868_v9, %v11715_v50  ;;  %v2388_v50 = vsel %vm2356_vm10, %v2132_v26, 0.0 }
 0x338   : > { %16455 = vst [vmem:[#allocation189_spill] sm:$0xff] %v12154_v8  ;;  %vm1936_vm5 = vcmp.eq.s32.totalorder %v16457_v1, 1  ;;  %v16460_v8 = vld [vmem:[#allocation183_spill] sm:$0xff]  ;;  %v3566_v38 = vsel %vm3534_vm2, %v12007_v4, 0.0  ;;  %v12244_v45 = vsel %vm2606_vm7, %v2446_v11, 0.0  ;;  %v2420_v4 = vadd.f32 %v2388_v50, %v1998_v24  ;;  %v16496_v1 = vld [vmem:[#allocation84_spill] sm:$0xff] }
 0x339   : > { %vm16461_vm15 = vcmp.lt.f32.partialorder %v16460_v8, 15.0  ;;  %16467 = vst [vmem:[#allocation158_spill] sm:$0xff] %v12190_v25  ;;  %v16471_v8 = vld [vmem:[#allocation95_spill] sm:$0xff]  ;;  %v16472_v25 = vld [vmem:[#allocation154_spill] sm:$0xff]  ;;  %v12217_v21 = vpop.permute.xlu1 %3204  ;;  %v2648_v42 = vsel %vm2616_vm9, %v2456_v57, 0.0  ;;  %v1995_v60 = vadd.f32 %v1963_v19, %v1703_v34  ;;  %v1708_v62 = vsel %vm1676_vm8, %v1420_v33, 0.0 }
 0x33a   : > { %vm12172_vm3 = vmand %vm16461_vm15, %vm16459_vm13  ;;  %vm2358_vm6 = vcmp.eq.s32.totalorder %v16471_v8, 1  ;;  %vm2353_vm1 = vcmp.eq.s32.totalorder %v16472_v25, 1  ;;  %16473 = vst [vmem:[#allocation103_spill] sm:$0xff] %v12217_v21  ;;  %v16480_v25 = vld [vmem:[#allocation168_spill] sm:$0xff]  ;;  %v2134_v63 = vmul.f32 %v16456_v40, %v12228_v37  ;;  %v3049_v11 = vmul.f32 %v11487_v6, %v16483_v14  ;;  %v16486_v33 = vld [vmem:[#allocation138_spill] sm:$0xff] }
 0x33b   : > { %3738 = vperm.xlu1 %7299, %v3689_v16   ;;  %v3691_v41 = vsel %vm12172_vm3, 1, %v16029_v2  ;;  %v16477_v16 = vld [vmem:[#allocation31_spill] sm:$0xff]  ;;  %v2385_v26 = vsel %vm2353_vm1, %v2129_v36, 0.0  ;;  %v12240_v57 = vadd.f32 %v3566_v38, %v16480_v25  ;;  %v12254_v28 = vadd.f32 %v2648_v42, %v2420_v4  ;;  %v16488_v34 = vld [vmem:[#allocation100_spill] sm:$0xff] }
 0x33c   : > { %vm16478_vm13 = vcmp.lt.f32.partialorder %v16477_v16, 15.0  ;;  %v3480_v16 = vpop.permute.xlu0 %3479  ;;  %v12256_v24 = vadd.f32 %v2385_v26, %v1995_v60  ;;  %vm16487_vm7 = vcmp.lt.f32.partialorder %v16486_v33, 15.0  ;;  %vm1937_vm3 = vcmp.eq.s32.totalorder %v16488_v34, 1  ;;  %v16492_v25 = vld [vmem:[#allocation171_spill] sm:$0xff] }
 0x33d   : > { %vm3661_vm15 = vmand %vm3077_vm12, %vm16478_vm13  ;;  %16481 = vst [vmem:[#allocation134_spill] sm:$0xff] %v12240_v57  ;;  %vm1677_vm12 = vcmp.eq.s32.totalorder %v16482_v52, 1  ;;  %vm3536_vm10 = vcmp.eq.s32.totalorder %v3480_v16, 1  ;;  %v3211_v38 = vpop.permute.xlu1 %3210  ;;  %v1968_v50 = vsel %vm1936_vm5, %v1776_v35, 0.0  ;;  %v16489_v19 = vrot.slane %v16446_v53, 7  ;;  %v16494_v16 = vld [vmem:[#allocation74_spill] sm:$0xff] }
 0x33e   : > { %v3693_v36 = vsel %vm3661_vm15, 1, %v16029_v2  ;;  %v3568_v5 = vsel %vm3536_vm10, %v12011_v48, 0.0  ;;  %vm3273_vm9 = vcmp.eq.s32.totalorder %v3211_v38, 1  ;;  %v16490_v42 = vrot.slane %v11265_v20, 7  ;;  %v16495_v14 = vld [vmem:[#allocation159_spill] sm:$0xff]  ;;  %v16529_v52 = vld [vmem:[#allocation2_spill] sm:$0xff] }
 0x33f   : > { %3744 = vperm.xlu1 %7299, %v3691_v41   ;;  %v16484_v41 = vld [vmem:[#allocation75_spill] sm:$0xff]  ;;  %v12274_v48 = vadd.f32 %v3568_v5, %v16492_v25  ;;  %v3305_v4 = vsel %vm3273_vm9, %v3049_v11, 0.0  ;;  %v2000_v60 = vadd.f32 %v1968_v50, %v1708_v62  ;;  %v2458_v38 = vmul.f32 %v9868_v9, %v16494_v16  ;;  %v16499_v11 = vld [vmem:[#allocation44_spill] sm:$0xff]  ;;  %v16500_v50 = vld [vmem:[#allocation57_spill] sm:$0xff] }
 0x340   : > { %vm16485_vm4 = vcmp.lt.f32.partialorder %v16484_v41, 15.0  ;;  %v12271_v26 = vsel %vm1276_vm0, %v16490_v42, %v16489_v19  ;;  %vm2618_vm1 = vcmp.eq.s32.totalorder %v16495_v14, 1  ;;  %v12280_v35 = vadd.f32 %v3305_v4, %v16496_v1  ;;  %v3486_v41 = vpop.permute.xlu0 %3485  ;;  %v16498_v42 = vld [vmem:[#allocation126_spill] sm:$0xff]  ;;  %v16503_v1 = vld [vmem:[#allocation77_spill] sm:$0xff] }
 0x341   : > { %vm3663_vm8 = vmand %vm16487_vm7, %vm16485_vm4  ;;  %16491 = vst [vmem:[#allocation8_spill] sm:$0xff] %v12271_v26  ;;  %v2390_v33 = vsel %vm2358_vm6, %v2134_v63, 0.0  ;;  %vm3538_vm5 = vcmp.eq.s32.totalorder %v3486_v41, 1  ;;  %v3217_v5 = vpop.permute.xlu1 %3216  ;;  %v3051_v62 = vmul.f32 %v11487_v6, %v16498_v42  ;;  %vm1664_vm2 = vcmp.eq.s32.totalorder %v16499_v11, 1  ;;  %v16505_v41 = vld [vmem:[#allocation209_spill] sm:$0xff]  ;;  %v16507_v42 = vld [vmem:[#allocation60_spill] sm:$0xff] }
 0x342   : > { %16493 = vst [vmem:[#allocation160_spill] sm:$0xff] %v12274_v48  ;;  %16497 = vst [vmem:[#allocation212_spill] sm:$0xff] %v12280_v35  ;;  %v3695_v19 = vsel %vm3663_vm8, 1, %v16029_v2  ;;  %v16501_v25 = vrot.slane %v16500_v50, 7  ;;  %v1421_v8 = vmul.f32 %v9622_v32, %v12271_v26  ;;  %v3570_v63 = vsel %vm3538_vm5, %v12016_v46, 0.0  ;;  %v16538_v35 = vld [vmem:[#allocation90_spill] sm:$0xff] }
 0x343   : > { %3750 = vperm.xlu1 %7299, %v3693_v36   ;;  %v16502_v36 = vrot.slane %v10950_v59, 7  ;;  %vm16504_vm6 = vcmp.lt.f32.partialorder %v16503_v1, 15.0  ;;  %vm16506_vm11 = vcmp.lt.f32.partialorder %v16505_v41, 15.0  ;;  %vm3275_vm15 = vcmp.eq.s32.totalorder %v3217_v5, 1  ;;  %v16513_v41 = vld [vmem:[#allocation149_spill] sm:$0xff] }
 0x344   : > { %vm3665_vm13 = vmand %vm16506_vm11, %vm16504_vm6  ;;  %vm1924_vm10 = vcmp.eq.s32.totalorder %v16507_v42, 1  ;;  %v2650_v15 = vsel %vm2618_vm1, %v2458_v38, 0.0  ;;  %v16508_v59 = vrot.slane %v11275_v27, 1  ;;  %vm16510_vm4 = vcmask 1046528   ;;  %v16552_v42 = vld [vmem:[#allocation130_spill] sm:$0xff] }
 0x345   : > { %v12293_v4 = vsel %vm1276_vm0, %v16502_v36, %v16501_v25  ;;  %v16509_v25 = vrot.slane %v16500_v50, 1  ;;  %v12313_v46 = vadd.f32 %v3570_v63, %v16511_v54  ;;  %v3307_v1 = vsel %vm3275_vm15, %v3051_v62, 0.0  ;;  %vm16516_vm7 = vmmov %vm16510_vm4 }
 0x346   : > { %v2422_v18 = vadd.f32 %v2390_v33, %v2000_v60  ;;  %v1777_v5 = vmul.f32 %v9619_v58, %v16446_v53  ;;  %v16514_v26 = vrot.slane %v16513_v41, 1  ;;  %v16515_v14 = vrot.slane %v16446_v53, 1  ;;  %v3223_v60 = vpop.permute.xlu1 %3222  ;;  %v16521_v33 = vld [vmem:[#allocation182_spill] sm:$0xff]  ;;  %vm16536_vm15 = vmmov %vm16510_vm4 }
 0x347   : > { %v12310_v36 = vsel %vm16510_vm4, %v16509_v25, %v16508_v59  ;;  %16512 = vst [vmem:[#allocation69_spill] sm:$0xff] %v12313_v46  ;;  %3756 = vperm.xlu1 %7299, %v3695_v19   ;;  %v12325_v48 = vadd.f32 %v3307_v1, %v16518_v55  ;;  %v3492_v59 = vpop.permute.xlu0 %3491  ;;  %v16520_v25 = vld [vmem:[#allocation208_spill] sm:$0xff]  ;;  %v3697_v62 = vsel %vm3665_vm13, 1, %v16029_v2  ;;  %v3053_v63 = vmul.f32 %v11487_v6, %v16521_v33  ;;  %v16524_v55 = vld [vmem:[#allocation47_spill] sm:$0xff] }
 0x348   : > { %v12322_v38 = vsel %vm16516_vm7, %v16515_v14, %v16514_v26  ;;  %v2021_v54 = vrot.slane %v16520_v25, 1  ;;  %vm3540_vm8 = vcmp.eq.s32.totalorder %v3492_v59, 1  ;;  %v12331_v46 = vadd.f32 %v2650_v15, %v2422_v18  ;;  %v16522_v14 = vld [vmem:[#allocation79_spill] sm:$0xff]  ;;  %v16526_v59 = vld [vmem:[#allocation65_spill] sm:$0xff]  ;;  %v16527_v33 = vld [vmem:[#allocation80_spill] sm:$0xff] }
 0x349   : > { %16517 = vst [vmem:[#allocation192_spill] sm:$0xff] %v12322_v38  ;;  %16519 = vst [vmem:[#allocation201_spill] sm:$0xff] %v12325_v48  ;;  %v1709_v26 = vsel %vm1677_vm12, %v1421_v8, 0.0  ;;  %v3572_v19 = vsel %vm3540_vm8, %v12024_v44, 0.0  ;;  %vm16523_vm9 = vcmp.lt.f32.partialorder %v16522_v14, 15.0  ;;  %vm16525_vm1 = vcmp.lt.f32.partialorder %v16524_v55, 15.0 }
 0x34a   : > { %vm3667_vm5 = vmand %vm16525_vm1, %vm16523_vm9  ;;  %vm3277_vm6 = vcmp.eq.s32.totalorder %v3223_v60, 1  ;;  %v2135_v1 = vmul.f32 %v16456_v40, %v12322_v38  ;;  %v1408_v53 = vmul.f32 %v9622_v32, %v16526_v59  ;;  %v12345_v18 = vadd.f32 %v3572_v19, %v16527_v33  ;;  %v16530_v8 = vld [vmem:[#allocation33_spill] sm:$0xff]  ;;  %v16531_v14 = vld [vmem:[#allocation178_spill] sm:$0xff]  ;;  %v3229_v34 = vpop.permute.xlu1 %3228 }
 0x34b   : > { %v3309_v15 = vsel %vm3277_vm6, %v3053_v63, 0.0  ;;  %vm1663_vm12 = vcmp.eq.s32.totalorder %v16529_v52, 1  ;;  %vm2346_vm11 = vcmp.eq.s32.totalorder %v16530_v8, 1  ;;  %v1969_v44 = vsel %vm1937_vm3, %v1777_v5, 0.0  ;;  %3762 = vperm.xlu1 %7299, %v3697_v62   ;;  %v16532_v55 = vld [vmem:[#allocation102_spill] sm:$0xff]  ;;  %v3498_v59 = vpop.permute.xlu0 %3497  ;;  %v16537_v5 = vld [vmem:[#allocation87_spill] sm:$0xff] }
 0x34c   : > { %16528 = vst [vmem:[#allocation32_spill] sm:$0xff] %v12345_v18  ;;  %vm2359_vm13 = vcmp.eq.s32.totalorder %v16531_v14, 1  ;;  %v1764_v60 = vmul.f32 %v9619_v58, %v16520_v25  ;;  %v12355_v38 = vadd.f32 %v3309_v15, %v16532_v55  ;;  %v16534_v19 = vld [vmem:[#allocation166_spill] sm:$0xff]  ;;  %v3699_v18 = vsel %vm3667_vm5, 1, %v16029_v2  ;;  %v16539_v62 = vld [vmem:[#allocation207_spill] sm:$0xff]  ;;  %v16541_v15 = vld [vmem:[#allocation45_spill] sm:$0xff] }
 0x34d   : > { %v16535_v33 = vrot.slane %v16534_v19, 1  ;;  %vm3542_vm4 = vcmp.eq.s32.totalorder %v3498_v59, 1  ;;  %v3055_v48 = vmul.f32 %v11487_v6, %v16537_v5  ;;  %vm1923_vm3 = vcmp.eq.s32.totalorder %v16538_v35, 1 }
 0x34e   : > { %16533 = vst [vmem:[#allocation20_spill] sm:$0xff] %v12355_v38  ;;  %v2001_v57 = vadd.f32 %v1969_v44, %v1709_v26  ;;  %v16540_v21 = vrot.slane %v16539_v62, 7  ;;  %v16542_v55 = vrot.slane %v16541_v15, 7  ;;  %vm16545_vm7 = vcmp.lt.f32.partialorder %v16544_v51, 15.0  ;;  %v16548_v44 = vld [vmem:[#allocation145_spill] sm:$0xff] }
 0x34f   : > { %v12360_v63 = vsel %vm16536_vm15, %v2021_v54, %v16535_v33  ;;  %v3574_v33 = vsel %vm3542_vm4, %v12033_v0, 0.0  ;;  %vm16547_vm8 = vcmp.lt.f32.partialorder %v16546_v29, 15.0  ;;  %vm3279_vm1 = vcmp.eq.s32.totalorder %v3229_v34, 1  ;;  %3768 = vperm.xlu1 %7299, %v3699_v18   ;;  %v16550_v29 = vld [vmem:[#allocation174_spill] sm:$0xff]  ;;  %v3504_v14 = vpop.permute.xlu0 %3503  ;;  %v16551_v34 = vld [vmem:[#allocation111_spill] sm:$0xff] }
 0x350   : > { %v12371_v38 = vsel %vm1276_vm0, %v16542_v55, %v16540_v21  ;;  %vm3669_vm9 = vmand %vm16547_vm8, %vm16545_vm7  ;;  %v2391_v59 = vsel %vm2359_vm13, %v2135_v1, 0.0  ;;  %v1696_v26 = vsel %vm1664_vm2, %v1408_v53, 0.0  ;;  %v12383_v5 = vadd.f32 %v3574_v33, %v16548_v44  ;;  %v16553_v18 = vld [vmem:[#allocation83_spill] sm:$0xff]  ;;  %v16554_v33 = vld [vmem:[#allocation52_spill] sm:$0xff] }
 0x351   : > { %16543 = vst [vmem:[#allocation144_spill] sm:$0xff] %v12371_v38  ;;  %v3311_v39 = vsel %vm3279_vm1, %v3055_v48, 0.0  ;;  %v2122_v21 = vmul.f32 %v16456_v40, %v12360_v63  ;;  %v1956_v51 = vsel %vm1924_vm10, %v1764_v60, 0.0  ;;  %v3384_v1 = vmul.f32 %v11915_v7, %v16541_v15  ;;  %v3235_v48 = vpop.permute.xlu1 %3234  ;;  %v16557_v15 = vld [vmem:[#allocation184_spill] sm:$0xff]  ;;  %v16558_v44 = vld [vmem:[#allocation165_spill] sm:$0xff] }
 0x352   : > { %16549 = vst [vmem:[#allocation110_spill] sm:$0xff] %v12383_v5  ;;  %v12390_v0 = vadd.f32 %v3311_v39, %v16550_v29  ;;  %v1407_v53 = vmul.f32 %v9622_v32, %v12371_v38  ;;  %v3701_v11 = vsel %vm3669_vm9, 1, %v16029_v2  ;;  %vm3544_vm2 = vcmp.eq.s32.totalorder %v3504_v14, 1  ;;  %v16559_v32 = vld [vmem:[#allocation157_spill] sm:$0xff]  ;;  %v16560_v38 = vld [vmem:[#allocation118_spill] sm:$0xff] }
 0x353   : > { %v3057_v55 = vmul.f32 %v11487_v6, %v16551_v34  ;;  %vm2345_vm10 = vcmp.eq.s32.totalorder %v16552_v42, 1  ;;  %vm2934_vm5 = vcmp.eq.s32.totalorder %v16553_v18, 1  ;;  %v1988_v39 = vadd.f32 %v1956_v51, %v1696_v26  ;;  %3774 = vperm.xlu1 %7299, %v3701_v11   ;;  %v16569_v11 = vld [vmem:[#allocation53_spill] sm:$0xff]  ;;  %v16586_v42 = vld [vmem:[#allocation18_spill] sm:$0xff] }
 0x354   : > { %v3576_v60 = vsel %vm3544_vm2, %v3384_v1, 0.0  ;;  %vm16555_vm6 = vcmp.lt.f32.partialorder %v16554_v33, 15.0  ;;  %vm16556_vm13 = vcmp.lt.f32.partialorder %v16357_v56, 15.0  ;;  %vm3281_vm4 = vcmp.eq.s32.totalorder %v3235_v48, 1  ;;  %v16566_v33 = vld [vmem:[#allocation143_spill] sm:$0xff] }
 0x355   : > { %vm3671_vm15 = vmand %vm16556_vm13, %vm16555_vm6  ;;  %v2774_v29 = vmul.f32 %v16558_v44, %v16557_v15  ;;  %v1763_v14 = vmul.f32 %v9619_v58, %v16539_v62  ;;  %v12410_v34 = vadd.f32 %v3576_v60, %v16559_v32  ;;  %v3313_v5 = vsel %vm3281_vm4, %v3057_v55, 0.0 }
 0x356   : > { %v16561_v18 = vrot.slane %v16560_v38, 7  ;;  %v16562_v26 = vrot.slane %v11275_v27, 7  ;;  %v12419_v56 = vadd.f32 %v2391_v59, %v2001_v57  ;;  %v16563_v1 = vrot.slane %v16539_v62, 1  ;;  %v16567_v57 = vld [vmem:[#allocation199_spill] sm:$0xff]  ;;  %v16568_v59 = vld [vmem:[#allocation172_spill] sm:$0xff] }
 0x357   : > { %vm16564_vm7 = vcmask 1046528   ;;  %v12427_v15 = vadd.f32 %v3313_v5, %v16566_v33  ;;  %v2966_v32 = vsel %vm2934_vm5, %v2774_v29, 0.0  ;;  %v2378_v55 = vsel %vm2346_vm11, %v2122_v21, 0.0  ;;  %v3241_v29 = vpop.permute.xlu1 %3240 }
 0x358   : > { %v12417_v51 = vsel %vm1276_vm0, %v16562_v26, %v16561_v18  ;;  %v12424_v48 = vsel %vm16564_vm7, %v16563_v1, %v2021_v54  ;;  %v1695_v27 = vsel %vm1663_vm12, %v1407_v53, 0.0  ;;  %v3703_v60 = vsel %vm3671_vm15, 1, %v16029_v2  ;;  %v3510_v53 = vpop.permute.xlu0 %3509  ;;  %v16572_v26 = vld [vmem:[#allocation196_spill] sm:$0xff] }
 0x359   : > { %16565 = vst [vmem:[#allocation42_spill] sm:$0xff] %v12424_v48  ;;  %vm2605_vm0 = vcmp.eq.s32.totalorder %v16567_v57, 1  ;;  %v12437_v18 = vmul.f32 %v16568_v59, %v11265_v20  ;;  %v2736_v54 = vmul.f32 %v16568_v59, %v16520_v25  ;;  %v2410_v5 = vadd.f32 %v2378_v55, %v1988_v39  ;;  %v16573_v39 = vld [vmem:[#allocation156_spill] sm:$0xff]  ;;  %3780 = vperm.xlu1 %7299, %v3703_v60  }
 0x35a   : > { %vm16570_vm8 = vcmp.lt.f32.partialorder %v16569_v11, 15.0  ;;  %vm16571_vm9 = vcmp.lt.f32.partialorder %v16371_v22, 15.0  ;;  %v1955_v52 = vsel %vm1923_vm3, %v1763_v14, 0.0  ;;  %v2121_v8 = vmul.f32 %v16456_v40, %v12424_v48  ;;  %v16574_v11 = vld [vmem:[#allocation34_spill] sm:$0xff]  ;;  %v16575_v20 = vld [vmem:[#allocation180_spill] sm:$0xff] }
 0x35b   : > { %vm3673_vm11 = vmand %vm16571_vm9, %vm16570_vm8  ;;  %v3386_v21 = vmul.f32 %v11915_v7, %v16520_v25  ;;  %v3059_v1 = vmul.f32 %v11487_v6, %v16572_v26  ;;  %vm2964_vm12 = vcmp.eq.s32.totalorder %v16573_v39, 1  ;;  %v1987_v33 = vadd.f32 %v1955_v52, %v1695_v27  ;;  %v16577_v26 = vld [vmem:[#allocation202_spill] sm:$0xff] }
 0x35c   : > { %vm3546_vm1 = vcmp.eq.s32.totalorder %v3510_v53, 1  ;;  %vm3283_vm2 = vcmp.eq.s32.totalorder %v3241_v29, 1  ;;  %v2804_v22 = vmul.f32 %v16558_v44, %v12360_v63  ;;  %v3705_v14 = vsel %vm3673_vm11, 1, %v16029_v2  ;;  %v16579_v27 = vld [vmem:[#allocation54_spill] sm:$0xff]  ;;  %v16584_v29 = vld [vmem:[#allocation117_spill] sm:$0xff] }
 0x35d   : > { %v3578_v35 = vsel %vm3546_vm1, %v3386_v21, 0.0  ;;  %v3315_v55 = vsel %vm3283_vm2, %v3059_v1, 0.0  ;;  %v2670_v25 = vadd.f32 %v12244_v45, %v2410_v5  ;;  %vm3288_vm3 = vcmp.eq.s32.totalorder %v16574_v11, 1  ;;  %v16582_v21 = vld [vmem:[#allocation10_spill] sm:$0xff]  ;;  %3786 = vperm.xlu1 %7299, %v3705_v14  }
 0x35e   : > { %v12460_v40 = vadd.f32 %v3578_v35, %v16575_v20  ;;  %v12463_v39 = vadd.f32 %v3315_v55, %v16577_v26  ;;  %vm16580_vm5 = vcmp.lt.f32.partialorder %v16579_v27, 15.0  ;;  %vm16581_vm6 = vcmp.lt.f32.partialorder %v16380_v12, 15.0  ;;  %v16583_v20 = vld [vmem:[#allocation214_spill] sm:$0xff]  ;;  %v16585_v35 = vld [vmem:[#allocation29_spill] sm:$0xff]  ;;  %v12484_v26 = vpop.permute.xlu1 %3246 }
 0x35f   : > { %vm3675_vm13 = vmand %vm16581_vm6, %vm16580_vm5  ;;  %v2996_v60 = vsel %vm2964_vm12, %v2804_v22, 0.0  ;;  %v2377_v52 = vsel %vm2345_vm10, %v2121_v8, 0.0  ;;  %v2445_v45 = vmul.f32 %v9868_v9, %v16582_v21  ;;  %v3064_v5 = vmul.f32 %v11487_v6, %v16437_v31  ;;  %v16587_v31 = vld [vmem:[#allocation86_spill] sm:$0xff] }
 0x360   : > { %16576 = vst [vmem:[#allocation162_spill] sm:$0xff] %v12460_v40  ;;  %16578 = vst [vmem:[#allocation193_spill] sm:$0xff] %v12463_v39  ;;  %v2768_v53 = vadd.f32 %v2736_v54, %v16583_v20  ;;  %v2706_v1 = vmul.f32 %v16568_v59, %v16584_v29  ;;  %vm3258_vm15 = vcmp.eq.s32.totalorder %v16585_v35, 1  ;;  %v2409_v55 = vadd.f32 %v2377_v52, %v1987_v33  ;;  %v16588_v33 = vld [vmem:[#allocation55_spill] sm:$0xff]  ;;  %v16592_v39 = vld [vmem:[#allocation37_spill] sm:$0xff] }
 0x361   : > { %v2784_v12 = vmul.f32 %v16558_v44, %v12228_v37  ;;  %v3034_v8 = vmul.f32 %v11487_v6, %v16586_v42  ;;  %v3320_v22 = vsel %vm3288_vm3, %v3064_v5, 0.0  ;;  %v3707_v11 = vsel %vm3675_vm13, 1, %v16029_v2  ;;  %v16591_v5 = vld [vmem:[#allocation114_spill] sm:$0xff]  ;;  %v3516_v42 = vpop.permute.xlu0 %3515 }
 0x362   : > { %vm2944_vm10 = vcmp.eq.s32.totalorder %v16587_v31, 1  ;;  %v2453_v54 = vmul.f32 %v9868_v9, %v12293_v4  ;;  %v3028_v27 = vadd.f32 %v2996_v60, %v2768_v53  ;;  %v2738_v20 = vadd.f32 %v2706_v1, %v2670_v25  ;;  %3792 = vperm.xlu1 %7299, %v3707_v11   ;;  %v16593_v25 = vld [vmem:[#allocation43_spill] sm:$0xff]  ;;  %v16594_v60 = vld [vmem:[#allocation125_spill] sm:$0xff] }
 0x363   : > { %vm16589_vm4 = vcmp.lt.f32.partialorder %v16588_v33, 15.0  ;;  %vm16590_vm7 = vcmp.lt.f32.partialorder %v16385_v13, 15.0  ;;  %v3290_v14 = vsel %vm3258_vm15, %v3034_v8, 0.0  ;;  %v2637_v52 = vsel %vm2605_vm0, %v2445_v45, 0.0  ;;  %v16595_v8 = vld [vmem:[#allocation15_spill] sm:$0xff]  ;;  %v16600_v33 = vld [vmem:[#allocation132_spill] sm:$0xff] }
 0x364   : > { %vm3677_vm8 = vmand %vm16590_vm7, %vm16589_vm4  ;;  %vm2933_vm9 = vcmp.eq.s32.totalorder %v16591_v5, 1  ;;  %v3388_v35 = vmul.f32 %v11915_v7, %v16584_v29  ;;  %v2669_v40 = vadd.f32 %v2637_v52, %v2409_v55  ;;  %v3352_v21 = vadd.f32 %v3320_v22, %v3028_v27  ;;  %v16599_v22 = vld [vmem:[#allocation116_spill] sm:$0xff] }
 0x365   : > { %vm3518_vm11 = vcmp.eq.s32.totalorder %v16592_v39, 1  ;;  %vm3548_vm12 = vcmp.eq.s32.totalorder %v3516_v42, 1  ;;  %v2773_v13 = vmul.f32 %v16558_v44, %v16593_v25  ;;  %v3358_v53 = vmul.f32 %v11915_v7, %v16594_v60  ;;  %v16597_v39 = vld [vmem:[#allocation56_spill] sm:$0xff] }
 0x366   : > { %v3580_v57 = vsel %vm3548_vm12, %v3388_v35, 0.0  ;;  %v3709_v45 = vsel %vm3677_vm8, 1, %v16029_v2  ;;  %v2998_v1 = vadd.f32 %v2966_v32, %v2738_v20  ;;  %v2705_v29 = vmul.f32 %v16568_v59, %v16534_v19  ;;  %v12518_v20 = vpop.permute.xlu1 %3252 }
 0x367   : > { %vm3257_vm0 = vcmp.eq.s32.totalorder %v16595_v8, 1  ;;  %v12507_v55 = vadd.f32 %v3580_v57, %v3352_v21  ;;  %vm16598_vm1 = vcmp.lt.f32.partialorder %v16597_v39, 15.0  ;;  %vm2613_vm3 = vcmp.eq.s32.totalorder %v16599_v22, 1  ;;  %3798 = vperm.xlu1 %7299, %v3709_v45   ;;  %v16604_v45 = vld [vmem:[#allocation119_spill] sm:$0xff] }
 0x368   : > { %vm3679_vm2 = vmand %vm3095_vm14, %vm16598_vm1  ;;  %v2965_v11 = vsel %vm2933_vm9, %v2773_v13, 0.0  ;;  %v3550_v27 = vsel %vm3518_vm11, %v3358_v53, 0.0  ;;  %v3033_v32 = vmul.f32 %v11487_v6, %v16600_v33  ;;  %v2748_v21 = vadd.f32 %v12437_v18, %v12254_v28  ;;  %v16601_v13 = vld [vmem:[#allocation187_spill] sm:$0xff]  ;;  %v3718_v53 = vpop.permute.xlu0 %3717  ;;  %v16602_v28 = vld [vmem:[#allocation50_spill] sm:$0xff] }
 0x369   : > { %16596 = vst [vmem:[#allocation137_spill] sm:$0xff] %v12507_v55  ;;  %v2976_v52 = vsel %vm2944_vm10, %v2784_v12, 0.0  ;;  %v3322_v35 = vadd.f32 %v3290_v14, %v2998_v1  ;;  %v2737_v17 = vadd.f32 %v2705_v29, %v2669_v40  ;;  %v2718_v42 = vmul.f32 %v16568_v59, %v16513_v41  ;;  %v16603_v12 = vld [vmem:[#allocation99_spill] sm:$0xff]  ;;  %v12535_v40 = vld [vmem:[%s14697_s8] ss:$0 sm:$0xff] }
 0x36a   : > { %v3289_v5 = vsel %vm3257_vm0, %v3033_v32, 0.0  ;;  %v3618_v60 = vmul.f32 %v12042_v23, %v16601_v13  ;;  %v3711_v57 = vsel %vm3679_vm2, 1, %v16029_v2  ;;  %v2645_v8 = vsel %vm2613_vm3, %v2453_v54, 0.0  ;;  %v3423_v14 = vpop.permute.xlu1 %3422  ;;  %v16605_v32 = vld [vmem:[#allocation203_spill] sm:$0xff] }
 0x36b   : > { %v2997_v39 = vadd.f32 %v2965_v11, %v2737_v17  ;;  %v3582_v22 = vadd.f32 %v3550_v27, %v3322_v35  ;;  %vm3810_vm14 = vcmp.eq.s32.totalorder %v3718_v53, 1  ;;  %v2786_v18 = vmul.f32 %v16558_v44, %v16602_v28  ;;  %3804 = vperm.xlu1 %7299, %v3711_v57   ;;  %v16606_v13 = vld [vmem:[#allocation123_spill] sm:$0xff] }
 0x36c   : > { %vm2946_vm5 = vcmp.eq.s32.totalorder %v16603_v12, 1  ;;  %v3842_v31 = vsel %vm3810_vm14, %v3618_v60, 0.0  ;;  %v3357_v1 = vmul.f32 %v11915_v7, %v16604_v45  ;;  %v12539_v29 = vadd.f32 %v2976_v52, %v2748_v21  ;;  %v3724_v35 = vpop.permute.xlu0 %3723 }
 0x36d   : > { %v3321_v54 = vadd.f32 %v3289_v5, %v2997_v39  ;;  %v3874_v11 = vadd.f32 %v3842_v31, %v3582_v22  ;;  %vm3517_vm6 = vcmp.eq.s32.totalorder %v3423_v14, 1  ;;  %v2677_v27 = vadd.f32 %v2645_v8, %v12256_v24 }
 0x36e   : > { %v12543_v33 = vadd.f32 %v2718_v42, %v12331_v46  ;;  %vm2619_vm13 = vcmp.eq.s32.totalorder %v16605_v32, 1  ;;  %v3549_v17 = vsel %vm3517_vm6, %v3357_v1, 0.0  ;;  %v2459_v60 = vmul.f32 %v9868_v9, %v16606_v13  ;;  %v3429_v46 = vpop.permute.xlu1 %3428  ;;  %v16608_v42 = vld [vmem:[#allocation135_spill] sm:$0xff] }
 0x36f   : > { %v12549_v53 = vadd.f32 %v12535_v40, %v3874_v11  ;;  %vm3812_vm15 = vcmp.eq.s32.totalorder %v3724_v35, 1  ;;  %v12551_v21 = vadd.f32 %v3549_v17, %v3321_v54  ;;  %v12555_v52 = vsel %vm2946_vm5, %v2786_v18, 0.0  ;;  %v16610_v18 = vld [vmem:[#allocation215_spill] sm:$0xff]  ;;  %v16612_v35 = vld [vmem:[#allocation216_spill] sm:$0xff]  ;;  %v16613_v17 = vld [vmem:[#allocation22_spill] sm:$0xff] }
 0x370   : > { %v3844_v24 = vsel %vm3812_vm15, %v12050_v49, 0.0  ;;  %v3359_v5 = vmul.f32 %v11915_v7, %v16608_v42  ;;  %vm3975_vm10 = vcmask 31744   ;;  %v12560_v57 = vsel %vm2619_vm13, %v2459_v60, 0.0  ;;  %v16611_v49 = vld [vmem:[#allocation92_spill] sm:$0xff]  ;;  %v3730_v31 = vpop.permute.xlu0 %3729 }
 0x371   : > { %16607 = vst [vmem:[#allocation181_spill] sm:$0xff] %v12549_v53  ;;  %v12563_v8 = vadd.f32 %v3844_v24, %v11956_v47  ;;  %vm3519_vm4 = vcmp.eq.s32.totalorder %v3429_v46, 1  ;;  %v12567_v39 = vmul.f32 %v12549_v53, %v12549_v53  ;;  %v3044_v22 = vmul.f32 %v11487_v6, %v16494_v16  ;;  %v16645_v53 = vld [vmem:[#allocation32_spill] sm:$0xff] }
 0x372   : > { %vm3268_vm7 = vcmp.eq.s32.totalorder %v16610_v18, 1  ;;  %v3622_v12 = vmul.f32 %v12042_v23, %v16611_v49  ;;  %v3551_v14 = vsel %vm3519_vm4, %v3359_v5, 0.0  ;;  %vm3263_vm8 = vcmp.eq.s32.totalorder %v11997_v61, 1  ;;  %v3435_v32 = vpop.permute.xlu1 %3434  ;;  %v16614_v49 = vld [vmem:[#allocation141_spill] sm:$0xff] }
 0x373   : > { %16609 = vst [vmem:[#allocation88_spill] sm:$0xff] %v12567_v39  ;;  %vm3814_vm9 = vcmp.eq.s32.totalorder %v3730_v31, 1  ;;  %v12576_v47 = vadd.f32 %v3551_v14, %v11976_v3  ;;  %v3979_v45 = vsel %vm3975_vm10, %v12567_v39, 0.0  ;;  %v2713_v1 = vmul.f32 %v16568_v59, %v16500_v50 }
 0x374   : > { %v2781_v16 = vmul.f32 %v16558_v44, %v12310_v36  ;;  %v3039_v54 = vmul.f32 %v11487_v6, %v12293_v4  ;;  %v3846_v11 = vsel %vm3814_vm9, %v3622_v12, 0.0  ;;  %3980 = vadd.xlane.f32.xlu0 %v3979_v45  ;;  %v3300_v61 = vsel %vm3268_vm7, %v3044_v22, 0.0  ;;  %v3736_v42 = vpop.permute.xlu0 %3735  ;;  %v16615_v22 = vld [vmem:[#allocation148_spill] sm:$0xff] }
 0x375   : > { %vm2941_vm11 = vcmp.eq.s32.totalorder %v16612_v35, 1  ;;  %v12588_v3 = vadd.f32 %v3846_v11, %v11971_v30  ;;  %vm3521_vm12 = vcmp.eq.s32.totalorder %v3435_v32, 1  ;;  %v3046_v60 = vmul.f32 %v11487_v6, %v16613_v17  ;;  %v16617_v32 = vld [vmem:[#allocation19_spill] sm:$0xff] }
 0x376   : > { %v3295_v24 = vsel %vm3263_vm8, %v3039_v54, 0.0  ;;  %v3624_v46 = vmul.f32 %v12042_v23, %v11693_v10  ;;  %v3553_v5 = vsel %vm3521_vm12, %v12057_v43, 0.0  ;;  %v2745_v18 = vadd.f32 %v2713_v1, %v2677_v27  ;;  %v3441_v45 = vpop.permute.xlu1 %3440  ;;  %v16616_v10 = vld [vmem:[#allocation121_spill] sm:$0xff]  ;;  %v16618_v43 = vld [vmem:[#allocation23_spill] sm:$0xff] }
 0x377   : > { %vm3265_vm0 = vcmp.eq.s32.totalorder %v16614_v49, 1  ;;  %vm3816_vm1 = vcmp.eq.s32.totalorder %v3736_v42, 1  ;;  %v12597_v12 = vadd.f32 %v3553_v5, %v16615_v22  ;;  %v2973_v30 = vsel %vm2941_vm11, %v2781_v16, 0.0  ;;  %v16619_v5 = vld [vmem:[#allocation97_spill] sm:$0xff] }
 0x378   : > { %v3041_v31 = vmul.f32 %v11487_v6, %v12417_v51  ;;  %v3848_v14 = vsel %vm3816_vm1, %v3624_v46, 0.0  ;;  %v3363_v54 = vmul.f32 %v11915_v7, %v16500_v50  ;;  %v3327_v11 = vadd.f32 %v3295_v24, %v16616_v10  ;;  %v3742_v17 = vpop.permute.xlu0 %3741  ;;  %v16620_v10 = vld [vmem:[#allocation205_spill] sm:$0xff] }
 0x379   : > { %vm3528_vm2 = vcmp.eq.s32.totalorder %v16617_v32, 1  ;;  %v12606_v27 = vadd.f32 %v3848_v14, %v16618_v43  ;;  %vm3523_vm3 = vcmp.eq.s32.totalorder %v3441_v45, 1  ;;  %v3368_v1 = vmul.f32 %v11915_v7, %v16513_v41 }
 0x37a   : > { %v3297_v16 = vsel %vm3265_vm0, %v3041_v31, 0.0  ;;  %v3626_v35 = vmul.f32 %v12042_v23, %v12228_v37  ;;  %v3555_v46 = vsel %vm3523_vm3, %v3363_v54, 0.0  ;;  %v3005_v42 = vadd.f32 %v2973_v30, %v2745_v18  ;;  %v3447_v45 = vpop.permute.xlu1 %3446  ;;  %v16621_v37 = vld [vmem:[#allocation17_spill] sm:$0xff] }
 0x37b   : > { %vm3270_vm14 = vcmp.eq.s32.totalorder %v16619_v5, 1  ;;  %vm3818_vm5 = vcmp.eq.s32.totalorder %v3742_v17, 1  ;;  %v12613_v24 = vadd.f32 %v3555_v46, %v3327_v11  ;;  %v3332_v49 = vadd.f32 %v3300_v61, %v12539_v29  ;;  %v16622_v30 = vld [vmem:[#allocation177_spill] sm:$0xff]  ;;  %v16623_v5 = vld [vmem:[#allocation146_spill] sm:$0xff] }
 0x37c   : > { %v3560_v22 = vsel %vm3528_vm2, %v3368_v1, 0.0  ;;  %v3850_v14 = vsel %vm3818_vm5, %v3626_v35, 0.0  ;;  %v3365_v41 = vmul.f32 %v11915_v7, %v16560_v38  ;;  %v3329_v31 = vadd.f32 %v3297_v16, %v3005_v42  ;;  %v3748_v61 = vpop.permute.xlu0 %3747 }
 0x37d   : > { %vm3530_vm6 = vcmp.eq.s32.totalorder %v16620_v10, 1  ;;  %v12620_v32 = vadd.f32 %v3850_v14, %v16621_v37  ;;  %vm3525_vm13 = vcmp.eq.s32.totalorder %v3447_v45, 1  ;;  %v3302_v18 = vsel %vm3270_vm14, %v3046_v60, 0.0  ;;  %v16624_v14 = vld [vmem:[#allocation13_spill] sm:$0xff]  ;;  %v16627_v10 = vld [vmem:[#allocation106_spill] sm:$0xff] }
 0x37e   : > { %v3370_v54 = vmul.f32 %v11915_v7, %v16622_v30  ;;  %v3628_v29 = vmul.f32 %v12042_v23, %v16602_v28  ;;  %v3557_v11 = vsel %vm3525_vm13, %v3365_v41, 0.0  ;;  %v3010_v43 = vadd.f32 %v12555_v52, %v12543_v33  ;;  %v12630_v46 = vpop.permute.xlu1 %3452  ;;  %v16625_v52 = vld [vmem:[#allocation176_spill] sm:$0xff]  ;;  %v16626_v41 = vld [vmem:[#allocation103_spill] sm:$0xff] }
 0x37f   : > { %v3592_v1 = vadd.f32 %v3560_v22, %v3332_v49  ;;  %vm3820_vm15 = vcmp.eq.s32.totalorder %v3748_v61, 1  ;;  %v12628_v16 = vadd.f32 %v3557_v11, %v3329_v31  ;;  %v2683_v60 = vadd.f32 %v12560_v57, %v12419_v56  ;;  %v16628_v57 = vld [vmem:[#allocation195_spill] sm:$0xff] }
 0x380   : > { %v3562_v35 = vsel %vm3530_vm6, %v3370_v54, 0.0  ;;  %v3852_v17 = vsel %vm3820_vm15, %v3628_v29, 0.0  ;;  %v3334_v42 = vadd.f32 %v3302_v18, %v3010_v43  ;;  %vm2947_vm4 = vcmp.eq.s32.totalorder %v16623_v5, 1  ;;  %v3754_v33 = vpop.permute.xlu0 %3753  ;;  %v16629_v43 = vld [vmem:[#allocation4_spill] sm:$0xff] }
 0x381   : > { %v12635_v28 = vadd.f32 %v3852_v17, %v3592_v1  ;;  %v2787_v45 = vmul.f32 %v16558_v44, %v16624_v14  ;;  %v2719_v49 = vmul.f32 %v16568_v59, %v16625_v52  ;;  %vm3271_vm7 = vcmp.eq.s32.totalorder %v16626_v41, 1 }
 0x382   : > { %v3594_v22 = vadd.f32 %v3562_v35, %v3334_v42  ;;  %vm3822_vm8 = vcmp.eq.s32.totalorder %v3754_v33, 1  ;;  %v3047_v56 = vmul.f32 %v11487_v6, %v16627_v10  ;;  %v12645_v18 = vpop.permute.xlu1 %3458  ;;  %v16630_v42 = vld [vmem:[#allocation21_spill] sm:$0xff] }
 0x383   : > { %v2979_v31 = vsel %vm2947_vm4, %v2787_v45, 0.0  ;;  %v3854_v37 = vsel %vm3822_vm8, %v16628_v57, 0.0  ;;  %v2751_v30 = vadd.f32 %v2719_v49, %v2683_v60  ;;  %v16631_v33 = vld [vmem:[#allocation105_spill] sm:$0xff]  ;;  %vm3285_vm8 = vcmp.eq.s32.totalorder %v12484_v26, 1 }
 0x384   : > { %v12647_v54 = vadd.f32 %v3854_v37, %v3594_v22  ;;  %v3303_v29 = vsel %vm3271_vm7, %v3047_v56, 0.0  ;;  %v3760_v61 = vpop.permute.xlu0 %3759  ;;  %v16632_v60 = vld [vmem:[#allocation153_spill] sm:$0xff]  ;;  %v16633_v56 = vld [vmem:[#allocation134_spill] sm:$0xff]  ;;  %v16634_v37 = vld [vmem:[#allocation24_spill] sm:$0xff] }
 0x385   : > { %v3011_v11 = vadd.f32 %v2979_v31, %v2751_v30  ;;  %vm3824_vm9 = vcmp.eq.s32.totalorder %v3760_v61, 1 }
 0x386   : > { %v3856_v1 = vsel %vm3824_vm9, %v16629_v43, 0.0  ;;  %v3465_v35 = vpop.permute.xlu1 %3464 }
 0x387   : > { %v3335_v17 = vadd.f32 %v3303_v29, %v3011_v11  ;;  %v12651_v5 = vadd.f32 %v3856_v1, %v16630_v42  ;;  %vm3531_vm11 = vcmp.eq.s32.totalorder %v3465_v35, 1  ;;  %v16635_v29 = vld [vmem:[#allocation212_spill] sm:$0xff] }
 0x388   : > { %v3766_v45 = vpop.permute.xlu0 %3765  ;;  %v3563_v41 = vsel %vm3531_vm11, %v16631_v33, 0.0  ;;  %v16636_v11 = vld [vmem:[#allocation36_spill] sm:$0xff] }
 0x389   : > { %vm3826_vm12 = vcmp.eq.s32.totalorder %v3766_v45, 1  ;;  %v12654_v10 = vadd.f32 %v3563_v41, %v3335_v17  ;;  %v16637_v35 = vld [vmem:[#allocation160_spill] sm:$0xff]  ;;  %v16638_v45 = vld [vmem:[#allocation155_spill] sm:$0xff]  ;;  %v16639_v41 = vld [vmem:[#allocation201_spill] sm:$0xff] }
 0x38a   : > { %v3858_v49 = vsel %vm3826_vm12, %v16632_v60, 0.0  ;;  %v3471_v22 = vpop.permute.xlu1 %3470 }
 0x38b   : > { %v12658_v31 = vadd.f32 %v3858_v49, %v16633_v56  ;;  %vm3533_vm0 = vcmp.eq.s32.totalorder %v3471_v22, 1  ;;  %v16640_v49 = vld [vmem:[#allocation35_spill] sm:$0xff] }
 0x38c   : > { %v3772_v57 = vpop.permute.xlu0 %3771  ;;  %v3565_v30 = vsel %vm3533_vm0, %v16634_v37, 0.0 }
 0x38d   : > { %vm3828_vm1 = vcmp.eq.s32.totalorder %v3772_v57, 1  ;;  %v12662_v61 = vadd.f32 %v3565_v30, %v16635_v29  ;;  %v16641_v57 = vld [vmem:[#allocation69_spill] sm:$0xff]  ;;  %v16642_v29 = vld [vmem:[#allocation7_spill] sm:$0xff] }
 0x38e   : > { %v3860_v43 = vsel %vm3828_vm1, %v16636_v11, 0.0  ;;  %v3477_v1 = vpop.permute.xlu1 %3476 }
 0x38f   : > { %v12666_v17 = vadd.f32 %v3860_v43, %v16637_v35  ;;  %vm3535_vm2 = vcmp.eq.s32.totalorder %v3477_v1, 1  ;;  %v16643_v43 = vld [vmem:[#allocation20_spill] sm:$0xff] }
 0x390   : > { %v3778_v42 = vpop.permute.xlu0 %3777  ;;  %v3567_v33 = vsel %vm3535_vm2, %v16638_v45, 0.0  ;;  %v16644_v35 = vld [vmem:[#allocation28_spill] sm:$0xff]  ;;  %vm3287_vm2 = vcmp.eq.s32.totalorder %v12518_v20, 1 }
 0x391   : > { %vm3830_vm3 = vcmp.eq.s32.totalorder %v3778_v42, 1  ;;  %v12670_v60 = vadd.f32 %v3567_v33, %v16639_v41  ;;  %v16669_v20 = vld [vmem:[#allocation96_spill] sm:$0xff] }
 0x392   : > { %v3862_v22 = vsel %vm3830_vm3, %v16640_v49, 0.0  ;;  %v3483_v56 = vpop.permute.xlu1 %3482  ;;  %v16647_v49 = vld [vmem:[#allocation179_spill] sm:$0xff] }
 0x393   : > { %v12674_v37 = vadd.f32 %v3862_v22, %v16641_v57  ;;  %vm3537_vm14 = vcmp.eq.s32.totalorder %v3483_v56, 1  ;;  %v16648_v22 = vld [vmem:[#allocation210_spill] sm:$0xff]  ;;  %v16650_v57 = vld [vmem:[#allocation144_spill] sm:$0xff] }
 0x394   : > { %v3784_v30 = vpop.permute.xlu0 %3783  ;;  %v3569_v11 = vsel %vm3537_vm14, %v16642_v29, 0.0  ;;  %vm2635_vm13 = vcmp.eq.s32.totalorder %v16648_v22, 1  ;;  %v16651_v29 = vld [vmem:[#allocation198_spill] sm:$0xff] }
 0x395   : > { %vm3832_vm5 = vcmp.eq.s32.totalorder %v3784_v30, 1  ;;  %v12678_v1 = vadd.f32 %v3569_v11, %v16643_v43  ;;  %v2475_v30 = vmul.f32 %v9868_v9, %v16650_v57  ;;  %v16656_v22 = vld [vmem:[#allocation6_spill] sm:$0xff] }
 0x396   : > { %v3864_v45 = vsel %vm3832_vm5, %v16644_v35, 0.0  ;;  %v3489_v42 = vpop.permute.xlu1 %3488  ;;  %v16652_v35 = vld [vmem:[#allocation110_spill] sm:$0xff]  ;;  %vm1933_vm5 = vcmp.eq.s32.totalorder %v16669_v20, 1 }
 0x397   : > { %v12682_v33 = vadd.f32 %v3864_v45, %v16645_v53  ;;  %vm3539_vm6 = vcmp.eq.s32.totalorder %v3489_v42, 1  ;;  %v16654_v53 = vld [vmem:[#allocation73_spill] sm:$0xff]  ;;  %v2667_v45 = vsel %vm2635_vm13, %v2475_v30, 0.0  ;;  %v16655_v42 = vld [vmem:[#allocation104_spill] sm:$0xff]  ;;  %v3061_v30 = vmul.f32 %v11487_v6, %v16650_v57 }
 0x398   : > { %v3790_v41 = vpop.permute.xlu0 %3789  ;;  %v3571_v39 = vsel %vm3539_vm6, %v16647_v49, 0.0  ;;  %vm1673_vm7 = vcmp.eq.s32.totalorder %v16654_v53, 1  ;;  %v3644_v49 = vmul.f32 %v12042_v23, %v16655_v42  ;;  %vm16674_vm6 = vcmask 1046528  }
 0x399   : > { %16646 = vst [vmem:[#allocation67_spill] sm:$0xff] %v12682_v33  ;;  %vm3834_vm15 = vcmp.eq.s32.totalorder %v3790_v41, 1  ;;  %v12687_v56 = vadd.f32 %v3571_v39, %v12390_v0  ;;  %v1773_v39 = vmul.f32 %v9619_v58, %v16500_v50  ;;  %v3317_v26 = vsel %vm3285_vm8, %v3061_v30, 0.0 }
 0x39a   : > { %v3866_v11 = vsel %vm3834_vm15, %v16651_v29, 0.0  ;;  %v3495_v43 = vpop.permute.xlu1 %3494  ;;  %v3387_v53 = vmul.f32 %v11915_v7, %v16534_v19 }
 0x39b   : > { %16649 = vst [vmem:[#allocation122_spill] sm:$0xff] %v12687_v56  ;;  %v12693_v55 = vadd.f32 %v3866_v11, %v16652_v35  ;;  %vm3541_vm4 = vcmp.eq.s32.totalorder %v3495_v43, 1  ;;  %v16658_v11 = vld [vmem:[#allocation128_spill] sm:$0xff]  ;;  %v16659_v35 = vld [vmem:[#allocation161_spill] sm:$0xff]  ;;  %v16668_v56 = vld [vmem:[#allocation162_spill] sm:$0xff] }
 0x39c   : > { %v3796_v41 = vpop.permute.xlu0 %3795  ;;  %v3573_v0 = vsel %vm3541_vm4, %v16656_v22, 0.0  ;;  %v1417_v43 = vmul.f32 %v16658_v11, %v12293_v4  ;;  %vm2355_vm11 = vcmp.eq.s32.totalorder %v16659_v35, 1  ;;  %v16660_v22 = vld [vmem:[#allocation91_spill] sm:$0xff]  ;;  %v2803_v4 = vmul.f32 %v16558_v44, %v12424_v48  ;;  %v16676_v35 = vld [vmem:[#allocation170_spill] sm:$0xff] }
 0x39d   : > { %16653 = vst [vmem:[#allocation46_spill] sm:$0xff] %v12693_v55  ;;  %vm3836_vm9 = vcmp.eq.s32.totalorder %v3796_v41, 1  ;;  %v12703_v29 = vadd.f32 %v3573_v0, %v12427_v15  ;;  %v2699_v25 = vadd.f32 %v2667_v45, %v16660_v22  ;;  %v16661_v55 = vld [vmem:[#allocation133_spill] sm:$0xff]  ;;  %v16663_v15 = vld [vmem:[#allocation76_spill] sm:$0xff]  ;;  %v3646_v41 = vmul.f32 %v12042_v23, %v12360_v63 }
 0x39e   : > { %v3868_v42 = vsel %vm3836_vm9, %v3644_v49, 0.0  ;;  %v3501_v2 = vpop.permute.xlu1 %3500  ;;  %vm2963_vm12 = vcmp.eq.s32.totalorder %v16661_v55, 1  ;;  %vm1675_vm1 = vcmp.eq.s32.totalorder %v16663_v15, 1  ;;  %v16664_v49 = vld [vmem:[#allocation109_spill] sm:$0xff]  ;;  %v2735_v45 = vmul.f32 %v16568_v59, %v16539_v62 }
 0x39f   : > { %16657 = vst [vmem:[#allocation164_spill] sm:$0xff] %v12703_v29  ;;  %v12713_v50 = vadd.f32 %v3868_v42, %v12410_v34  ;;  %vm3543_vm0 = vcmp.eq.s32.totalorder %v3501_v2, 1  ;;  %v16665_v34 = vld [vmem:[#allocation193_spill] sm:$0xff]  ;;  %v2995_v55 = vsel %vm2963_vm12, %v2803_v4, 0.0  ;;  %v16666_v42 = vld [vmem:[#allocation10_spill] sm:$0xff]  ;;  %v3385_v63 = vmul.f32 %v11915_v7, %v16539_v62 }
 0x3a0   : > { %v3802_v57 = vpop.permute.xlu0 %3801  ;;  %v3575_v0 = vsel %vm3543_vm0, %v16664_v49, 0.0  ;;  %v3063_v22 = vmul.f32 %v11487_v6, %v16666_v42  ;;  %v16667_v49 = vld [vmem:[#allocation185_spill] sm:$0xff]  ;;  %v1419_v62 = vmul.f32 %v16658_v11, %v12417_v51  ;;  %v1775_v11 = vmul.f32 %v9619_v58, %v16560_v38  ;;  %v16677_v58 = vld [vmem:[#allocation98_spill] sm:$0xff] }
 0x3a1   : > { %16662 = vst [vmem:[#allocation140_spill] sm:$0xff] %v12713_v50  ;;  %vm3838_vm3 = vcmp.eq.s32.totalorder %v3802_v57, 1  ;;  %v12725_v2 = vadd.f32 %v3575_v0, %v16665_v34  ;;  %v2767_v50 = vadd.f32 %v2735_v45, %v2699_v25  ;;  %v3349_v29 = vadd.f32 %v3317_v26, %v16667_v49  ;;  %v16670_v57 = vld [vmem:[#allocation136_spill] sm:$0xff] }
 0x3a2   : > { %v3870_v30 = vsel %vm3838_vm3, %v3646_v41, 0.0  ;;  %v3507_v48 = vpop.permute.xlu1 %3506  ;;  %v2131_v4 = vmul.f32 %v16670_v57, %v12310_v36  ;;  %v3319_v0 = vsel %vm3287_vm2, %v3063_v22, 0.0  ;;  %v1705_v41 = vsel %vm1673_vm7, %v1417_v43, 0.0 }
 0x3a3   : > { %v12733_v33 = vadd.f32 %v3870_v30, %v16668_v56  ;;  %vm3545_vm14 = vcmp.eq.s32.totalorder %v3507_v48, 1  ;;  %v3027_v25 = vadd.f32 %v2995_v55, %v2767_v50  ;;  %v1965_v26 = vsel %vm1933_vm5, %v1773_v39, 0.0  ;;  %v16671_v56 = vld [vmem:[#allocation11_spill] sm:$0xff] }
 0x3a4   : > { %v3577_v34 = vsel %vm3545_vm14, %v3385_v63, 0.0  ;;  %v2387_v48 = vsel %vm2355_vm11, %v2131_v4, 0.0  ;;  %v16672_v42 = vrot.slane %v16671_v56, 1  ;;  %v16673_v30 = vrot.slane %v16560_v38, 1  ;;  %v16679_v56 = vld [vmem:[#allocation8_spill] sm:$0xff] }
 0x3a5   : > { %v12742_v45 = vadd.f32 %v3577_v34, %v3349_v29  ;;  %v16675_v29 = vld [vmem:[#allocation12_spill] sm:$0xff]  ;;  %v3351_v39 = vadd.f32 %v3319_v0, %v3027_v25  ;;  %v1997_v43 = vadd.f32 %v1965_v26, %v1705_v41  ;;  %vm2357_vm4 = vcmp.eq.s32.totalorder %v16676_v35, 1 }
 0x3a6   : > { %v12751_v22 = vsel %vm16674_vm6, %v16673_v30, %v16672_v42  ;;  %v3513_v63 = vpop.permute.xlu1 %3512  ;;  %vm2615_vm13 = vcmp.eq.s32.totalorder %v16675_v29, 1  ;;  %v2455_v50 = vmul.f32 %v9868_v9, %v12417_v51  ;;  %v1707_v49 = vsel %vm1675_vm1, %v1419_v62, 0.0  ;;  %v16678_v34 = vld [vmem:[#allocation188_spill] sm:$0xff]  ;;  %v16680_v62 = vld [vmem:[#allocation85_spill] sm:$0xff] }
 0x3a7   : > { %vm3547_vm15 = vcmp.eq.s32.totalorder %v3513_v63, 1  ;;  %v2133_v19 = vmul.f32 %v16670_v57, %v12751_v22  ;;  %vm1935_vm7 = vcmp.eq.s32.totalorder %v16677_v58, 1  ;;  %v2419_v4 = vadd.f32 %v2387_v48, %v1997_v43  ;;  %v16681_v29 = vld [vmem:[#allocation197_spill] sm:$0xff]  ;;  %v16684_v58 = vld [vmem:[#allocation163_spill] sm:$0xff] }
 0x3a8   : > { %v3579_v55 = vsel %vm3547_vm15, %v3387_v53, 0.0  ;;  %v2647_v0 = vsel %vm2615_vm13, %v2455_v50, 0.0  ;;  %vm2617_vm8 = vcmp.eq.s32.totalorder %v16678_v34, 1  ;;  %v1967_v25 = vsel %vm1935_vm7, %v1775_v11, 0.0  ;;  %v16686_v34 = vld [vmem:[#allocation115_spill] sm:$0xff] }
 0x3a9   : > { %v12765_v20 = vadd.f32 %v3579_v55, %v3351_v39  ;;  %v2389_v26 = vsel %vm2357_vm4, %v2133_v19, 0.0  ;;  %v2457_v51 = vmul.f32 %v9868_v9, %v16679_v56  ;;  %v1999_v15 = vadd.f32 %v1967_v25, %v1707_v49 }
 0x3aa   : > { %v3715_v41 = vpop.permute.xlu1 %3714  ;;  %v2679_v30 = vadd.f32 %v2647_v0, %v2419_v4  ;;  %vm2943_vm11 = vcmp.eq.s32.totalorder %v16681_v29, 1  ;;  %v12776_v48 = vadd.f32 %v12535_v40, %v12563_v8  ;;  %v2715_v39 = vmul.f32 %v16568_v59, %v16560_v38  ;;  %v16685_v4 = vld [vmem:[#allocation192_spill] sm:$0xff] }
 0x3ab   : > { %vm3809_vm9 = vcmp.eq.s32.totalorder %v3715_v41, 1  ;;  %v2649_v57 = vsel %vm2617_vm8, %v2457_v51, 0.0  ;;  %v2421_v53 = vadd.f32 %v2389_v26, %v1999_v15  ;;  %v2783_v9 = vmul.f32 %v16558_v44, %v12751_v22  ;;  %v16688_v15 = vld [vmem:[#allocation189_spill] sm:$0xff] }
 0x3ac   : > { %v3841_v42 = vsel %vm3809_vm9, %v16680_v62, 0.0  ;;  %v2747_v55 = vadd.f32 %v2715_v39, %v2679_v30  ;;  %v2717_v38 = vmul.f32 %v16568_v59, %v16684_v58  ;;  %v2785_v0 = vmul.f32 %v16558_v44, %v16685_v4  ;;  %v16689_v30 = vld [vmem:[#allocation151_spill] sm:$0xff] }
 0x3ad   : > { %v3873_v63 = vadd.f32 %v3841_v42, %v12551_v21  ;;  %v2681_v35 = vadd.f32 %v2649_v57, %v2421_v53  ;;  %v16682_v21 = vld [vmem:[#allocation49_spill] sm:$0xff]  ;;  %v2975_v49 = vsel %vm2943_vm11, %v2783_v9, 0.0  ;;  %vm2945_vm0 = vcmp.eq.s32.totalorder %v16686_v34, 1 }
 0x3ae   : > { %v3721_v11 = vpop.permute.xlu1 %3720  ;;  %v12798_v25 = vmul.f32 %v12776_v48, %v12776_v48  ;;  %v3007_v51 = vadd.f32 %v2975_v49, %v2747_v55  ;;  %v2977_v42 = vsel %vm2945_vm0, %v2785_v0, 0.0  ;;  %vm3267_vm2 = vcmp.eq.s32.totalorder %v16689_v30, 1 }
 0x3af   : > { %v12783_v43 = vadd.f32 %v12535_v40, %v3873_v63  ;;  %vm3811_vm12 = vcmp.eq.s32.totalorder %v3721_v11, 1  ;;  %v2749_v44 = vadd.f32 %v2717_v38, %v2681_v35  ;;  %v3043_v63 = vmul.f32 %v11487_v6, %v16679_v56 }
 0x3b0   : > { %v3843_v50 = vsel %vm3811_vm12, %v16682_v21, 0.0  ;;  %16687 = vst [vmem:[#allocation3_spill] sm:$0xff] %v12798_v25  ;;  %v12820_v53 = vadd.f32 %v12535_v40, %v12606_v27  ;;  %v3623_v11 = vmul.f32 %v12042_v23, %v12310_v36  ;;  %v3985_v39 = vsel %vm3975_vm10, %v12798_v25, 0.0 }
 0x3b1   : > { %v3875_v19 = vadd.f32 %v3843_v50, %v12576_v47  ;;  %v12789_v8 = vmul.f32 %v12783_v43, %v12783_v43  ;;  %v12802_v47 = vadd.f32 %v12535_v40, %v12588_v3  ;;  %v3009_v27 = vadd.f32 %v2977_v42, %v2749_v44 }
 0x3b2   : > { %v3727_v41 = vpop.permute.xlu1 %3726  ;;  %v3299_v35 = vsel %vm3267_vm2, %v3043_v63, 0.0  ;;  %v3045_v21 = vmul.f32 %v11487_v6, %v16606_v13  ;;  %v3367_v50 = vmul.f32 %v11915_v7, %v16684_v58  ;;  %vm3527_vm14 = vcmp.eq.s32.totalorder %v12630_v46, 1 }
 0x3b3   : > { %16683 = vst [vmem:[#allocation186_spill] sm:$0xff] %v12789_v8  ;;  %v12805_v26 = vadd.f32 %v12535_v40, %v3875_v19  ;;  %vm3813_vm1 = vcmp.eq.s32.totalorder %v3727_v41, 1  ;;  %v3976_v59 = vsel %vm3975_vm10, %v12789_v8, 0.0  ;;  %v12833_v56 = vmul.f32 %v12802_v47, %v12802_v47  ;;  %v16693_v19 = vld [vmem:[#allocation190_spill] sm:$0xff] }
 0x3b4   : > { %v3845_v62 = vsel %vm3813_vm1, %v16688_v15, 0.0  ;;  %3977 = vadd.xlane.f32.xlu1 %v3976_v59  ;;  %vm3269_vm5 = vcmp.eq.s32.totalorder %v16693_v19, 1  ;;  %v12848_v38 = vadd.f32 %v12535_v40, %v12620_v32  ;;  %v3625_v13 = vmul.f32 %v12042_v23, %v12751_v22 }
 0x3b5   : > { %v3877_v57 = vadd.f32 %v3845_v62, %v12597_v12  ;;  %v12814_v3 = vmul.f32 %v12805_v26, %v12805_v26  ;;  %16691 = vst [vmem:[#allocation48_spill] sm:$0xff] %v12833_v56  ;;  %v12854_v58 = vmul.f32 %v12820_v53, %v12820_v53  ;;  %v3991_v0 = vsel %vm3975_vm10, %v12833_v56, 0.0 }
 0x3b6   : > { %v3733_v29 = vpop.permute.xlu1 %3732  ;;  %v3331_v32 = vadd.f32 %v3299_v35, %v3007_v51  ;;  %v3559_v34 = vsel %vm3527_vm14, %v3367_v50, 0.0  ;;  %v3369_v41 = vmul.f32 %v11915_v7, %v16625_v52  ;;  %v3301_v59 = vsel %vm3269_vm5, %v3045_v21, 0.0 }
 0x3b7   : > { %16690 = vst [vmem:[#allocation213_spill] sm:$0xff] %v12814_v3  ;;  %v12827_v12 = vadd.f32 %v12535_v40, %v3877_v57  ;;  %vm3815_vm3 = vcmp.eq.s32.totalorder %v3733_v29, 1  ;;  %v3982_v9 = vsel %vm3975_vm10, %v12814_v3, 0.0  ;;  %16694 = vst [vmem:[#allocation147_spill] sm:$0xff] %v12854_v58  ;;  %vm3529_vm13 = vcmp.eq.s32.totalorder %v12645_v18, 1 }
 0x3b8   : > { %v3847_v36 = vsel %vm3815_vm3, %v3623_v11, 0.0  ;;  %3983 = vadd.xlane.f32.xlu0 %v3982_v9  ;;  %3986 = vadd.xlane.f32.xlu1 %v3985_v39  ;;  %v12873_v62 = vadd.f32 %v12535_v40, %v12635_v28  ;;  %v3627_v7 = vmul.f32 %v12042_v23, %v16685_v4  ;;  %v3997_v52 = vsel %vm3975_vm10, %v12854_v58, 0.0 }
 0x3b9   : > { %v3879_v55 = vadd.f32 %v3847_v36, %v12613_v24  ;;  %v12843_v49 = vmul.f32 %v12827_v12, %v12827_v12  ;;  %v12881_v18 = vmul.f32 %v12848_v38, %v12848_v38  ;;  %v3561_v30 = vsel %vm3529_vm13, %v3369_v41, 0.0 }
 0x3ba   : > { %v3739_v6 = vpop.permute.xlu1 %3738  ;;  %v3333_v4 = vadd.f32 %v3301_v59, %v3009_v27  ;;  %v12894_v11 = vadd.f32 %v12535_v40, %v12647_v54  ;;  %v3629_v9 = vmul.f32 %v12042_v23, %v16624_v14  ;;  %v12902_v21 = vmul.f32 %v12873_v62, %v12873_v62 }
 0x3bb   : > { %16692 = vst [vmem:[#allocation167_spill] sm:$0xff] %v12843_v49  ;;  %v12857_v24 = vadd.f32 %v12535_v40, %v3879_v55  ;;  %vm3817_vm6 = vcmp.eq.s32.totalorder %v3739_v6, 1  ;;  %v3988_v46 = vsel %vm3975_vm10, %v12843_v49, 0.0  ;;  %16696 = vst [vmem:[#allocation204_spill] sm:$0xff] %v12881_v18  ;;  %v4003_v35 = vsel %vm3975_vm10, %v12881_v18, 0.0 }
 0x3bc   : > { %v3849_v22 = vsel %vm3817_vm6, %v3625_v13, 0.0  ;;  %3989 = vadd.xlane.f32.xlu0 %v3988_v46  ;;  %3992 = vadd.xlane.f32.xlu1 %v3991_v0  ;;  %16698 = vst [vmem:[#allocation61_spill] sm:$0xff] %v12902_v21  ;;  %v3593_v27 = vadd.f32 %v3561_v30, %v3333_v4  ;;  %v12915_v19 = vadd.f32 %v12535_v40, %v12651_v5 }
 0x3bd   : > { %v3881_v44 = vadd.f32 %v3849_v22, %v12628_v16  ;;  %v12869_v15 = vmul.f32 %v12857_v24, %v12857_v24  ;;  %v3591_v16 = vadd.f32 %v3559_v34, %v3331_v32  ;;  %v12919_v13 = vmul.f32 %v12894_v11, %v12894_v11  ;;  %v16701_v34 = vld [vmem:[#allocation113_spill] sm:$0xff] }
 0x3be   : > { %v3745_v51 = vpop.permute.xlu1 %3744  ;;  %v4009_v32 = vsel %vm3975_vm10, %v12902_v21, 0.0 }
 0x3bf   : > { %16695 = vst [vmem:[#allocation124_spill] sm:$0xff] %v12869_v15  ;;  %v12884_v42 = vadd.f32 %v12535_v40, %v3881_v44  ;;  %vm3819_vm15 = vcmp.eq.s32.totalorder %v3745_v51, 1  ;;  %v3994_v28 = vsel %vm3975_vm10, %v12869_v15, 0.0  ;;  %16700 = vst [vmem:[#allocation101_spill] sm:$0xff] %v12919_v13  ;;  %v4015_v44 = vsel %vm3975_vm10, %v12919_v13, 0.0 }
 0x3c0   : > { %v3851_v57 = vsel %vm3819_vm15, %v3627_v7, 0.0  ;;  %3995 = vadd.xlane.f32.xlu0 %v3994_v28  ;;  %3998 = vadd.xlane.f32.xlu1 %v3997_v52  ;;  %v12938_v51 = vmul.f32 %v12915_v19, %v12915_v19  ;;  %v12942_v7 = vadd.f32 %v12535_v40, %v12658_v31  ;;  %v12957_v31 = vadd.f32 %v12535_v40, %v12666_v17 }
 0x3c1   : > { %v3883_v63 = vadd.f32 %v3851_v57, %v3591_v16  ;;  %v12890_v29 = vmul.f32 %v12884_v42, %v12884_v42  ;;  %v16704_v16 = vld [vmem:[#allocation64_spill] sm:$0xff]  ;;  %vm4783_vm15 = vcmask 27648  }
 0x3c2   : > { %v3751_v39 = vpop.permute.xlu1 %3750  ;;  %16703 = vst [vmem:[#allocation191_spill] sm:$0xff] %v12938_v51 }
 0x3c3   : > { %16697 = vst [vmem:[#allocation5_spill] sm:$0xff] %v12890_v29  ;;  %v12905_v36 = vadd.f32 %v12535_v40, %v3883_v63  ;;  %vm3821_vm4 = vcmp.eq.s32.totalorder %v3751_v39, 1  ;;  %v4000_v54 = vsel %vm3975_vm10, %v12890_v29, 0.0  ;;  %v4021_v63 = vsel %vm3975_vm10, %v12938_v51, 0.0 }
 0x3c4   : > { %v3853_v50 = vsel %vm3821_vm4, %v3629_v9, 0.0  ;;  %4001 = vadd.xlane.f32.xlu0 %v4000_v54  ;;  %4004 = vadd.xlane.f32.xlu1 %v4003_v35  ;;  %v16707_v35 = vld [vmem:[#allocation38_spill] sm:$0xff] }
 0x3c5   : > { %v3885_v55 = vadd.f32 %v3853_v50, %v3593_v27  ;;  %v12911_v14 = vmul.f32 %v12905_v36, %v12905_v36  ;;  %v12978_v50 = vadd.f32 %v12535_v40, %v12674_v37 }
 0x3c6   : > { %v3757_v6 = vpop.permute.xlu1 %3756 }
 0x3c7   : > { %16699 = vst [vmem:[#allocation41_spill] sm:$0xff] %v12911_v14  ;;  %v12922_v46 = vadd.f32 %v12535_v40, %v3885_v55  ;;  %vm3823_vm7 = vcmp.eq.s32.totalorder %v3757_v6, 1  ;;  %v4006_v0 = vsel %vm3975_vm10, %v12911_v14, 0.0  ;;  %16709 = vst [vmem:[#allocation40_spill] sm:$0xff] %v12978_v50  ;;  %v12982_v6 = vmul.f32 %v12957_v31, %v12957_v31 }
 0x3c8   : > { %v3855_v41 = vsel %vm3823_vm7, %v16701_v34, 0.0  ;;  %4007 = vadd.xlane.f32.xlu0 %v4006_v0  ;;  %4010 = vadd.xlane.f32.xlu1 %v4009_v32  ;;  %v16712_v34 = vld [vmem:[#allocation158_spill] sm:$0xff] }
 0x3c9   : > { %v3887_v5 = vadd.f32 %v3855_v41, %v12654_v10  ;;  %v12932_v22 = vmul.f32 %v12922_v46, %v12922_v46  ;;  %16710 = vst [vmem:[#allocation63_spill] sm:$0xff] %v12982_v6 }
 0x3ca   : > { %v3763_v59 = vpop.permute.xlu1 %3762 }
 0x3cb   : > { %16702 = vst [vmem:[#allocation25_spill] sm:$0xff] %v12932_v22  ;;  %v12945_v52 = vadd.f32 %v12535_v40, %v3887_v5  ;;  %vm3825_vm8 = vcmp.eq.s32.totalorder %v3763_v59, 1  ;;  %v4012_v10 = vsel %vm3975_vm10, %v12932_v22, 0.0 }
 0x3cc   : > { %v3857_v28 = vsel %vm3825_vm8, %v16704_v16, 0.0  ;;  %4013 = vadd.xlane.f32.xlu0 %v4012_v10  ;;  %4016 = vadd.xlane.f32.xlu1 %v4015_v44  ;;  %v4033_v44 = vsel %vm3975_vm10, %v12982_v6, 0.0  ;;  %v13001_v10 = vmul.f32 %v12978_v50, %v12978_v50  ;;  %v16715_v16 = vld [vmem:[#allocation67_spill] sm:$0xff] }
 0x3cd   : > { %v3889_v30 = vadd.f32 %v3857_v28, %v12662_v61  ;;  %v12953_v57 = vmul.f32 %v12945_v52, %v12945_v52  ;;  %v12968_v61 = vmul.f32 %v12942_v7, %v12942_v7  ;;  %v13005_v28 = vadd.f32 %v12535_v40, %v16715_v16  ;;  %v16726_v16 = vld [vmem:[#allocation164_spill] sm:$0xff] }
 0x3ce   : > { %v3769_v4 = vpop.permute.xlu1 %3768  ;;  %16714 = vst [vmem:[#allocation200_spill] sm:$0xff] %v13001_v10 }
 0x3cf   : > { %16705 = vst [vmem:[#allocation62_spill] sm:$0xff] %v12953_v57  ;;  %v12962_v39 = vadd.f32 %v12535_v40, %v3889_v30  ;;  %vm3827_vm9 = vcmp.eq.s32.totalorder %v3769_v4, 1  ;;  %v4018_v9 = vsel %vm3975_vm10, %v12953_v57, 0.0  ;;  %16706 = vst [vmem:[#allocation173_spill] sm:$0xff] %v12968_v61  ;;  %v4027_v32 = vsel %vm3975_vm10, %v12968_v61, 0.0  ;;  %v16718_v4 = vld [vmem:[#allocation112_spill] sm:$0xff] }
 0x3d0   : > { %v3859_v27 = vsel %vm3827_vm9, %v16707_v35, 0.0  ;;  %4019 = vadd.xlane.f32.xlu0 %v4018_v9  ;;  %4022 = vadd.xlane.f32.xlu1 %v4021_v63  ;;  %16716 = vst [vmem:[#allocation39_spill] sm:$0xff] %v13005_v28  ;;  %v16719_v9 = vld [vmem:[#allocation122_spill] sm:$0xff] }
 0x3d1   : > { %v3891_v17 = vadd.f32 %v3859_v27, %v12670_v60  ;;  %v12974_v54 = vmul.f32 %v12962_v39, %v12962_v39 }
 0x3d2   : > { %v3775_v55 = vpop.permute.xlu1 %3774 }
 0x3d3   : > { %16708 = vst [vmem:[#allocation82_spill] sm:$0xff] %v12974_v54  ;;  %v12985_v0 = vadd.f32 %v12535_v40, %v3891_v17  ;;  %vm3829_vm11 = vcmp.eq.s32.totalorder %v3775_v55, 1  ;;  %v4024_v60 = vsel %vm3975_vm10, %v12974_v54, 0.0  ;;  %v16721_v17 = vld [vmem:[#allocation46_spill] sm:$0xff] }
 0x3d4   : > { %v3861_v41 = vsel %vm3829_vm11, %v16712_v34, 0.0  ;;  %4025 = vadd.xlane.f32.xlu0 %v4024_v60  ;;  %4028 = vadd.xlane.f32.xlu1 %v4027_v32  ;;  %v13020_v55 = vadd.f32 %v12535_v40, %v16721_v17  ;;  %v4039_v32 = vsel %vm3975_vm10, %v13001_v10, 0.0 }
 0x3d5   : > { %16711 = vst [vmem:[#allocation129_spill] sm:$0xff] %v12985_v0  ;;  %v3893_v37 = vadd.f32 %v3861_v41, %v12678_v1  ;;  %v12995_v5 = vmul.f32 %v12985_v0, %v12985_v0 }
 0x3d6   : > { %v3781_v59 = vpop.permute.xlu1 %3780  ;;  %16722 = vst [vmem:[#allocation194_spill] sm:$0xff] %v13020_v55  ;;  %v13045_v17 = vmul.f32 %v13020_v55, %v13020_v55 }
 0x3d7   : > { %16713 = vst [vmem:[#allocation66_spill] sm:$0xff] %v12995_v5  ;;  %v13008_v30 = vadd.f32 %v12535_v40, %v3893_v37  ;;  %vm3831_vm12 = vcmp.eq.s32.totalorder %v3781_v59, 1  ;;  %v4030_v1 = vsel %vm3975_vm10, %v12995_v5, 0.0  ;;  %v13031_v37 = vmul.f32 %v13005_v28, %v13005_v28  ;;  %v16725_v59 = vld [vmem:[#allocation51_spill] sm:$0xff] }
 0x3d8   : > { %v3863_v63 = vsel %vm3831_vm12, %v16718_v4, 0.0  ;;  %4031 = vadd.xlane.f32.xlu0 %v4030_v1  ;;  %4034 = vadd.xlane.f32.xlu1 %v4033_v44  ;;  %16730 = vst [vmem:[#allocation93_spill] sm:$0xff] %v13045_v17 }
 0x3d9   : > { %16717 = vst [vmem:[#allocation16_spill] sm:$0xff] %v13008_v30  ;;  %v3895_v35 = vadd.f32 %v3863_v63, %v16719_v9  ;;  %v13016_v27 = vmul.f32 %v13008_v30, %v13008_v30  ;;  %16724 = vst [vmem:[#allocation9_spill] sm:$0xff] %v13031_v37  ;;  %v16728_v63 = vld [vmem:[#allocation140_spill] sm:$0xff] }
 0x3da   : > { %v3787_v60 = vpop.permute.xlu1 %3786  ;;  %v13041_v9 = vadd.f32 %v12535_v40, %v16728_v63 }
 0x3db   : > { %16720 = vst [vmem:[#allocation70_spill] sm:$0xff] %v13016_v27  ;;  %v13025_v34 = vadd.f32 %v12535_v40, %v3895_v35  ;;  %vm3833_vm0 = vcmp.eq.s32.totalorder %v3787_v60, 1  ;;  %v4036_v41 = vsel %vm3975_vm10, %v13016_v27, 0.0 }
 0x3dc   : > { %v3865_v44 = vsel %vm3833_vm0, %v16725_v59, 0.0  ;;  %4037 = vadd.xlane.f32.xlu0 %v4036_v41  ;;  %4040 = vadd.xlane.f32.xlu1 %v4039_v32  ;;  %16729 = vst [vmem:[#allocation26_spill] sm:$0xff] %v13041_v9  ;;  %v4045_v41 = vsel %vm3975_vm10, %v13031_v37, 0.0  ;;  %v16732_v59 = vld [vmem:[#allocation59_spill] sm:$0xff]  ;;  %v13066_v28 = vmul.f32 %v13041_v9, %v13041_v9 }
 0x3dd   : > { %16723 = vst [vmem:[#allocation27_spill] sm:$0xff] %v13025_v34  ;;  %v3897_v1 = vadd.f32 %v3865_v44, %v16726_v16  ;;  %v13037_v4 = vmul.f32 %v13025_v34, %v13025_v34  ;;  %v4051_v34 = vsel %vm3975_vm10, %v13045_v17, 0.0 }
 0x3de   : > { %v3793_v35 = vpop.permute.xlu1 %3792  ;;  %16735 = vst [vmem:[#allocation94_spill] sm:$0xff] %v13066_v28 }
 0x3df   : > { %16727 = vst [vmem:[#allocation107_spill] sm:$0xff] %v13037_v4  ;;  %v13048_v60 = vadd.f32 %v12535_v40, %v3897_v1  ;;  %vm3835_vm1 = vcmp.eq.s32.totalorder %v3793_v35, 1  ;;  %v4042_v32 = vsel %vm3975_vm10, %v13037_v4, 0.0  ;;  %v16734_v1 = vld [vmem:[#allocation42_spill] sm:$0xff] }
 0x3e0   : > { %v3867_v44 = vsel %vm3835_vm1, %v16732_v59, 0.0  ;;  %4043 = vadd.xlane.f32.xlu0 %v4042_v32  ;;  %4046 = vadd.xlane.f32.xlu1 %v4045_v41  ;;  %v3645_v35 = vmul.f32 %v12042_v23, %v16734_v1  ;;  %v13070_v32 = vadd.f32 %v12535_v40, %v12733_v33 }
 0x3e1   : > { %16731 = vst [vmem:[#allocation89_spill] sm:$0xff] %v13048_v60  ;;  %v3899_v16 = vadd.f32 %v3867_v44, %v12725_v2  ;;  %v13058_v63 = vmul.f32 %v13048_v60, %v13048_v60  ;;  %v16739_v60 = vld [vmem:[#allocation43_spill] sm:$0xff] }
 0x3e2   : > { %v3799_v55 = vpop.permute.xlu1 %3798  ;;  %16736 = vst [vmem:[#allocation175_spill] sm:$0xff] %v13070_v32  ;;  %v3647_v33 = vmul.f32 %v12042_v23, %v16739_v60 }
 0x3e3   : > { %16733 = vst [vmem:[#allocation211_spill] sm:$0xff] %v13058_v63  ;;  %v13073_v2 = vadd.f32 %v12535_v40, %v3899_v16  ;;  %vm3837_vm2 = vcmp.eq.s32.totalorder %v3799_v55, 1  ;;  %v4048_v41 = vsel %vm3975_vm10, %v13058_v63, 0.0  ;;  %v4057_v16 = vsel %vm3975_vm10, %v13066_v28, 0.0 }
 0x3e4   : > { %v3869_v59 = vsel %vm3837_vm2, %v3645_v35, 0.0  ;;  %4049 = vadd.xlane.f32.xlu0 %v4048_v41  ;;  %4052 = vadd.xlane.f32.xlu1 %v4051_v34 }
 0x3e5   : > { %16737 = vst [vmem:[#allocation120_spill] sm:$0xff] %v13073_v2  ;;  %v3901_v44 = vadd.f32 %v3869_v59, %v12742_v45  ;;  %v13080_v1 = vmul.f32 %v13073_v2, %v13073_v2  ;;  %v13093_v45 = vmul.f32 %v13070_v32, %v13070_v32 }
 0x3e6   : > { %v3805_v9 = vpop.permute.xlu1 %3804 }
 0x3e7   : > { %16738 = vst [vmem:[#allocation68_spill] sm:$0xff] %v13080_v1  ;;  %v13087_v55 = vadd.f32 %v12535_v40, %v3901_v44  ;;  %vm3839_vm3 = vcmp.eq.s32.totalorder %v3805_v9, 1  ;;  %v4054_v34 = vsel %vm3975_vm10, %v13080_v1, 0.0  ;;  %16741 = vst [vmem:[#allocation139_spill] sm:$0xff] %v13093_v45  ;;  %v4063_v44 = vsel %vm3975_vm10, %v13093_v45, 0.0 }
 0x3e8   : > { %v3871_v35 = vsel %vm3839_vm3, %v3647_v33, 0.0  ;;  %4055 = vadd.xlane.f32.xlu0 %v4054_v34  ;;  %4058 = vadd.xlane.f32.xlu1 %v4057_v16  ;;  %v16745_v16 = vld [vmem:[#allocation58_spill] sm:$0xff]  ;;  %v16747_v34 = vld [vmem:[#allocation169_spill] sm:$0xff] }
 0x3e9   : > { %16740 = vst [vmem:[#allocation14_spill] sm:$0xff] %v13087_v55  ;;  %v3903_v41 = vadd.f32 %v3871_v35, %v12765_v20  ;;  %v13098_v60 = vmul.f32 %v13087_v55, %v13087_v55  ;;  %vm16746_vm14 = vcmp.lt.f32.partialorder %v16745_v16, 15.0  ;;  %vm16748_vm5 = vcmp.lt.f32.partialorder %v16747_v34, 15.0 }
 0x3ea   : > { %vm3680_vm6 = vmand %vm16748_vm5, %vm16746_vm14  ;;  %v16749_v35 = vmov 0  }
 0x3eb   : > { %16742 = vst [vmem:[#allocation152_spill] sm:$0xff] %v13098_v60  ;;  %v13101_v59 = vadd.f32 %v12535_v40, %v3903_v41  ;;  %v4060_v9 = vsel %vm3975_vm10, %v13098_v60, 0.0  ;;  %v3712_v41 = vsel %vm3680_vm6, 1, %v16749_v35 }
 0x3ec   : > { %4061 = vadd.xlane.f32.xlu0 %v4060_v9  ;;  %4064 = vadd.xlane.f32.xlu1 %v4063_v44 }
 0x3ed   : > { %16743 = vst [vmem:[#allocation150_spill] sm:$0xff] %v13101_v59  ;;  %v13109_v33 = vmul.f32 %v13101_v59, %v13101_v59 }
 0x3ef   : > { %16744 = vst [vmem:[#allocation142_spill] sm:$0xff] %v13109_v33  ;;  %v4066_v20 = vsel %vm3975_vm10, %v13109_v33, 0.0 }
 0x3f0   : > { %4067 = vadd.xlane.f32.xlu0 %v4066_v20 }
 0x3fd   : > { %v13144_v9 = vpop.xlane.xlu0 %3980 }
 0x406   : > { %3807 = vperm.xlu0 %7298, %v3712_v41  }
 0x40a   : > { %4168 = vrot.lane.b32.xlu0 %v12789_v8, %s7684_s19 }
 0x40e   : > { %4174 = vrot.lane.b32.xlu0 %v12798_v25, %s7684_s19  ;;  %v16751_v25 = vld [vmem:[#allocation137_spill] sm:$0xff] }
 0x412   : > { %4178 = vrot.lane.b32.xlu0 %v12833_v56, %s7684_s19 }
 0x416   : > { %4182 = vrot.lane.b32.xlu0 %v12854_v58, %s7684_s19 }
 0x41a   : > { %4186 = vrot.lane.b32.xlu0 %v12881_v18, %s7684_s19 }
 0x41e   : > { %4190 = vrot.lane.b32.xlu0 %v12902_v21, %s7684_s19  ;;  %v16750_v21 = vld [vmem:[#allocation184_spill] sm:$0xff] }
 0x41f   : > { %v3648_v18 = vmul.f32 %v12042_v23, %v16750_v21  ;;  %v16754_v23 = vld [vmem:[#allocation88_spill] sm:$0xff] }
 0x422   : > { %4194 = vrot.lane.b32.xlu0 %v12919_v13, %s7684_s19 }
 0x426   : > { %4198 = vrot.lane.b32.xlu0 %v12938_v51, %s7684_s19 }
 0x42a   : > { %4202 = vrot.lane.b32.xlu0 %v12968_v61, %s7684_s19 }
 0x42e   : > { %4206 = vrot.lane.b32.xlu0 %v12982_v6, %s7684_s19 }
 0x432   : > { %4210 = vrot.lane.b32.xlu0 %v13001_v10, %s7684_s19 }
 0x436   : > { %4214 = vrot.lane.b32.xlu0 %v13031_v37, %s7684_s19 }
 0x43a   : > { %4218 = vrot.lane.b32.xlu0 %v13045_v17, %s7684_s19 }
 0x43e   : > { %4222 = vrot.lane.b32.xlu0 %v13066_v28, %s7684_s19 }
 0x441   : > { %v13148_v44 = vpop.xlane.xlu0 %3983 }
 0x442   : > { %4226 = vrot.lane.b32.xlu0 %v13093_v45, %s7684_s19 }
 0x445   : > { %v13152_v20 = vpop.xlane.xlu0 %3989 }
 0x449   : > { %v13154_v16 = vpop.xlane.xlu0 %3995 }
 0x44d   : > { %v13156_v34 = vpop.xlane.xlu0 %4001 }
 0x451   : > { %v13158_v35 = vpop.xlane.xlu0 %4007 }
 0x455   : > { %v13160_v41 = vpop.xlane.xlu0 %4013 }
 0x459   : > { %v13162_v17 = vpop.xlane.xlu0 %4019 }
 0x45d   : > { %v13164_v37 = vpop.xlane.xlu0 %4025 }
 0x461   : > { %v13166_v28 = vpop.xlane.xlu0 %4031 }
 0x465   : > { %v13168_v10 = vpop.xlane.xlu0 %4037 }
 0x469   : > { %v13170_v6 = vpop.xlane.xlu0 %4043 }
 0x46d   : > { %v13172_v45 = vpop.xlane.xlu0 %4049 }
 0x471   : > { %v13174_v61 = vpop.xlane.xlu0 %4055 }
 0x475   : > { %v13176_v51 = vpop.xlane.xlu0 %4061 }
 0x479   : > { %v13178_v13 = vpop.xlane.xlu0 %4067 }
 0x481   : > { %v3808_v58 = vpop.permute.xlu0 %3807 }
 0x482   : > { %vm3840_vm13 = vcmp.eq.s32.totalorder %v3808_v58, 1 }
 0x483   : > { %v3872_v56 = vsel %vm3840_vm13, %v3648_v18, 0.0 }
 0x484   : > { %v3904_v8 = vadd.f32 %v3872_v56, %v16751_v25 }
 0x485   : > { %v4169_v21 = vpop.permute.xlu0 %4168 }
 0x486   : > { %v13184_v59 = vadd.f32 %v12535_v40, %v3904_v8  ;;  %v13210_v40 = vpop.xlane.xlu1 %3977 }
 0x488   : > { %16752 = vst [vmem:[#allocation72_spill] sm:$0xff] %v13184_v59  ;;  %v13188_v55 = vmul.f32 %v13184_v59, %v13184_v59 }
 0x48a   : > { %16753 = vst [vmem:[#allocation71_spill] sm:$0xff] %v13188_v55  ;;  %4230 = vrot.lane.b32.xlu0 %v13188_v55, %s7684_s19  ;;  %v4069_v32 = vsel %vm3975_vm10, %v13188_v55, 0.0  ;;  %v13216_v8 = vpop.xlane.xlu1 %3986  ;;  %v4175_v55 = vpop.permute.xlu0 %4174 }
 0x48b   : > { %4070 = vadd.xlane.f32.xlu1 %v4069_v32 }
 0x48e   : > { %v13220_v25 = vpop.xlane.xlu1 %3992 }
 0x492   : > { %v13226_v56 = vpop.xlane.xlu1 %3998 }
 0x496   : > { %v13230_v58 = vpop.xlane.xlu1 %4004 }
 0x49a   : > { %v13236_v18 = vpop.xlane.xlu1 %4010 }
 0x49c   : > { %4170 = vrot.lane.b32.xlu1 %v16754_v23, %s7684_s19 }
 0x49e   : > { %v13238_v32 = vpop.xlane.xlu1 %4016 }
 0x4a0   : > { %4172 = vrot.lane.b32.xlu1 %v12814_v3, %s7684_s19 }
 0x4a4   : > { %4176 = vrot.lane.b32.xlu1 %v12843_v49, %s7684_s19 }
 0x4a8   : > { %4180 = vrot.lane.b32.xlu1 %v12869_v15, %s7684_s19 }
 0x4ac   : > { %4184 = vrot.lane.b32.xlu1 %v12890_v29, %s7684_s19 }
 0x4b0   : > { %4188 = vrot.lane.b32.xlu1 %v12911_v14, %s7684_s19  ;;  %v4273_v14 = vsel %vm3975_vm10, %v4175_v55, 0.0 }
 0x4b4   : > { %4192 = vrot.lane.b32.xlu1 %v12932_v22, %s7684_s19 }
 0x4b8   : > { %4196 = vrot.lane.b32.xlu1 %v12953_v57, %s7684_s19 }
 0x4bc   : > { %4200 = vrot.lane.b32.xlu1 %v12974_v54, %s7684_s19 }
 0x4c0   : > { %4204 = vrot.lane.b32.xlu1 %v12995_v5, %s7684_s19 }
 0x4c4   : > { %4208 = vrot.lane.b32.xlu1 %v13016_v27, %s7684_s19 }
 0x4c8   : > { %4212 = vrot.lane.b32.xlu1 %v13037_v4, %s7684_s19  ;;  %v4179_v4 = vpop.permute.xlu0 %4178 }
 0x4c9   : > { %v4279_v15 = vsel %vm3975_vm10, %v4179_v4, 0.0 }
 0x4cc   : > { %4216 = vrot.lane.b32.xlu1 %v13058_v63, %s7684_s19  ;;  %v13240_v63 = vpop.xlane.xlu1 %4022 }
 0x4d0   : > { %4220 = vrot.lane.b32.xlu1 %v13080_v1, %s7684_s19  ;;  %v13242_v27 = vpop.xlane.xlu1 %4028  ;;  %v4183_v1 = vpop.permute.xlu0 %4182 }
 0x4d1   : > { %v4285_v23 = vsel %vm3975_vm10, %v4183_v1, 0.0 }
 0x4d4   : > { %4224 = vrot.lane.b32.xlu1 %v13098_v60, %s7684_s19  ;;  %v13244_v5 = vpop.xlane.xlu1 %4034  ;;  %v4187_v54 = vpop.permute.xlu0 %4186 }
 0x4d8   : > { %4228 = vrot.lane.b32.xlu1 %v13109_v33, %s7684_s19  ;;  %v13246_v57 = vpop.xlane.xlu1 %4040  ;;  %v4191_v60 = vpop.permute.xlu0 %4190  ;;  %v4264_v33 = vsel %vm3975_vm10, %v4169_v21, 0.0  ;;  %v4291_v21 = vsel %vm3975_vm10, %v4187_v54, 0.0 }
 0x4d9   : > { %v4297_v2 = vsel %vm3975_vm10, %v4191_v60, 0.0 }
 0x4dc   : > { %v13249_v22 = vpop.xlane.xlu1 %4046  ;;  %v4195_v29 = vpop.permute.xlu0 %4194 }
 0x4dd   : > { %v4303_v4 = vsel %vm3975_vm10, %v4195_v29, 0.0 }
 0x4e0   : > { %v13253_v49 = vpop.xlane.xlu1 %4052  ;;  %v4199_v3 = vpop.permute.xlu0 %4198 }
 0x4e4   : > { %v13256_v59 = vpop.xlane.xlu1 %4058 }
 0x4e8   : > { %v13260_v55 = vpop.xlane.xlu1 %4064 }
 0x4fc   : > { %4265 = vadd.xlane.f32.xlu1 %v4264_v33  ;;  %v4203_v33 = vpop.permute.xlu0 %4202 }
 0x500   : > { %4274 = vadd.xlane.f32.xlu1 %v4273_v14  ;;  %v4207_v14 = vpop.permute.xlu0 %4206 }
 0x501   : > { %v4321_v29 = vsel %vm3975_vm10, %v4207_v14, 0.0 }
 0x504   : > { %4280 = vadd.xlane.f32.xlu1 %v4279_v15  ;;  %v4309_v15 = vsel %vm3975_vm10, %v4199_v3, 0.0  ;;  %v4211_v1 = vpop.permute.xlu0 %4210 }
 0x508   : > { %4286 = vadd.xlane.f32.xlu1 %v4285_v23  ;;  %v4215_v50 = vpop.permute.xlu0 %4214 }
 0x50c   : > { %4292 = vadd.xlane.f32.xlu1 %v4291_v21  ;;  %v4315_v21 = vsel %vm3975_vm10, %v4203_v33, 0.0 }
 0x510   : > { %4298 = vadd.xlane.f32.xlu1 %v4297_v2 }
 0x514   : > { %v13263_v30 = vpop.xlane.xlu1 %4070  ;;  %4304 = vadd.xlane.f32.xlu1 %v4303_v4  ;;  %v4327_v4 = vsel %vm3975_vm10, %v4211_v1, 0.0 }
 0x518   : > { %v4171_v23 = vpop.permute.xlu1 %4170  ;;  %4310 = vadd.xlane.f32.xlu1 %v4309_v15  ;;  %v4219_v15 = vpop.permute.xlu0 %4218 }
 0x519   : > { %v4267_v54 = vsel %vm3975_vm10, %v4171_v23, 0.0 }
 0x51a   : > { %4268 = vadd.xlane.f32.xlu0 %v4267_v54  ;;  %v4333_v54 = vsel %vm3975_vm10, %v4215_v50, 0.0 }
 0x51c   : > { %v4173_v60 = vpop.permute.xlu1 %4172  ;;  %4316 = vadd.xlane.f32.xlu1 %v4315_v21  ;;  %v4223_v14 = vpop.permute.xlu0 %4222 }
 0x51d   : > { %v4270_v2 = vsel %vm3975_vm10, %v4173_v60, 0.0 }
 0x51e   : > { %4271 = vadd.xlane.f32.xlu0 %v4270_v2  ;;  %v4339_v2 = vsel %vm3975_vm10, %v4219_v15, 0.0 }
 0x520   : > { %v4177_v0 = vpop.permute.xlu1 %4176  ;;  %4322 = vadd.xlane.f32.xlu1 %v4321_v29  ;;  %v4345_v29 = vsel %vm3975_vm10, %v4223_v14, 0.0 }
 0x521   : > { %v4276_v3 = vsel %vm3975_vm10, %v4177_v0, 0.0 }
 0x522   : > { %4277 = vadd.xlane.f32.xlu0 %v4276_v3  ;;  %v4227_v3 = vpop.permute.xlu0 %4226 }
 0x524   : > { %v4181_v23 = vpop.permute.xlu1 %4180  ;;  %4328 = vadd.xlane.f32.xlu1 %v4327_v4 }
 0x525   : > { %v4282_v33 = vsel %vm3975_vm10, %v4181_v23, 0.0  ;;  %v4073_v23 = vmax.f32 %v13144_v9, 1e-24  ;;  %v4076_v9 = vmax.f32 %v13152_v20, 1e-24 }
 0x526   : > { %4283 = vadd.xlane.f32.xlu0 %v4282_v33  ;;  %v4351_v33 = vsel %vm3975_vm10, %v4227_v3, 0.0  ;;  %v4078_v3 = vmax.f32 %v13154_v16, 1e-24  ;;  %v13293_v20 = vld [vmem:[%s14698_s9] ss:$0 sm:$0xff] }
 0x527   : > { %7366 = vrsqrt.f32 %v4073_v23  ;;  %v4082_v16 = vmax.f32 %v13158_v35, 1e-24  ;;  %v4086_v35 = vmax.f32 %v13162_v17, 1e-24  ;;  %v4072_v17 = vmax.f32 %v13210_v40, 1e-24 }
 0x528   : > { %v4185_v21 = vpop.permute.xlu1 %4184  ;;  %4334 = vadd.xlane.f32.xlu1 %v4333_v54  ;;  %v4231_v54 = vpop.permute.xlu0 %4230  ;;  %v4077_v40 = vmax.f32 %v13220_v25, 1e-24  ;;  %v4081_v25 = vmax.f32 %v13230_v58, 1e-24 }
 0x529   : > { %v4288_v60 = vsel %vm3975_vm10, %v4185_v21, 0.0  ;;  %v4357_v14 = vsel %vm3975_vm10, %v4231_v54, 0.0 }
 0x52a   : > { %4289 = vadd.xlane.f32.xlu0 %v4288_v60  ;;  %v4074_v60 = vmax.f32 %v13148_v44, 1e-24 }
 0x52c   : > { %v4189_v0 = vpop.permute.xlu1 %4188  ;;  %4340 = vadd.xlane.f32.xlu1 %v4339_v2  ;;  %7368 = vrsqrt.f32 %v4074_v60 }
 0x52d   : > { %v4294_v1 = vsel %vm3975_vm10, %v4189_v0, 0.0  ;;  %7370 = vrsqrt.f32 %v4076_v9 }
 0x52e   : > { %4295 = vadd.xlane.f32.xlu0 %v4294_v1  ;;  %7372 = vrsqrt.f32 %v4078_v3 }
 0x530   : > { %v4193_v4 = vpop.permute.xlu1 %4192  ;;  %4346 = vadd.xlane.f32.xlu1 %v4345_v29 }
 0x531   : > { %v4300_v50 = vsel %vm3975_vm10, %v4193_v4, 0.0 }
 0x532   : > { %4301 = vadd.xlane.f32.xlu0 %v4300_v50  ;;  %v4080_v50 = vmax.f32 %v13156_v34, 1e-24 }
 0x534   : > { %v4197_v21 = vpop.permute.xlu1 %4196  ;;  %4352 = vadd.xlane.f32.xlu1 %v4351_v33  ;;  %v7367_v23 = vpop.eup %7366  ;;  %7374 = vrsqrt.f32 %v4080_v50 }
 0x535   : > { %v4306_v15 = vsel %vm3975_vm10, %v4197_v21, 0.0  ;;  %v4432_v21 = vmul.f32 %v7367_v23, %v13293_v20  ;;  %7376 = vrsqrt.f32 %v4082_v16  ;;  %v4090_v16 = vmax.f32 %v13166_v28, 1e-24 }
 0x536   : > { %4307 = vadd.xlane.f32.xlu0 %v4306_v15  ;;  %v4094_v28 = vmax.f32 %v13170_v6, 1e-24  ;;  %v4098_v6 = vmax.f32 %v13174_v61, 1e-24  ;;  %v4085_v61 = vmax.f32 %v13238_v32, 1e-24 }
 0x538   : > { %v4201_v2 = vpop.permute.xlu1 %4200  ;;  %4358 = vadd.xlane.f32.xlu1 %v4357_v14  ;;  %v4084_v14 = vmax.f32 %v13160_v41, 1e-24  ;;  %v4088_v41 = vmax.f32 %v13164_v37, 1e-24  ;;  %v4075_v37 = vmax.f32 %v13216_v8, 1e-24 }
 0x539   : > { %v4312_v0 = vsel %vm3975_vm10, %v4201_v2, 0.0  ;;  %v7369_v15 = vpop.eup %7368  ;;  %v4079_v8 = vmax.f32 %v13226_v56, 1e-24  ;;  %v4083_v56 = vmax.f32 %v13236_v18, 1e-24 }
 0x53a   : > { %4313 = vadd.xlane.f32.xlu0 %v4312_v0  ;;  %v4433_v2 = vmul.f32 %v7369_v15, %v13293_v20  ;;  %v7371_v0 = vpop.eup %7370  ;;  %7378 = vrsqrt.f32 %v4084_v14  ;;  %v4102_v18 = vmax.f32 %v13178_v13, 1e-24  ;;  %v4089_v13 = vmax.f32 %v13242_v27, 1e-24 }
 0x53b   : > { %v7373_v3 = vpop.eup %7372  ;;  %7380 = vrsqrt.f32 %v4086_v35  ;;  %v4093_v27 = vmax.f32 %v13246_v57, 1e-24  ;;  %v4097_v57 = vmax.f32 %v13253_v49, 1e-24 }
 0x53c   : > { %v4205_v1 = vpop.permute.xlu1 %4204  ;;  %v4437_v50 = vmul.f32 %v7373_v3, %v13293_v20  ;;  %7382 = vrsqrt.f32 %v4088_v41 }
 0x53d   : > { %v4318_v29 = vsel %vm3975_vm10, %v4205_v1, 0.0  ;;  %7384 = vrsqrt.f32 %v4072_v17 }
 0x53e   : > { %4319 = vadd.xlane.f32.xlu0 %v4318_v29  ;;  %v4435_v29 = vmul.f32 %v7371_v0, %v13293_v20  ;;  %7386 = vrsqrt.f32 %v4090_v16 }
 0x53f   : > { %7388 = vrsqrt.f32 %v4075_v37 }
 0x540   : > { %v4209_v4 = vpop.permute.xlu1 %4208 }
 0x541   : > { %v4324_v44 = vsel %vm3975_vm10, %v4209_v4, 0.0  ;;  %v7375_v23 = vpop.eup %7374 }
 0x542   : > { %4325 = vadd.xlane.f32.xlu0 %v4324_v44  ;;  %v7377_v15 = vpop.eup %7376 }
 0x544   : > { %v4213_v33 = vpop.permute.xlu1 %4212 }
 0x545   : > { %v4330_v54 = vsel %vm3975_vm10, %v4213_v33, 0.0 }
 0x546   : > { %4331 = vadd.xlane.f32.xlu0 %v4330_v54 }
 0x547   : > { %v7379_v14 = vpop.eup %7378 }
 0x548   : > { %v4217_v60 = vpop.permute.xlu1 %4216  ;;  %v7381_v0 = vpop.eup %7380 }
 0x549   : > { %4470 = vperm.xlu1 %7299, %v4432_v21   ;;  %v4336_v34 = vsel %vm3975_vm10, %v4217_v60, 0.0  ;;  %v4439_v21 = vmul.f32 %v7375_v23, %v13293_v20  ;;  %v4092_v60 = vmax.f32 %v13168_v10, 1e-24  ;;  %v4096_v10 = vmax.f32 %v13172_v45, 1e-24 }
 0x54a   : > { %4337 = vadd.xlane.f32.xlu0 %v4336_v34  ;;  %v4441_v34 = vmul.f32 %v7377_v15, %v13293_v20 }
 0x54b   : > { %7390 = vrsqrt.f32 %v4092_v60 }
 0x54c   : > { %v4221_v9 = vpop.permute.xlu1 %4220  ;;  %7392 = vrsqrt.f32 %v4077_v40 }
 0x54d   : > { %4475 = vperm.xlu1 %7299, %v4433_v2   ;;  %v4342_v1 = vsel %vm3975_vm10, %v4221_v9, 0.0  ;;  %v4443_v2 = vmul.f32 %v7379_v14, %v13293_v20  ;;  %7394 = vrsqrt.f32 %v4094_v28  ;;  %v4445_v9 = vmul.f32 %v7381_v0, %v13293_v20 }
 0x54e   : > { %4343 = vadd.xlane.f32.xlu0 %v4342_v1  ;;  %v7383_v1 = vpop.eup %7382  ;;  %7396 = vrsqrt.f32 %v4079_v8 }
 0x54f   : > { %v7385_v35 = vpop.eup %7384  ;;  %7398 = vrsqrt.f32 %v4096_v10 }
 0x550   : > { %v4225_v4 = vpop.permute.xlu1 %4224  ;;  %v7387_v3 = vpop.eup %7386  ;;  %7400 = vrsqrt.f32 %v4081_v25  ;;  %v4431_v45 = vmul.f32 %v7385_v35, %v13293_v20 }
 0x551   : > { %4485 = vperm.xlu1 %7299, %v4435_v29   ;;  %v4348_v44 = vsel %vm3975_vm10, %v4225_v4, 0.0  ;;  %v4447_v29 = vmul.f32 %v7383_v1, %v13293_v20  ;;  %v7389_v4 = vpop.eup %7388  ;;  %7402 = vrsqrt.f32 %v4098_v6  ;;  %v4449_v41 = vmul.f32 %v7387_v3, %v13293_v20 }
 0x552   : > { %4349 = vadd.xlane.f32.xlu0 %v4348_v44  ;;  %v4100_v44 = vmax.f32 %v13176_v51, 1e-24  ;;  %7404 = vrsqrt.f32 %v4083_v56  ;;  %v4087_v51 = vmax.f32 %v13240_v63, 1e-24  ;;  %v4091_v63 = vmax.f32 %v13244_v5, 1e-24 }
 0x553   : > { %v4095_v5 = vmax.f32 %v13249_v22, 1e-24  ;;  %v4099_v22 = vmax.f32 %v13256_v59, 1e-24 }
 0x554   : > { %v4229_v33 = vpop.permute.xlu1 %4228  ;;  %7406 = vrsqrt.f32 %v4100_v44 }
 0x555   : > { %4495 = vperm.xlu1 %7299, %v4437_v50   ;;  %v4354_v54 = vsel %vm3975_vm10, %v4229_v33, 0.0  ;;  %v4434_v50 = vmul.f32 %v7389_v4, %v13293_v20  ;;  %7408 = vrsqrt.f32 %v4085_v61 }
 0x556   : > { %4355 = vadd.xlane.f32.xlu0 %v4354_v54  ;;  %7410 = vrsqrt.f32 %v4102_v18 }
 0x557   : > { %7412 = vrsqrt.f32 %v4087_v51 }
 0x558   : > { %v7391_v58 = vpop.eup %7390  ;;  %7414 = vrsqrt.f32 %v4089_v13 }
 0x559   : > { %4505 = vperm.xlu1 %7299, %v4439_v21   ;;  %v7393_v23 = vpop.eup %7392  ;;  %v4451_v33 = vmul.f32 %v7391_v58, %v13293_v20  ;;  %7416 = vrsqrt.f32 %v4091_v63  ;;  %v4101_v58 = vmax.f32 %v13260_v55, 1e-24 }
 0x55a   : > { %v7395_v54 = vpop.eup %7394  ;;  %v4436_v17 = vmul.f32 %v7393_v23, %v13293_v20  ;;  %7418 = vrsqrt.f32 %v4093_v27  ;;  %v4103_v23 = vmax.f32 %v13263_v30, 1e-24 }
 0x55b   : > { %v7397_v16 = vpop.eup %7396  ;;  %v4453_v32 = vmul.f32 %v7395_v54, %v13293_v20  ;;  %7420 = vrsqrt.f32 %v4095_v5 }
 0x55c   : > { %v7399_v21 = vpop.eup %7398  ;;  %v4438_v15 = vmul.f32 %v7397_v16, %v13293_v20 }
 0x55d   : > { %4515 = vperm.xlu1 %7299, %v4441_v34   ;;  %v7401_v37 = vpop.eup %7400  ;;  %v4455_v60 = vmul.f32 %v7399_v21, %v13293_v20 }
 0x55e   : > { %v7403_v34 = vpop.eup %7402  ;;  %v4440_v14 = vmul.f32 %v7401_v37, %v13293_v20 }
 0x55f   : > { %v7405_v40 = vpop.eup %7404  ;;  %v4457_v28 = vmul.f32 %v7403_v34, %v13293_v20 }
 0x560   : > { %v4442_v0 = vmul.f32 %v7405_v40, %v13293_v20 }
 0x561   : > { %4525 = vperm.xlu1 %7299, %v4443_v2   ;;  %v7407_v2 = vpop.eup %7406 }
 0x562   : > { %v7409_v8 = vpop.eup %7408  ;;  %v4459_v10 = vmul.f32 %v7407_v2, %v13293_v20 }
 0x563   : > { %v4444_v1 = vmul.f32 %v7409_v8, %v13293_v20 }
 0x565   : > { %4535 = vperm.xlu1 %7299, %v4445_v9   ;;  %v7411_v9 = vpop.eup %7410 }
 0x566   : > { %v7413_v25 = vpop.eup %7412  ;;  %v4461_v35 = vmul.f32 %v7411_v9, %v13293_v20 }
 0x567   : > { %v4446_v3 = vmul.f32 %v7413_v25, %v13293_v20  ;;  %v7415_v56 = vpop.eup %7414 }
 0x568   : > { %v4448_v4 = vmul.f32 %v7415_v56, %v13293_v20  ;;  %v7417_v44 = vpop.eup %7416 }
 0x569   : > { %4545 = vperm.xlu1 %7299, %v4447_v29   ;;  %v4450_v49 = vmul.f32 %v7417_v44, %v13293_v20  ;;  %v7419_v61 = vpop.eup %7418  ;;  %v16755_v44 = vld [vmem:[#allocation181_spill] sm:$0xff] }
 0x56a   : > { %v4452_v18 = vmul.f32 %v7419_v61, %v13293_v20 }
 0x56c   : > { %4465 = vperm.xlu0 %7298, %v4431_v45  }
 0x56d   : > { %4555 = vperm.xlu1 %7299, %v4449_v41  }
 0x570   : > { %4480 = vperm.xlu0 %7298, %v4434_v50  }
 0x571   : > { %4565 = vperm.xlu1 %7299, %v4451_v33   ;;  %v7421_v33 = vpop.eup %7420 }
 0x572   : > { %v4454_v51 = vmul.f32 %v7421_v33, %v13293_v20 }
 0x574   : > { %4490 = vperm.xlu0 %7298, %v4436_v17  }
 0x575   : > { %4575 = vperm.xlu1 %7299, %v4453_v32  }
 0x578   : > { %4500 = vperm.xlu0 %7298, %v4438_v15  }
 0x579   : > { %4585 = vperm.xlu1 %7299, %v4455_v60  }
 0x57c   : > { %4510 = vperm.xlu0 %7298, %v4440_v14  }
 0x57d   : > { %4595 = vperm.xlu1 %7299, %v4457_v28  }
 0x580   : > { %4520 = vperm.xlu0 %7298, %v4442_v0  }
 0x581   : > { %4605 = vperm.xlu1 %7299, %v4459_v10  }
 0x584   : > { %4530 = vperm.xlu0 %7298, %v4444_v1  }
 0x585   : > { %v4266_v6 = vpop.xlane.xlu1 %4265  ;;  %4615 = vperm.xlu1 %7299, %v4461_v35  }
 0x586   : > { %v4360_v29 = vmax.f32 %v4266_v6, 1e-24 }
 0x588   : > { %7422 = vrsqrt.f32 %v4360_v29  ;;  %4540 = vperm.xlu0 %7298, %v4446_v3  }
 0x589   : > { %v4275_v45 = vpop.xlane.xlu1 %4274  ;;  %7424 = vrsqrt.f32 %v4097_v57 }
 0x58a   : > { %7426 = vrsqrt.f32 %v4099_v22  ;;  %v4363_v60 = vmax.f32 %v4275_v45, 1e-24 }
 0x58b   : > { %7428 = vrsqrt.f32 %v4101_v58 }
 0x58c   : > { %4550 = vperm.xlu0 %7298, %v4448_v4   ;;  %7430 = vrsqrt.f32 %v4103_v23 }
 0x58d   : > { %v4281_v41 = vpop.xlane.xlu1 %4280  ;;  %7432 = vrsqrt.f32 %v4363_v60 }
 0x58e   : > { %v4365_v2 = vmax.f32 %v4281_v41, 1e-24 }
 0x590   : > { %4560 = vperm.xlu0 %7298, %v4450_v49  }
 0x591   : > { %v4287_v50 = vpop.xlane.xlu1 %4286 }
 0x592   : > { %v4367_v9 = vmax.f32 %v4287_v50, 1e-24 }
 0x594   : > { %4570 = vperm.xlu0 %7298, %v4452_v18  }
 0x595   : > { %v7423_v59 = vpop.eup %7422  ;;  %v4293_v54 = vpop.xlane.xlu1 %4292 }
 0x596   : > { %v4816_v17 = vmul.f32 %v7423_v59, %v12783_v43  ;;  %v7425_v55 = vpop.eup %7424  ;;  %v4369_v35 = vmax.f32 %v4293_v54, 1e-24 }
 0x597   : > { %v4456_v21 = vmul.f32 %v7425_v55, %v13293_v20  ;;  %v7427_v30 = vpop.eup %7426 }
 0x598   : > { %4580 = vperm.xlu0 %7298, %v4454_v51   ;;  %v7100_v16 = vpack.c.bf16 %v4816_v17, %v4816_v17  ;;  %v4458_v15 = vmul.f32 %v7427_v30, %v13293_v20  ;;  %v7429_v37 = vpop.eup %7428 }
 0x599   : > { %v4299_v32 = vpop.xlane.xlu1 %4298  ;;  %v4460_v63 = vmul.f32 %v7429_v37, %v13293_v20  ;;  %v7431_v14 = vpop.eup %7430 }
 0x59a   : > { %4944 = vrot.lane.b32.xlu1 %v7100_v16, %s7684_s19  ;;  %v4462_v0 = vmul.f32 %v7431_v14, %v13293_v20  ;;  %v4371_v3 = vmax.f32 %v4299_v32, 1e-24  ;;  %v7433_v56 = vpop.eup %7432 }
 0x59b   : > { %v4819_v23 = vmul.f32 %v7433_v56, %v12776_v48 }
 0x59c   : > { %4590 = vperm.xlu0 %7298, %v4456_v21  }
 0x59d   : > { %v4305_v13 = vpop.xlane.xlu1 %4304  ;;  %v7103_v16 = vpack.c.bf16 %v4819_v23, %v4819_v23 }
 0x59e   : > { %v4373_v58 = vmax.f32 %v4305_v13, 1e-24 }
 0x5a0   : > { %4600 = vperm.xlu0 %7298, %v4458_v15  }
 0x5a1   : > { %v4311_v34 = vpop.xlane.xlu1 %4310 }
 0x5a2   : > { %v4375_v51 = vmax.f32 %v4311_v34, 1e-24 }
 0x5a3   : > { %v4269_v40 = vpop.xlane.xlu0 %4268 }
 0x5a4   : > { %v4361_v28 = vmax.f32 %v4269_v40, 1e-24  ;;  %4610 = vperm.xlu0 %7298, %v4460_v63  }
 0x5a5   : > { %v13360_v27 = vpop.xlane.xlu1 %4316 }
 0x5a6   : > { %7434 = vrsqrt.f32 %v4361_v28  ;;  %v4377_v60 = vmax.f32 %v13360_v27, 1e-24 }
 0x5a7   : > { %v4272_v8 = vpop.xlane.xlu0 %4271  ;;  %7436 = vrsqrt.f32 %v4365_v2 }
 0x5a8   : > { %v4362_v10 = vmax.f32 %v4272_v8, 1e-24  ;;  %4620 = vperm.xlu0 %7298, %v4462_v0  }
 0x5a9   : > { %v13363_v5 = vpop.xlane.xlu1 %4322 }
 0x5aa   : > { %7438 = vrsqrt.f32 %v4362_v10  ;;  %v4379_v27 = vmax.f32 %v13363_v5, 1e-24 }
 0x5ab   : > { %v4278_v1 = vpop.xlane.xlu0 %4277  ;;  %7440 = vrsqrt.f32 %v4367_v9 }
 0x5ac   : > { %v4364_v25 = vmax.f32 %v4278_v1, 1e-24 }
 0x5ad   : > { %v13365_v6 = vpop.xlane.xlu1 %4328 }
 0x5ae   : > { %7442 = vrsqrt.f32 %v4364_v25  ;;  %v4381_v5 = vmax.f32 %v13365_v6, 1e-24 }
 0x5af   : > { %v4284_v57 = vpop.xlane.xlu0 %4283  ;;  %7444 = vrsqrt.f32 %v4369_v35 }
 0x5b0   : > { %v4366_v29 = vmax.f32 %v4284_v57, 1e-24 }
 0x5b1   : > { %v13367_v20 = vpop.xlane.xlu1 %4334 }
 0x5b2   : > { %7446 = vrsqrt.f32 %v4366_v29 }
 0x5b3   : > { %v7435_v45 = vpop.eup %7434  ;;  %v4290_v22 = vpop.xlane.xlu0 %4289  ;;  %7448 = vrsqrt.f32 %v4371_v3 }
 0x5b4   : > { %v4368_v4 = vmax.f32 %v4290_v22, 1e-24  ;;  %v4817_v41 = vmul.f32 %v7435_v45, %v16755_v44  ;;  %v7437_v61 = vpop.eup %7436 }
 0x5b5   : > { %v13370_v49 = vpop.xlane.xlu1 %4340  ;;  %v4821_v21 = vmul.f32 %v7437_v61, %v12802_v47 }
 0x5b6   : > { %7450 = vrsqrt.f32 %v4368_v4  ;;  %v7101_v50 = vpack.c.bf16 %v4817_v41, %v4817_v41 }
 0x5b7   : > { %v7439_v18 = vpop.eup %7438  ;;  %v4296_v33 = vpop.xlane.xlu0 %4295  ;;  %7452 = vrsqrt.f32 %v4373_v58  ;;  %v7105_v14 = vpack.c.bf16 %v4821_v21, %v4821_v21 }
 0x5b8   : > { %v4370_v59 = vmax.f32 %v4296_v33, 1e-24  ;;  %4946 = vrot.lane.b32.xlu0 %v7101_v50, %s7684_s19  ;;  %v4818_v54 = vmul.f32 %v7439_v18, %v12805_v26  ;;  %v7441_v55 = vpop.eup %7440 }
 0x5b9   : > { %v13375_v17 = vpop.xlane.xlu1 %4346  ;;  %v4823_v28 = vmul.f32 %v7441_v55, %v12820_v53 }
 0x5ba   : > { %7454 = vrsqrt.f32 %v4370_v59  ;;  %v7102_v32 = vpack.c.bf16 %v4818_v54, %v4818_v54  ;;  %v4383_v54 = vmax.f32 %v13367_v20, 1e-24 }
 0x5bb   : > { %v7443_v30 = vpop.eup %7442  ;;  %v4302_v13 = vpop.xlane.xlu0 %4301  ;;  %7456 = vrsqrt.f32 %v4375_v51  ;;  %v7107_v25 = vpack.c.bf16 %v4823_v28, %v4823_v28 }
 0x5bc   : > { %v4372_v15 = vmax.f32 %v4302_v13, 1e-24  ;;  %4950 = vrot.lane.b32.xlu0 %v7103_v16, %s7684_s19  ;;  %4948 = vrot.lane.b32.xlu1 %v7102_v32, %s7684_s19  ;;  %v4820_v37 = vmul.f32 %v7443_v30, %v12827_v12  ;;  %v7445_v63 = vpop.eup %7444 }
 0x5bd   : > { %v13382_v34 = vpop.xlane.xlu1 %4352  ;;  %v4825_v57 = vmul.f32 %v7445_v63, %v12848_v38  ;;  %v4385_v63 = vmax.f32 %v13370_v49, 1e-24 }
 0x5be   : > { %7458 = vrsqrt.f32 %v4372_v15  ;;  %v7104_v40 = vpack.c.bf16 %v4820_v37, %v4820_v37 }
 0x5bf   : > { %v7447_v2 = vpop.eup %7446  ;;  %v4308_v0 = vpop.xlane.xlu0 %4307  ;;  %7460 = vrsqrt.f32 %v4377_v60  ;;  %v7109_v61 = vpack.c.bf16 %v4825_v57, %v4825_v57 }
 0x5c0   : > { %v4374_v8 = vmax.f32 %v4308_v0, 1e-24  ;;  %4954 = vrot.lane.b32.xlu0 %v7105_v14, %s7684_s19  ;;  %4952 = vrot.lane.b32.xlu1 %v7104_v40, %s7684_s19  ;;  %v4822_v10 = vmul.f32 %v7447_v2, %v12857_v24  ;;  %v7449_v1 = vpop.eup %7448 }
 0x5c1   : > { %v13389_v9 = vpop.xlane.xlu1 %4358  ;;  %v4827_v4 = vmul.f32 %v7449_v1, %v12873_v62 }
 0x5c2   : > { %7462 = vrsqrt.f32 %v4374_v8  ;;  %v7106_v35 = vpack.c.bf16 %v4822_v10, %v4822_v10 }
 0x5c3   : > { %v7451_v29 = vpop.eup %7450  ;;  %v4314_v3 = vpop.xlane.xlu0 %4313  ;;  %7464 = vrsqrt.f32 %v4379_v27  ;;  %v7111_v55 = vpack.c.bf16 %v4827_v4, %v4827_v4 }
 0x5c4   : > { %v4376_v56 = vmax.f32 %v4314_v3, 1e-24  ;;  %4958 = vrot.lane.b32.xlu0 %v7107_v25, %s7684_s19  ;;  %4956 = vrot.lane.b32.xlu1 %v7106_v35, %s7684_s19  ;;  %v4824_v45 = vmul.f32 %v7451_v29, %v12884_v42  ;;  %v7453_v41 = vpop.eup %7452  ;;  %v4387_v35 = vmax.f32 %v13375_v17, 1e-24 }
 0x5c5   : > { %v4471_v22 = vpop.permute.xlu1 %4470  ;;  %v4829_v30 = vmul.f32 %v7453_v41, %v12894_v11 }
 0x5c6   : > { %7466 = vrsqrt.f32 %v4376_v56  ;;  %v4624_v58 = vmul.f32 %v4471_v22, %v16755_v44  ;;  %v7108_v50 = vpack.c.bf16 %v4824_v45, %v4824_v45 }
 0x5c7   : > { %v7455_v23 = vpop.eup %7454  ;;  %v4320_v18 = vpop.xlane.xlu0 %4319  ;;  %7468 = vrsqrt.f32 %v4381_v5  ;;  %v7113_v0 = vpack.c.bf16 %v4829_v30, %v4829_v30 }
 0x5c8   : > { %v7069_v33 = vpack.c.bf16 %v4624_v58, %v4624_v58  ;;  %v4378_v6 = vmax.f32 %v4320_v18, 1e-24  ;;  %4962 = vrot.lane.b32.xlu0 %v7109_v61, %s7684_s19  ;;  %4960 = vrot.lane.b32.xlu1 %v7108_v50, %s7684_s19  ;;  %v4826_v59 = vmul.f32 %v7455_v23, %v12905_v36  ;;  %v7457_v16 = vpop.eup %7456  ;;  %v4389_v61 = vmax.f32 %v13382_v34, 1e-24  ;;  %v16756_v34 = vld [vmem:[#allocation129_spill] sm:$0xff] }
 0x5c9   : > { %v4476_v51 = vpop.permute.xlu1 %4475  ;;  %v4831_v40 = vmul.f32 %v7457_v16, %v12915_v19 }
 0x5ca   : > { %4785 = vst.msk [vmem:[%s13402_s26 + $0x4] sm:$0xf] %vm4783_vm15, %v7069_v33  ;;  %7470 = vrsqrt.f32 %v4378_v6  ;;  %v4625_v32 = vmul.f32 %v4476_v51, %v12805_v26  ;;  %v7110_v21 = vpack.c.bf16 %v4826_v59, %v4826_v59 }
 0x5cb   : > { %v7459_v13 = vpop.eup %7458  ;;  %v4326_v15 = vpop.xlane.xlu0 %4325  ;;  %7472 = vrsqrt.f32 %v4383_v54  ;;  %v7115_v29 = vpack.c.bf16 %v4831_v40, %v4831_v40 }
 0x5cc   : > { %v7070_v37 = vpack.c.bf16 %v4625_v32, %v4625_v32  ;;  %v4380_v60 = vmax.f32 %v4326_v15, 1e-24  ;;  %4966 = vrot.lane.b32.xlu0 %v7111_v55, %s7684_s19  ;;  %4964 = vrot.lane.b32.xlu1 %v7110_v21, %s7684_s19  ;;  %v4828_v20 = vmul.f32 %v7459_v13, %v12922_v46  ;;  %v7461_v28 = vpop.eup %7460  ;;  %v4391_v21 = vmax.f32 %v13389_v9, 1e-24  ;;  %v16758_v9 = vld [vmem:[#allocation16_spill] sm:$0xff] }
 0x5cd   : > { %v4486_v14 = vpop.permute.xlu1 %4485  ;;  %v4833_v5 = vmul.f32 %v7461_v28, %v12942_v7 }
 0x5ce   : > { %4786 = vst.msk [vmem:[%s13402_s26 + $0x8] sm:$0xf] %vm4783_vm15, %v7070_v37  ;;  %7474 = vrsqrt.f32 %v4380_v60  ;;  %v4627_v2 = vmul.f32 %v4486_v14, %v12827_v12  ;;  %v7112_v8 = vpack.c.bf16 %v4828_v20, %v4828_v20  ;;  %v16757_v20 = vld [vmem:[#allocation40_spill] sm:$0xff] }
 0x5cf   : > { %v7463_v10 = vpop.eup %7462  ;;  %v4332_v27 = vpop.xlane.xlu0 %4331  ;;  %7476 = vrsqrt.f32 %v4385_v63  ;;  %v7117_v6 = vpack.c.bf16 %v4833_v5, %v4833_v5 }
 0x5d0   : > { %v7072_v1 = vpack.c.bf16 %v4627_v2, %v4627_v2  ;;  %v4382_v25 = vmax.f32 %v4332_v27, 1e-24  ;;  %4970 = vrot.lane.b32.xlu0 %v7113_v0, %s7684_s19  ;;  %4968 = vrot.lane.b32.xlu1 %v7112_v8, %s7684_s19  ;;  %v4830_v49 = vmul.f32 %v7463_v10, %v12945_v52  ;;  %v7465_v3 = vpop.eup %7464  ;;  %v16759_v10 = vld [vmem:[#allocation39_spill] sm:$0xff] }
 0x5d1   : > { %v4496_v57 = vpop.permute.xlu1 %4495  ;;  %v4835_v23 = vmul.f32 %v7465_v3, %v12957_v31 }
 0x5d2   : > { %4788 = vst.msk [vmem:[%s13402_s26 + $0x10] sm:$0xf] %vm4783_vm15, %v7072_v1  ;;  %7478 = vrsqrt.f32 %v4382_v25  ;;  %v4629_v56 = vmul.f32 %v4496_v57, %v12857_v24  ;;  %v7114_v45 = vpack.c.bf16 %v4830_v49, %v4830_v49 }
 0x5d3   : > { %v7467_v22 = vpop.eup %7466  ;;  %v4338_v4 = vpop.xlane.xlu0 %4337  ;;  %7480 = vrsqrt.f32 %v4387_v35  ;;  %v7119_v13 = vpack.c.bf16 %v4835_v23, %v4835_v23 }
 0x5d4   : > { %v7074_v41 = vpack.c.bf16 %v4629_v56, %v4629_v56  ;;  %v4384_v58 = vmax.f32 %v4338_v4, 1e-24  ;;  %4974 = vrot.lane.b32.xlu0 %v7115_v29, %s7684_s19  ;;  %4972 = vrot.lane.b32.xlu1 %v7114_v45, %s7684_s19  ;;  %v4832_v17 = vmul.f32 %v7467_v22, %v12962_v39  ;;  %v7469_v18 = vpop.eup %7468  ;;  %v16760_v45 = vld [vmem:[#allocation27_spill] sm:$0xff] }
 0x5d5   : > { %v4506_v50 = vpop.permute.xlu1 %4505  ;;  %v4837_v63 = vmul.f32 %v7469_v18, %v16757_v20 }
 0x5d6   : > { %4790 = vst.msk [vmem:[%s13402_s26 + $0x18] sm:$0xf] %vm4783_vm15, %v7074_v41  ;;  %7482 = vrsqrt.f32 %v4384_v58  ;;  %v4631_v33 = vmul.f32 %v4506_v50, %v12884_v42  ;;  %v7116_v59 = vpack.c.bf16 %v4832_v17, %v4832_v17 }
 0x5d7   : > { %v7471_v54 = vpop.eup %7470  ;;  %v4344_v51 = vpop.xlane.xlu0 %4343  ;;  %7484 = vrsqrt.f32 %v4389_v61  ;;  %v7121_v49 = vpack.c.bf16 %v4837_v63, %v4837_v63  ;;  %v16761_v61 = vld [vmem:[#allocation194_spill] sm:$0xff] }
 0x5d8   : > { %v7076_v55 = vpack.c.bf16 %v4631_v33, %v4631_v33  ;;  %v4386_v16 = vmax.f32 %v4344_v51, 1e-24  ;;  %4978 = vrot.lane.b32.xlu0 %v7117_v6, %s7684_s19  ;;  %4976 = vrot.lane.b32.xlu1 %v7116_v59, %s7684_s19  ;;  %v4834_v32 = vmul.f32 %v7471_v54, %v16756_v34  ;;  %v7473_v15 = vpop.eup %7472  ;;  %v16762_v33 = vld [vmem:[#allocation89_spill] sm:$0xff] }
 0x5d9   : > { %v4516_v30 = vpop.permute.xlu1 %4515  ;;  %v4839_v27 = vmul.f32 %v7473_v15, %v16759_v10 }
 0x5da   : > { %4792 = vst.msk [vmem:[%s13402_s26 + $0x20] sm:$0xf] %vm4783_vm15, %v7076_v55  ;;  %7486 = vrsqrt.f32 %v4386_v16  ;;  %v4633_v37 = vmul.f32 %v4516_v30, %v12905_v36  ;;  %v7118_v60 = vpack.c.bf16 %v4834_v32, %v4834_v32  ;;  %v16763_v32 = vld [vmem:[#allocation26_spill] sm:$0xff] }
 0x5db   : > { %v7475_v14 = vpop.eup %7474  ;;  %v4350_v40 = vpop.xlane.xlu0 %4349  ;;  %7488 = vrsqrt.f32 %v4391_v21  ;;  %v7123_v4 = vpack.c.bf16 %v4839_v27, %v4839_v27 }
 0x5dc   : > { %v7078_v28 = vpack.c.bf16 %v4633_v37, %v4633_v37  ;;  %v4388_v2 = vmax.f32 %v4350_v40, 1e-24  ;;  %4982 = vrot.lane.b32.xlu0 %v7119_v13, %s7684_s19  ;;  %4980 = vrot.lane.b32.xlu1 %v7118_v60, %s7684_s19  ;;  %v4836_v0 = vmul.f32 %v7475_v14, %v16758_v9  ;;  %v7477_v1 = vpop.eup %7476  ;;  %v16764_v60 = vld [vmem:[#allocation120_spill] sm:$0xff]  ;;  %v16765_v40 = vld [vmem:[#allocation175_spill] sm:$0xff] }
 0x5dd   : > { %v4526_v8 = vpop.permute.xlu1 %4525  ;;  %v4841_v50 = vmul.f32 %v7477_v1, %v16761_v61 }
 0x5de   : > { %4794 = vst.msk [vmem:[%s13402_s26 + $0x28] sm:$0xf] %vm4783_vm15, %v7078_v28  ;;  %7490 = vrsqrt.f32 %v4388_v2  ;;  %v4635_v25 = vmul.f32 %v4526_v8, %v12922_v46  ;;  %v7120_v35 = vpack.c.bf16 %v4836_v0, %v4836_v0 }
 0x5df   : > { %v7479_v57 = vpop.eup %7478  ;;  %v4356_v29 = vpop.xlane.xlu0 %4355  ;;  %v7125_v55 = vpack.c.bf16 %v4841_v50, %v4841_v50 }
 0x5e0   : > { %v7080_v3 = vpack.c.bf16 %v4635_v25, %v4635_v25  ;;  %v4390_v56 = vmax.f32 %v4356_v29, 1e-24  ;;  %4986 = vrot.lane.b32.xlu0 %v7121_v49, %s7684_s19  ;;  %4984 = vrot.lane.b32.xlu1 %v7120_v35, %s7684_s19  ;;  %v4838_v5 = vmul.f32 %v7479_v57, %v16760_v45  ;;  %v7481_v41 = vpop.eup %7480  ;;  %v16766_v29 = vld [vmem:[#allocation14_spill] sm:$0xff] }
 0x5e1   : > { %v4536_v22 = vpop.permute.xlu1 %4535  ;;  %v4843_v21 = vmul.f32 %v7481_v41, %v16763_v32 }
 0x5e2   : > { %4796 = vst.msk [vmem:[%s13402_s26 + $0x30] sm:$0xf] %vm4783_vm15, %v7080_v3  ;;  %7492 = vrsqrt.f32 %v4390_v56  ;;  %v4637_v58 = vmul.f32 %v4536_v22, %v12945_v52  ;;  %v7122_v17 = vpack.c.bf16 %v4838_v5, %v4838_v5 }
 0x5e3   : > { %v7483_v23 = vpop.eup %7482  ;;  %v7127_v27 = vpack.c.bf16 %v4843_v21, %v4843_v21 }
 0x5e4   : > { %v7082_v18 = vpack.c.bf16 %v4637_v58, %v4637_v58  ;;  %4990 = vrot.lane.b32.xlu0 %v7123_v4, %s7684_s19  ;;  %4988 = vrot.lane.b32.xlu1 %v7122_v17, %s7684_s19  ;;  %v4840_v6 = vmul.f32 %v7483_v23, %v16762_v33  ;;  %v7485_v54 = vpop.eup %7484  ;;  %v16767_v58 = vld [vmem:[#allocation72_spill] sm:$0xff] }
 0x5e5   : > { %v4546_v59 = vpop.permute.xlu1 %4545  ;;  %v4845_v28 = vmul.f32 %v7485_v54, %v16765_v40 }
 0x5e6   : > { %4798 = vst.msk [vmem:[%s13402_s26 + $0x38] sm:$0xf] %vm4783_vm15, %v7082_v18  ;;  %v4639_v51 = vmul.f32 %v4546_v59, %v12962_v39  ;;  %v7124_v16 = vpack.c.bf16 %v4840_v6, %v4840_v6  ;;  %v16768_v59 = vld [vmem:[#allocation150_spill] sm:$0xff] }
 0x5e7   : > { %v7487_v30 = vpop.eup %7486  ;;  %v4466_v13 = vpop.permute.xlu0 %4465  ;;  %v7129_v5 = vpack.c.bf16 %v4845_v28, %v4845_v28 }
 0x5e8   : > { %v7084_v15 = vpack.c.bf16 %v4639_v51, %v4639_v51  ;;  %v4623_v37 = vmul.f32 %v4466_v13, %v12783_v43  ;;  %4994 = vrot.lane.b32.xlu0 %v7125_v55, %s7684_s19  ;;  %4992 = vrot.lane.b32.xlu1 %v7124_v16, %s7684_s19  ;;  %v4842_v63 = vmul.f32 %v7487_v30, %v16764_v60  ;;  %v7489_v2 = vpop.eup %7488 }
 0x5e9   : > { %v4556_v14 = vpop.permute.xlu1 %4555  ;;  %v4847_v17 = vmul.f32 %v7489_v2, %v16767_v58  ;;  %v13502_v2 = vpack.c.bf16 %v16755_v44, %v16755_v44 }
 0x5ea   : > { %4800 = vst.msk [vmem:[%s13402_s26 + $0x40] sm:$0xf] %vm4783_vm15, %v7084_v15  ;;  %v7068_v0 = vpack.c.bf16 %v4623_v37, %v4623_v37  ;;  %v4641_v8 = vmul.f32 %v4556_v14, %v16756_v34  ;;  %v7126_v1 = vpack.c.bf16 %v4842_v63, %v4842_v63 }
 0x5eb   : > { %v7491_v25 = vpop.eup %7490  ;;  %v4481_v49 = vpop.permute.xlu0 %4480  ;;  %v7131_v21 = vpack.c.bf16 %v4847_v17, %v4847_v17  ;;  %16769 = vst [vmem:[#allocation183_spill] sm:$0xff] %v13502_v2 }
 0x5ec   : > { %4784 = vst.msk [vmem:[%s13402_s26] sm:$0xf] %vm4783_vm15, %v7068_v0  ;;  %v7086_v35 = vpack.c.bf16 %v4641_v8, %v4641_v8  ;;  %v4626_v57 = vmul.f32 %v4481_v49, %v12776_v48  ;;  %4998 = vrot.lane.b32.xlu0 %v7127_v27, %s7684_s19  ;;  %4996 = vrot.lane.b32.xlu1 %v7126_v1, %s7684_s19 }
 0x5ed   : > { %v4844_v3 = vmul.f32 %v7491_v25, %v16766_v29  ;;  %v4566_v56 = vpop.permute.xlu1 %4565  ;;  %v13506_v0 = vpack.c.bf16 %v12783_v43, %v12783_v43 }
 0x5ee   : > { %4802 = vst.msk [vmem:[%s13402_s26 + $0x48] sm:$0xf] %vm4783_vm15, %v7086_v35  ;;  %v7071_v22 = vpack.c.bf16 %v4626_v57, %v4626_v57  ;;  %v4643_v4 = vmul.f32 %v4566_v56, %v16758_v9  ;;  %v13520_v57 = vpack.c.bf16 %v12776_v48, %v12776_v48 }
 0x5ef   : > { %v7128_v41 = vpack.c.bf16 %v4844_v3, %v4844_v3  ;;  %v7493_v50 = vpop.eup %7492  ;;  %v4491_v23 = vpop.permute.xlu0 %4490  ;;  %16770 = vst [vmem:[#allocation95_spill] sm:$0xff] %v13506_v0  ;;  %v13524_v3 = vpack.c.bf16 %v12805_v26, %v12805_v26 }
 0x5f0   : > { %4787 = vst.msk [vmem:[%s13402_s26 + $0xc] sm:$0xf] %vm4783_vm15, %v7071_v22  ;;  %v7088_v18 = vpack.c.bf16 %v4643_v4, %v4643_v4  ;;  %v4628_v6 = vmul.f32 %v4491_v23, %v12802_v47  ;;  %5002 = vrot.lane.b32.xlu0 %v7129_v5, %s7684_s19  ;;  %v4846_v54 = vmul.f32 %v7493_v50, %v16768_v59  ;;  %16771 = vst [vmem:[#allocation154_spill] sm:$0xff] %v13520_v57 }
 0x5f1   : > { %5000 = vrot.lane.b32.xlu1 %v7128_v41, %s7684_s19  ;;  %v4576_v51 = vpop.permute.xlu1 %4575  ;;  %16772 = vst [vmem:[#allocation31_spill] sm:$0xff] %v13524_v3  ;;  %v13538_v50 = vpack.c.bf16 %v12802_v47, %v12802_v47  ;;  %v13542_v23 = vpack.c.bf16 %v12827_v12, %v12827_v12 }
 0x5f2   : > { %4804 = vst.msk [vmem:[%s13402_s26 + $0x50] sm:$0xf] %vm4783_vm15, %v7088_v18  ;;  %v7073_v55 = vpack.c.bf16 %v4628_v6, %v4628_v6  ;;  %v4645_v16 = vmul.f32 %v4576_v51, %v16760_v45  ;;  %v7130_v30 = vpack.c.bf16 %v4846_v54, %v4846_v54 }
 0x5f3   : > { %v4501_v13 = vpop.permute.xlu0 %4500  ;;  %16773 = vst [vmem:[#allocation206_spill] sm:$0xff] %v13538_v50  ;;  %16774 = vst [vmem:[#allocation168_spill] sm:$0xff] %v13542_v23 }
 0x5f4   : > { %4789 = vst.msk [vmem:[%s13402_s26 + $0x14] sm:$0xf] %vm4783_vm15, %v7073_v55  ;;  %v7090_v15 = vpack.c.bf16 %v4645_v16, %v4645_v16  ;;  %v4630_v37 = vmul.f32 %v4501_v13, %v12820_v53  ;;  %5006 = vrot.lane.b32.xlu0 %v7131_v21, %s7684_s19  ;;  %v13556_v21 = vpack.c.bf16 %v12820_v53, %v12820_v53 }
 0x5f5   : > { %5004 = vrot.lane.b32.xlu1 %v7130_v30, %s7684_s19  ;;  %v4586_v63 = vpop.permute.xlu1 %4585  ;;  %v13560_v30 = vpack.c.bf16 %v12857_v24, %v12857_v24  ;;  %s7689_s19 = smov 108  }
 0x5f6   : > { %4806 = vst.msk [vmem:[%s13402_s26 + $0x58] sm:$0xf] %vm4783_vm15, %v7090_v15  ;;  %v7075_v14 = vpack.c.bf16 %v4630_v37, %v4630_v37  ;;  %v4647_v28 = vmul.f32 %v4586_v63, %v16762_v33  ;;  %16775 = vst [vmem:[#allocation78_spill] sm:$0xff] %v13556_v21 }
 0x5f7   : > { %v4511_v8 = vpop.permute.xlu0 %4510  ;;  %16776 = vst [vmem:[#allocation108_spill] sm:$0xff] %v13560_v30 }
 0x5f8   : > { %4791 = vst.msk [vmem:[%s13402_s26 + $0x1c] sm:$0xf] %vm4783_vm15, %v7075_v14  ;;  %v7092_v27 = vpack.c.bf16 %v4647_v28, %v4647_v28  ;;  %v4632_v1 = vmul.f32 %v4511_v8, %v12848_v38  ;;  %5170 = vrot.lane.b32.xlu0 %v13502_v2, %s7685_s27  ;;  %v13573_v14 = vpack.c.bf16 %v12848_v38, %v12848_v38 }
 0x5f9   : > { %5168 = vrot.lane.b32.xlu1 %v13506_v0, %s7685_s27  ;;  %v4596_v25 = vpop.permute.xlu1 %4595  ;;  %v13577_v28 = vpack.c.bf16 %v12884_v42, %v12884_v42 }
 0x5fa   : > { %4808 = vst.msk [vmem:[%s13402_s26 + $0x60] sm:$0xf] %vm4783_vm15, %v7092_v27  ;;  %v7077_v49 = vpack.c.bf16 %v4632_v1, %v4632_v1  ;;  %v4649_v35 = vmul.f32 %v4596_v25, %v16764_v60  ;;  %16777 = vst [vmem:[#allocation75_spill] sm:$0xff] %v13573_v14  ;;  %v13594_v25 = vpack.c.bf16 %v12873_v62, %v12873_v62 }
 0x5fb   : > { %v4521_v56 = vpop.permute.xlu0 %4520  ;;  %16778 = vst [vmem:[#allocation138_spill] sm:$0xff] %v13577_v28 }
 0x5fc   : > { %4793 = vst.msk [vmem:[%s13402_s26 + $0x24] sm:$0xf] %vm4783_vm15, %v7077_v49  ;;  %v7094_v5 = vpack.c.bf16 %v4649_v35, %v4649_v35  ;;  %v4634_v22 = vmul.f32 %v4521_v56, %v12873_v62  ;;  %5174 = vrot.lane.b32.xlu0 %v13520_v57, %s7685_s27  ;;  %16779 = vst [vmem:[#allocation100_spill] sm:$0xff] %v13594_v25  ;;  %v13598_v49 = vpack.c.bf16 %v12905_v36, %v12905_v36  ;;  %v16825_v57 = vld [vmem:[#allocation211_spill] sm:$0xff] }
 0x5fd   : > { %5172 = vrot.lane.b32.xlu1 %v13524_v3, %s7685_s27  ;;  %v4606_v4 = vpop.permute.xlu1 %4605  ;;  %v16826_v3 = vld [vmem:[#allocation93_spill] sm:$0xff] }
 0x5fe   : > { %4810 = vst.msk [vmem:[%s13402_s26 + $0x68] sm:$0xf] %vm4783_vm15, %v7094_v5  ;;  %v7079_v41 = vpack.c.bf16 %v4634_v22, %v4634_v22  ;;  %v4651_v17 = vmul.f32 %v4606_v4, %v16766_v29  ;;  %16780 = vst [vmem:[#allocation171_spill] sm:$0xff] %v13598_v49  ;;  %v13611_v4 = vpack.c.bf16 %v12894_v11, %v12894_v11 }
 0x5ff   : > { %v4531_v18 = vpop.permute.xlu0 %4530 }
 0x600   : > { %4795 = vst.msk [vmem:[%s13402_s26 + $0x2c] sm:$0xf] %vm4783_vm15, %v7079_v41  ;;  %v7096_v6 = vpack.c.bf16 %v4651_v17, %v4651_v17  ;;  %v4636_v54 = vmul.f32 %v4531_v18, %v12894_v11  ;;  %5178 = vrot.lane.b32.xlu0 %v13538_v50, %s7685_s27  ;;  %16781 = vst [vmem:[#allocation74_spill] sm:$0xff] %v13611_v4  ;;  %v13615_v41 = vpack.c.bf16 %v12922_v46, %v12922_v46  ;;  %v16823_v50 = vld [vmem:[#allocation107_spill] sm:$0xff] }
 0x601   : > { %5176 = vrot.lane.b32.xlu1 %v13542_v23, %s7685_s27  ;;  %v4616_v51 = vpop.permute.xlu1 %4615 }
 0x602   : > { %4812 = vst.msk [vmem:[%s13402_s26 + $0x70] sm:$0xf] %vm4783_vm15, %v7096_v6  ;;  %v7081_v55 = vpack.c.bf16 %v4636_v54, %v4636_v54  ;;  %v4653_v16 = vmul.f32 %v4616_v51, %v16768_v59  ;;  %16782 = vst [vmem:[#allocation159_spill] sm:$0xff] %v13615_v41  ;;  %v13626_v54 = vpack.c.bf16 %v12915_v19, %v12915_v19 }
 0x603   : > { %v4541_v13 = vpop.permute.xlu0 %4540  ;;  %v13630_v51 = vpack.c.bf16 %v12945_v52, %v12945_v52 }
 0x604   : > { %4797 = vst.msk [vmem:[%s13402_s26 + $0x34] sm:$0xf] %vm4783_vm15, %v7081_v55  ;;  %v7098_v15 = vpack.c.bf16 %v4653_v16, %v4653_v16  ;;  %v4638_v37 = vmul.f32 %v4541_v13, %v12915_v19  ;;  %5182 = vrot.lane.b32.xlu0 %v13556_v21, %s7685_s27  ;;  %16783 = vst [vmem:[#allocation84_spill] sm:$0xff] %v13626_v54  ;;  %v16821_v21 = vld [vmem:[#allocation70_spill] sm:$0xff] }
 0x605   : > { %5180 = vrot.lane.b32.xlu1 %v13560_v30, %s7685_s27  ;;  %16784 = vst [vmem:[#allocation126_spill] sm:$0xff] %v13630_v51 }
 0x606   : > { %4814 = vst.msk [vmem:[%s13402_s26 + $0x78] sm:$0xf] %vm4783_vm15, %v7098_v15  ;;  %v7083_v63 = vpack.c.bf16 %v4638_v37, %v4638_v37  ;;  %v13641_v15 = vpack.c.bf16 %v12942_v7, %v12942_v7  ;;  %v13645_v37 = vpack.c.bf16 %v12962_v39, %v12962_v39 }
 0x607   : > { %v4551_v8 = vpop.permute.xlu0 %4550 }
 0x608   : > { %4799 = vst.msk [vmem:[%s13402_s26 + $0x3c] sm:$0xf] %vm4783_vm15, %v7083_v63  ;;  %v4640_v27 = vmul.f32 %v4551_v8, %v12942_v7  ;;  %5186 = vrot.lane.b32.xlu0 %v13573_v14, %s7685_s27  ;;  %16785 = vst [vmem:[#allocation44_spill] sm:$0xff] %v13641_v15  ;;  %v16819_v14 = vld [vmem:[#allocation66_spill] sm:$0xff] }
 0x609   : > { %5184 = vrot.lane.b32.xlu1 %v13577_v28, %s7685_s27  ;;  %16786 = vst [vmem:[#allocation57_spill] sm:$0xff] %v13645_v37 }
 0x60a   : > { %v7085_v1 = vpack.c.bf16 %v4640_v27, %v4640_v27 }
 0x60b   : > { %v4561_v35 = vpop.permute.xlu0 %4560 }
 0x60c   : > { %4801 = vst.msk [vmem:[%s13402_s26 + $0x44] sm:$0xf] %vm4783_vm15, %v7085_v1  ;;  %v4642_v56 = vmul.f32 %v4561_v35, %v12957_v31  ;;  %v4945_v5 = vpop.permute.xlu1 %4944  ;;  %5190 = vrot.lane.b32.xlu0 %v13594_v25, %s7685_s27  ;;  %v13656_v1 = vpack.c.bf16 %v12957_v31, %v12957_v31  ;;  %v13660_v35 = vpack.c.bf16 %v16756_v34, %v16756_v34  ;;  %v16817_v25 = vld [vmem:[#allocation82_spill] sm:$0xff] }
 0x60d   : > { %5188 = vrot.lane.b32.xlu1 %v13598_v49, %s7685_s27  ;;  %5040 = vst.msk [vmem:[%s13590_s30] sm:$0xf] %vm4783_vm15, %v4945_v5 }
 0x60e   : > { %v7087_v22 = vpack.c.bf16 %v4642_v56, %v4642_v56  ;;  %16787 = vst [vmem:[#allocation77_spill] sm:$0xff] %v13656_v1  ;;  %16788 = vst [vmem:[#allocation209_spill] sm:$0xff] %v13660_v35 }
 0x60f   : > { %v4571_v17 = vpop.permute.xlu0 %4570 }
 0x610   : > { %4803 = vst.msk [vmem:[%s13402_s26 + $0x4c] sm:$0xf] %vm4783_vm15, %v7087_v22  ;;  %v4644_v18 = vmul.f32 %v4571_v17, %v16757_v20  ;;  %5194 = vrot.lane.b32.xlu0 %v13611_v4, %s7685_s27  ;;  %v13671_v17 = vpack.c.bf16 %v16757_v20, %v16757_v20  ;;  %v16815_v4 = vld [vmem:[#allocation62_spill] sm:$0xff] }
 0x611   : > { %5192 = vrot.lane.b32.xlu1 %v13615_v41, %s7685_s27 }
 0x612   : > { %v7089_v6 = vpack.c.bf16 %v4644_v18, %v4644_v18  ;;  %16789 = vst [vmem:[#allocation60_spill] sm:$0xff] %v13671_v17  ;;  %v13675_v18 = vpack.c.bf16 %v16758_v9, %v16758_v9 }
 0x613   : > { %v4581_v55 = vpop.permute.xlu0 %4580 }
 0x614   : > { %4805 = vst.msk [vmem:[%s13402_s26 + $0x54] sm:$0xf] %vm4783_vm15, %v7089_v6  ;;  %v4646_v16 = vmul.f32 %v4581_v55, %v16759_v10  ;;  %5198 = vrot.lane.b32.xlu0 %v13626_v54, %s7685_s27  ;;  %16790 = vst [vmem:[#allocation131_spill] sm:$0xff] %v13675_v18  ;;  %v16813_v54 = vld [vmem:[#allocation25_spill] sm:$0xff] }
 0x615   : > { %5196 = vrot.lane.b32.xlu1 %v13630_v51, %s7685_s27 }
 0x616   : > { %v7091_v13 = vpack.c.bf16 %v4646_v16, %v4646_v16 }
 0x617   : > { %v4591_v63 = vpop.permute.xlu0 %4590 }
 0x618   : > { %4807 = vst.msk [vmem:[%s13402_s26 + $0x5c] sm:$0xf] %vm4783_vm15, %v7091_v13  ;;  %v4648_v8 = vmul.f32 %v4591_v63, %v16761_v61  ;;  %5202 = vrot.lane.b32.xlu0 %v13641_v15, %s7685_s27  ;;  %v13686_v13 = vpack.c.bf16 %v16759_v10, %v16759_v10  ;;  %v13690_v63 = vpack.c.bf16 %v16760_v45, %v16760_v45  ;;  %v16811_v15 = vld [vmem:[#allocation41_spill] sm:$0xff] }
 0x619   : > { %5200 = vrot.lane.b32.xlu1 %v13645_v37, %s7685_s27 }
 0x61a   : > { %v7093_v27 = vpack.c.bf16 %v4648_v8, %v4648_v8  ;;  %16791 = vst [vmem:[#allocation149_spill] sm:$0xff] %v13686_v13  ;;  %16792 = vst [vmem:[#allocation127_spill] sm:$0xff] %v13690_v63 }
 0x61b   : > { %v4601_v56 = vpop.permute.xlu0 %4600 }
 0x61c   : > { %4809 = vst.msk [vmem:[%s13402_s26 + $0x64] sm:$0xf] %vm4783_vm15, %v7093_v27  ;;  %v4650_v5 = vmul.f32 %v4601_v56, %v16763_v32  ;;  %5206 = vrot.lane.b32.xlu0 %v13656_v1, %s7685_s27  ;;  %v16809_v1 = vld [vmem:[#allocation5_spill] sm:$0xff] }
 0x61d   : > { %5204 = vrot.lane.b32.xlu1 %v13660_v35, %s7685_s27 }
 0x61e   : > { %v7095_v22 = vpack.c.bf16 %v4650_v5, %v4650_v5  ;;  %v13701_v5 = vpack.c.bf16 %v16761_v61, %v16761_v61 }
 0x61f   : > { %v4611_v6 = vpop.permute.xlu0 %4610 }
 0x620   : > { %4811 = vst.msk [vmem:[%s13402_s26 + $0x6c] sm:$0xf] %vm4783_vm15, %v7095_v22  ;;  %v4652_v55 = vmul.f32 %v4611_v6, %v16765_v40  ;;  %5210 = vrot.lane.b32.xlu0 %v13671_v17, %s7685_s27  ;;  %16793 = vst [vmem:[#allocation208_spill] sm:$0xff] %v13701_v5  ;;  %v13705_v22 = vpack.c.bf16 %v16762_v33, %v16762_v33  ;;  %v16807_v17 = vld [vmem:[#allocation124_spill] sm:$0xff] }
 0x621   : > { %5208 = vrot.lane.b32.xlu1 %v13675_v18, %s7685_s27 }
 0x622   : > { %v7097_v16 = vpack.c.bf16 %v4652_v55, %v4652_v55  ;;  %16794 = vst [vmem:[#allocation182_spill] sm:$0xff] %v13705_v22  ;;  %v13715_v55 = vpack.c.bf16 %v16763_v32, %v16763_v32 }
 0x623   : > { %v4621_v8 = vpop.permute.xlu0 %4620 }
 0x624   : > { %4813 = vst.msk [vmem:[%s13402_s26 + $0x74] sm:$0xf] %vm4783_vm15, %v7097_v16  ;;  %v4654_v27 = vmul.f32 %v4621_v8, %v16767_v58  ;;  %5214 = vrot.lane.b32.xlu0 %v13686_v13, %s7685_s27  ;;  %16795 = vst [vmem:[#allocation79_spill] sm:$0xff] %v13715_v55  ;;  %v13719_v16 = vpack.c.bf16 %v16764_v60, %v16764_v60  ;;  %v16805_v13 = vld [vmem:[#allocation167_spill] sm:$0xff] }
 0x625   : > { %5212 = vrot.lane.b32.xlu1 %v13690_v63, %s7685_s27 }
 0x626   : > { %v7099_v56 = vpack.c.bf16 %v4654_v27, %v4654_v27  ;;  %16796 = vst [vmem:[#allocation47_spill] sm:$0xff] %v13719_v16 }
 0x628   : > { %4815 = vst.msk [vmem:[%s13402_s26 + $0x7c] sm:$0xf] %vm4783_vm15, %v7099_v56  ;;  %5218 = vrot.lane.b32.xlu0 %v13701_v5, %s7685_s27  ;;  %v13729_v56 = vpack.c.bf16 %v16765_v40, %v16765_v40  ;;  %v13733_v5 = vpack.c.bf16 %v16766_v29, %v16766_v29 }
 0x629   : > { %5216 = vrot.lane.b32.xlu1 %v13705_v22, %s7685_s27  ;;  %v13749_v22 = vpack.c.bf16 %v16768_v59, %v16768_v59  ;;  %v16829_v59 = vld [vmem:[#allocation152_spill] sm:$0xff] }
 0x62a   : > { %v4947_v6 = vpop.permute.xlu0 %4946  ;;  %16797 = vst [vmem:[#allocation65_spill] sm:$0xff] %v13729_v56  ;;  %16798 = vst [vmem:[#allocation80_spill] sm:$0xff] %v13733_v5 }
 0x62b   : > { %5041 = vst.msk [vmem:[%s13590_s30 + $0x4] sm:$0xf] %vm4783_vm15, %v4947_v6  ;;  %16800 = vst [vmem:[#allocation33_spill] sm:$0xff] %v13749_v22 }
 0x62c   : > { %5222 = vrot.lane.b32.xlu0 %v13715_v55, %s7685_s27 }
 0x62d   : > { %5220 = vrot.lane.b32.xlu1 %v13719_v16, %s7685_s27  ;;  %v13745_v16 = vpack.c.bf16 %v16767_v58, %v16767_v58 }
 0x62e   : > { %v4949_v8 = vpop.permute.xlu1 %4948  ;;  %v4951_v27 = vpop.permute.xlu0 %4950 }
 0x62f   : > { %5042 = vst.msk [vmem:[%s13590_s30 + $0x8] sm:$0xf] %vm4783_vm15, %v4949_v8  ;;  %5043 = vst.msk [vmem:[%s13590_s30 + $0xc] sm:$0xf] %vm4783_vm15, %v4951_v27 }
 0x630   : > { %5226 = vrot.lane.b32.xlu0 %v13729_v56, %s7685_s27  ;;  %16799 = vst [vmem:[#allocation2_spill] sm:$0xff] %v13745_v16  ;;  %v16801_v56 = vld [vmem:[#allocation186_spill] sm:$0xff] }
 0x631   : > { %5224 = vrot.lane.b32.xlu1 %v13733_v5, %s7685_s27 }
 0x632   : > { %v4953_v6 = vpop.permute.xlu1 %4952  ;;  %v4955_v55 = vpop.permute.xlu0 %4954 }
 0x633   : > { %5044 = vst.msk [vmem:[%s13590_s30 + $0x10] sm:$0xf] %vm4783_vm15, %v4953_v6  ;;  %5045 = vst.msk [vmem:[%s13590_s30 + $0x14] sm:$0xf] %vm4783_vm15, %v4955_v55  ;;  %v16802_v55 = vld [vmem:[#allocation88_spill] sm:$0xff] }
 0x634   : > { %5230 = vrot.lane.b32.xlu0 %v13745_v16, %s7685_s27 }
 0x635   : > { %5228 = vrot.lane.b32.xlu1 %v13749_v22, %s7685_s27  ;;  %v16803_v22 = vld [vmem:[#allocation213_spill] sm:$0xff] }
 0x636   : > { %v4957_v8 = vpop.permute.xlu1 %4956  ;;  %v4959_v27 = vpop.permute.xlu0 %4958 }
 0x637   : > { %5046 = vst.msk [vmem:[%s13590_s30 + $0x18] sm:$0xf] %vm4783_vm15, %v4957_v8  ;;  %5047 = vst.msk [vmem:[%s13590_s30 + $0x1c] sm:$0xf] %vm4783_vm15, %v4959_v27  ;;  %v16804_v8 = vld [vmem:[#allocation3_spill] sm:$0xff] }
 0x638   : > { %5298 = vrot.lane.b32.xlu0 %v16802_v55, %s7686_s13 }
 0x639   : > { %5296 = vrot.lane.b32.xlu1 %v16801_v56, %s7686_s13 }
 0x63a   : > { %v4961_v6 = vpop.permute.xlu1 %4960  ;;  %v4963_v16 = vpop.permute.xlu0 %4962 }
 0x63b   : > { %5048 = vst.msk [vmem:[%s13590_s30 + $0x20] sm:$0xf] %vm4783_vm15, %v4961_v6  ;;  %5049 = vst.msk [vmem:[%s13590_s30 + $0x24] sm:$0xf] %vm4783_vm15, %v4963_v16  ;;  %v16806_v6 = vld [vmem:[#allocation48_spill] sm:$0xff] }
 0x63c   : > { %5302 = vrot.lane.b32.xlu0 %v16804_v8, %s7686_s13 }
 0x63d   : > { %5300 = vrot.lane.b32.xlu1 %v16803_v22, %s7686_s13 }
 0x63e   : > { %v4965_v27 = vpop.permute.xlu1 %4964  ;;  %v4967_v5 = vpop.permute.xlu0 %4966 }
 0x63f   : > { %5050 = vst.msk [vmem:[%s13590_s30 + $0x28] sm:$0xf] %vm4783_vm15, %v4965_v27  ;;  %5051 = vst.msk [vmem:[%s13590_s30 + $0x2c] sm:$0xf] %vm4783_vm15, %v4967_v5  ;;  %v16808_v27 = vld [vmem:[#allocation147_spill] sm:$0xff] }
 0x640   : > { %5306 = vrot.lane.b32.xlu0 %v16806_v6, %s7686_s13 }
 0x641   : > { %5304 = vrot.lane.b32.xlu1 %v16805_v13, %s7686_s13 }
 0x642   : > { %v4969_v16 = vpop.permute.xlu1 %4968  ;;  %v4971_v63 = vpop.permute.xlu0 %4970 }
 0x643   : > { %5052 = vst.msk [vmem:[%s13590_s30 + $0x30] sm:$0xf] %vm4783_vm15, %v4969_v16  ;;  %5053 = vst.msk [vmem:[%s13590_s30 + $0x34] sm:$0xf] %vm4783_vm15, %v4971_v63  ;;  %v16810_v16 = vld [vmem:[#allocation204_spill] sm:$0xff] }
 0x644   : > { %5310 = vrot.lane.b32.xlu0 %v16808_v27, %s7686_s13 }
 0x645   : > { %5308 = vrot.lane.b32.xlu1 %v16807_v17, %s7686_s13 }
 0x646   : > { %v4973_v5 = vpop.permute.xlu1 %4972  ;;  %v4975_v18 = vpop.permute.xlu0 %4974 }
 0x647   : > { %5054 = vst.msk [vmem:[%s13590_s30 + $0x38] sm:$0xf] %vm4783_vm15, %v4973_v5  ;;  %5055 = vst.msk [vmem:[%s13590_s30 + $0x3c] sm:$0xf] %vm4783_vm15, %v4975_v18  ;;  %v16812_v5 = vld [vmem:[#allocation61_spill] sm:$0xff] }
 0x648   : > { %5314 = vrot.lane.b32.xlu0 %v16810_v16, %s7686_s13 }
 0x649   : > { %5312 = vrot.lane.b32.xlu1 %v16809_v1, %s7686_s13 }
 0x64a   : > { %v4977_v63 = vpop.permute.xlu1 %4976  ;;  %v4979_v35 = vpop.permute.xlu0 %4978 }
 0x64b   : > { %5056 = vst.msk [vmem:[%s13590_s30 + $0x40] sm:$0xf] %vm4783_vm15, %v4977_v63  ;;  %5057 = vst.msk [vmem:[%s13590_s30 + $0x44] sm:$0xf] %vm4783_vm15, %v4979_v35  ;;  %v16814_v63 = vld [vmem:[#allocation101_spill] sm:$0xff] }
 0x64c   : > { %5318 = vrot.lane.b32.xlu0 %v16812_v5, %s7686_s13 }
 0x64d   : > { %5316 = vrot.lane.b32.xlu1 %v16811_v15, %s7686_s13 }
 0x64e   : > { %v4981_v18 = vpop.permute.xlu1 %4980  ;;  %v4983_v37 = vpop.permute.xlu0 %4982 }
 0x64f   : > { %5058 = vst.msk [vmem:[%s13590_s30 + $0x48] sm:$0xf] %vm4783_vm15, %v4981_v18  ;;  %5059 = vst.msk [vmem:[%s13590_s30 + $0x4c] sm:$0xf] %vm4783_vm15, %v4983_v37  ;;  %v16816_v18 = vld [vmem:[#allocation191_spill] sm:$0xff] }
 0x650   : > { %5322 = vrot.lane.b32.xlu0 %v16814_v63, %s7686_s13 }
 0x651   : > { %5320 = vrot.lane.b32.xlu1 %v16813_v54, %s7686_s13 }
 0x652   : > { %v4985_v35 = vpop.permute.xlu1 %4984  ;;  %v4987_v51 = vpop.permute.xlu0 %4986 }
 0x653   : > { %5060 = vst.msk [vmem:[%s13590_s30 + $0x50] sm:$0xf] %vm4783_vm15, %v4985_v35  ;;  %5061 = vst.msk [vmem:[%s13590_s30 + $0x54] sm:$0xf] %vm4783_vm15, %v4987_v51  ;;  %v16818_v35 = vld [vmem:[#allocation173_spill] sm:$0xff] }
 0x654   : > { %5326 = vrot.lane.b32.xlu0 %v16816_v18, %s7686_s13 }
 0x655   : > { %5324 = vrot.lane.b32.xlu1 %v16815_v4, %s7686_s13 }
 0x656   : > { %v4989_v37 = vpop.permute.xlu1 %4988  ;;  %v4991_v41 = vpop.permute.xlu0 %4990 }
 0x657   : > { %5062 = vst.msk [vmem:[%s13590_s30 + $0x58] sm:$0xf] %vm4783_vm15, %v4989_v37  ;;  %5063 = vst.msk [vmem:[%s13590_s30 + $0x5c] sm:$0xf] %vm4783_vm15, %v4991_v41  ;;  %v16820_v37 = vld [vmem:[#allocation63_spill] sm:$0xff] }
 0x658   : > { %5330 = vrot.lane.b32.xlu0 %v16818_v35, %s7686_s13 }
 0x659   : > { %5328 = vrot.lane.b32.xlu1 %v16817_v25, %s7686_s13 }
 0x65a   : > { %v4993_v51 = vpop.permute.xlu1 %4992  ;;  %v4995_v49 = vpop.permute.xlu0 %4994 }
 0x65b   : > { %5064 = vst.msk [vmem:[%s13590_s30 + $0x60] sm:$0xf] %vm4783_vm15, %v4993_v51  ;;  %5065 = vst.msk [vmem:[%s13590_s30 + $0x64] sm:$0xf] %vm4783_vm15, %v4995_v49  ;;  %v16822_v49 = vld [vmem:[#allocation200_spill] sm:$0xff] }
 0x65c   : > { %5334 = vrot.lane.b32.xlu0 %v16820_v37, %s7686_s13 }
 0x65d   : > { %5332 = vrot.lane.b32.xlu1 %v16819_v14, %s7686_s13 }
 0x65e   : > { %v4997_v41 = vpop.permute.xlu1 %4996  ;;  %v4999_v28 = vpop.permute.xlu0 %4998 }
 0x65f   : > { %5066 = vst.msk [vmem:[%s13590_s30 + $0x68] sm:$0xf] %vm4783_vm15, %v4997_v41  ;;  %5067 = vst.msk [vmem:[%s13590_s30 + $0x6c] sm:$0xf] %vm4783_vm15, %v4999_v28  ;;  %v16824_v41 = vld [vmem:[#allocation9_spill] sm:$0xff] }
 0x660   : > { %5338 = vrot.lane.b32.xlu0 %v16822_v49, %s7686_s13 }
 0x661   : > { %5336 = vrot.lane.b32.xlu1 %v16821_v21, %s7686_s13 }
 0x662   : > { %v5003_v30 = vpop.permute.xlu0 %5002 }
 0x663   : > { %v5001_v51 = vpop.permute.xlu1 %5000  ;;  %5069 = vst.msk [vmem:[%s13590_s30 + $0x74] sm:$0xf] %vm4783_vm15, %v5003_v30 }
 0x664   : > { %5068 = vst.msk [vmem:[%s13590_s30 + $0x70] sm:$0xf] %vm4783_vm15, %v5001_v51  ;;  %5342 = vrot.lane.b32.xlu0 %v16824_v41, %s7686_s13  ;;  %v16827_v51 = vld [vmem:[#allocation68_spill] sm:$0xff] }
 0x665   : > { %5340 = vrot.lane.b32.xlu1 %v16823_v50, %s7686_s13 }
 0x666   : > { %v5007_v28 = vpop.permute.xlu0 %5006 }
 0x667   : > { %v5005_v23 = vpop.permute.xlu1 %5004  ;;  %5071 = vst.msk [vmem:[%s13590_s30 + $0x7c] sm:$0xf] %vm4783_vm15, %v5007_v28  ;;  %v16828_v28 = vld [vmem:[#allocation94_spill] sm:$0xff] }
 0x668   : > { %5070 = vst.msk [vmem:[%s13590_s30 + $0x78] sm:$0xf] %vm4783_vm15, %v5005_v23  ;;  %5346 = vrot.lane.b32.xlu0 %v16826_v3, %s7686_s13 }
 0x669   : > { %5344 = vrot.lane.b32.xlu1 %v16825_v57, %s7686_s13 }
 0x66a   : > { %v5171_v30 = vpop.permute.xlu0 %5170 }
 0x66b   : > { %v5169_v23 = vpop.permute.xlu1 %5168  ;;  %5265 = vst.msk [vmem:[%s13867_s16 + $0x4] sm:$0xf] %vm4783_vm15, %v5171_v30 }
 0x66c   : > { %5264 = vst.msk [vmem:[%s13867_s16] sm:$0xf] %vm4783_vm15, %v5169_v23  ;;  %5350 = vrot.lane.b32.xlu0 %v16828_v28, %s7686_s13  ;;  %v16830_v23 = vld [vmem:[#allocation139_spill] sm:$0xff] }
 0x66d   : > { %5348 = vrot.lane.b32.xlu1 %v16827_v51, %s7686_s13 }
 0x66e   : > { %v5175_v0 = vpop.permute.xlu0 %5174 }
 0x66f   : > { %v5173_v2 = vpop.permute.xlu1 %5172  ;;  %5267 = vst.msk [vmem:[%s13867_s16 + $0xc] sm:$0xf] %vm4783_vm15, %v5175_v0  ;;  %v16832_v0 = vld [vmem:[#allocation71_spill] sm:$0xff] }
 0x670   : > { %5266 = vst.msk [vmem:[%s13867_s16 + $0x8] sm:$0xf] %vm4783_vm15, %v5173_v2  ;;  %5354 = vrot.lane.b32.xlu0 %v16830_v23, %s7686_s13  ;;  %v16831_v2 = vld [vmem:[#allocation142_spill] sm:$0xff] }
 0x671   : > { %5352 = vrot.lane.b32.xlu1 %v16829_v59, %s7686_s13 }
 0x672   : > { %v5179_v58 = vpop.permute.xlu0 %5178 }
 0x673   : > { %v5177_v30 = vpop.permute.xlu1 %5176  ;;  %5269 = vst.msk [vmem:[%s13867_s16 + $0x14] sm:$0xf] %vm4783_vm15, %v5179_v58 }
 0x674   : > { %5268 = vst.msk [vmem:[%s13867_s16 + $0x10] sm:$0xf] %vm4783_vm15, %v5177_v30  ;;  %5358 = vrot.lane.b32.xlu0 %v16832_v0, %s7686_s13 }
 0x675   : > { %5356 = vrot.lane.b32.xlu1 %v16831_v2, %s7686_s13 }
 0x676   : > { %v5183_v40 = vpop.permute.xlu0 %5182 }
 0x677   : > { %v5181_v29 = vpop.permute.xlu1 %5180  ;;  %5271 = vst.msk [vmem:[%s13867_s16 + $0x1c] sm:$0xf] %vm4783_vm15, %v5183_v40 }
 0x678   : > { %5270 = vst.msk [vmem:[%s13867_s16 + $0x18] sm:$0xf] %vm4783_vm15, %v5181_v29 }
 0x67a   : > { %v5187_v30 = vpop.permute.xlu0 %5186 }
 0x67b   : > { %v5185_v60 = vpop.permute.xlu1 %5184  ;;  %5273 = vst.msk [vmem:[%s13867_s16 + $0x24] sm:$0xf] %vm4783_vm15, %v5187_v30 }
 0x67c   : > { %5272 = vst.msk [vmem:[%s13867_s16 + $0x20] sm:$0xf] %vm4783_vm15, %v5185_v60 }
 0x67e   : > { %v5191_v32 = vpop.permute.xlu0 %5190 }
 0x67f   : > { %v5189_v58 = vpop.permute.xlu1 %5188  ;;  %5275 = vst.msk [vmem:[%s13867_s16 + $0x2c] sm:$0xf] %vm4783_vm15, %v5191_v32 }
 0x680   : > { %5274 = vst.msk [vmem:[%s13867_s16 + $0x28] sm:$0xf] %vm4783_vm15, %v5189_v58 }
 0x682   : > { %v5195_v33 = vpop.permute.xlu0 %5194 }
 0x683   : > { %v5193_v29 = vpop.permute.xlu1 %5192  ;;  %5277 = vst.msk [vmem:[%s13867_s16 + $0x34] sm:$0xf] %vm4783_vm15, %v5195_v33 }
 0x684   : > { %5276 = vst.msk [vmem:[%s13867_s16 + $0x30] sm:$0xf] %vm4783_vm15, %v5193_v29 }
 0x686   : > { %v5199_v40 = vpop.permute.xlu0 %5198 }
 0x687   : > { %v5197_v60 = vpop.permute.xlu1 %5196  ;;  %5279 = vst.msk [vmem:[%s13867_s16 + $0x3c] sm:$0xf] %vm4783_vm15, %v5199_v40 }
 0x688   : > { %5278 = vst.msk [vmem:[%s13867_s16 + $0x38] sm:$0xf] %vm4783_vm15, %v5197_v60 }
 0x68a   : > { %v5203_v58 = vpop.permute.xlu0 %5202 }
 0x68b   : > { %v5201_v30 = vpop.permute.xlu1 %5200  ;;  %5281 = vst.msk [vmem:[%s13867_s16 + $0x44] sm:$0xf] %vm4783_vm15, %v5203_v58 }
 0x68c   : > { %5280 = vst.msk [vmem:[%s13867_s16 + $0x40] sm:$0xf] %vm4783_vm15, %v5201_v30 }
 0x68e   : > { %v5207_v29 = vpop.permute.xlu0 %5206 }
 0x68f   : > { %v5205_v32 = vpop.permute.xlu1 %5204  ;;  %5283 = vst.msk [vmem:[%s13867_s16 + $0x4c] sm:$0xf] %vm4783_vm15, %v5207_v29 }
 0x690   : > { %5282 = vst.msk [vmem:[%s13867_s16 + $0x48] sm:$0xf] %vm4783_vm15, %v5205_v32 }
 0x692   : > { %v5211_v60 = vpop.permute.xlu0 %5210 }
 0x693   : > { %v5209_v33 = vpop.permute.xlu1 %5208  ;;  %5285 = vst.msk [vmem:[%s13867_s16 + $0x54] sm:$0xf] %vm4783_vm15, %v5211_v60 }
 0x694   : > { %5284 = vst.msk [vmem:[%s13867_s16 + $0x50] sm:$0xf] %vm4783_vm15, %v5209_v33 }
 0x696   : > { %v5215_v30 = vpop.permute.xlu0 %5214 }
 0x697   : > { %v5213_v40 = vpop.permute.xlu1 %5212  ;;  %5287 = vst.msk [vmem:[%s13867_s16 + $0x5c] sm:$0xf] %vm4783_vm15, %v5215_v30 }
 0x698   : > { %5286 = vst.msk [vmem:[%s13867_s16 + $0x58] sm:$0xf] %vm4783_vm15, %v5213_v40 }
 0x69a   : > { %v5219_v32 = vpop.permute.xlu0 %5218 }
 0x69b   : > { %v5217_v58 = vpop.permute.xlu1 %5216  ;;  %5289 = vst.msk [vmem:[%s13867_s16 + $0x64] sm:$0xf] %vm4783_vm15, %v5219_v32 }
 0x69c   : > { %5288 = vst.msk [vmem:[%s13867_s16 + $0x60] sm:$0xf] %vm4783_vm15, %v5217_v58 }
 0x69e   : > { %v5223_v33 = vpop.permute.xlu0 %5222 }
 0x69f   : > { %v5221_v29 = vpop.permute.xlu1 %5220  ;;  %5291 = vst.msk [vmem:[%s13867_s16 + $0x6c] sm:$0xf] %vm4783_vm15, %v5223_v33 }
 0x6a0   : > { %5290 = vst.msk [vmem:[%s13867_s16 + $0x68] sm:$0xf] %vm4783_vm15, %v5221_v29 }
 0x6a2   : > { %v5227_v61 = vpop.permute.xlu0 %5226 }
 0x6a3   : > { %v5225_v60 = vpop.permute.xlu1 %5224  ;;  %5293 = vst.msk [vmem:[%s13867_s16 + $0x74] sm:$0xf] %vm4783_vm15, %v5227_v61 }
 0x6a4   : > { %5292 = vst.msk [vmem:[%s13867_s16 + $0x70] sm:$0xf] %vm4783_vm15, %v5225_v60 }
 0x6a6   : > { %v5231_v30 = vpop.permute.xlu0 %5230 }
 0x6a7   : > { %v5229_v40 = vpop.permute.xlu1 %5228  ;;  %5295 = vst.msk [vmem:[%s13867_s16 + $0x7c] sm:$0xf] %vm4783_vm15, %v5231_v30 }
 0x6a8   : > { %5294 = vst.msk [vmem:[%s13867_s16 + $0x78] sm:$0xf] %vm4783_vm15, %v5229_v40 }
 0x6aa   : > { %v5299_v32 = vpop.permute.xlu0 %5298 }
 0x6ab   : > { %v5297_v58 = vpop.permute.xlu1 %5296  ;;  %v5395_v29 = vsel %vm3975_vm10, %v5299_v32, 0.0 }
 0x6ac   : > { %v5392_v45 = vsel %vm3975_vm10, %v5297_v58, 0.0  ;;  %5396 = vadd.xlane.f32.xlu0 %v5395_v29 }
 0x6ad   : > { %5393 = vadd.xlane.f32.xlu1 %v5392_v45 }
 0x6ae   : > { %v5303_v10 = vpop.permute.xlu0 %5302 }
 0x6af   : > { %v5301_v33 = vpop.permute.xlu1 %5300  ;;  %v5401_v61 = vsel %vm3975_vm10, %v5303_v10, 0.0 }
 0x6b0   : > { %v5398_v60 = vsel %vm3975_vm10, %v5301_v33, 0.0 }
 0x6b1   : > { %5399 = vadd.xlane.f32.xlu0 %v5398_v60  ;;  %5402 = vadd.xlane.f32.xlu1 %v5401_v61 }
 0x6b2   : > { %v5307_v40 = vpop.permute.xlu0 %5306 }
 0x6b3   : > { %v5305_v9 = vpop.permute.xlu1 %5304  ;;  %v5407_v20 = vsel %vm3975_vm10, %v5307_v40, 0.0 }
 0x6b4   : > { %v5404_v30 = vsel %vm3975_vm10, %v5305_v9, 0.0 }
 0x6b5   : > { %5405 = vadd.xlane.f32.xlu0 %v5404_v30  ;;  %5408 = vadd.xlane.f32.xlu1 %v5407_v20 }
 0x6b6   : > { %v5311_v32 = vpop.permute.xlu0 %5310 }
 0x6b7   : > { %v5309_v58 = vpop.permute.xlu1 %5308  ;;  %v5413_v29 = vsel %vm3975_vm10, %v5311_v32, 0.0 }
 0x6b8   : > { %v5410_v45 = vsel %vm3975_vm10, %v5309_v58, 0.0 }
 0x6b9   : > { %5411 = vadd.xlane.f32.xlu0 %v5410_v45  ;;  %5414 = vadd.xlane.f32.xlu1 %v5413_v29 }
 0x6ba   : > { %v5315_v10 = vpop.permute.xlu0 %5314 }
 0x6bb   : > { %v5313_v33 = vpop.permute.xlu1 %5312  ;;  %v5419_v61 = vsel %vm3975_vm10, %v5315_v10, 0.0 }
 0x6bc   : > { %v5416_v60 = vsel %vm3975_vm10, %v5313_v33, 0.0 }
 0x6bd   : > { %5417 = vadd.xlane.f32.xlu0 %v5416_v60  ;;  %5420 = vadd.xlane.f32.xlu1 %v5419_v61 }
 0x6be   : > { %v5319_v40 = vpop.permute.xlu0 %5318 }
 0x6bf   : > { %v5317_v9 = vpop.permute.xlu1 %5316  ;;  %v5425_v30 = vsel %vm3975_vm10, %v5319_v40, 0.0 }
 0x6c0   : > { %v5422_v20 = vsel %vm3975_vm10, %v5317_v9, 0.0 }
 0x6c1   : > { %5423 = vadd.xlane.f32.xlu0 %v5422_v20  ;;  %5426 = vadd.xlane.f32.xlu1 %v5425_v30 }
 0x6c2   : > { %v5323_v32 = vpop.permute.xlu0 %5322 }
 0x6c3   : > { %v5321_v58 = vpop.permute.xlu1 %5320  ;;  %v5431_v29 = vsel %vm3975_vm10, %v5323_v32, 0.0 }
 0x6c4   : > { %v5428_v45 = vsel %vm3975_vm10, %v5321_v58, 0.0 }
 0x6c5   : > { %5429 = vadd.xlane.f32.xlu0 %v5428_v45  ;;  %5432 = vadd.xlane.f32.xlu1 %v5431_v29 }
 0x6c6   : > { %v5327_v10 = vpop.permute.xlu0 %5326 }
 0x6c7   : > { %v5325_v33 = vpop.permute.xlu1 %5324  ;;  %v5437_v61 = vsel %vm3975_vm10, %v5327_v10, 0.0 }
 0x6c8   : > { %v5434_v60 = vsel %vm3975_vm10, %v5325_v33, 0.0 }
 0x6c9   : > { %5435 = vadd.xlane.f32.xlu0 %v5434_v60  ;;  %5438 = vadd.xlane.f32.xlu1 %v5437_v61 }
 0x6ca   : > { %v5331_v40 = vpop.permute.xlu0 %5330 }
 0x6cb   : > { %v5329_v9 = vpop.permute.xlu1 %5328  ;;  %v5443_v30 = vsel %vm3975_vm10, %v5331_v40, 0.0 }
 0x6cc   : > { %v5440_v20 = vsel %vm3975_vm10, %v5329_v9, 0.0 }
 0x6cd   : > { %5441 = vadd.xlane.f32.xlu0 %v5440_v20  ;;  %5444 = vadd.xlane.f32.xlu1 %v5443_v30 }
 0x6ce   : > { %v5335_v32 = vpop.permute.xlu0 %5334 }
 0x6cf   : > { %v5333_v58 = vpop.permute.xlu1 %5332  ;;  %v5449_v29 = vsel %vm3975_vm10, %v5335_v32, 0.0 }
 0x6d0   : > { %v5446_v45 = vsel %vm3975_vm10, %v5333_v58, 0.0 }
 0x6d1   : > { %5447 = vadd.xlane.f32.xlu0 %v5446_v45  ;;  %5450 = vadd.xlane.f32.xlu1 %v5449_v29 }
 0x6d2   : > { %v5339_v10 = vpop.permute.xlu0 %5338 }
 0x6d3   : > { %v5337_v33 = vpop.permute.xlu1 %5336  ;;  %v5455_v61 = vsel %vm3975_vm10, %v5339_v10, 0.0 }
 0x6d4   : > { %v5452_v60 = vsel %vm3975_vm10, %v5337_v33, 0.0 }
 0x6d5   : > { %5453 = vadd.xlane.f32.xlu0 %v5452_v60  ;;  %5456 = vadd.xlane.f32.xlu1 %v5455_v61 }
 0x6d6   : > { %v5343_v40 = vpop.permute.xlu0 %5342 }
 0x6d7   : > { %v5341_v9 = vpop.permute.xlu1 %5340  ;;  %v5461_v30 = vsel %vm3975_vm10, %v5343_v40, 0.0 }
 0x6d8   : > { %v5458_v20 = vsel %vm3975_vm10, %v5341_v9, 0.0 }
 0x6d9   : > { %5459 = vadd.xlane.f32.xlu0 %v5458_v20  ;;  %5462 = vadd.xlane.f32.xlu1 %v5461_v30 }
 0x6da   : > { %v5347_v32 = vpop.permute.xlu0 %5346 }
 0x6db   : > { %v5345_v58 = vpop.permute.xlu1 %5344  ;;  %v5467_v29 = vsel %vm3975_vm10, %v5347_v32, 0.0 }
 0x6dc   : > { %v5464_v45 = vsel %vm3975_vm10, %v5345_v58, 0.0 }
 0x6dd   : > { %5465 = vadd.xlane.f32.xlu0 %v5464_v45  ;;  %5468 = vadd.xlane.f32.xlu1 %v5467_v29 }
 0x6de   : > { %v5351_v10 = vpop.permute.xlu0 %5350 }
 0x6df   : > { %v5349_v33 = vpop.permute.xlu1 %5348  ;;  %v5473_v61 = vsel %vm3975_vm10, %v5351_v10, 0.0 }
 0x6e0   : > { %v5470_v60 = vsel %vm3975_vm10, %v5349_v33, 0.0 }
 0x6e1   : > { %5471 = vadd.xlane.f32.xlu0 %v5470_v60  ;;  %5474 = vadd.xlane.f32.xlu1 %v5473_v61 }
 0x6e2   : > { %v5355_v40 = vpop.permute.xlu0 %5354 }
 0x6e3   : > { %v5353_v9 = vpop.permute.xlu1 %5352  ;;  %v5479_v30 = vsel %vm3975_vm10, %v5355_v40, 0.0 }
 0x6e4   : > { %v5476_v20 = vsel %vm3975_vm10, %v5353_v9, 0.0 }
 0x6e5   : > { %5477 = vadd.xlane.f32.xlu0 %v5476_v20  ;;  %5480 = vadd.xlane.f32.xlu1 %v5479_v30 }
 0x6e6   : > { %v5359_v32 = vpop.permute.xlu0 %5358 }
 0x6e7   : > { %v5357_v58 = vpop.permute.xlu1 %5356  ;;  %v5485_v29 = vsel %vm3975_vm10, %v5359_v32, 0.0 }
 0x6e8   : > { %v5482_v45 = vsel %vm3975_vm10, %v5357_v58, 0.0 }
 0x6e9   : > { %5483 = vadd.xlane.f32.xlu0 %v5482_v45  ;;  %5486 = vadd.xlane.f32.xlu1 %v5485_v29 }
 0x6fa   : > { %5554 = vrot.lane.b32.xlu1 %v16802_v55, %s7687_s23 }
 0x6fe   : > { %5556 = vrot.lane.b32.xlu1 %v16803_v22, %s7687_s23 }
 0x6ff   : > { %5552 = vrot.lane.b32.xlu0 %v16801_v56, %s7687_s23 }
 0x702   : > { %5560 = vrot.lane.b32.xlu1 %v16805_v13, %s7687_s23 }
 0x703   : > { %5558 = vrot.lane.b32.xlu0 %v16804_v8, %s7687_s23 }
 0x706   : > { %5564 = vrot.lane.b32.xlu1 %v16807_v17, %s7687_s23 }
 0x707   : > { %5562 = vrot.lane.b32.xlu0 %v16806_v6, %s7687_s23 }
 0x70a   : > { %5568 = vrot.lane.b32.xlu1 %v16809_v1, %s7687_s23 }
 0x70b   : > { %5566 = vrot.lane.b32.xlu0 %v16808_v27, %s7687_s23 }
 0x70e   : > { %5572 = vrot.lane.b32.xlu1 %v16811_v15, %s7687_s23 }
 0x70f   : > { %5570 = vrot.lane.b32.xlu0 %v16810_v16, %s7687_s23 }
 0x712   : > { %5576 = vrot.lane.b32.xlu1 %v16813_v54, %s7687_s23 }
 0x713   : > { %5574 = vrot.lane.b32.xlu0 %v16812_v5, %s7687_s23 }
 0x716   : > { %5580 = vrot.lane.b32.xlu1 %v16815_v4, %s7687_s23 }
 0x717   : > { %5578 = vrot.lane.b32.xlu0 %v16814_v63, %s7687_s23 }
 0x71a   : > { %5584 = vrot.lane.b32.xlu1 %v16817_v25, %s7687_s23 }
 0x71b   : > { %5582 = vrot.lane.b32.xlu0 %v16816_v18, %s7687_s23 }
 0x71e   : > { %5588 = vrot.lane.b32.xlu1 %v16819_v14, %s7687_s23 }
 0x71f   : > { %5586 = vrot.lane.b32.xlu0 %v16818_v35, %s7687_s23 }
 0x722   : > { %5592 = vrot.lane.b32.xlu1 %v16821_v21, %s7687_s23 }
 0x723   : > { %5590 = vrot.lane.b32.xlu0 %v16820_v37, %s7687_s23 }
 0x726   : > { %5596 = vrot.lane.b32.xlu1 %v16823_v50, %s7687_s23  ;;  %v7688_v50 = vmov 1  }
 0x727   : > { %5594 = vrot.lane.b32.xlu0 %v16822_v49, %s7687_s23  ;;  %7301 = vset.pattern.permute.xlu1 %v7688_v50 }
 0x728   : > { %7300 = vset.pattern.permute.xlu0 %v7688_v50 }
 0x72a   : > { %5600 = vrot.lane.b32.xlu1 %v16825_v57, %s7687_s23 }
 0x72b   : > { %5598 = vrot.lane.b32.xlu0 %v16824_v41, %s7687_s23 }
 0x72e   : > { %5604 = vrot.lane.b32.xlu1 %v16827_v51, %s7687_s23 }
 0x72f   : > { %5602 = vrot.lane.b32.xlu0 %v16826_v3, %s7687_s23 }
 0x732   : > { %5608 = vrot.lane.b32.xlu1 %v16829_v59, %s7687_s23 }
 0x733   : > { %5606 = vrot.lane.b32.xlu0 %v16828_v28, %s7687_s23 }
 0x735   : > { %v14039_v57 = vpop.xlane.xlu0 %5396 }
 0x736   : > { %v14035_v21 = vpop.xlane.xlu1 %5393  ;;  %5612 = vrot.lane.b32.xlu1 %v16831_v2, %s7687_s23 }
 0x737   : > { %5610 = vrot.lane.b32.xlu0 %v16830_v23, %s7687_s23 }
 0x73a   : > { %v14043_v3 = vpop.xlane.xlu1 %5402  ;;  %v14045_v14 = vpop.xlane.xlu0 %5399 }
 0x73b   : > { %5614 = vrot.lane.b32.xlu0 %v16832_v0, %s7687_s23 }
 0x73e   : > { %v14049_v59 = vpop.xlane.xlu1 %5408  ;;  %v14051_v25 = vpop.xlane.xlu0 %5405 }
 0x742   : > { %v14053_v4 = vpop.xlane.xlu1 %5414  ;;  %v14055_v54 = vpop.xlane.xlu0 %5411 }
 0x746   : > { %v14057_v15 = vpop.xlane.xlu1 %5420  ;;  %v14059_v1 = vpop.xlane.xlu0 %5417 }
 0x74a   : > { %v14061_v17 = vpop.xlane.xlu1 %5426  ;;  %v14063_v13 = vpop.xlane.xlu0 %5423 }
 0x74e   : > { %v14065_v22 = vpop.xlane.xlu1 %5432  ;;  %v14067_v56 = vpop.xlane.xlu0 %5429 }
 0x752   : > { %v14069_v55 = vpop.xlane.xlu1 %5438  ;;  %v14071_v8 = vpop.xlane.xlu0 %5435 }
 0x756   : > { %v14073_v6 = vpop.xlane.xlu1 %5444  ;;  %v14075_v27 = vpop.xlane.xlu0 %5441 }
 0x75a   : > { %v14077_v16 = vpop.xlane.xlu1 %5450  ;;  %v14079_v5 = vpop.xlane.xlu0 %5447 }
 0x75e   : > { %v14081_v63 = vpop.xlane.xlu1 %5456  ;;  %v14083_v18 = vpop.xlane.xlu0 %5453 }
 0x762   : > { %v14085_v35 = vpop.xlane.xlu1 %5462  ;;  %v14087_v37 = vpop.xlane.xlu0 %5459 }
 0x766   : > { %v14089_v49 = vpop.xlane.xlu1 %5468  ;;  %v14091_v41 = vpop.xlane.xlu0 %5465 }
 0x76a   : > { %v14093_v51 = vpop.xlane.xlu1 %5474  ;;  %v14095_v28 = vpop.xlane.xlu0 %5471 }
 0x76e   : > { %v14097_v23 = vpop.xlane.xlu1 %5480  ;;  %v14099_v2 = vpop.xlane.xlu0 %5477 }
 0x772   : > { %v14101_v0 = vpop.xlane.xlu1 %5486  ;;  %v14103_v33 = vpop.xlane.xlu0 %5483 }
 0x776   : > { %v5555_v10 = vpop.permute.xlu1 %5554  ;;  %v5553_v60 = vpop.permute.xlu0 %5552 }
 0x777   : > { %v5651_v61 = vsel %vm3975_vm10, %v5555_v10, 0.0  ;;  %v5648_v9 = vsel %vm3975_vm10, %v5553_v60, 0.0 }
 0x778   : > { %5652 = vadd.xlane.f32.xlu0 %v5651_v61  ;;  %5649 = vadd.xlane.f32.xlu1 %v5648_v9 }
 0x77a   : > { %v5557_v40 = vpop.permute.xlu1 %5556  ;;  %v5559_v20 = vpop.permute.xlu0 %5558 }
 0x77b   : > { %v5654_v30 = vsel %vm3975_vm10, %v5557_v40, 0.0  ;;  %v5657_v58 = vsel %vm3975_vm10, %v5559_v20, 0.0 }
 0x77c   : > { %5655 = vadd.xlane.f32.xlu0 %v5654_v30  ;;  %5658 = vadd.xlane.f32.xlu1 %v5657_v58 }
 0x77e   : > { %v5561_v32 = vpop.permute.xlu1 %5560  ;;  %v5563_v45 = vpop.permute.xlu0 %5562 }
 0x77f   : > { %v5660_v29 = vsel %vm3975_vm10, %v5561_v32, 0.0  ;;  %v5663_v50 = vsel %vm3975_vm10, %v5563_v45, 0.0 }
 0x780   : > { %5661 = vadd.xlane.f32.xlu0 %v5660_v29  ;;  %5664 = vadd.xlane.f32.xlu1 %v5663_v50 }
 0x782   : > { %v5565_v10 = vpop.permute.xlu1 %5564  ;;  %v5567_v60 = vpop.permute.xlu0 %5566 }
 0x783   : > { %v5666_v61 = vsel %vm3975_vm10, %v5565_v10, 0.0  ;;  %v5669_v9 = vsel %vm3975_vm10, %v5567_v60, 0.0 }
 0x784   : > { %5667 = vadd.xlane.f32.xlu0 %v5666_v61  ;;  %5670 = vadd.xlane.f32.xlu1 %v5669_v9 }
 0x786   : > { %v5569_v40 = vpop.permute.xlu1 %5568  ;;  %v5571_v20 = vpop.permute.xlu0 %5570 }
 0x787   : > { %v5672_v30 = vsel %vm3975_vm10, %v5569_v40, 0.0  ;;  %v5675_v58 = vsel %vm3975_vm10, %v5571_v20, 0.0 }
 0x788   : > { %5673 = vadd.xlane.f32.xlu0 %v5672_v30  ;;  %5676 = vadd.xlane.f32.xlu1 %v5675_v58 }
 0x78a   : > { %v5573_v32 = vpop.permute.xlu1 %5572  ;;  %v5575_v45 = vpop.permute.xlu0 %5574 }
 0x78b   : > { %v5678_v29 = vsel %vm3975_vm10, %v5573_v32, 0.0  ;;  %v5681_v50 = vsel %vm3975_vm10, %v5575_v45, 0.0 }
 0x78c   : > { %5679 = vadd.xlane.f32.xlu0 %v5678_v29  ;;  %5682 = vadd.xlane.f32.xlu1 %v5681_v50 }
 0x78e   : > { %v5577_v10 = vpop.permute.xlu1 %5576  ;;  %v5579_v60 = vpop.permute.xlu0 %5578 }
 0x78f   : > { %v5684_v61 = vsel %vm3975_vm10, %v5577_v10, 0.0  ;;  %v5687_v9 = vsel %vm3975_vm10, %v5579_v60, 0.0 }
 0x790   : > { %5685 = vadd.xlane.f32.xlu0 %v5684_v61  ;;  %5688 = vadd.xlane.f32.xlu1 %v5687_v9 }
 0x792   : > { %v5581_v40 = vpop.permute.xlu1 %5580  ;;  %v5583_v20 = vpop.permute.xlu0 %5582 }
 0x793   : > { %v5690_v30 = vsel %vm3975_vm10, %v5581_v40, 0.0  ;;  %v5693_v58 = vsel %vm3975_vm10, %v5583_v20, 0.0 }
 0x794   : > { %5691 = vadd.xlane.f32.xlu0 %v5690_v30  ;;  %5694 = vadd.xlane.f32.xlu1 %v5693_v58 }
 0x796   : > { %v5585_v32 = vpop.permute.xlu1 %5584  ;;  %v5587_v45 = vpop.permute.xlu0 %5586 }
 0x797   : > { %v5696_v29 = vsel %vm3975_vm10, %v5585_v32, 0.0  ;;  %v5699_v50 = vsel %vm3975_vm10, %v5587_v45, 0.0 }
 0x798   : > { %5697 = vadd.xlane.f32.xlu0 %v5696_v29  ;;  %5700 = vadd.xlane.f32.xlu1 %v5699_v50 }
 0x79a   : > { %v5589_v10 = vpop.permute.xlu1 %5588  ;;  %v5591_v60 = vpop.permute.xlu0 %5590 }
 0x79b   : > { %v5702_v61 = vsel %vm3975_vm10, %v5589_v10, 0.0  ;;  %v5705_v9 = vsel %vm3975_vm10, %v5591_v60, 0.0 }
 0x79c   : > { %5703 = vadd.xlane.f32.xlu0 %v5702_v61  ;;  %5706 = vadd.xlane.f32.xlu1 %v5705_v9 }
 0x79e   : > { %v5593_v40 = vpop.permute.xlu1 %5592  ;;  %v5595_v20 = vpop.permute.xlu0 %5594 }
 0x79f   : > { %v5708_v30 = vsel %vm3975_vm10, %v5593_v40, 0.0  ;;  %v5711_v58 = vsel %vm3975_vm10, %v5595_v20, 0.0 }
 0x7a0   : > { %5709 = vadd.xlane.f32.xlu0 %v5708_v30  ;;  %5712 = vadd.xlane.f32.xlu1 %v5711_v58 }
 0x7a2   : > { %v5597_v32 = vpop.permute.xlu1 %5596  ;;  %v5599_v45 = vpop.permute.xlu0 %5598 }
 0x7a3   : > { %v5714_v29 = vsel %vm3975_vm10, %v5597_v32, 0.0  ;;  %v5717_v50 = vsel %vm3975_vm10, %v5599_v45, 0.0 }
 0x7a4   : > { %5715 = vadd.xlane.f32.xlu0 %v5714_v29  ;;  %5718 = vadd.xlane.f32.xlu1 %v5717_v50  ;;  %v5489_v29 = vmax.f32 %v14039_v57, 1e-24  ;;  %v5491_v57 = vmax.f32 %v14043_v3, 1e-24  ;;  %v14149_v3 = vld [vmem:[%s14698_s9] ss:$0 sm:$0xff] }
 0x7a6   : > { %v5601_v10 = vpop.permute.xlu1 %5600  ;;  %v5603_v60 = vpop.permute.xlu0 %5602  ;;  %7494 = vrsqrt.f32 %v5489_v29 }
 0x7a7   : > { %v5720_v61 = vsel %vm3975_vm10, %v5601_v10, 0.0  ;;  %v5723_v9 = vsel %vm3975_vm10, %v5603_v60, 0.0 }
 0x7a8   : > { %5721 = vadd.xlane.f32.xlu0 %v5720_v61  ;;  %5724 = vadd.xlane.f32.xlu1 %v5723_v9  ;;  %v5490_v9 = vmax.f32 %v14045_v14, 1e-24  ;;  %v5499_v14 = vmax.f32 %v14061_v17, 1e-24  ;;  %v5503_v17 = vmax.f32 %v14069_v55, 1e-24 }
 0x7aa   : > { %v5605_v40 = vpop.permute.xlu1 %5604  ;;  %v5607_v20 = vpop.permute.xlu0 %5606  ;;  %7496 = vrsqrt.f32 %v5490_v9 }
 0x7ab   : > { %v5726_v30 = vsel %vm3975_vm10, %v5605_v40, 0.0  ;;  %v5729_v58 = vsel %vm3975_vm10, %v5607_v20, 0.0 }
 0x7ac   : > { %5727 = vadd.xlane.f32.xlu0 %v5726_v30  ;;  %5730 = vadd.xlane.f32.xlu1 %v5729_v58  ;;  %v5488_v30 = vmax.f32 %v14035_v21, 1e-24  ;;  %v5497_v58 = vmax.f32 %v14057_v15, 1e-24  ;;  %v5501_v21 = vmax.f32 %v14065_v22, 1e-24 }
 0x7ad   : > { %v5494_v15 = vmax.f32 %v14055_v54, 1e-24 }
 0x7ae   : > { %v5609_v32 = vpop.permute.xlu1 %5608  ;;  %v5611_v45 = vpop.permute.xlu0 %5610  ;;  %7498 = vrsqrt.f32 %v5488_v30 }
 0x7af   : > { %v5732_v50 = vsel %vm3975_vm10, %v5609_v32, 0.0  ;;  %v5735_v10 = vsel %vm3975_vm10, %v5611_v45, 0.0  ;;  %7500 = vrsqrt.f32 %v5491_v57  ;;  %v5492_v32 = vmax.f32 %v14051_v25, 1e-24 }
 0x7b0   : > { %5733 = vadd.xlane.f32.xlu0 %v5732_v50  ;;  %5736 = vadd.xlane.f32.xlu1 %v5735_v10  ;;  %7502 = vrsqrt.f32 %v5497_v58  ;;  %v5493_v45 = vmax.f32 %v14049_v59, 1e-24  ;;  %v5495_v10 = vmax.f32 %v14053_v4, 1e-24  ;;  %v5507_v4 = vmax.f32 %v14077_v16, 1e-24 }
 0x7b1   : > { %7504 = vrsqrt.f32 %v5492_v32  ;;  %v5500_v16 = vmax.f32 %v14067_v56, 1e-24  ;;  %v5513_v56 = vmax.f32 %v14089_v49, 1e-24  ;;  %v5506_v49 = vmax.f32 %v14079_v5, 1e-24 }
 0x7b2   : > { %v5613_v60 = vpop.permute.xlu1 %5612  ;;  %v5615_v61 = vpop.permute.xlu0 %5614  ;;  %7506 = vrsqrt.f32 %v5499_v14  ;;  %v5519_v5 = vmax.f32 %v14101_v0, 1e-24  ;;  %v5512_v0 = vmax.f32 %v14091_v41, 1e-24  ;;  %v5516_v41 = vmax.f32 %v14099_v2, 1e-24 }
 0x7b3   : > { %v5738_v40 = vsel %vm3975_vm10, %v5613_v60, 0.0  ;;  %v5741_v20 = vsel %vm3975_vm10, %v5615_v61, 0.0  ;;  %v7495_v29 = vpop.eup %7494  ;;  %7508 = vrsqrt.f32 %v5493_v45  ;;  %v5505_v61 = vmax.f32 %v14073_v6, 1e-24 }
 0x7b4   : > { %5739 = vadd.xlane.f32.xlu0 %v5738_v40  ;;  %5742 = vadd.xlane.f32.xlu1 %v5741_v20  ;;  %v5816_v25 = vmul.f32 %v7495_v29, %v14149_v3  ;;  %7510 = vrsqrt.f32 %v5501_v21  ;;  %v5496_v40 = vmax.f32 %v14059_v1, 1e-24  ;;  %v5498_v6 = vmax.f32 %v14063_v13, 1e-24 }
 0x7b5   : > { %7512 = vrsqrt.f32 %v5494_v15  ;;  %v5509_v1 = vmax.f32 %v14081_v63, 1e-24  ;;  %v5511_v13 = vmax.f32 %v14085_v35, 1e-24  ;;  %v5502_v63 = vmax.f32 %v14071_v8, 1e-24 }
 0x7b6   : > { %7514 = vrsqrt.f32 %v5503_v17  ;;  %v5504_v35 = vmax.f32 %v14075_v27, 1e-24  ;;  %v5515_v8 = vmax.f32 %v14093_v51, 1e-24  ;;  %v5517_v27 = vmax.f32 %v14097_v23, 1e-24 }
 0x7b7   : > { %v7497_v50 = vpop.eup %7496  ;;  %7516 = vrsqrt.f32 %v5495_v10  ;;  %v5508_v51 = vmax.f32 %v14083_v18, 1e-24  ;;  %v5510_v23 = vmax.f32 %v14087_v37, 1e-24  ;;  %v5514_v37 = vmax.f32 %v14095_v28, 1e-24 }
 0x7b8   : > { %v5817_v22 = vmul.f32 %v7497_v50, %v14149_v3  ;;  %7518 = vrsqrt.f32 %v5505_v61  ;;  %v5518_v28 = vmax.f32 %v14103_v33, 1e-24 }
 0x7b9   : > { %7520 = vrsqrt.f32 %v5496_v40 }
 0x7ba   : > { %7522 = vrsqrt.f32 %v5507_v4 }
 0x7bb   : > { %v7499_v59 = vpop.eup %7498  ;;  %7524 = vrsqrt.f32 %v5498_v6 }
 0x7bc   : > { %v7501_v60 = vpop.eup %7500  ;;  %v5815_v9 = vmul.f32 %v7499_v59, %v14149_v3  ;;  %7526 = vrsqrt.f32 %v5509_v1 }
 0x7bd   : > { %v7503_v54 = vpop.eup %7502  ;;  %v5818_v55 = vmul.f32 %v7501_v60, %v14149_v3  ;;  %7528 = vrsqrt.f32 %v5500_v16 }
 0x7be   : > { %v7505_v20 = vpop.eup %7504  ;;  %v5824_v30 = vmul.f32 %v7503_v54, %v14149_v3  ;;  %7530 = vrsqrt.f32 %v5511_v13 }
 0x7bf   : > { %v7507_v57 = vpop.eup %7506  ;;  %v5819_v58 = vmul.f32 %v7505_v20, %v14149_v3  ;;  %7532 = vrsqrt.f32 %v5502_v63 }
 0x7c0   : > { %v7509_v32 = vpop.eup %7508  ;;  %v5826_v14 = vmul.f32 %v7507_v57, %v14149_v3  ;;  %7534 = vrsqrt.f32 %v5513_v56 }
 0x7c1   : > { %v7511_v45 = vpop.eup %7510  ;;  %v5820_v29 = vmul.f32 %v7509_v32, %v14149_v3  ;;  %7536 = vrsqrt.f32 %v5504_v35 }
 0x7c2   : > { %v7513_v21 = vpop.eup %7512  ;;  %v5828_v15 = vmul.f32 %v7511_v45, %v14149_v3  ;;  %7538 = vrsqrt.f32 %v5515_v8 }
 0x7c3   : > { %v5821_v50 = vmul.f32 %v7513_v21, %v14149_v3  ;;  %7540 = vrsqrt.f32 %v5506_v49 }
 0x7c4   : > { %7542 = vrsqrt.f32 %v5517_v27 }
 0x7c5   : > { %5854 = vperm.xlu1 %7301, %v5816_v25   ;;  %v7515_v25 = vpop.eup %7514  ;;  %7544 = vrsqrt.f32 %v5508_v51 }
 0x7c6   : > { %v7517_v17 = vpop.eup %7516  ;;  %v5830_v59 = vmul.f32 %v7515_v25, %v14149_v3  ;;  %7546 = vrsqrt.f32 %v5519_v5 }
 0x7c7   : > { %v7519_v10 = vpop.eup %7518  ;;  %7548 = vrsqrt.f32 %v5510_v23 }
 0x7c8   : > { %v7521_v60 = vpop.eup %7520  ;;  %v5832_v61 = vmul.f32 %v7519_v10, %v14149_v3  ;;  %7550 = vrsqrt.f32 %v5512_v0 }
 0x7c9   : > { %5859 = vperm.xlu1 %7301, %v5817_v22   ;;  %v5822_v22 = vmul.f32 %v7517_v17, %v14149_v3  ;;  %v5823_v54 = vmul.f32 %v7521_v60, %v14149_v3  ;;  %7552 = vrsqrt.f32 %v5514_v37 }
 0x7ca   : > { %5849 = vperm.xlu0 %7300, %v5815_v9   ;;  %v7523_v9 = vpop.eup %7522  ;;  %7554 = vrsqrt.f32 %v5516_v41 }
 0x7cb   : > { %v7525_v40 = vpop.eup %7524  ;;  %7556 = vrsqrt.f32 %v5518_v28 }
 0x7cc   : > { %v7527_v20 = vpop.eup %7526  ;;  %v5825_v4 = vmul.f32 %v7525_v40, %v14149_v3 }
 0x7cd   : > { %5864 = vperm.xlu1 %7301, %v5818_v55   ;;  %v5834_v55 = vmul.f32 %v7523_v9, %v14149_v3  ;;  %v5836_v57 = vmul.f32 %v7527_v20, %v14149_v3 }
 0x7ce   : > { %5894 = vperm.xlu0 %7300, %v5824_v30   ;;  %v7529_v30 = vpop.eup %7528 }
 0x7cf   : > { %v7531_v6 = vpop.eup %7530 }
 0x7d0   : > { %v7533_v32 = vpop.eup %7532  ;;  %v5838_v18 = vmul.f32 %v7531_v6, %v14149_v3 }
 0x7d1   : > { %5869 = vperm.xlu1 %7301, %v5819_v58   ;;  %v5827_v58 = vmul.f32 %v7529_v30, %v14149_v3  ;;  %v7535_v1 = vpop.eup %7534 }
 0x7d2   : > { %5904 = vperm.xlu0 %7300, %v5826_v14   ;;  %v5829_v14 = vmul.f32 %v7533_v32, %v14149_v3  ;;  %v7537_v45 = vpop.eup %7536  ;;  %v5840_v16 = vmul.f32 %v7535_v1, %v14149_v3 }
 0x7d3   : > { %v5831_v21 = vmul.f32 %v7537_v45, %v14149_v3 }
 0x7d5   : > { %5874 = vperm.xlu1 %7301, %v5820_v29   ;;  %v7539_v29 = vpop.eup %7538 }
 0x7d6   : > { %5914 = vperm.xlu0 %7300, %v5828_v15   ;;  %v7541_v13 = vpop.eup %7540  ;;  %v5842_v15 = vmul.f32 %v7539_v29, %v14149_v3 }
 0x7d7   : > { %v7543_v25 = vpop.eup %7542  ;;  %v5833_v63 = vmul.f32 %v7541_v13, %v14149_v3 }
 0x7d8   : > { %v5844_v17 = vmul.f32 %v7543_v25, %v14149_v3 }
 0x7d9   : > { %5879 = vperm.xlu1 %7301, %v5821_v50   ;;  %v7545_v50 = vpop.eup %7544 }
 0x7da   : > { %5924 = vperm.xlu0 %7300, %v5830_v59   ;;  %v7547_v56 = vpop.eup %7546  ;;  %v5835_v59 = vmul.f32 %v7545_v50, %v14149_v3 }
 0x7db   : > { %v7549_v10 = vpop.eup %7548  ;;  %v5846_v35 = vmul.f32 %v7547_v56, %v14149_v3 }
 0x7dc   : > { %v5837_v2 = vmul.f32 %v7549_v10, %v14149_v3 }
 0x7dd   : > { %5884 = vperm.xlu1 %7301, %v5822_v22   ;;  %v7551_v22 = vpop.eup %7550 }
 0x7de   : > { %5934 = vperm.xlu0 %7300, %v5832_v61   ;;  %v5839_v60 = vmul.f32 %v7551_v22, %v14149_v3  ;;  %v7553_v8 = vpop.eup %7552 }
 0x7df   : > { %v5841_v33 = vmul.f32 %v7553_v8, %v14149_v3  ;;  %v7555_v49 = vpop.eup %7554 }
 0x7e0   : > { %v5843_v27 = vmul.f32 %v7555_v49, %v14149_v3 }
 0x7e1   : > { %5889 = vperm.xlu1 %7301, %v5823_v54  }
 0x7e2   : > { %5944 = vperm.xlu0 %7300, %v5834_v55   ;;  %v7557_v55 = vpop.eup %7556 }
 0x7e5   : > { %5899 = vperm.xlu1 %7301, %v5825_v4   ;;  %v5845_v4 = vmul.f32 %v7557_v55, %v14149_v3 }
 0x7e6   : > { %5954 = vperm.xlu0 %7300, %v5836_v57  }
 0x7e9   : > { %5909 = vperm.xlu1 %7301, %v5827_v58  }
 0x7ea   : > { %5964 = vperm.xlu0 %7300, %v5838_v18  }
 0x7ed   : > { %5919 = vperm.xlu1 %7301, %v5829_v14  }
 0x7ee   : > { %5974 = vperm.xlu0 %7300, %v5840_v16  }
 0x7f1   : > { %5929 = vperm.xlu1 %7301, %v5831_v21  }
 0x7f2   : > { %5984 = vperm.xlu0 %7300, %v5842_v15  }
 0x7f5   : > { %5939 = vperm.xlu1 %7301, %v5833_v63  }
 0x7f6   : > { %5994 = vperm.xlu0 %7300, %v5844_v17  }
 0x7f9   : > { %5949 = vperm.xlu1 %7301, %v5835_v59  }
 0x7fa   : > { %6004 = vperm.xlu0 %7300, %v5846_v35  }
 0x7fd   : > { %5959 = vperm.xlu1 %7301, %v5837_v2  }
 0x801   : > { %v14203_v61 = vpop.xlane.xlu1 %5649  ;;  %5969 = vperm.xlu1 %7301, %v5839_v60   ;;  %v14205_v9 = vpop.xlane.xlu0 %5652 }
 0x805   : > { %v14208_v54 = vpop.xlane.xlu1 %5658  ;;  %5979 = vperm.xlu1 %7301, %v5841_v33   ;;  %v14210_v40 = vpop.xlane.xlu0 %5655 }
 0x809   : > { %v14213_v20 = vpop.xlane.xlu1 %5664  ;;  %5989 = vperm.xlu1 %7301, %v5843_v27   ;;  %v14215_v51 = vpop.xlane.xlu0 %5661 }
 0x80d   : > { %v14218_v30 = vpop.xlane.xlu1 %5670  ;;  %5999 = vperm.xlu1 %7301, %v5845_v4   ;;  %v14220_v5 = vpop.xlane.xlu0 %5667 }
 0x811   : > { %v14222_v57 = vpop.xlane.xlu1 %5676  ;;  %v14224_v6 = vpop.xlane.xlu0 %5673 }
 0x815   : > { %v14226_v23 = vpop.xlane.xlu1 %5682  ;;  %v14228_v58 = vpop.xlane.xlu0 %5679 }
 0x819   : > { %v14230_v32 = vpop.xlane.xlu1 %5688  ;;  %v14232_v18 = vpop.xlane.xlu0 %5685 }
 0x81d   : > { %v14234_v1 = vpop.xlane.xlu1 %5694  ;;  %v14236_v3 = vpop.xlane.xlu0 %5691 }
 0x821   : > { %v14238_v0 = vpop.xlane.xlu1 %5700  ;;  %v14240_v14 = vpop.xlane.xlu0 %5697 }
 0x825   : > { %v14242_v45 = vpop.xlane.xlu1 %5706  ;;  %v14244_v16 = vpop.xlane.xlu0 %5703 }
 0x829   : > { %v14246_v29 = vpop.xlane.xlu1 %5712  ;;  %v14248_v37 = vpop.xlane.xlu0 %5709 }
 0x82d   : > { %v14250_v21 = vpop.xlane.xlu1 %5718  ;;  %v14252_v13 = vpop.xlane.xlu0 %5715 }
 0x831   : > { %v14254_v15 = vpop.xlane.xlu1 %5724  ;;  %v14256_v25 = vpop.xlane.xlu0 %5721 }
 0x835   : > { %v14258_v41 = vpop.xlane.xlu1 %5730  ;;  %v14260_v63 = vpop.xlane.xlu0 %5727 }
 0x836   : > { %16833 = vst [vmem:[#allocation178_spill] sm:$0xff] %v14258_v41  ;;  %16834 = vst [vmem:[#allocation102_spill] sm:$0xff] %v14260_v63 }
 0x839   : > { %v14262_v50 = vpop.xlane.xlu1 %5736  ;;  %v14264_v17 = vpop.xlane.xlu0 %5733 }
 0x83a   : > { %16835 = vst [vmem:[#allocation166_spill] sm:$0xff] %v14262_v50  ;;  %16836 = vst [vmem:[#allocation87_spill] sm:$0xff] %v14264_v17 }
 0x83d   : > { %v14266_v56 = vpop.xlane.xlu1 %5742  ;;  %v14268_v28 = vpop.xlane.xlu0 %5739 }
 0x83e   : > { %16837 = vst [vmem:[#allocation90_spill] sm:$0xff] %v14266_v56  ;;  %16838 = vst [vmem:[#allocation207_spill] sm:$0xff] %v14268_v28 }
 0x841   : > { %v5855_v59 = vpop.permute.xlu1 %5854 }
 0x842   : > { %v6008_v10 = vmul.f32 %v5855_v59, %v16755_v44 }
 0x844   : > { %v7165_v35 = vpack.c.bf16 %v6008_v10, %v6008_v10 }
 0x845   : > { %v5860_v2 = vpop.permute.xlu1 %5859  ;;  %v5850_v22 = vpop.permute.xlu0 %5849 }
 0x846   : > { %v6007_v60 = vmul.f32 %v5850_v22, %v12783_v43  ;;  %6137 = vrot.lane.b32.xlu0 %v7165_v35, %s7686_s13  ;;  %v6009_v8 = vmul.f32 %v5860_v2, %v12805_v26 }
 0x848   : > { %v7164_v33 = vpack.c.bf16 %v6007_v60, %v6007_v60  ;;  %v7166_v4 = vpack.c.bf16 %v6009_v8, %v6009_v8 }
 0x849   : > { %v5865_v49 = vpop.permute.xlu1 %5864  ;;  %v5895_v27 = vpop.permute.xlu0 %5894 }
 0x84a   : > { %v6010_v55 = vmul.f32 %v5865_v49, %v12776_v48  ;;  %6135 = vrot.lane.b32.xlu1 %v7164_v33, %s7686_s13 }
 0x84c   : > { %v7167_v28 = vpack.c.bf16 %v6010_v55, %v6010_v55 }
 0x84d   : > { %v5870_v56 = vpop.permute.xlu1 %5869  ;;  %v5905_v59 = vpop.permute.xlu0 %5904 }
 0x84e   : > { %v6011_v10 = vmul.f32 %v5870_v56, %v12827_v12  ;;  %6141 = vrot.lane.b32.xlu0 %v7167_v28, %s7686_s13  ;;  %6139 = vrot.lane.b32.xlu1 %v7166_v4, %s7686_s13 }
 0x850   : > { %v7168_v35 = vpack.c.bf16 %v6011_v10, %v6011_v10  ;;  %v6016_v10 = vmul.f32 %v5895_v27, %v12848_v38 }
 0x851   : > { %v5875_v22 = vpop.permute.xlu1 %5874  ;;  %v5915_v2 = vpop.permute.xlu0 %5914 }
 0x852   : > { %v6012_v60 = vmul.f32 %v5875_v22, %v12802_v47  ;;  %6143 = vrot.lane.b32.xlu1 %v7168_v35, %s7686_s13  ;;  %v6020_v27 = vmul.f32 %v5915_v2, %v12894_v11 }
 0x854   : > { %v7169_v49 = vpack.c.bf16 %v6012_v60, %v6012_v60  ;;  %v7173_v60 = vpack.c.bf16 %v6016_v10, %v6016_v10 }
 0x855   : > { %v5880_v17 = vpop.permute.xlu1 %5879  ;;  %v5925_v33 = vpop.permute.xlu0 %5924 }
 0x856   : > { %v6013_v8 = vmul.f32 %v5880_v17, %v12857_v24  ;;  %6145 = vrot.lane.b32.xlu0 %v7169_v49, %s7686_s13  ;;  %v6018_v17 = vmul.f32 %v5905_v59, %v12873_v62  ;;  %v7177_v59 = vpack.c.bf16 %v6020_v27, %v6020_v27  ;;  %v6022_v10 = vmul.f32 %v5925_v33, %v12915_v19 }
 0x858   : > { %v7170_v55 = vpack.c.bf16 %v6013_v8, %v6013_v8 }
 0x859   : > { %v5885_v56 = vpop.permute.xlu1 %5884  ;;  %v5935_v4 = vpop.permute.xlu0 %5934 }
 0x85a   : > { %v6014_v28 = vmul.f32 %v5885_v56, %v12820_v53  ;;  %6147 = vrot.lane.b32.xlu1 %v7170_v55, %s7686_s13  ;;  %v7175_v55 = vpack.c.bf16 %v6018_v17, %v6018_v17  ;;  %v6024_v2 = vmul.f32 %v5935_v4, %v12942_v7 }
 0x85c   : > { %v7171_v50 = vpack.c.bf16 %v6014_v28, %v6014_v28  ;;  %v7181_v33 = vpack.c.bf16 %v6024_v2, %v6024_v2 }
 0x85d   : > { %v5890_v22 = vpop.permute.xlu1 %5889  ;;  %v5945_v49 = vpop.permute.xlu0 %5944 }
 0x85e   : > { %v6015_v35 = vmul.f32 %v5890_v22, %v12884_v42  ;;  %6149 = vrot.lane.b32.xlu0 %v7171_v50, %s7686_s13  ;;  %v6026_v27 = vmul.f32 %v5945_v49, %v12957_v31  ;;  %v5745_v49 = vmax.f32 %v14205_v9, 1e-24  ;;  %v16843_v9 = vld [vmem:[#allocation194_spill] sm:$0xff] }
 0x860   : > { %v7172_v63 = vpack.c.bf16 %v6015_v35, %v6015_v35 }
 0x861   : > { %v5900_v8 = vpop.permute.xlu1 %5899  ;;  %v5955_v50 = vpop.permute.xlu0 %5954 }
 0x862   : > { %v6017_v41 = vmul.f32 %v5900_v8, %v12905_v36  ;;  %6151 = vrot.lane.b32.xlu1 %v7172_v63, %s7686_s13  ;;  %6153 = vrot.lane.b32.xlu0 %v7173_v60, %s7686_s13 }
 0x864   : > { %v7174_v56 = vpack.c.bf16 %v6017_v41, %v6017_v41  ;;  %v7179_v41 = vpack.c.bf16 %v6022_v10, %v6022_v10  ;;  %v16839_v10 = vld [vmem:[#allocation40_spill] sm:$0xff] }
 0x865   : > { %v5910_v28 = vpop.permute.xlu1 %5909  ;;  %v5965_v17 = vpop.permute.xlu0 %5964 }
 0x866   : > { %v6019_v22 = vmul.f32 %v5910_v28, %v12922_v46  ;;  %6155 = vrot.lane.b32.xlu1 %v7174_v56, %s7686_s13  ;;  %6157 = vrot.lane.b32.xlu0 %v7175_v55, %s7686_s13 }
 0x868   : > { %v7176_v35 = vpack.c.bf16 %v6019_v22, %v6019_v22 }
 0x869   : > { %v5920_v8 = vpop.permute.xlu1 %5919  ;;  %v5975_v4 = vpop.permute.xlu0 %5974 }
 0x86a   : > { %v6021_v63 = vmul.f32 %v5920_v8, %v12945_v52  ;;  %6159 = vrot.lane.b32.xlu1 %v7176_v35, %s7686_s13  ;;  %6161 = vrot.lane.b32.xlu0 %v7177_v59, %s7686_s13  ;;  %v7183_v59 = vpack.c.bf16 %v6026_v27, %v6026_v27  ;;  %v6028_v8 = vmul.f32 %v5955_v50, %v16839_v10  ;;  %v5747_v50 = vmax.f32 %v14208_v54, 1e-24 }
 0x86b   : > { %v5749_v54 = vmax.f32 %v14213_v20, 1e-24 }
 0x86c   : > { %v7178_v60 = vpack.c.bf16 %v6021_v63, %v6021_v63 }
 0x86d   : > { %v5930_v56 = vpop.permute.xlu1 %5929 }
 0x86e   : > { %v6023_v55 = vmul.f32 %v5930_v56, %v12962_v39  ;;  %6163 = vrot.lane.b32.xlu1 %v7178_v60, %s7686_s13  ;;  %6165 = vrot.lane.b32.xlu0 %v7179_v41, %s7686_s13  ;;  %v5744_v60 = vmax.f32 %v14203_v61, 1e-24  ;;  %v16840_v41 = vld [vmem:[#allocation16_spill] sm:$0xff]  ;;  %v5746_v61 = vmax.f32 %v14210_v40, 1e-24  ;;  %v16845_v40 = vld [vmem:[#allocation26_spill] sm:$0xff] }
 0x870   : > { %v7180_v28 = vpack.c.bf16 %v6023_v55, %v6023_v55  ;;  %v7185_v55 = vpack.c.bf16 %v6028_v8, %v6028_v8  ;;  %7558 = vrsqrt.f32 %v5744_v60  ;;  %v6032_v8 = vmul.f32 %v5975_v4, %v16843_v9 }
 0x871   : > { %v5940_v22 = vpop.permute.xlu1 %5939  ;;  %7560 = vrsqrt.f32 %v5745_v49  ;;  %v5748_v49 = vmax.f32 %v14215_v51, 1e-24 }
 0x872   : > { %v6025_v35 = vmul.f32 %v5940_v22, %v16756_v34  ;;  %6167 = vrot.lane.b32.xlu1 %v7180_v28, %s7686_s13  ;;  %6169 = vrot.lane.b32.xlu0 %v7181_v33, %s7686_s13  ;;  %v16841_v28 = vld [vmem:[#allocation39_spill] sm:$0xff]  ;;  %v5985_v34 = vpop.permute.xlu0 %5984  ;;  %7562 = vrsqrt.f32 %v5747_v50 }
 0x873   : > { %v6030_v22 = vmul.f32 %v5965_v17, %v16841_v28  ;;  %7564 = vrsqrt.f32 %v5746_v61  ;;  %v5750_v61 = vmax.f32 %v14220_v5, 1e-24  ;;  %v5752_v5 = vmax.f32 %v14224_v6, 1e-24 }
 0x874   : > { %v7182_v63 = vpack.c.bf16 %v6025_v35, %v6025_v35  ;;  %v16842_v35 = vld [vmem:[#allocation27_spill] sm:$0xff]  ;;  %7566 = vrsqrt.f32 %v5749_v54  ;;  %v5753_v54 = vmax.f32 %v14222_v57, 1e-24 }
 0x875   : > { %v5950_v56 = vpop.permute.xlu1 %5949  ;;  %7568 = vrsqrt.f32 %v5748_v49 }
 0x876   : > { %v6027_v2 = vmul.f32 %v5950_v56, %v16840_v41  ;;  %6171 = vrot.lane.b32.xlu1 %v7182_v63, %s7686_s13  ;;  %6173 = vrot.lane.b32.xlu0 %v7183_v59, %s7686_s13  ;;  %v7187_v59 = vpack.c.bf16 %v6030_v22, %v6030_v22  ;;  %v16844_v56 = vld [vmem:[#allocation89_spill] sm:$0xff]  ;;  %v5995_v60 = vpop.permute.xlu0 %5994  ;;  %v6034_v22 = vmul.f32 %v5985_v34, %v16845_v40 }
 0x878   : > { %v7184_v33 = vpack.c.bf16 %v6027_v2, %v6027_v2  ;;  %v7191_v20 = vpack.c.bf16 %v6034_v22, %v6034_v22  ;;  %v16849_v22 = vld [vmem:[#allocation72_spill] sm:$0xff] }
 0x879   : > { %v5960_v27 = vpop.permute.xlu1 %5959 }
 0x87a   : > { %v6029_v10 = vmul.f32 %v5960_v27, %v16842_v35  ;;  %6175 = vrot.lane.b32.xlu1 %v7184_v33, %s7686_s13  ;;  %6177 = vrot.lane.b32.xlu0 %v7185_v55, %s7686_s13  ;;  %v7189_v55 = vpack.c.bf16 %v6032_v8, %v6032_v8  ;;  %v16846_v27 = vld [vmem:[#allocation120_spill] sm:$0xff] }
 0x87c   : > { %v7186_v63 = vpack.c.bf16 %v6029_v10, %v6029_v10  ;;  %v5751_v10 = vmax.f32 %v14218_v30, 1e-24 }
 0x87d   : > { %v5970_v17 = vpop.permute.xlu1 %5969  ;;  %v7559_v30 = vpop.eup %7558 }
 0x87e   : > { %v6031_v2 = vmul.f32 %v5970_v17, %v16844_v56  ;;  %6179 = vrot.lane.b32.xlu1 %v7186_v63, %s7686_s13  ;;  %6181 = vrot.lane.b32.xlu0 %v7187_v59, %s7686_s13  ;;  %v16847_v59 = vld [vmem:[#allocation175_spill] sm:$0xff]  ;;  %v6005_v63 = vpop.permute.xlu0 %6004  ;;  %7570 = vrsqrt.f32 %v5751_v10  ;;  %v16848_v17 = vld [vmem:[#allocation14_spill] sm:$0xff]  ;;  %v6264_v57 = vmul.f32 %v7559_v30, %v12783_v43  ;;  %v5756_v43 = vmax.f32 %v14232_v18, 1e-24 }
 0x87f   : > { %v6036_v51 = vmul.f32 %v5995_v60, %v16847_v59  ;;  %7572 = vrsqrt.f32 %v5750_v61  ;;  %v6038_v60 = vmul.f32 %v6005_v63, %v16849_v22  ;;  %v5755_v61 = vmax.f32 %v14226_v23, 1e-24 }
 0x880   : > { %v7188_v33 = vpack.c.bf16 %v6031_v2, %v6031_v2  ;;  %7574 = vrsqrt.f32 %v5753_v54  ;;  %v7196_v54 = vpack.c.bf16 %v6264_v57, %v6264_v57 }
 0x881   : > { %v5980_v4 = vpop.permute.xlu1 %5979  ;;  %v7193_v49 = vpack.c.bf16 %v6036_v51, %v6036_v51  ;;  %7576 = vrsqrt.f32 %v5752_v5  ;;  %v5754_v51 = vmax.f32 %v14228_v58, 1e-24  ;;  %v7195_v63 = vpack.c.bf16 %v6038_v60, %v6038_v60 }
 0x882   : > { %v6033_v50 = vmul.f32 %v5980_v4, %v16846_v27  ;;  %6183 = vrot.lane.b32.xlu1 %v7188_v33, %s7686_s13  ;;  %6185 = vrot.lane.b32.xlu0 %v7189_v55, %s7686_s13  ;;  %v7561_v55 = vpop.eup %7560  ;;  %7578 = vrsqrt.f32 %v5755_v61  ;;  %v5759_v5 = vmax.f32 %v14234_v1, 1e-24 }
 0x883   : > { %7580 = vrsqrt.f32 %v5754_v51 }
 0x884   : > { %v7190_v8 = vpack.c.bf16 %v6033_v50, %v6033_v50  ;;  %v16850_v50 = vld [vmem:[#allocation150_spill] sm:$0xff] }
 0x885   : > { %v5990_v34 = vpop.permute.xlu1 %5989 }
 0x886   : > { %v6035_v2 = vmul.f32 %v5990_v34, %v16848_v17  ;;  %6187 = vrot.lane.b32.xlu1 %v7190_v8, %s7686_s13  ;;  %6189 = vrot.lane.b32.xlu0 %v7191_v20, %s7686_s13  ;;  %v7563_v8 = vpop.eup %7562  ;;  %v6265_v20 = vmul.f32 %v7561_v55, %v16755_v44 }
 0x887   : > { %v7565_v6 = vpop.eup %7564  ;;  %v6267_v23 = vmul.f32 %v7563_v8, %v12776_v48 }
 0x888   : > { %v7192_v33 = vpack.c.bf16 %v6035_v2, %v6035_v2  ;;  %v5757_v2 = vmax.f32 %v14230_v32, 1e-24  ;;  %v7197_v44 = vpack.c.bf16 %v6265_v20, %v6265_v20  ;;  %v6266_v30 = vmul.f32 %v7565_v6, %v12805_v26 }
 0x889   : > { %v6000_v4 = vpop.permute.xlu1 %5999  ;;  %v7199_v32 = vpack.c.bf16 %v6267_v23, %v6267_v23  ;;  %v5761_v26 = vmax.f32 %v14238_v0, 1e-24 }
 0x88a   : > { %v6037_v10 = vmul.f32 %v6000_v4, %v16850_v50  ;;  %6191 = vrot.lane.b32.xlu1 %v7192_v33, %s7686_s13  ;;  %6193 = vrot.lane.b32.xlu0 %v7193_v49, %s7686_s13  ;;  %v7567_v49 = vpop.eup %7566  ;;  %7582 = vrsqrt.f32 %v5757_v2  ;;  %v5758_v33 = vmax.f32 %v14236_v3, 1e-24  ;;  %v7198_v18 = vpack.c.bf16 %v6266_v30, %v6266_v30 }
 0x88b   : > { %v7569_v58 = vpop.eup %7568  ;;  %v6269_v60 = vmul.f32 %v7567_v49, %v12802_v47  ;;  %7584 = vrsqrt.f32 %v5756_v43  ;;  %v5760_v47 = vmax.f32 %v14240_v14, 1e-24 }
 0x88c   : > { %v7194_v34 = vpack.c.bf16 %v6037_v10, %v6037_v10  ;;  %v7571_v55 = vpop.eup %7570  ;;  %v6268_v4 = vmul.f32 %v7569_v58, %v12827_v12  ;;  %7586 = vrsqrt.f32 %v5759_v5  ;;  %v5763_v12 = vmax.f32 %v14242_v45, 1e-24 }
 0x88d   : > { %v7573_v48 = vpop.eup %7572  ;;  %v7201_v10 = vpack.c.bf16 %v6269_v60, %v6269_v60  ;;  %v6271_v1 = vmul.f32 %v7571_v55, %v12820_v53  ;;  %7588 = vrsqrt.f32 %v5758_v33  ;;  %v5762_v53 = vmax.f32 %v14244_v16, 1e-24 }
 0x88e   : > { %6195 = vrot.lane.b32.xlu1 %v7194_v34, %s7686_s13  ;;  %6197 = vrot.lane.b32.xlu0 %v7195_v63, %s7686_s13  ;;  %v7575_v8 = vpop.eup %7574  ;;  %v7200_v61 = vpack.c.bf16 %v6268_v4, %v6268_v4  ;;  %v6270_v3 = vmul.f32 %v7573_v48, %v12857_v24  ;;  %7590 = vrsqrt.f32 %v5761_v26  ;;  %v5765_v24 = vmax.f32 %v14246_v29, 1e-24 }
 0x88f   : > { %v7577_v57 = vpop.eup %7576  ;;  %v7203_v20 = vpack.c.bf16 %v6271_v1, %v6271_v1  ;;  %v6273_v0 = vmul.f32 %v7575_v8, %v12848_v38  ;;  %7592 = vrsqrt.f32 %v5760_v47  ;;  %v5764_v38 = vmax.f32 %v14248_v37, 1e-24 }
 0x890   : > { %v7579_v6 = vpop.eup %7578  ;;  %v7202_v51 = vpack.c.bf16 %v6270_v3, %v6270_v3  ;;  %v6272_v14 = vmul.f32 %v7577_v57, %v12884_v42  ;;  %7594 = vrsqrt.f32 %v5763_v12  ;;  %v5767_v42 = vmax.f32 %v14250_v21, 1e-24  ;;  %v16855_v57 = vld [vmem:[#allocation129_spill] sm:$0xff] }
 0x891   : > { %v7581_v63 = vpop.eup %7580  ;;  %v7205_v34 = vpack.c.bf16 %v6273_v0, %v6273_v0  ;;  %v6275_v45 = vmul.f32 %v7579_v6, %v12873_v62  ;;  %7596 = vrsqrt.f32 %v5762_v53  ;;  %v5766_v62 = vmax.f32 %v14252_v13, 1e-24  ;;  %v16857_v53 = vld [vmem:[#allocation40_spill] sm:$0xff] }
 0x892   : > { %6392 = vrot.lane.b32.xlu1 %v7196_v54, %s7687_s23  ;;  %6394 = vrot.lane.b32.xlu0 %v7197_v44, %s7687_s23  ;;  %v7204_v54 = vpack.c.bf16 %v6272_v14, %v6272_v14  ;;  %v6274_v16 = vmul.f32 %v7581_v63, %v12905_v36  ;;  %7598 = vrsqrt.f32 %v5765_v24  ;;  %v5769_v36 = vmax.f32 %v14254_v15, 1e-24 }
 0x893   : > { %v7207_v49 = vpack.c.bf16 %v6275_v45, %v6275_v45  ;;  %7600 = vrsqrt.f32 %v5764_v38 }
 0x894   : > { %v7206_v44 = vpack.c.bf16 %v6274_v16, %v6274_v16  ;;  %7602 = vrsqrt.f32 %v5767_v42 }
 0x895   : > { %7604 = vrsqrt.f32 %v5766_v62 }
 0x896   : > { %6396 = vrot.lane.b32.xlu1 %v7198_v18, %s7687_s23  ;;  %6398 = vrot.lane.b32.xlu0 %v7199_v32, %s7687_s23  ;;  %7606 = vrsqrt.f32 %v5769_v36 }
 0x897   : > { %v7583_v2 = vpop.eup %7582 }
 0x898   : > { %v7585_v23 = vpop.eup %7584  ;;  %v6277_v29 = vmul.f32 %v7583_v2, %v12894_v11  ;;  %v5768_v11 = vmax.f32 %v14256_v25, 1e-24 }
 0x899   : > { %v7587_v43 = vpop.eup %7586  ;;  %v6276_v37 = vmul.f32 %v7585_v23, %v12922_v46  ;;  %v16851_v46 = vld [vmem:[#allocation178_spill] sm:$0xff] }
 0x89a   : > { %6400 = vrot.lane.b32.xlu1 %v7200_v61, %s7687_s23  ;;  %6402 = vrot.lane.b32.xlu0 %v7201_v10, %s7687_s23  ;;  %v7589_v30 = vpop.eup %7588  ;;  %v7209_v58 = vpack.c.bf16 %v6277_v29, %v6277_v29  ;;  %v6279_v21 = vmul.f32 %v7587_v43, %v12915_v19  ;;  %v5771_v60 = vmax.f32 %v16851_v46, 1e-24  ;;  %7608 = vrsqrt.f32 %v5768_v11  ;;  %v16852_v19 = vld [vmem:[#allocation102_spill] sm:$0xff] }
 0x89b   : > { %v7591_v55 = vpop.eup %7590  ;;  %v7208_v5 = vpack.c.bf16 %v6276_v37, %v6276_v37  ;;  %v6278_v13 = vmul.f32 %v7589_v30, %v12945_v52  ;;  %v5770_v18 = vmax.f32 %v16852_v19, 1e-24  ;;  %v16853_v52 = vld [vmem:[#allocation166_spill] sm:$0xff] }
 0x89c   : > { %v7593_v32 = vpop.eup %7592  ;;  %v7211_v48 = vpack.c.bf16 %v6279_v21, %v6279_v21  ;;  %v6281_v15 = vmul.f32 %v7591_v55, %v12942_v7  ;;  %7610 = vrsqrt.f32 %v5771_v60  ;;  %v5773_v10 = vmax.f32 %v16853_v52, 1e-24  ;;  %v16854_v7 = vld [vmem:[#allocation87_spill] sm:$0xff] }
 0x89d   : > { %v7595_v33 = vpop.eup %7594  ;;  %v7210_v4 = vpack.c.bf16 %v6278_v13, %v6278_v13  ;;  %v6280_v25 = vmul.f32 %v7593_v32, %v12962_v39  ;;  %7612 = vrsqrt.f32 %v5770_v18  ;;  %v5772_v61 = vmax.f32 %v16854_v7, 1e-24  ;;  %v16856_v39 = vld [vmem:[#allocation90_spill] sm:$0xff]  ;;  %v16861_v52 = vld [vmem:[#allocation31_spill] sm:$0xff] }
 0x89e   : > { %6404 = vrot.lane.b32.xlu1 %v7202_v51, %s7687_s23  ;;  %6406 = vrot.lane.b32.xlu0 %v7203_v20, %s7687_s23  ;;  %v7597_v26 = vpop.eup %7596  ;;  %v7213_v1 = vpack.c.bf16 %v6281_v15, %v6281_v15  ;;  %v6283_v8 = vmul.f32 %v7595_v33, %v12957_v31  ;;  %7614 = vrsqrt.f32 %v5773_v10  ;;  %v5775_v0 = vmax.f32 %v16856_v39, 1e-24  ;;  %v16858_v31 = vld [vmem:[#allocation207_spill] sm:$0xff]  ;;  %v16862_v10 = vld [vmem:[#allocation154_spill] sm:$0xff] }
 0x89f   : > { %v7599_v47 = vpop.eup %7598  ;;  %v7212_v3 = vpack.c.bf16 %v6280_v25, %v6280_v25  ;;  %v6282_v12 = vmul.f32 %v7597_v26, %v16855_v57  ;;  %7616 = vrsqrt.f32 %v5772_v61  ;;  %v5774_v63 = vmax.f32 %v16858_v31, 1e-24  ;;  %v16864_v7 = vld [vmem:[#allocation206_spill] sm:$0xff]  ;;  %v16865_v57 = vld [vmem:[#allocation108_spill] sm:$0xff] }
 0x8a0   : > { %v7601_v20 = vpop.eup %7600  ;;  %v7215_v6 = vpack.c.bf16 %v6283_v8, %v6283_v8  ;;  %v6285_v51 = vmul.f32 %v7599_v47, %v16857_v53  ;;  %7618 = vrsqrt.f32 %v5775_v0  ;;  %v16863_v47 = vld [vmem:[#allocation168_spill] sm:$0xff]  ;;  %v16867_v0 = vld [vmem:[#allocation138_spill] sm:$0xff] }
 0x8a1   : > { %v7603_v14 = vpop.eup %7602  ;;  %v7214_v24 = vpack.c.bf16 %v6282_v12, %v6282_v12  ;;  %7620 = vrsqrt.f32 %v5774_v63  ;;  %v16866_v12 = vld [vmem:[#allocation78_spill] sm:$0xff]  ;;  %v16870_v31 = vld [vmem:[#allocation100_spill] sm:$0xff] }
 0x8a2   : > { %6408 = vrot.lane.b32.xlu1 %v7204_v54, %s7687_s23  ;;  %6410 = vrot.lane.b32.xlu0 %v7205_v34, %s7687_s23  ;;  %v6284_v34 = vmul.f32 %v7601_v20, %v16840_v41  ;;  %v7605_v45 = vpop.eup %7604  ;;  %v7217_v2 = vpack.c.bf16 %v6285_v51, %v6285_v51  ;;  %v6287_v42 = vmul.f32 %v7603_v14, %v16841_v28  ;;  %v16869_v14 = vld [vmem:[#allocation171_spill] sm:$0xff] }
 0x8a3   : > { %v7607_v38 = vpop.eup %7606  ;;  %v6286_v23 = vmul.f32 %v7605_v45, %v16842_v35  ;;  %v16872_v45 = vld [vmem:[#allocation74_spill] sm:$0xff] }
 0x8a4   : > { %v7216_v16 = vpack.c.bf16 %v6284_v34, %v6284_v34  ;;  %v7219_v62 = vpack.c.bf16 %v6287_v42, %v6287_v42  ;;  %v6289_v37 = vmul.f32 %v7607_v38, %v16843_v9  ;;  %v16871_v34 = vld [vmem:[#allocation159_spill] sm:$0xff] }
 0x8a5   : > { %v7218_v43 = vpack.c.bf16 %v6286_v23, %v6286_v23 }
 0x8a6   : > { %6412 = vrot.lane.b32.xlu1 %v7206_v44, %s7687_s23  ;;  %6414 = vrot.lane.b32.xlu0 %v7207_v49, %s7687_s23  ;;  %v7221_v21 = vpack.c.bf16 %v6289_v37, %v6289_v37 }
 0x8a7   : > { %v7609_v49 = vpop.eup %7608 }
 0x8a8   : > { %v6288_v44 = vmul.f32 %v7609_v49, %v16844_v56  ;;  %v16875_v49 = vld [vmem:[#allocation57_spill] sm:$0xff] }
 0x8a9   : > { %v7611_v41 = vpop.eup %7610 }
 0x8aa   : > { %6416 = vrot.lane.b32.xlu1 %v7208_v5, %s7687_s23  ;;  %6418 = vrot.lane.b32.xlu0 %v7209_v58, %s7687_s23  ;;  %v7613_v35 = vpop.eup %7612  ;;  %v7220_v58 = vpack.c.bf16 %v6288_v44, %v6288_v44  ;;  %v6291_v11 = vmul.f32 %v7611_v41, %v16845_v40  ;;  %v16876_v41 = vld [vmem:[#allocation44_spill] sm:$0xff]  ;;  %v16878_v44 = vld [vmem:[#allocation77_spill] sm:$0xff] }
 0x8ab   : > { %v7615_v28 = vpop.eup %7614  ;;  %v6290_v55 = vmul.f32 %v7613_v35, %v16846_v27 }
 0x8ac   : > { %v7617_v56 = vpop.eup %7616  ;;  %v7223_v32 = vpack.c.bf16 %v6291_v11, %v6291_v11  ;;  %v6293_v27 = vmul.f32 %v7615_v28, %v16847_v59  ;;  %v16879_v28 = vld [vmem:[#allocation131_spill] sm:$0xff] }
 0x8ad   : > { %v7619_v9 = vpop.eup %7618  ;;  %v7222_v13 = vpack.c.bf16 %v6290_v55, %v6290_v55  ;;  %v6292_v46 = vmul.f32 %v7617_v56, %v16848_v17  ;;  %v16882_v55 = vld [vmem:[#allocation149_spill] sm:$0xff] }
 0x8ae   : > { %6420 = vrot.lane.b32.xlu1 %v7210_v4, %s7687_s23  ;;  %6422 = vrot.lane.b32.xlu0 %v7211_v48, %s7687_s23  ;;  %v7621_v40 = vpop.eup %7620  ;;  %v7225_v15 = vpack.c.bf16 %v6293_v27, %v6293_v27  ;;  %v6295_v19 = vmul.f32 %v7619_v9, %v16849_v22  ;;  %v16860_v4 = vld [vmem:[#allocation183_spill] sm:$0xff]  ;;  %v16883_v9 = vld [vmem:[#allocation182_spill] sm:$0xff] }
 0x8af   : > { %v7224_v48 = vpack.c.bf16 %v6292_v46, %v6292_v46  ;;  %v6294_v33 = vmul.f32 %v7621_v40, %v16850_v50  ;;  %v16859_v50 = vld [vmem:[#allocation95_spill] sm:$0xff] }
 0x8b0   : > { %v7227_v18 = vpack.c.bf16 %v6295_v19, %v6295_v19  ;;  %v16885_v46 = vld [vmem:[#allocation47_spill] sm:$0xff] }
 0x8b1   : > { %v7226_v17 = vpack.c.bf16 %v6294_v33, %v6294_v33  ;;  %v16886_v27 = vld [vmem:[#allocation79_spill] sm:$0xff] }
 0x8b2   : > { %6424 = vrot.lane.b32.xlu1 %v7212_v3, %s7687_s23  ;;  %6426 = vrot.lane.b32.xlu0 %v7213_v1, %s7687_s23 }
 0x8b6   : > { %6428 = vrot.lane.b32.xlu1 %v7214_v24, %s7687_s23  ;;  %6430 = vrot.lane.b32.xlu0 %v7215_v6, %s7687_s23  ;;  %v16868_v6 = vld [vmem:[#allocation75_spill] sm:$0xff] }
 0x8b8   : > { %v6138_v54 = vpop.permute.xlu0 %6137 }
 0x8b9   : > { %6935 = vst.msk [vmem:[%s13402_s26 + $0x84] sm:$0xf] %vm4783_vm15, %v6138_v54  ;;  %v16873_v54 = vld [vmem:[#allocation126_spill] sm:$0xff] }
 0x8ba   : > { %6432 = vrot.lane.b32.xlu1 %v7216_v16, %s7687_s23  ;;  %6434 = vrot.lane.b32.xlu0 %v7217_v2, %s7687_s23  ;;  %v16874_v16 = vld [vmem:[#allocation84_spill] sm:$0xff] }
 0x8bc   : > { %v6136_v29 = vpop.permute.xlu1 %6135 }
 0x8bd   : > { %6934 = vst.msk [vmem:[%s13402_s26 + $0x80] sm:$0xf] %vm4783_vm15, %v6136_v29 }
 0x8be   : > { %6436 = vrot.lane.b32.xlu1 %v7218_v43, %s7687_s23  ;;  %6438 = vrot.lane.b32.xlu0 %v7219_v62, %s7687_s23  ;;  %v16877_v62 = vld [vmem:[#allocation209_spill] sm:$0xff] }
 0x8c0   : > { %v6140_v30 = vpop.permute.xlu1 %6139  ;;  %v6142_v36 = vpop.permute.xlu0 %6141 }
 0x8c1   : > { %6936 = vst.msk [vmem:[%s13402_s26 + $0x88] sm:$0xf] %vm4783_vm15, %v6140_v30  ;;  %6937 = vst.msk [vmem:[%s13402_s26 + $0x8c] sm:$0xf] %vm4783_vm15, %v6142_v36  ;;  %v16880_v30 = vld [vmem:[#allocation60_spill] sm:$0xff] }
 0x8c2   : > { %6440 = vrot.lane.b32.xlu1 %v7220_v58, %s7687_s23  ;;  %6442 = vrot.lane.b32.xlu0 %v7221_v21, %s7687_s23  ;;  %v16881_v21 = vld [vmem:[#allocation127_spill] sm:$0xff] }
 0x8c4   : > { %v6144_v5 = vpop.permute.xlu1 %6143 }
 0x8c5   : > { %6938 = vst.msk [vmem:[%s13402_s26 + $0x90] sm:$0xf] %vm4783_vm15, %v6144_v5  ;;  %v16884_v5 = vld [vmem:[#allocation208_spill] sm:$0xff] }
 0x8c6   : > { %6444 = vrot.lane.b32.xlu1 %v7222_v13, %s7687_s23  ;;  %6446 = vrot.lane.b32.xlu0 %v7223_v32, %s7687_s23 }
 0x8c8   : > { %v6146_v60 = vpop.permute.xlu0 %6145 }
 0x8c9   : > { %6939 = vst.msk [vmem:[%s13402_s26 + $0x94] sm:$0xf] %vm4783_vm15, %v6146_v60 }
 0x8ca   : > { %6448 = vrot.lane.b32.xlu1 %v7224_v48, %s7687_s23  ;;  %6450 = vrot.lane.b32.xlu0 %v7225_v15, %s7687_s23  ;;  %v16887_v48 = vld [vmem:[#allocation80_spill] sm:$0xff]  ;;  %v16888_v15 = vld [vmem:[#allocation65_spill] sm:$0xff] }
 0x8cc   : > { %v6148_v59 = vpop.permute.xlu1 %6147 }
 0x8cd   : > { %6940 = vst.msk [vmem:[%s13402_s26 + $0x98] sm:$0xf] %vm4783_vm15, %v6148_v59  ;;  %v16889_v59 = vld [vmem:[#allocation33_spill] sm:$0xff] }
 0x8ce   : > { %6452 = vrot.lane.b32.xlu1 %v7226_v17, %s7687_s23  ;;  %6454 = vrot.lane.b32.xlu0 %v7227_v18, %s7687_s23  ;;  %v16890_v17 = vld [vmem:[#allocation2_spill] sm:$0xff] }
 0x8d0   : > { %v6150_v22 = vpop.permute.xlu0 %6149 }
 0x8d1   : > { %6941 = vst.msk [vmem:[%s13402_s26 + $0x9c] sm:$0xf] %vm4783_vm15, %v6150_v22 }
 0x8d2   : > { %6521 = vrot.lane.b32.xlu1 %v16859_v50, %s7689_s19  ;;  %6523 = vrot.lane.b32.xlu0 %v16860_v4, %s7689_s19 }
 0x8d4   : > { %v6152_v25 = vpop.permute.xlu1 %6151  ;;  %v6154_v26 = vpop.permute.xlu0 %6153 }
 0x8d5   : > { %6942 = vst.msk [vmem:[%s13402_s26 + $0xa0] sm:$0xf] %vm4783_vm15, %v6152_v25  ;;  %6943 = vst.msk [vmem:[%s13402_s26 + $0xa4] sm:$0xf] %vm4783_vm15, %v6154_v26 }
 0x8d6   : > { %6525 = vrot.lane.b32.xlu1 %v16861_v52, %s7689_s19  ;;  %6527 = vrot.lane.b32.xlu0 %v16862_v10, %s7689_s19 }
 0x8d8   : > { %v6156_v1 = vpop.permute.xlu1 %6155  ;;  %v6158_v8 = vpop.permute.xlu0 %6157 }
 0x8d9   : > { %6944 = vst.msk [vmem:[%s13402_s26 + $0xa8] sm:$0xf] %vm4783_vm15, %v6156_v1  ;;  %6945 = vst.msk [vmem:[%s13402_s26 + $0xac] sm:$0xf] %vm4783_vm15, %v6158_v8 }
 0x8da   : > { %6529 = vrot.lane.b32.xlu1 %v16863_v47, %s7689_s19  ;;  %6531 = vrot.lane.b32.xlu0 %v16864_v7, %s7689_s19 }
 0x8dc   : > { %v6160_v61 = vpop.permute.xlu1 %6159  ;;  %v6162_v3 = vpop.permute.xlu0 %6161 }
 0x8dd   : > { %6946 = vst.msk [vmem:[%s13402_s26 + $0xb0] sm:$0xf] %vm4783_vm15, %v6160_v61  ;;  %6947 = vst.msk [vmem:[%s13402_s26 + $0xb4] sm:$0xf] %vm4783_vm15, %v6162_v3 }
 0x8de   : > { %6533 = vrot.lane.b32.xlu1 %v16865_v57, %s7689_s19  ;;  %6535 = vrot.lane.b32.xlu0 %v16866_v12, %s7689_s19 }
 0x8e0   : > { %v6164_v20 = vpop.permute.xlu1 %6163  ;;  %v6166_v39 = vpop.permute.xlu0 %6165 }
 0x8e1   : > { %6948 = vst.msk [vmem:[%s13402_s26 + $0xb8] sm:$0xf] %vm4783_vm15, %v6164_v20  ;;  %6949 = vst.msk [vmem:[%s13402_s26 + $0xbc] sm:$0xf] %vm4783_vm15, %v6166_v39 }
 0x8e2   : > { %6537 = vrot.lane.b32.xlu1 %v16867_v0, %s7689_s19  ;;  %6539 = vrot.lane.b32.xlu0 %v16868_v6, %s7689_s19 }
 0x8e4   : > { %v6168_v53 = vpop.permute.xlu1 %6167  ;;  %v6170_v51 = vpop.permute.xlu0 %6169 }
 0x8e5   : > { %6950 = vst.msk [vmem:[%s13402_s26 + $0xc0] sm:$0xf] %vm4783_vm15, %v6168_v53  ;;  %6951 = vst.msk [vmem:[%s13402_s26 + $0xc4] sm:$0xf] %vm4783_vm15, %v6170_v51 }
 0x8e6   : > { %6541 = vrot.lane.b32.xlu1 %v16869_v14, %s7689_s19  ;;  %6543 = vrot.lane.b32.xlu0 %v16870_v31, %s7689_s19 }
 0x8e8   : > { %v6172_v63 = vpop.permute.xlu1 %6171  ;;  %v6174_v24 = vpop.permute.xlu0 %6173 }
 0x8e9   : > { %6952 = vst.msk [vmem:[%s13402_s26 + $0xc8] sm:$0xf] %vm4783_vm15, %v6172_v63  ;;  %6953 = vst.msk [vmem:[%s13402_s26 + $0xcc] sm:$0xf] %vm4783_vm15, %v6174_v24 }
 0x8ea   : > { %6545 = vrot.lane.b32.xlu1 %v16871_v34, %s7689_s19  ;;  %6547 = vrot.lane.b32.xlu0 %v16872_v45, %s7689_s19 }
 0x8ec   : > { %v6176_v2 = vpop.permute.xlu1 %6175  ;;  %v6178_v38 = vpop.permute.xlu0 %6177 }
 0x8ed   : > { %6954 = vst.msk [vmem:[%s13402_s26 + $0xd0] sm:$0xf] %vm4783_vm15, %v6176_v2  ;;  %6955 = vst.msk [vmem:[%s13402_s26 + $0xd4] sm:$0xf] %vm4783_vm15, %v6178_v38 }
 0x8ee   : > { %6549 = vrot.lane.b32.xlu1 %v16873_v54, %s7689_s19  ;;  %6551 = vrot.lane.b32.xlu0 %v16874_v16, %s7689_s19 }
 0x8f0   : > { %v6180_v23 = vpop.permute.xlu1 %6179  ;;  %v6182_v42 = vpop.permute.xlu0 %6181 }
 0x8f1   : > { %6956 = vst.msk [vmem:[%s13402_s26 + $0xd8] sm:$0xf] %vm4783_vm15, %v6180_v23  ;;  %6957 = vst.msk [vmem:[%s13402_s26 + $0xdc] sm:$0xf] %vm4783_vm15, %v6182_v42 }
 0x8f2   : > { %6553 = vrot.lane.b32.xlu1 %v16875_v49, %s7689_s19  ;;  %6555 = vrot.lane.b32.xlu0 %v16876_v41, %s7689_s19 }
 0x8f4   : > { %v6184_v29 = vpop.permute.xlu1 %6183  ;;  %v6186_v43 = vpop.permute.xlu0 %6185 }
 0x8f5   : > { %6958 = vst.msk [vmem:[%s13402_s26 + $0xe0] sm:$0xf] %vm4783_vm15, %v6184_v29  ;;  %6959 = vst.msk [vmem:[%s13402_s26 + $0xe4] sm:$0xf] %vm4783_vm15, %v6186_v43 }
 0x8f6   : > { %6557 = vrot.lane.b32.xlu1 %v16877_v62, %s7689_s19  ;;  %6559 = vrot.lane.b32.xlu0 %v16878_v44, %s7689_s19 }
 0x8f8   : > { %v6188_v37 = vpop.permute.xlu1 %6187  ;;  %v6190_v35 = vpop.permute.xlu0 %6189 }
 0x8f9   : > { %6960 = vst.msk [vmem:[%s13402_s26 + $0xe8] sm:$0xf] %vm4783_vm15, %v6188_v37  ;;  %6961 = vst.msk [vmem:[%s13402_s26 + $0xec] sm:$0xf] %vm4783_vm15, %v6190_v35 }
 0x8fa   : > { %6561 = vrot.lane.b32.xlu1 %v16879_v28, %s7689_s19  ;;  %6563 = vrot.lane.b32.xlu0 %v16880_v30, %s7689_s19 }
 0x8fc   : > { %v6192_v36 = vpop.permute.xlu1 %6191  ;;  %v6194_v58 = vpop.permute.xlu0 %6193 }
 0x8fd   : > { %6962 = vst.msk [vmem:[%s13402_s26 + $0xf0] sm:$0xf] %vm4783_vm15, %v6192_v36  ;;  %6963 = vst.msk [vmem:[%s13402_s26 + $0xf4] sm:$0xf] %vm4783_vm15, %v6194_v58 }
 0x8fe   : > { %6565 = vrot.lane.b32.xlu1 %v16881_v21, %s7689_s19  ;;  %6567 = vrot.lane.b32.xlu0 %v16882_v55, %s7689_s19 }
 0x900   : > { %v6196_v11 = vpop.permute.xlu1 %6195  ;;  %v6198_v56 = vpop.permute.xlu0 %6197 }
 0x901   : > { %6964 = vst.msk [vmem:[%s13402_s26 + $0xf8] sm:$0xf] %vm4783_vm15, %v6196_v11  ;;  %6965 = vst.msk [vmem:[%s13402_s26 + $0xfc] sm:$0xf] %vm4783_vm15, %v6198_v56 }
 0x902   : > { %6569 = vrot.lane.b32.xlu1 %v16883_v9, %s7689_s19  ;;  %6571 = vrot.lane.b32.xlu0 %v16884_v5, %s7689_s19 }
 0x904   : > { %v6393_v13 = vpop.permute.xlu1 %6392  ;;  %v6395_v32 = vpop.permute.xlu0 %6394 }
 0x905   : > { %6998 = vst.msk [vmem:[%s13590_s30 + $0x80] sm:$0xf] %vm4783_vm15, %v6393_v13  ;;  %6999 = vst.msk [vmem:[%s13590_s30 + $0x84] sm:$0xf] %vm4783_vm15, %v6395_v32 }
 0x906   : > { %6573 = vrot.lane.b32.xlu1 %v16885_v46, %s7689_s19  ;;  %6575 = vrot.lane.b32.xlu0 %v16886_v27, %s7689_s19 }
 0x908   : > { %v6397_v40 = vpop.permute.xlu1 %6396  ;;  %v6399_v60 = vpop.permute.xlu0 %6398 }
 0x909   : > { %7000 = vst.msk [vmem:[%s13590_s30 + $0x88] sm:$0xf] %vm4783_vm15, %v6397_v40  ;;  %7001 = vst.msk [vmem:[%s13590_s30 + $0x8c] sm:$0xf] %vm4783_vm15, %v6399_v60 }
 0x90a   : > { %6577 = vrot.lane.b32.xlu1 %v16887_v48, %s7689_s19  ;;  %6579 = vrot.lane.b32.xlu0 %v16888_v15, %s7689_s19 }
 0x90c   : > { %v6401_v33 = vpop.permute.xlu1 %6400  ;;  %v6403_v19 = vpop.permute.xlu0 %6402 }
 0x90d   : > { %7002 = vst.msk [vmem:[%s13590_s30 + $0x90] sm:$0xf] %vm4783_vm15, %v6401_v33  ;;  %7003 = vst.msk [vmem:[%s13590_s30 + $0x94] sm:$0xf] %vm4783_vm15, %v6403_v19 }
 0x90e   : > { %6581 = vrot.lane.b32.xlu1 %v16889_v59, %s7689_s19  ;;  %6583 = vrot.lane.b32.xlu0 %v16890_v17, %s7689_s19 }
 0x910   : > { %v6405_v18 = vpop.permute.xlu1 %6404  ;;  %v6407_v22 = vpop.permute.xlu0 %6406 }
 0x911   : > { %7004 = vst.msk [vmem:[%s13590_s30 + $0x98] sm:$0xf] %vm4783_vm15, %v6405_v18  ;;  %7005 = vst.msk [vmem:[%s13590_s30 + $0x9c] sm:$0xf] %vm4783_vm15, %v6407_v22 }
 0x914   : > { %v6409_v50 = vpop.permute.xlu1 %6408  ;;  %v6411_v4 = vpop.permute.xlu0 %6410 }
 0x915   : > { %7006 = vst.msk [vmem:[%s13590_s30 + $0xa0] sm:$0xf] %vm4783_vm15, %v6409_v50  ;;  %7007 = vst.msk [vmem:[%s13590_s30 + $0xa4] sm:$0xf] %vm4783_vm15, %v6411_v4 }
 0x918   : > { %v6413_v25 = vpop.permute.xlu1 %6412  ;;  %v6415_v26 = vpop.permute.xlu0 %6414 }
 0x919   : > { %7008 = vst.msk [vmem:[%s13590_s30 + $0xa8] sm:$0xf] %vm4783_vm15, %v6413_v25  ;;  %7009 = vst.msk [vmem:[%s13590_s30 + $0xac] sm:$0xf] %vm4783_vm15, %v6415_v26 }
 0x91c   : > { %v6417_v52 = vpop.permute.xlu1 %6416  ;;  %v6419_v10 = vpop.permute.xlu0 %6418 }
 0x91d   : > { %7010 = vst.msk [vmem:[%s13590_s30 + $0xb0] sm:$0xf] %vm4783_vm15, %v6417_v52  ;;  %7011 = vst.msk [vmem:[%s13590_s30 + $0xb4] sm:$0xf] %vm4783_vm15, %v6419_v10 }
 0x920   : > { %v6421_v1 = vpop.permute.xlu1 %6420  ;;  %v6423_v8 = vpop.permute.xlu0 %6422 }
 0x921   : > { %7012 = vst.msk [vmem:[%s13590_s30 + $0xb8] sm:$0xf] %vm4783_vm15, %v6421_v1  ;;  %7013 = vst.msk [vmem:[%s13590_s30 + $0xbc] sm:$0xf] %vm4783_vm15, %v6423_v8 }
 0x924   : > { %v6425_v47 = vpop.permute.xlu1 %6424  ;;  %v6427_v7 = vpop.permute.xlu0 %6426 }
 0x925   : > { %7014 = vst.msk [vmem:[%s13590_s30 + $0xc0] sm:$0xf] %vm4783_vm15, %v6425_v47  ;;  %7015 = vst.msk [vmem:[%s13590_s30 + $0xc4] sm:$0xf] %vm4783_vm15, %v6427_v7 }
 0x928   : > { %v6429_v61 = vpop.permute.xlu1 %6428  ;;  %v6431_v3 = vpop.permute.xlu0 %6430 }
 0x929   : > { %7016 = vst.msk [vmem:[%s13590_s30 + $0xc8] sm:$0xf] %vm4783_vm15, %v6429_v61  ;;  %7017 = vst.msk [vmem:[%s13590_s30 + $0xcc] sm:$0xf] %vm4783_vm15, %v6431_v3 }
 0x92c   : > { %v6433_v57 = vpop.permute.xlu1 %6432  ;;  %v6435_v12 = vpop.permute.xlu0 %6434 }
 0x92d   : > { %7018 = vst.msk [vmem:[%s13590_s30 + $0xd0] sm:$0xf] %vm4783_vm15, %v6433_v57  ;;  %7019 = vst.msk [vmem:[%s13590_s30 + $0xd4] sm:$0xf] %vm4783_vm15, %v6435_v12 }
 0x930   : > { %v6437_v20 = vpop.permute.xlu1 %6436  ;;  %v6439_v39 = vpop.permute.xlu0 %6438 }
 0x931   : > { %7020 = vst.msk [vmem:[%s13590_s30 + $0xd8] sm:$0xf] %vm4783_vm15, %v6437_v20  ;;  %7021 = vst.msk [vmem:[%s13590_s30 + $0xdc] sm:$0xf] %vm4783_vm15, %v6439_v39 }
 0x934   : > { %v6441_v0 = vpop.permute.xlu1 %6440  ;;  %v6443_v6 = vpop.permute.xlu0 %6442 }
 0x935   : > { %7022 = vst.msk [vmem:[%s13590_s30 + $0xe0] sm:$0xf] %vm4783_vm15, %v6441_v0  ;;  %7023 = vst.msk [vmem:[%s13590_s30 + $0xe4] sm:$0xf] %vm4783_vm15, %v6443_v6 }
 0x938   : > { %v6445_v53 = vpop.permute.xlu1 %6444  ;;  %v6447_v51 = vpop.permute.xlu0 %6446 }
 0x939   : > { %7024 = vst.msk [vmem:[%s13590_s30 + $0xe8] sm:$0xf] %vm4783_vm15, %v6445_v53  ;;  %7025 = vst.msk [vmem:[%s13590_s30 + $0xec] sm:$0xf] %vm4783_vm15, %v6447_v51 }
 0x93c   : > { %v6449_v14 = vpop.permute.xlu1 %6448  ;;  %v6451_v31 = vpop.permute.xlu0 %6450 }
 0x93d   : > { %7026 = vst.msk [vmem:[%s13590_s30 + $0xf0] sm:$0xf] %vm4783_vm15, %v6449_v14  ;;  %7027 = vst.msk [vmem:[%s13590_s30 + $0xf4] sm:$0xf] %vm4783_vm15, %v6451_v31 }
 0x940   : > { %v6453_v63 = vpop.permute.xlu1 %6452  ;;  %v6455_v24 = vpop.permute.xlu0 %6454 }
 0x941   : > { %7028 = vst.msk [vmem:[%s13590_s30 + $0xf8] sm:$0xf] %vm4783_vm15, %v6453_v63  ;;  %7029 = vst.msk [vmem:[%s13590_s30 + $0xfc] sm:$0xf] %vm4783_vm15, %v6455_v24 }
 0x944   : > { %v6522_v34 = vpop.permute.xlu1 %6521  ;;  %v6524_v45 = vpop.permute.xlu0 %6523 }
 0x945   : > { %7030 = vst.msk [vmem:[%s13867_s16 + $0x80] sm:$0xf] %vm4783_vm15, %v6522_v34  ;;  %7031 = vst.msk [vmem:[%s13867_s16 + $0x84] sm:$0xf] %vm4783_vm15, %v6524_v45 }
 0x948   : > { %v6526_v2 = vpop.permute.xlu1 %6525  ;;  %v6528_v38 = vpop.permute.xlu0 %6527 }
 0x949   : > { %7032 = vst.msk [vmem:[%s13867_s16 + $0x88] sm:$0xf] %vm4783_vm15, %v6526_v2  ;;  %7033 = vst.msk [vmem:[%s13867_s16 + $0x8c] sm:$0xf] %vm4783_vm15, %v6528_v38 }
 0x94c   : > { %v6530_v54 = vpop.permute.xlu1 %6529  ;;  %v6532_v16 = vpop.permute.xlu0 %6531 }
 0x94d   : > { %7034 = vst.msk [vmem:[%s13867_s16 + $0x90] sm:$0xf] %vm4783_vm15, %v6530_v54  ;;  %7035 = vst.msk [vmem:[%s13867_s16 + $0x94] sm:$0xf] %vm4783_vm15, %v6532_v16 }
 0x950   : > { %v6534_v23 = vpop.permute.xlu1 %6533  ;;  %v6536_v42 = vpop.permute.xlu0 %6535 }
 0x951   : > { %7036 = vst.msk [vmem:[%s13867_s16 + $0x98] sm:$0xf] %vm4783_vm15, %v6534_v23  ;;  %7037 = vst.msk [vmem:[%s13867_s16 + $0x9c] sm:$0xf] %vm4783_vm15, %v6536_v42 }
 0x954   : > { %v6538_v49 = vpop.permute.xlu1 %6537  ;;  %v6540_v41 = vpop.permute.xlu0 %6539 }
 0x955   : > { %7038 = vst.msk [vmem:[%s13867_s16 + $0xa0] sm:$0xf] %vm4783_vm15, %v6538_v49  ;;  %7039 = vst.msk [vmem:[%s13867_s16 + $0xa4] sm:$0xf] %vm4783_vm15, %v6540_v41 }
 0x958   : > { %v6542_v29 = vpop.permute.xlu1 %6541  ;;  %v6544_v43 = vpop.permute.xlu0 %6543 }
 0x959   : > { %7040 = vst.msk [vmem:[%s13867_s16 + $0xa8] sm:$0xf] %vm4783_vm15, %v6542_v29  ;;  %7041 = vst.msk [vmem:[%s13867_s16 + $0xac] sm:$0xf] %vm4783_vm15, %v6544_v43 }
 0x95c   : > { %v6546_v62 = vpop.permute.xlu1 %6545  ;;  %v6548_v44 = vpop.permute.xlu0 %6547 }
 0x95d   : > { %7042 = vst.msk [vmem:[%s13867_s16 + $0xb0] sm:$0xf] %vm4783_vm15, %v6546_v62  ;;  %7043 = vst.msk [vmem:[%s13867_s16 + $0xb4] sm:$0xf] %vm4783_vm15, %v6548_v44 }
 0x960   : > { %v6550_v37 = vpop.permute.xlu1 %6549  ;;  %v6552_v35 = vpop.permute.xlu0 %6551 }
 0x961   : > { %7044 = vst.msk [vmem:[%s13867_s16 + $0xb8] sm:$0xf] %vm4783_vm15, %v6550_v37  ;;  %7045 = vst.msk [vmem:[%s13867_s16 + $0xbc] sm:$0xf] %vm4783_vm15, %v6552_v35 }
 0x964   : > { %v6554_v28 = vpop.permute.xlu1 %6553  ;;  %v6556_v30 = vpop.permute.xlu0 %6555 }
 0x965   : > { %7046 = vst.msk [vmem:[%s13867_s16 + $0xc0] sm:$0xf] %vm4783_vm15, %v6554_v28  ;;  %7047 = vst.msk [vmem:[%s13867_s16 + $0xc4] sm:$0xf] %vm4783_vm15, %v6556_v30 }
 0x968   : > { %v6558_v36 = vpop.permute.xlu1 %6557  ;;  %v6560_v58 = vpop.permute.xlu0 %6559 }
 0x969   : > { %7048 = vst.msk [vmem:[%s13867_s16 + $0xc8] sm:$0xf] %vm4783_vm15, %v6558_v36  ;;  %7049 = vst.msk [vmem:[%s13867_s16 + $0xcc] sm:$0xf] %vm4783_vm15, %v6560_v58 }
 0x96c   : > { %v6562_v21 = vpop.permute.xlu1 %6561  ;;  %v6564_v55 = vpop.permute.xlu0 %6563 }
 0x96d   : > { %7050 = vst.msk [vmem:[%s13867_s16 + $0xd0] sm:$0xf] %vm4783_vm15, %v6562_v21  ;;  %7051 = vst.msk [vmem:[%s13867_s16 + $0xd4] sm:$0xf] %vm4783_vm15, %v6564_v55 }
 0x970   : > { %v6566_v11 = vpop.permute.xlu1 %6565  ;;  %v6568_v56 = vpop.permute.xlu0 %6567 }
 0x971   : > { %7052 = vst.msk [vmem:[%s13867_s16 + $0xd8] sm:$0xf] %vm4783_vm15, %v6566_v11  ;;  %7053 = vst.msk [vmem:[%s13867_s16 + $0xdc] sm:$0xf] %vm4783_vm15, %v6568_v56 }
 0x974   : > { %v6570_v9 = vpop.permute.xlu1 %6569  ;;  %v6572_v5 = vpop.permute.xlu0 %6571 }
 0x975   : > { %7054 = vst.msk [vmem:[%s13867_s16 + $0xe0] sm:$0xf] %vm4783_vm15, %v6570_v9  ;;  %7055 = vst.msk [vmem:[%s13867_s16 + $0xe4] sm:$0xf] %vm4783_vm15, %v6572_v5 }
 0x978   : > { %v6574_v13 = vpop.permute.xlu1 %6573  ;;  %v6576_v32 = vpop.permute.xlu0 %6575 }
 0x979   : > { %7056 = vst.msk [vmem:[%s13867_s16 + $0xe8] sm:$0xf] %vm4783_vm15, %v6574_v13  ;;  %7057 = vst.msk [vmem:[%s13867_s16 + $0xec] sm:$0xf] %vm4783_vm15, %v6576_v32 }
 0x97c   : > { %v6578_v46 = vpop.permute.xlu1 %6577  ;;  %v6580_v27 = vpop.permute.xlu0 %6579 }
 0x97d   : > { %7058 = vst.msk [vmem:[%s13867_s16 + $0xf0] sm:$0xf] %vm4783_vm15, %v6578_v46  ;;  %7059 = vst.msk [vmem:[%s13867_s16 + $0xf4] sm:$0xf] %vm4783_vm15, %v6580_v27 }
 0x980   : > { %v6582_v40 = vpop.permute.xlu1 %6581  ;;  %v6584_v60 = vpop.permute.xlu0 %6583 }
 0x981   : > { %7060 = vst.msk [vmem:[%s13867_s16 + $0xf8] sm:$0xf] %vm4783_vm15, %v6582_v40  ;;  %7061 = vst.msk [vmem:[%s13867_s16 + $0xfc] sm:$0xf] %vm4783_vm15, %v6584_v60 }
 0x982 PF: > { %s23_s21 = sadd.s32 1, %s7681_s21  }
 0x983   : > { %p20_p4 = scmp.ge.s32.totalorder %s23_s21, 4  }
 0x985   :  { %22 = sbr.rel (!%p20_p4) target bundleno = 1 (0x1), region = 117 }

</bundles_post_ra>
